<compile_context>
chip_gen: v6e
topology: v6e:2x2x1
jax: 0.10.0
libtpu: 0.0.40
codegen_flags: <defaults>
</compile_context>

<pallas_src>
import numpy as np
import jax
import jax.numpy as jnp
from jax import lax
from jax.experimental import pallas as pl
from jax.experimental.pallas import tpu as pltpu

# MXU operand dtype: bf16 inputs + f32 accumulation (v6e/v7x MXU peak, half the
# activation/weight traffic).  Set to jnp.float32 for strict-f32 numerics.
COMPUTE_DTYPE = jnp.bfloat16

C1, C2, C3 = 32, 64, 128          # channel widths of the three conv layers


# --------------------------- in-kernel value helpers ---------------------------

def _conv3x3_bn_relu(x, w_ref, scale, shift):
    """3x3 'same' conv + folded BN + ReLU as 3 im2col MXU matmuls (one per dy).

    x:      (H, W, Cin)  activation (any float dtype), W a multiple of 8.
    w_ref:  (3, 3*Cin, Cout) ref; w_ref[dy] rows ordered (dx, cin).
    scale/shift: (Cout,) folded BatchNorm (+ conv bias), float32.
    Returns (H, W, Cout) float32.
    """
    H, W, Cin = x.shape
    Cout = w_ref.shape[-1]
    xb = x.astype(COMPUTE_DTYPE)

    # 'same' padding: the H pad is a free leading-dim concat; the W pad is a
    # cheap 1-row sublane concat.
    zr = jnp.zeros((1, W, Cin), COMPUTE_DTYPE)
    xp = jnp.concatenate([zr, xb, zr], axis=0)            # (H+2, W,   Cin)
    zc = jnp.zeros((H + 2, 1, Cin), COMPUTE_DTYPE)
    xp = jnp.concatenate([zc, xp, zc], axis=1)            # (H+2, W+2, Cin)

    # im2col slab over the dx taps only: 3 W-shifted windows on the lane axis
    # (the only sublane-misaligned copies in the layer).
    slab = jnp.concatenate([xp[:, dx:dx + W, :] for dx in range(3)], axis=-1)
    slab = slab.reshape((H + 2) * W, 3 * Cin)             # free when W % 16 == 0

    # One matmul per dy tap; the dy shift is applied post-matmul as a FREE
    # leading-dim (H) offset of the f32 result — no lane slicing needed.
    def tap(dy):
        t = jnp.dot(slab, w_ref[dy], preferred_element_type=jnp.float32)
        return t.reshape(H + 2, W, Cout)                  # free when W % 8 == 0

    y = tap(0)[0:H] + tap(1)[1:H + 1] + tap(2)[2:H + 2]   # (H, W, Cout) f32
    return jnp.maximum(y * scale + shift, 0.0)            # folded BN + ReLU (f32)


def _maxpool2x2(y):
    """2x2 / stride-2 max pool of an (H, W, C) f32 value (H, W even)."""
    H, W, C = y.shape
    y = y.reshape(H // 2, 2, W, C)                     # leading-dim split: free
    y = jnp.maximum(y[:, 0], y[:, 1])                  # (H/2, W, C)
    y = y.reshape(H // 2, W // 2, 2, C)                # small sublane regroup
    return jnp.maximum(y[:, :, 0, :], y[:, :, 1, :])   # (H/2, W/2, C)


# ----------------------- fused conv trunk (one image/program) ------------------

def _features_kernel(x_ref, w1_ref, s1_ref, t1_ref, w2_ref, s2_ref, t2_ref,
                     w3_ref, s3_ref, t3_ref, o_ref):
    y = _conv3x3_bn_relu(x_ref[0], w1_ref, s1_ref[0], t1_ref[0])   # (H, W, 32)
    y = _conv3x3_bn_relu(y, w2_ref, s2_ref[0], t2_ref[0])          # (H, W, 64)
    y = _maxpool2x2(y)                                             # (H/2, W/2, 64)
    y = _conv3x3_bn_relu(y, w3_ref, s3_ref[0], t3_ref[0])          # (H/2, W/2, 128)
    y = _maxpool2x2(y)                                             # (H/4, W/4, 128)
    o_ref[...] = y[None].astype(o_ref.dtype)


def conv_features(x_nhwc, p):
    """Fused conv1 -> conv2 -> pool -> conv3 -> pool.  Returns (N, H/4, W/4, 128)."""
    N, H, W, Cin = x_nhwc.shape
    assert Cin == 1 and H % 4 == 0 and W % 4 == 0
    q = lambda a: a.astype(COMPUTE_DTYPE)

    def full(*shape):                      # whole-array block, constant index map
        nd = len(shape)
        return pl.BlockSpec(shape, lambda n: (0,) * nd)

    return pl.pallas_call(
        _features_kernel,
        out_shape=jax.ShapeDtypeStruct((N, H // 4, W // 4, C3), COMPUTE_DTYPE),
        grid=(N,),
        in_specs=[
            pl.BlockSpec((1, H, W, 1), lambda n: (n, 0, 0, 0)),
            full(3, 3 * 1, C1), full(1, C1), full(1, C1),
            full(3, 3 * C1, C2), full(1, C2), full(1, C2),
            full(3, 3 * C2, C3), full(1, C3), full(1, C3),
        ],
        out_specs=pl.BlockSpec((1, H // 4, W // 4, C3), lambda n: (n, 0, 0, 0)),
        compiler_params=pltpu.CompilerParams(dimension_semantics=("parallel",)),
    )(q(x_nhwc),
      q(p["w1"].reshape(3, 3 * 1, C1)),  p["s1"].reshape(1, C1), p["t1"].reshape(1, C1),
      q(p["w2"].reshape(3, 3 * C1, C2)), p["s2"].reshape(1, C2), p["t2"].reshape(1, C2),
      q(p["w3"].reshape(3, 3 * C2, C3)), p["s3"].reshape(1, C3), p["t3"].reshape(1, C3))


# ------------------------------ linear head (FC) --------------------------------

def _fc_kernel(x_ref, w_ref, b_ref, o_ref):
    # The (N, 128) f32 output block is resident across the K grid axis (same
    # output index every step), so accumulate directly into it — no scratch.
    # Requires dimension_semantics=("arbitrary",) for this axis.
    @pl.when(pl.program_id(0) == 0)
    def _():
        o_ref[...] = jnp.broadcast_to(b_ref[...], o_ref.shape)

    o_ref[...] += jnp.dot(x_ref[...], w_ref[...],
                          preferred_element_type=jnp.float32)


def _largest_divisor_leq(n, cap):
    if n <= cap:
        return n
    best = 1
    d = 1
    while d * d <= n:
        if n % d == 0:
            if d <= cap:
                best = max(best, d)
            if n // d <= cap:
                best = max(best, n // d)
        d += 1
    return best


def linear_padded(x, w_pad, b_pad, *, max_block_k=16384):
    """x:(N,F) @ w_pad:(F,Mp) + b_pad, with Mp a multiple of 128 (lane-dense).

    K is tiled with the largest divisor of F under a VMEM-friendly cap so the
    grid stays at a handful of steps (1 at the test size, 6 at the canonical
    F = 128*16*39) while the double-buffered bf16 weight block stays ~<= 8 MiB.
    """
    N, F = x.shape
    Mp = w_pad.shape[1]
    tk = _largest_divisor_leq(F, max_block_k)
    return pl.pallas_call(
        _fc_kernel,
        out_shape=jax.ShapeDtypeStruct((N, Mp), jnp.float32),
        grid=(F // tk,),
        in_specs=[pl.BlockSpec((N, tk), lambda k: (0, k)),
                  pl.BlockSpec((tk, Mp), lambda k: (k, 0)),
                  pl.BlockSpec((1, Mp), lambda k: (0, 0))],
        out_specs=pl.BlockSpec((N, Mp), lambda k: (0, 0)),
        compiler_params=pltpu.CompilerParams(dimension_semantics=("arbitrary",)),
    )(x.astype(COMPUTE_DTYPE), w_pad.astype(COMPUTE_DTYPE), b_pad.reshape(1, Mp))


# --------------------------------- parameters -----------------------------------

def init_params(key, H, W, num_classes=36):
    eps = 1e-5
    ks = jax.random.split(key, 8)

    def conv_w(k, cin, cout):
        bound = 1.0 / np.sqrt(9 * cin)
        return jax.random.uniform(k, (3, 3, cin, cout), jnp.float32, -bound, bound)

    def conv_b(k, cin, cout):
        bound = 1.0 / np.sqrt(9 * cin)
        return jax.random.uniform(k, (cout,), jnp.float32, -bound, bound)

    w1, b1 = conv_w(ks[0], 1, C1),  conv_b(ks[1], 1, C1)
    w2, b2 = conv_w(ks[2], C1, C2), conv_b(ks[3], C1, C2)
    w3, b3 = conv_w(ks[4], C2, C3), conv_b(ks[5], C2, C3)

    # BatchNorm at PyTorch init (eval mode): gamma=1, beta=0, mean=0, var=1,
    # folded together with the conv bias into per-channel scale/shift.
    def fold(c, bias):
        gamma = jnp.ones((c,), jnp.float32); beta = jnp.zeros((c,), jnp.float32)
        mean = jnp.zeros((c,), jnp.float32); var = jnp.ones((c,), jnp.float32)
        scale = gamma / jnp.sqrt(var + eps)
        shift = beta - mean * scale + bias * scale
        return scale, shift

    s1, t1 = fold(C1, b1)
    s2, t2 = fold(C2, b2)
    s3, t3 = fold(C3, b3)

    # fc_input_size derived the same way the torch module does: 128 * H/4 * W/4.
    Hp, Wp = H // 4, W // 4
    F = C3 * Hp * Wp
    bound = 1.0 / np.sqrt(F)
    fw = jax.random.uniform(ks[6], (F, num_classes), jnp.float32, -bound, bound)
    fb = jax.random.uniform(ks[7], (num_classes,), jnp.float32, -bound, bound)

    # One-time fc-weight row permutation so the kernel consumes the NHWC flatten
    # order directly (rows of `fw` are ordered (c, h, w) like torch's NCHW
    # x.view(N, -1)), plus zero-padding of the classifier to a lane-dense 128
    # columns (unmasked stores + full MXU columns in the FC kernel).
    Mp = ((num_classes + 127) // 128) * 128
    fw_nhwc = fw.reshape(C3, Hp, Wp, num_classes).transpose(1, 2, 0, 3)
    fw_nhwc = fw_nhwc.reshape(F, num_classes)
    fw_pad = jnp.zeros((F, Mp), jnp.float32).at[:, :num_classes].set(fw_nhwc)
    fb_pad = jnp.zeros((Mp,), jnp.float32).at[:num_classes].set(fb)

    return dict(w1=w1, s1=s1, t1=t1, w2=w2, s2=s2, t2=t2, w3=w3, s3=s3, t3=t3,
                fw=fw, fb=fb, fw_pad=fw_pad, fb_pad=fb_pad)


# --------------------------------- forward pass ----------------------------------

def coatnet_forward(x_nchw, p):
    x = jnp.transpose(x_nchw, (0, 2, 3, 1))                 # NCHW -> NHWC (C on lanes)
    feats = conv_features(x, p)                             # (N, H/4, W/4, 128)
    feats = feats.reshape(feats.shape[0], -1)               # NHWC flatten (fw pre-permuted)
    logits = linear_padded(feats, p["fw_pad"], p["fb_pad"])  # (N, 128)
    return logits[:, :p["fb"].shape[0]]                     # drop the lane padding


def ref_forward(x_nchw, p):
    """Pure-JAX reference, torch-faithful ordering (NCHW flatten + torch-layout fw).
    Matmul/conv operands are cast to COMPUTE_DTYPE the same way the kernels do."""
    q = lambda a: a.astype(COMPUTE_DTYPE)
    x = jnp.transpose(x_nchw, (0, 2, 3, 1))

    def conv(x, w, s, t):
        y = lax.conv_general_dilated(q(x), q(w), (1, 1), "SAME",
                                     dimension_numbers=("NHWC", "HWIO", "NHWC"),
                                     preferred_element_type=jnp.float32)
        return jnp.maximum(y * s + t, 0.0)

    def pool(x):
        N, H, W, C = x.shape
        return jnp.max(x.reshape(N, H // 2, 2, W // 2, 2, C), axis=(2, 4))

    y = conv(x, p["w1"], p["s1"], p["t1"])
    y = conv(y, p["w2"], p["s2"], p["t2"])
    y = pool(y)
    y = conv(y, p["w3"], p["s3"], p["t3"])
    y = pool(y)
    feats = jnp.transpose(y, (0, 3, 1, 2)).reshape(y.shape[0], -1)   # torch x.view(N,-1)
    return jnp.dot(q(feats), q(p["fw"]), preferred_element_type=jnp.float32) + p["fb"]


if __name__ == "__main__":
    key = jax.random.PRNGKey(0)
    kx, kp = jax.random.split(key)
    # Small, module-consistent input (NCHW, 1 channel, H/W divisible by 4).
    # The torch module's canonical input is (N, 1, 64, 156); we scale the spatial
    # dims down and derive fc_input_size with the same 128 * H/4 * W/4 rule.
    N, H, W = 2, 16, 32
    x = jax.random.normal(kx, (N, 1, H, W), jnp.float32)
    params = init_params(kp, H, W, num_classes=36)

    out = jax.block_until_ready(jax.jit(coatnet_forward)(x, params))
    assert out.shape == (N, 36)

    ref = jax.block_until_ready(jax.jit(ref_forward)(x, params))
    np.testing.assert_allclose(np.asarray(out), np.asarray(ref), atol=3e-3, rtol=3e-3)
    print("KERNEL_OK")
</pallas_src>

<mosaic_0001>
module attributes {stable_mosaic.version = 11 : i64} {
  func.func @_fc_kernel(%arg0: i32, %arg1: memref<2x4096xbf16, #tpu.memory_space<vmem>>, %arg2: memref<4096x128xbf16, #tpu.memory_space<vmem>>, %arg3: memref<1x128xf32, #tpu.memory_space<vmem>>, %arg4: memref<2x128xf32, #tpu.memory_space<vmem>>) attributes {dimension_semantics = [#tpu.dimension_semantics<arbitrary>], iteration_bounds = array<i64: 1>, scalar_prefetch = 0 : i64, scratch_operands = 0 : i64, tpu.core_type = #tpu.core_type<tc>, window_params = [{transform_indices = @transform_0, window_bounds = array<i64: 2, 4096>}, {transform_indices = @transform_1, window_bounds = array<i64: 4096, 128>}, {pipeline_mode = #tpu.pipeline_mode<synchronous>, transform_indices = @transform_2, window_bounds = array<i64: 1, 128>}, {pipeline_mode = #tpu.pipeline_mode<synchronous>, transform_indices = @transform_3, window_bounds = array<i64: 2, 128>}]} {
    %c0_i32 = arith.constant 0 : i32
    %0 = arith.cmpi eq, %arg0, %c0_i32 : i32
    %1 = arith.extui %0 : i1 to i32
    %c0_i32_0 = arith.constant 0 : i32
    %2 = arith.cmpi ne, %1, %c0_i32_0 : i32
    scf.if %2 {
      %c0_8 = arith.constant 0 : index
      %c0_9 = arith.constant 0 : index
      %9 = vector.load %arg3[%c0_8, %c0_9] : memref<1x128xf32, #tpu.memory_space<vmem>>, vector<1x128xf32>
      %10 = vector.shape_cast %9 : vector<1x128xf32> to vector<1x128xf32>
      %11 = vector.broadcast %10 : vector<1x128xf32> to vector<2x128xf32>
      %c0_10 = arith.constant 0 : index
      %c0_11 = arith.constant 0 : index
      %12 = vector.load %arg4[%c0_10, %c0_11] : memref<2x128xf32, #tpu.memory_space<vmem>>, vector<2x128xf32>
      tpu.vector_store %arg4[%c0_10, %c0_11], %11 {strides = array<i32>} : memref<2x128xf32, #tpu.memory_space<vmem>>, vector<2x128xf32>,
    } else {
    }
    %c0 = arith.constant 0 : index
    %c0_1 = arith.constant 0 : index
    %3 = vector.load %arg4[%c0, %c0_1] : memref<2x128xf32, #tpu.memory_space<vmem>>, vector<2x128xf32>
    %c0_2 = arith.constant 0 : index
    %c0_3 = arith.constant 0 : index
    %4 = vector.load %arg1[%c0_2, %c0_3] : memref<2x4096xbf16, #tpu.memory_space<vmem>>, vector<2x4096xbf16>
    %c0_4 = arith.constant 0 : index
    %c0_5 = arith.constant 0 : index
    %5 = vector.load %arg2[%c0_4, %c0_5] : memref<4096x128xbf16, #tpu.memory_space<vmem>>, vector<4096x128xbf16>
    %cst = arith.constant dense<0.000000e+00> : vector<2x128xf32>
    %6 = tpu.matmul %4, %5, %cst {dimension_numbers = #tpu.dot_dimension_numbers<[1], [0], [0], [1], [0, 0, 1, 1], [], []>} : vector<2x4096xbf16>, vector<4096x128xbf16>, vector<2x128xf32> -> vector<2x128xf32>
    %7 = arith.addf %3, %6 : vector<2x128xf32>
    %c0_6 = arith.constant 0 : index
    %c0_7 = arith.constant 0 : index
    %8 = vector.load %arg4[%c0_6, %c0_7] : memref<2x128xf32, #tpu.memory_space<vmem>>, vector<2x128xf32>
    tpu.vector_store %arg4[%c0_6, %c0_7], %7 {strides = array<i32>} : memref<2x128xf32, #tpu.memory_space<vmem>>, vector<2x128xf32>,
    return
  }
  func.func @transform_0(%arg0: i32) -> (i32, i32) {
    %c0_i32 = arith.constant 0 : i32
    %c0_i32_0 = arith.constant 0 : i32
    return %c0_i32, %arg0 : i32, i32
  }
  func.func @transform_1(%arg0: i32) -> (i32, i32) {
    %c0_i32 = arith.constant 0 : i32
    %c0_i32_0 = arith.constant 0 : i32
    return %arg0, %c0_i32 : i32, i32
  }
  func.func @transform_2(%arg0: i32) -> (i32, i32) {
    %c0_i32 = arith.constant 0 : i32
    %c0_i32_0 = arith.constant 0 : i32
    %c0_i32_1 = arith.constant 0 : i32
    return %c0_i32, %c0_i32_0 : i32, i32
  }
  func.func @transform_3(%arg0: i32) -> (i32, i32) {
    %c0_i32 = arith.constant 0 : i32
    %c0_i32_0 = arith.constant 0 : i32
    %c0_i32_1 = arith.constant 0 : i32
    return %c0_i32, %c0_i32_0 : i32, i32
  }
}

module attributes {stable_mosaic.version = 11 : i64} {
  func.func @_features_kernel(%arg0: i32, %arg1: memref<1x16x32x1xbf16, #tpu.memory_space<vmem>>, %arg2: memref<3x3x32xbf16, #tpu.memory_space<vmem>>, %arg3: memref<1x32xf32, #tpu.memory_space<vmem>>, %arg4: memref<1x32xf32, #tpu.memory_space<vmem>>, %arg5: memref<3x96x64xbf16, #tpu.memory_space<vmem>>, %arg6: memref<1x64xf32, #tpu.memory_space<vmem>>, %arg7: memref<1x64xf32, #tpu.memory_space<vmem>>, %arg8: memref<3x192x128xbf16, #tpu.memory_space<vmem>>, %arg9: memref<1x128xf32, #tpu.memory_space<vmem>>, %arg10: memref<1x128xf32, #tpu.memory_space<vmem>>, %arg11: memref<1x4x8x128xbf16, #tpu.memory_space<vmem>>) attributes {dimension_semantics = [#tpu.dimension_semantics<parallel>], iteration_bounds = array<i64: 2>, scalar_prefetch = 0 : i64, scratch_operands = 0 : i64, tpu.core_type = #tpu.core_type<tc>, window_params = [{transform_indices = @transform_0, window_bounds = array<i64: 1, 16, 32, 1>}, {pipeline_mode = #tpu.pipeline_mode<synchronous>, transform_indices = @transform_1, window_bounds = array<i64: 3, 3, 32>}, {pipeline_mode = #tpu.pipeline_mode<synchronous>, transform_indices = @transform_2, window_bounds = array<i64: 1, 32>}, {pipeline_mode = #tpu.pipeline_mode<synchronous>, transform_indices = @transform_3, window_bounds = array<i64: 1, 32>}, {pipeline_mode = #tpu.pipeline_mode<synchronous>, transform_indices = @transform_4, window_bounds = array<i64: 3, 96, 64>}, {pipeline_mode = #tpu.pipeline_mode<synchronous>, transform_indices = @transform_5, window_bounds = array<i64: 1, 64>}, {pipeline_mode = #tpu.pipeline_mode<synchronous>, transform_indices = @transform_6, window_bounds = array<i64: 1, 64>}, {pipeline_mode = #tpu.pipeline_mode<synchronous>, transform_indices = @transform_7, window_bounds = array<i64: 3, 192, 128>}, {pipeline_mode = #tpu.pipeline_mode<synchronous>, transform_indices = @transform_8, window_bounds = array<i64: 1, 128>}, {pipeline_mode = #tpu.pipeline_mode<synchronous>, transform_indices = @transform_9, window_bounds = array<i64: 1, 128>}, {transform_indices = @transform_10, window_bounds = array<i64: 1, 4, 8, 128>}]} {
    %c0 = arith.constant 0 : index
    %c0_0 = arith.constant 0 : index
    %c0_1 = arith.constant 0 : index
    %c0_2 = arith.constant 0 : index
    %0 = vector.load %arg1[%c0, %c0_0, %c0_1, %c0_2] : memref<1x16x32x1xbf16, #tpu.memory_space<vmem>>, vector<1x16x32x1xbf16>
    %1 = vector.shape_cast %0 : vector<1x16x32x1xbf16> to vector<16x32x1xbf16>
    %c0_3 = arith.constant 0 : index
    %c0_4 = arith.constant 0 : index
    %2 = vector.load %arg3[%c0_3, %c0_4] : memref<1x32xf32, #tpu.memory_space<vmem>>, vector<1x32xf32>
    %3 = vector.shape_cast %2 : vector<1x32xf32> to vector<32xf32>
    %c0_5 = arith.constant 0 : index
    %c0_6 = arith.constant 0 : index
    %4 = vector.load %arg4[%c0_5, %c0_6] : memref<1x32xf32, #tpu.memory_space<vmem>>, vector<1x32xf32>
    %5 = vector.shape_cast %4 : vector<1x32xf32> to vector<32xf32>
    %cst = arith.constant 0.000000e+00 : bf16
    %6 = vector.broadcast %cst : bf16 to vector<1x32x1xbf16>
    %7 = tpu.concatenate %6, %1, %6 in 0 : vector<1x32x1xbf16>, vector<16x32x1xbf16>, vector<1x32x1xbf16> -> vector<18x32x1xbf16>
    %cst_7 = arith.constant 0.000000e+00 : bf16
    %8 = vector.broadcast %cst_7 : bf16 to vector<18x1x1xbf16>
    %9 = tpu.concatenate %8, %7, %8 in 1 : vector<18x1x1xbf16>, vector<18x32x1xbf16>, vector<18x1x1xbf16> -> vector<18x34x1xbf16>
    %10 = vector.extract_strided_slice %9 {offsets = [0, 0, 0], sizes = [18, 32, 1], strides = [1, 1, 1]} : vector<18x34x1xbf16> to vector<18x32x1xbf16>
    %11 = vector.extract_strided_slice %9 {offsets = [0, 1, 0], sizes = [18, 32, 1], strides = [1, 1, 1]} : vector<18x34x1xbf16> to vector<18x32x1xbf16>
    %12 = vector.extract_strided_slice %9 {offsets = [0, 2, 0], sizes = [18, 32, 1], strides = [1, 1, 1]} : vector<18x34x1xbf16> to vector<18x32x1xbf16>
    %13 = tpu.concatenate %10, %11, %12 in 2 : vector<18x32x1xbf16>, vector<18x32x1xbf16>, vector<18x32x1xbf16> -> vector<18x32x3xbf16>
    %14 = vector.shape_cast %13 : vector<18x32x3xbf16> to vector<576x3xbf16>
    %c0_8 = arith.constant 0 : index
    %c0_9 = arith.constant 0 : index
    %c0_10 = arith.constant 0 : index
    %15 = vector.load %arg2[%c0_8, %c0_9, %c0_10] : memref<3x3x32xbf16, #tpu.memory_space<vmem>>, vector<1x3x32xbf16>
    %16 = vector.shape_cast %15 : vector<1x3x32xbf16> to vector<3x32xbf16>
    %cst_11 = arith.constant dense<0.000000e+00> : vector<576x32xf32>
    %17 = tpu.matmul %14, %16, %cst_11 {dimension_numbers = #tpu.dot_dimension_numbers<[1], [0], [0], [1], [0, 0, 1, 1], [], []>} : vector<576x3xbf16>, vector<3x32xbf16>, vector<576x32xf32> -> vector<576x32xf32>
    %18 = vector.shape_cast %17 : vector<576x32xf32> to vector<18x32x32xf32>
    %19 = vector.extract_strided_slice %18 {offsets = [0, 0, 0], sizes = [16, 32, 32], strides = [1, 1, 1]} : vector<18x32x32xf32> to vector<16x32x32xf32>
    %c1 = arith.constant 1 : index
    %c0_12 = arith.constant 0 : index
    %c0_13 = arith.constant 0 : index
    %20 = vector.load %arg2[%c1, %c0_12, %c0_13] : memref<3x3x32xbf16, #tpu.memory_space<vmem>>, vector<1x3x32xbf16>
    %21 = vector.shape_cast %20 : vector<1x3x32xbf16> to vector<3x32xbf16>
    %cst_14 = arith.constant dense<0.000000e+00> : vector<576x32xf32>
    %22 = tpu.matmul %14, %21, %cst_14 {dimension_numbers = #tpu.dot_dimension_numbers<[1], [0], [0], [1], [0, 0, 1, 1], [], []>} : vector<576x3xbf16>, vector<3x32xbf16>, vector<576x32xf32> -> vector<576x32xf32>
    %23 = vector.shape_cast %22 : vector<576x32xf32> to vector<18x32x32xf32>
    %24 = vector.extract_strided_slice %23 {offsets = [1, 0, 0], sizes = [16, 32, 32], strides = [1, 1, 1]} : vector<18x32x32xf32> to vector<16x32x32xf32>
    %25 = arith.addf %19, %24 : vector<16x32x32xf32>
    %c2 = arith.constant 2 : index
    %c0_15 = arith.constant 0 : index
    %c0_16 = arith.constant 0 : index
    %26 = vector.load %arg2[%c2, %c0_15, %c0_16] : memref<3x3x32xbf16, #tpu.memory_space<vmem>>, vector<1x3x32xbf16>
    %27 = vector.shape_cast %26 : vector<1x3x32xbf16> to vector<3x32xbf16>
    %cst_17 = arith.constant dense<0.000000e+00> : vector<576x32xf32>
    %28 = tpu.matmul %14, %27, %cst_17 {dimension_numbers = #tpu.dot_dimension_numbers<[1], [0], [0], [1], [0, 0, 1, 1], [], []>} : vector<576x3xbf16>, vector<3x32xbf16>, vector<576x32xf32> -> vector<576x32xf32>
    %29 = vector.shape_cast %28 : vector<576x32xf32> to vector<18x32x32xf32>
    %30 = vector.extract_strided_slice %29 {offsets = [2, 0, 0], sizes = [16, 32, 32], strides = [1, 1, 1]} : vector<18x32x32xf32> to vector<16x32x32xf32>
    %31 = arith.addf %25, %30 : vector<16x32x32xf32>
    %32 = vector.shape_cast %3 : vector<32xf32> to vector<1x1x32xf32>
    %33 = vector.broadcast %32 : vector<1x1x32xf32> to vector<16x32x32xf32>
    %34 = arith.mulf %31, %33 : vector<16x32x32xf32>
    %35 = vector.shape_cast %5 : vector<32xf32> to vector<1x1x32xf32>
    %36 = vector.broadcast %35 : vector<1x1x32xf32> to vector<16x32x32xf32>
    %37 = arith.addf %34, %36 : vector<16x32x32xf32>
    %cst_18 = arith.constant 0.000000e+00 : f32
    %38 = vector.broadcast %cst_18 : f32 to vector<16x32x32xf32>
    %39 = arith.maximumf %37, %38 : vector<16x32x32xf32>
    %c0_19 = arith.constant 0 : index
    %c0_20 = arith.constant 0 : index
    %40 = vector.load %arg6[%c0_19, %c0_20] : memref<1x64xf32, #tpu.memory_space<vmem>>, vector<1x64xf32>
    %41 = vector.shape_cast %40 : vector<1x64xf32> to vector<64xf32>
    %c0_21 = arith.constant 0 : index
    %c0_22 = arith.constant 0 : index
    %42 = vector.load %arg7[%c0_21, %c0_22] : memref<1x64xf32, #tpu.memory_space<vmem>>, vector<1x64xf32>
    %43 = vector.shape_cast %42 : vector<1x64xf32> to vector<64xf32>
    %44 = arith.truncf %39 : vector<16x32x32xf32> to vector<16x32x32xbf16>
    %cst_23 = arith.constant 0.000000e+00 : bf16
    %45 = vector.broadcast %cst_23 : bf16 to vector<1x32x32xbf16>
    %46 = tpu.concatenate %45, %44, %45 in 0 : vector<1x32x32xbf16>, vector<16x32x32xbf16>, vector<1x32x32xbf16> -> vector<18x32x32xbf16>
    %cst_24 = arith.constant 0.000000e+00 : bf16
    %47 = vector.broadcast %cst_24 : bf16 to vector<18x1x32xbf16>
    %48 = tpu.concatenate %47, %46, %47 in 1 : vector<18x1x32xbf16>, vector<18x32x32xbf16>, vector<18x1x32xbf16> -> vector<18x34x32xbf16>
    %49 = vector.extract_strided_slice %48 {offsets = [0, 0, 0], sizes = [18, 32, 32], strides = [1, 1, 1]} : vector<18x34x32xbf16> to vector<18x32x32xbf16>
    %50 = vector.extract_strided_slice %48 {offsets = [0, 1, 0], sizes = [18, 32, 32], strides = [1, 1, 1]} : vector<18x34x32xbf16> to vector<18x32x32xbf16>
    %51 = vector.extract_strided_slice %48 {offsets = [0, 2, 0], sizes = [18, 32, 32], strides = [1, 1, 1]} : vector<18x34x32xbf16> to vector<18x32x32xbf16>
    %52 = tpu.concatenate %49, %50, %51 in 2 : vector<18x32x32xbf16>, vector<18x32x32xbf16>, vector<18x32x32xbf16> -> vector<18x32x96xbf16>
    %53 = vector.shape_cast %52 : vector<18x32x96xbf16> to vector<576x96xbf16>
    %c0_25 = arith.constant 0 : index
    %c0_26 = arith.constant 0 : index
    %c0_27 = arith.constant 0 : index
    %54 = vector.load %arg5[%c0_25, %c0_26, %c0_27] : memref<3x96x64xbf16, #tpu.memory_space<vmem>>, vector<1x96x64xbf16>
    %55 = vector.shape_cast %54 : vector<1x96x64xbf16> to vector<96x64xbf16>
    %cst_28 = arith.constant dense<0.000000e+00> : vector<576x64xf32>
    %56 = tpu.matmul %53, %55, %cst_28 {dimension_numbers = #tpu.dot_dimension_numbers<[1], [0], [0], [1], [0, 0, 1, 1], [], []>} : vector<576x96xbf16>, vector<96x64xbf16>, vector<576x64xf32> -> vector<576x64xf32>
    %57 = vector.shape_cast %56 : vector<576x64xf32> to vector<18x32x64xf32>
    %58 = vector.extract_strided_slice %57 {offsets = [0, 0, 0], sizes = [16, 32, 64], strides = [1, 1, 1]} : vector<18x32x64xf32> to vector<16x32x64xf32>
    %c1_29 = arith.constant 1 : index
    %c0_30 = arith.constant 0 : index
    %c0_31 = arith.constant 0 : index
    %59 = vector.load %arg5[%c1_29, %c0_30, %c0_31] : memref<3x96x64xbf16, #tpu.memory_space<vmem>>, vector<1x96x64xbf16>
    %60 = vector.shape_cast %59 : vector<1x96x64xbf16> to vector<96x64xbf16>
    %cst_32 = arith.constant dense<0.000000e+00> : vector<576x64xf32>
    %61 = tpu.matmul %53, %60, %cst_32 {dimension_numbers = #tpu.dot_dimension_numbers<[1], [0], [0], [1], [0, 0, 1, 1], [], []>} : vector<576x96xbf16>, vector<96x64xbf16>, vector<576x64xf32> -> vector<576x64xf32>
    %62 = vector.shape_cast %61 : vector<576x64xf32> to vector<18x32x64xf32>
    %63 = vector.extract_strided_slice %62 {offsets = [1, 0, 0], sizes = [16, 32, 64], strides = [1, 1, 1]} : vector<18x32x64xf32> to vector<16x32x64xf32>
    %64 = arith.addf %58, %63 : vector<16x32x64xf32>
    %c2_33 = arith.constant 2 : index
    %c0_34 = arith.constant 0 : index
    %c0_35 = arith.constant 0 : index
    %65 = vector.load %arg5[%c2_33, %c0_34, %c0_35] : memref<3x96x64xbf16, #tpu.memory_space<vmem>>, vector<1x96x64xbf16>
    %66 = vector.shape_cast %65 : vector<1x96x64xbf16> to vector<96x64xbf16>
    %cst_36 = arith.constant dense<0.000000e+00> : vector<576x64xf32>
    %67 = tpu.matmul %53, %66, %cst_36 {dimension_numbers = #tpu.dot_dimension_numbers<[1], [0], [0], [1], [0, 0, 1, 1], [], []>} : vector<576x96xbf16>, vector<96x64xbf16>, vector<576x64xf32> -> vector<576x64xf32>
    %68 = vector.shape_cast %67 : vector<576x64xf32> to vector<18x32x64xf32>
    %69 = vector.extract_strided_slice %68 {offsets = [2, 0, 0], sizes = [16, 32, 64], strides = [1, 1, 1]} : vector<18x32x64xf32> to vector<16x32x64xf32>
    %70 = arith.addf %64, %69 : vector<16x32x64xf32>
    %71 = vector.shape_cast %41 : vector<64xf32> to vector<1x1x64xf32>
    %72 = vector.broadcast %71 : vector<1x1x64xf32> to vector<16x32x64xf32>
    %73 = arith.mulf %70, %72 : vector<16x32x64xf32>
    %74 = vector.shape_cast %43 : vector<64xf32> to vector<1x1x64xf32>
    %75 = vector.broadcast %74 : vector<1x1x64xf32> to vector<16x32x64xf32>
    %76 = arith.addf %73, %75 : vector<16x32x64xf32>
    %cst_37 = arith.constant 0.000000e+00 : f32
    %77 = vector.broadcast %cst_37 : f32 to vector<16x32x64xf32>
    %78 = arith.maximumf %76, %77 : vector<16x32x64xf32>
    %79 = vector.shape_cast %78 : vector<16x32x64xf32> to vector<8x2x32x64xf32>
    %80 = vector.extract_strided_slice %79 {offsets = [0, 0, 0, 0], sizes = [8, 1, 32, 64], strides = [1, 1, 1, 1]} : vector<8x2x32x64xf32> to vector<8x1x32x64xf32>
    %81 = vector.shape_cast %80 : vector<8x1x32x64xf32> to vector<8x32x64xf32>
    %82 = vector.extract_strided_slice %79 {offsets = [0, 1, 0, 0], sizes = [8, 1, 32, 64], strides = [1, 1, 1, 1]} : vector<8x2x32x64xf32> to vector<8x1x32x64xf32>
    %83 = vector.shape_cast %82 : vector<8x1x32x64xf32> to vector<8x32x64xf32>
    %84 = arith.maximumf %81, %83 : vector<8x32x64xf32>
    %85 = vector.shape_cast %84 : vector<8x32x64xf32> to vector<8x16x2x64xf32>
    %86 = vector.extract_strided_slice %85 {offsets = [0, 0, 0, 0], sizes = [8, 16, 1, 64], strides = [1, 1, 1, 1]} : vector<8x16x2x64xf32> to vector<8x16x1x64xf32>
    %87 = vector.shape_cast %86 : vector<8x16x1x64xf32> to vector<8x16x64xf32>
    %88 = vector.extract_strided_slice %85 {offsets = [0, 0, 1, 0], sizes = [8, 16, 1, 64], strides = [1, 1, 1, 1]} : vector<8x16x2x64xf32> to vector<8x16x1x64xf32>
    %89 = vector.shape_cast %88 : vector<8x16x1x64xf32> to vector<8x16x64xf32>
    %90 = arith.maximumf %87, %89 : vector<8x16x64xf32>
    %c0_38 = arith.constant 0 : index
    %c0_39 = arith.constant 0 : index
    %91 = vector.load %arg9[%c0_38, %c0_39] : memref<1x128xf32, #tpu.memory_space<vmem>>, vector<1x128xf32>
    %92 = vector.shape_cast %91 : vector<1x128xf32> to vector<128xf32>
    %c0_40 = arith.constant 0 : index
    %c0_41 = arith.constant 0 : index
    %93 = vector.load %arg10[%c0_40, %c0_41] : memref<1x128xf32, #tpu.memory_space<vmem>>, vector<1x128xf32>
    %94 = vector.shape_cast %93 : vector<1x128xf32> to vector<128xf32>
    %95 = arith.truncf %90 : vector<8x16x64xf32> to vector<8x16x64xbf16>
    %cst_42 = arith.constant 0.000000e+00 : bf16
    %96 = vector.broadcast %cst_42 : bf16 to vector<1x16x64xbf16>
    %97 = tpu.concatenate %96, %95, %96 in 0 : vector<1x16x64xbf16>, vector<8x16x64xbf16>, vector<1x16x64xbf16> -> vector<10x16x64xbf16>
    %cst_43 = arith.constant 0.000000e+00 : bf16
    %98 = vector.broadcast %cst_43 : bf16 to vector<10x1x64xbf16>
    %99 = tpu.concatenate %98, %97, %98 in 1 : vector<10x1x64xbf16>, vector<10x16x64xbf16>, vector<10x1x64xbf16> -> vector<10x18x64xbf16>
    %100 = vector.extract_strided_slice %99 {offsets = [0, 0, 0], sizes = [10, 16, 64], strides = [1, 1, 1]} : vector<10x18x64xbf16> to vector<10x16x64xbf16>
    %101 = vector.extract_strided_slice %99 {offsets = [0, 1, 0], sizes = [10, 16, 64], strides = [1, 1, 1]} : vector<10x18x64xbf16> to vector<10x16x64xbf16>
    %102 = vector.extract_strided_slice %99 {offsets = [0, 2, 0], sizes = [10, 16, 64], strides = [1, 1, 1]} : vector<10x18x64xbf16> to vector<10x16x64xbf16>
    %103 = tpu.concatenate %100, %101, %102 in 2 : vector<10x16x64xbf16>, vector<10x16x64xbf16>, vector<10x16x64xbf16> -> vector<10x16x192xbf16>
    %104 = vector.shape_cast %103 : vector<10x16x192xbf16> to vector<160x192xbf16>
    %c0_44 = arith.constant 0 : index
    %c0_45 = arith.constant 0 : index
    %c0_46 = arith.constant 0 : index
    %105 = vector.load %arg8[%c0_44, %c0_45, %c0_46] : memref<3x192x128xbf16, #tpu.memory_space<vmem>>, vector<1x192x128xbf16>
    %106 = vector.shape_cast %105 : vector<1x192x128xbf16> to vector<192x128xbf16>
    %cst_47 = arith.constant dense<0.000000e+00> : vector<160x128xf32>
    %107 = tpu.matmul %104, %106, %cst_47 {dimension_numbers = #tpu.dot_dimension_numbers<[1], [0], [0], [1], [0, 0, 1, 1], [], []>} : vector<160x192xbf16>, vector<192x128xbf16>, vector<160x128xf32> -> vector<160x128xf32>
    %108 = vector.shape_cast %107 : vector<160x128xf32> to vector<10x16x128xf32>
    %109 = vector.extract_strided_slice %108 {offsets = [0, 0, 0], sizes = [8, 16, 128], strides = [1, 1, 1]} : vector<10x16x128xf32> to vector<8x16x128xf32>
    %c1_48 = arith.constant 1 : index
    %c0_49 = arith.constant 0 : index
    %c0_50 = arith.constant 0 : index
    %110 = vector.load %arg8[%c1_48, %c0_49, %c0_50] : memref<3x192x128xbf16, #tpu.memory_space<vmem>>, vector<1x192x128xbf16>
    %111 = vector.shape_cast %110 : vector<1x192x128xbf16> to vector<192x128xbf16>
    %cst_51 = arith.constant dense<0.000000e+00> : vector<160x128xf32>
    %112 = tpu.matmul %104, %111, %cst_51 {dimension_numbers = #tpu.dot_dimension_numbers<[1], [0], [0], [1], [0, 0, 1, 1], [], []>} : vector<160x192xbf16>, vector<192x128xbf16>, vector<160x128xf32> -> vector<160x128xf32>
    %113 = vector.shape_cast %112 : vector<160x128xf32> to vector<10x16x128xf32>
    %114 = vector.extract_strided_slice %113 {offsets = [1, 0, 0], sizes = [8, 16, 128], strides = [1, 1, 1]} : vector<10x16x128xf32> to vector<8x16x128xf32>
    %115 = arith.addf %109, %114 : vector<8x16x128xf32>
    %c2_52 = arith.constant 2 : index
    %c0_53 = arith.constant 0 : index
    %c0_54 = arith.constant 0 : index
    %116 = vector.load %arg8[%c2_52, %c0_53, %c0_54] : memref<3x192x128xbf16, #tpu.memory_space<vmem>>, vector<1x192x128xbf16>
    %117 = vector.shape_cast %116 : vector<1x192x128xbf16> to vector<192x128xbf16>
    %cst_55 = arith.constant dense<0.000000e+00> : vector<160x128xf32>
    %118 = tpu.matmul %104, %117, %cst_55 {dimension_numbers = #tpu.dot_dimension_numbers<[1], [0], [0], [1], [0, 0, 1, 1], [], []>} : vector<160x192xbf16>, vector<192x128xbf16>, vector<160x128xf32> -> vector<160x128xf32>
    %119 = vector.shape_cast %118 : vector<160x128xf32> to vector<10x16x128xf32>
    %120 = vector.extract_strided_slice %119 {offsets = [2, 0, 0], sizes = [8, 16, 128], strides = [1, 1, 1]} : vector<10x16x128xf32> to vector<8x16x128xf32>
    %121 = arith.addf %115, %120 : vector<8x16x128xf32>
    %122 = vector.shape_cast %92 : vector<128xf32> to vector<1x1x128xf32>
    %123 = vector.broadcast %122 : vector<1x1x128xf32> to vector<8x16x128xf32>
    %124 = arith.mulf %121, %123 : vector<8x16x128xf32>
    %125 = vector.shape_cast %94 : vector<128xf32> to vector<1x1x128xf32>
    %126 = vector.broadcast %125 : vector<1x1x128xf32> to vector<8x16x128xf32>
    %127 = arith.addf %124, %126 : vector<8x16x128xf32>
    %cst_56 = arith.constant 0.000000e+00 : f32
    %128 = vector.broadcast %cst_56 : f32 to vector<8x16x128xf32>
    %129 = arith.maximumf %127, %128 : vector<8x16x128xf32>
    %130 = vector.shape_cast %129 : vector<8x16x128xf32> to vector<4x2x16x128xf32>
    %131 = vector.extract_strided_slice %130 {offsets = [0, 0, 0, 0], sizes = [4, 1, 16, 128], strides = [1, 1, 1, 1]} : vector<4x2x16x128xf32> to vector<4x1x16x128xf32>
    %132 = vector.shape_cast %131 : vector<4x1x16x128xf32> to vector<4x16x128xf32>
    %133 = vector.extract_strided_slice %130 {offsets = [0, 1, 0, 0], sizes = [4, 1, 16, 128], strides = [1, 1, 1, 1]} : vector<4x2x16x128xf32> to vector<4x1x16x128xf32>
    %134 = vector.shape_cast %133 : vector<4x1x16x128xf32> to vector<4x16x128xf32>
    %135 = arith.maximumf %132, %134 : vector<4x16x128xf32>
    %136 = vector.shape_cast %135 : vector<4x16x128xf32> to vector<4x8x2x128xf32>
    %137 = vector.extract_strided_slice %136 {offsets = [0, 0, 0, 0], sizes = [4, 8, 1, 128], strides = [1, 1, 1, 1]} : vector<4x8x2x128xf32> to vector<4x8x1x128xf32>
    %138 = vector.shape_cast %137 : vector<4x8x1x128xf32> to vector<4x8x128xf32>
    %139 = vector.extract_strided_slice %136 {offsets = [0, 0, 1, 0], sizes = [4, 8, 1, 128], strides = [1, 1, 1, 1]} : vector<4x8x2x128xf32> to vector<4x8x1x128xf32>
    %140 = vector.shape_cast %139 : vector<4x8x1x128xf32> to vector<4x8x128xf32>
    %141 = arith.maximumf %138, %140 : vector<4x8x128xf32>
    %142 = vector.shape_cast %141 : vector<4x8x128xf32> to vector<1x4x8x128xf32>
    %143 = arith.truncf %142 : vector<1x4x8x128xf32> to vector<1x4x8x128xbf16>
    %c0_57 = arith.constant 0 : index
    %c0_58 = arith.constant 0 : index
    %c0_59 = arith.constant 0 : index
    %c0_60 = arith.constant 0 : index
    %144 = vector.load %arg11[%c0_57, %c0_58, %c0_59, %c0_60] : memref<1x4x8x128xbf16, #tpu.memory_space<vmem>>, vector<1x4x8x128xbf16>
    tpu.vector_store %arg11[%c0_57, %c0_58, %c0_59, %c0_60], %143 {strides = array<i32>} : memref<1x4x8x128xbf16, #tpu.memory_space<vmem>>, vector<1x4x8x128xbf16>,
    return
  }
  func.func @transform_0(%arg0: i32) -> (i32, i32, i32, i32) {
    %c0_i32 = arith.constant 0 : i32
    %c0_i32_0 = arith.constant 0 : i32
    %c0_i32_1 = arith.constant 0 : i32
    %c0_i32_2 = arith.constant 0 : i32
    return %arg0, %c0_i32, %c0_i32_0, %c0_i32_1 : i32, i32, i32, i32
  }
  func.func @transform_1(%arg0: i32) -> (i32, i32, i32) {
    %c0_i32 = arith.constant 0 : i32
    %c0_i32_0 = arith.constant 0 : i32
    %c0_i32_1 = arith.constant 0 : i32
    %c0_i32_2 = arith.constant 0 : i32
    return %c0_i32, %c0_i32_0, %c0_i32_1 : i32, i32, i32
  }
  func.func @transform_2(%arg0: i32) -> (i32, i32) {
    %c0_i32 = arith.constant 0 : i32
    %c0_i32_0 = arith.constant 0 : i32
    %c0_i32_1 = arith.constant 0 : i32
    return %c0_i32, %c0_i32_0 : i32, i32
  }
  func.func @transform_3(%arg0: i32) -> (i32, i32) {
    %c0_i32 = arith.constant 0 : i32
    %c0_i32_0 = arith.constant 0 : i32
    %c0_i32_1 = arith.constant 0 : i32
    return %c0_i32, %c0_i32_0 : i32, i32
  }
  func.func @transform_4(%arg0: i32) -> (i32, i32, i32) {
    %c0_i32 = arith.constant 0 : i32
    %c0_i32_0 = arith.constant 0 : i32
    %c0_i32_1 = arith.constant 0 : i32
    %c0_i32_2 = arith.constant 0 : i32
    return %c0_i32, %c0_i32_0, %c0_i32_1 : i32, i32, i32
  }
  func.func @transform_5(%arg0: i32) -> (i32, i32) {
    %c0_i32 = arith.constant 0 : i32
    %c0_i32_0 = arith.constant 0 : i32
    %c0_i32_1 = arith.constant 0 : i32
    return %c0_i32, %c0_i32_0 : i32, i32
  }
  func.func @transform_6(%arg0: i32) -> (i32, i32) {
    %c0_i32 = arith.constant 0 : i32
    %c0_i32_0 = arith.constant 0 : i32
    %c0_i32_1 = arith.constant 0 : i32
    return %c0_i32, %c0_i32_0 : i32, i32
  }
  func.func @transform_7(%arg0: i32) -> (i32, i32, i32) {
    %c0_i32 = arith.constant 0 : i32
    %c0_i32_0 = arith.constant 0 : i32
    %c0_i32_1 = arith.constant 0 : i32
    %c0_i32_2 = arith.constant 0 : i32
    return %c0_i32, %c0_i32_0, %c0_i32_1 : i32, i32, i32
  }
  func.func @transform_8(%arg0: i32) -> (i32, i32) {
    %c0_i32 = arith.constant 0 : i32
    %c0_i32_0 = arith.constant 0 : i32
    %c0_i32_1 = arith.constant 0 : i32
    return %c0_i32, %c0_i32_0 : i32, i32
  }
  func.func @transform_9(%arg0: i32) -> (i32, i32) {
    %c0_i32 = arith.constant 0 : i32
    %c0_i32_0 = arith.constant 0 : i32
    %c0_i32_1 = arith.constant 0 : i32
    return %c0_i32, %c0_i32_0 : i32, i32
  }
  func.func @transform_10(%arg0: i32) -> (i32, i32, i32, i32) {
    %c0_i32 = arith.constant 0 : i32
    %c0_i32_0 = arith.constant 0 : i32
    %c0_i32_1 = arith.constant 0 : i32
    %c0_i32_2 = arith.constant 0 : i32
    return %arg0, %c0_i32, %c0_i32_0, %c0_i32_1 : i32, i32, i32, i32
  }
}

</mosaic_0001>

<bundles_post_ra>
// kernel: coatnet_forward.3
= control target key start
LH: loop header
LB: loop body
LE: loop exit
PB: predicated region body
PF: predicated region fallthrough
CT: control target
= control target key end

     0   :  { %v553_v28 = vlaneseq  ;;  %v3862_v36 = vmov 1966171168   ;;  %s4716_s0 = inlined_call_operand.vmem [shape: bf16[2,4096], index: 0, kind: input, shape index: {}]   ;;  %s4717_s1 = inlined_call_operand.vmem [shape: bf16[4096,128], index: 1, kind: input, shape index: {}]   ;;  %s4718_s2 = inlined_call_operand.vmem [shape: f32[1,128], index: 2, kind: input, shape index: {}]   ;;  %s4719_s3 = inlined_call_operand.hbm [shape: f32[2,128], index: 3, kind: output, shape index: {}]  }
   0x1   :  { %v3580_v0 = vld [vmem:[%s4717_s1 + $0x78] sm:$0xff]   ;;  %v3584_v4 = vld [vmem:[%s4717_s1 + $0x70] sm:$0xff]   ;;  %v3588_v8 = vld [vmem:[%s4717_s1 + $0x68] sm:$0xff]   ;;  %v551_v37 = vunpack.c.l.s4 %v3862_v36 }
   0x2   :  { %v3581_v1 = vld [vmem:[%s4717_s1 + $0xf8] sm:$0xff]   ;;  %3226 = vmatprep.subr.bf16.mxu0 %v3580_v0  ;;  %v3585_v5 = vld [vmem:[%s4717_s1 + $0xf0] sm:$0xff]   ;;  %v3589_v9 = vld [vmem:[%s4717_s1 + $0xe8] sm:$0xff]   ;;  %v554_v33 = vshrl.u32 %v553_v28, 7 }
   0x3   :  { %v3582_v2 = vld [vmem:[%s4717_s1 + $0x38] sm:$0xff]   ;;  %3248 = vmatprep.subr.bf16.mxu1 %v3581_v1  ;;  %v3586_v6 = vld [vmem:[%s4717_s1 + $0x30] sm:$0xff]   ;;  %v3590_v10 = vld [vmem:[%s4717_s1 + $0x28] sm:$0xff]   ;;  %v552_v40 = vunpack.c.0.s8 %v551_v37 }
   0x4   :  { %v3583_v3 = vld [vmem:[%s4717_s1 + $0xb8] sm:$0xff]   ;;  %3227 = vmatpush3.bf16.msra.mxu0 %v3582_v2  ;;  %v3587_v7 = vld [vmem:[%s4717_s1 + $0xb0] sm:$0xff]   ;;  %v3591_v11 = vld [vmem:[%s4717_s1 + $0xa8] sm:$0xff]  }
   0x5   :  { %3249 = vmatpush3.bf16.msra.mxu1 %v3583_v3  ;;  %3228 = vmatprep.subr.bf16.mxu0 %v3584_v4  ;;  %v3592_v12 = vld [vmem:[%s4717_s1 + $0x60] sm:$0xff]   ;;  %v3596_v16 = vld [vmem:[%s4717_s1 + $0x58] sm:$0xff]   ;;  %v3600_v20 = vld [vmem:[%s4717_s1 + $0x50] sm:$0xff]   ;;  %v3989_v41 = vsub.s32 %v552_v40, %v554_v33 }
   0x6   :  { %3250 = vmatprep.subr.bf16.mxu1 %v3585_v5  ;;  %v3593_v13 = vld [vmem:[%s4717_s1 + $0xe0] sm:$0xff]   ;;  %v3597_v17 = vld [vmem:[%s4717_s1 + $0xd8] sm:$0xff]   ;;  %v3601_v21 = vld [vmem:[%s4717_s1 + $0xd0] sm:$0xff]  }
   0x7   :  { %v3594_v14 = vld [vmem:[%s4717_s1 + $0x20] sm:$0xff]   ;;  %v3598_v18 = vld [vmem:[%s4717_s1 + $0x18] sm:$0xff]   ;;  %v3602_v22 = vld [vmem:[%s4717_s1 + $0x10] sm:$0xff]  }
   0x8   :  { %3229 = vmatpush3.bf16.msra.mxu0 %v3586_v6  ;;  %v3595_v15 = vld [vmem:[%s4717_s1 + $0xa0] sm:$0xff]   ;;  %v3599_v19 = vld [vmem:[%s4717_s1 + $0x98] sm:$0xff]   ;;  %v3603_v23 = vld [vmem:[%s4717_s1 + $0x90] sm:$0xff]  }
   0x9   :  { %3251 = vmatpush3.bf16.msra.mxu1 %v3587_v7  ;;  %3230 = vmatprep.subr.bf16.mxu0 %v3588_v8  ;;  %v3604_v24 = vld [vmem:[%s4717_s1 + $0x48] sm:$0xff]   ;;  %v3608_v29 = vld [vmem:[%s4717_s1 + $0x40] sm:$0xff]   ;;  %v3613_v35 = vld [vmem:[%s4717_s1 + $0x178] sm:$0xff]  }
   0xa   :  { %3252 = vmatprep.subr.bf16.mxu1 %v3589_v9  ;;  %v3605_v25 = vld [vmem:[%s4717_s1 + $0xc8] sm:$0xff]   ;;  %v3609_v30 = vld [vmem:[%s4717_s1 + $0xc0] sm:$0xff]   ;;  %v3614_v38 = vld [vmem:[%s4717_s1 + $0x1f8] sm:$0xff]  }
   0xb   :  { %v3606_v26 = vld [vmem:[%s4717_s1 + $0x8] sm:$0xff]   ;;  %v3610_v31 = vld [vmem:[%s4717_s1] sm:$0xff]   ;;  %v3615_v47 = vld [vmem:[%s4717_s1 + $0x138] sm:$0xff]  }
   0xc   :  { %3231 = vmatpush3.bf16.msra.mxu0 %v3590_v10  ;;  %v3607_v27 = vld [vmem:[%s4717_s1 + $0x88] sm:$0xff]   ;;  %v3611_v32 = vld [vmem:[%s4717_s1 + $0x80] sm:$0xff]   ;;  %v3616_v49 = vld [vmem:[%s4717_s1 + $0x1b8] sm:$0xff]  }
   0xd   :  { %3253 = vmatpush3.bf16.msra.mxu1 %v3591_v11  ;;  %3232 = vmatprep.subr.bf16.mxu0 %v3592_v12  ;;  %v29_v34 = vld [vmem:[%s4716_s0] sm:$0xff]  ;;  %v3617_v52 = vld [vmem:[%s4717_s1 + $0x170] sm:$0xff]   ;;  %v3621_v58 = vld [vmem:[%s4717_s1 + $0x168] sm:$0xff]  }
   0xe   :  { %3254 = vmatprep.subr.bf16.mxu1 %v3593_v13  ;;  %v549_v39 = vcombine.high %v29_v34, %v29_v34  ;;  %v556_v42 = vrot.slane %v29_v34, %v3989_v41  ;;  %v3618_v54 = vld [vmem:[%s4717_s1 + $0x1f0] sm:$0xff]   ;;  %v3622_v59 = vld [vmem:[%s4717_s1 + $0x1e8] sm:$0xff]   ;;  %v3625_v62 = vld [vmem:[%s4717_s1 + $0x160] sm:$0xff]  }
   0xf   :  { %v3619_v55 = vld [vmem:[%s4717_s1 + $0x130] sm:$0xff]   ;;  %v3623_v60 = vld [vmem:[%s4717_s1 + $0x128] sm:$0xff]   ;;  %v3626_v63 = vld [vmem:[%s4717_s1 + $0x1e0] sm:$0xff]  }
  0x10   :  { %3233 = vmatpush3.bf16.msra.mxu0 %v3594_v14  ;;  %v3993_v43 = vrot.slane %v549_v39, %v3989_v41  ;;  %v564_v44 = vcombine.high %v556_v42, %v556_v42  ;;  %v572_v45 = vrot.slane %v556_v42, %v3989_v41  ;;  %v3620_v57 = vld [vmem:[%s4717_s1 + $0x1b0] sm:$0xff]   ;;  %v3624_v61 = vld [vmem:[%s4717_s1 + $0x1a8] sm:$0xff]   ;;  %v3627_v0 = vld [vmem:[%s4717_s1 + $0x120] sm:$0xff]  }
  0x11   :  { %3255 = vmatpush3.bf16.msra.mxu1 %v3595_v15  ;;  %3234 = vmatprep.subr.bf16.mxu0 %v3596_v16  ;;  %v3628_v1 = vld [vmem:[%s4717_s1 + $0x1a0] sm:$0xff]   ;;  %v3629_v2 = vld [vmem:[%s4717_s1 + $0x158] sm:$0xff]   ;;  %v3633_v6 = vld [vmem:[%s4717_s1 + $0x150] sm:$0xff]  }
  0x12   :  { %3256 = vmatprep.subr.bf16.mxu1 %v3597_v17  ;;  %v565_v46 = vcombine.high %v3993_v43, %v3993_v43  ;;  %v586_v48 = vrot.slane %v564_v44, %v3989_v41  ;;  %v594_v51 = vcombine.high %v572_v45, %v572_v45  ;;  %v3630_v3 = vld [vmem:[%s4717_s1 + $0x1d8] sm:$0xff]   ;;  %v3634_v7 = vld [vmem:[%s4717_s1 + $0x1d0] sm:$0xff]   ;;  %v3637_v10 = vld [vmem:[%s4717_s1 + $0x148] sm:$0xff]  }
  0x13   :  { %v3631_v4 = vld [vmem:[%s4717_s1 + $0x118] sm:$0xff]   ;;  %v3635_v8 = vld [vmem:[%s4717_s1 + $0x110] sm:$0xff]   ;;  %v3638_v11 = vld [vmem:[%s4717_s1 + $0x1c8] sm:$0xff]  }
  0x14   :  { %3235 = vmatpush3.bf16.msra.mxu0 %v3598_v18  ;;  %v593_v50 = vrot.slane %v565_v46, %v3989_v41  ;;  %2345 = vmatprep.mubr.bf16.mxu0 %v586_v48  ;;  %v596_v53 = vcombine.high %v586_v48, %v586_v48  ;;  %v3632_v5 = vld [vmem:[%s4717_s1 + $0x198] sm:$0xff]   ;;  %v3636_v9 = vld [vmem:[%s4717_s1 + $0x190] sm:$0xff]   ;;  %v3639_v12 = vld [vmem:[%s4717_s1 + $0x108] sm:$0xff]   ;;  %v579_v18 = vrot.slane %v3993_v43, %v3989_v41 }
  0x15   :  { %3257 = vmatpush3.bf16.msra.mxu1 %v3599_v19  ;;  %3236 = vmatprep.subr.bf16.mxu0 %v3600_v20  ;;  %v3640_v13 = vld [vmem:[%s4717_s1 + $0x188] sm:$0xff]   ;;  %v3641_v14 = vld [vmem:[%s4717_s1 + $0x140] sm:$0xff]   ;;  %v3645_v19 = vld [vmem:[%s4717_s1 + $0x278] sm:$0xff]  }
  0x16   :  { %3258 = vmatprep.subr.bf16.mxu1 %v3601_v21  ;;  %v597_v56 = vcombine.high %v593_v50, %v593_v50  ;;  %2385 = vmatprep.mubr.bf16.mxu1 %v596_v53  ;;  %v3642_v15 = vld [vmem:[%s4717_s1 + $0x1c0] sm:$0xff]   ;;  %v3646_v20 = vld [vmem:[%s4717_s1 + $0x2f8] sm:$0xff]   ;;  %v3653_v28 = vld [vmem:[%s4717_s1 + $0x268] sm:$0xff]  }
  0x17   :  { %v3643_v16 = vld [vmem:[%s4717_s1 + $0x100] sm:$0xff]   ;;  %v3647_v21 = vld [vmem:[%s4717_s1 + $0x238] sm:$0xff]   ;;  %v3665_v40 = vld [vmem:[%s4717_s1 + $0x250] sm:$0xff]  }
  0x18   :  { %3237 = vmatpush3.bf16.msra.mxu0 %v3602_v22  ;;  %v3644_v17 = vld [vmem:[%s4717_s1 + $0x180] sm:$0xff]   ;;  %v3648_v22 = vld [vmem:[%s4717_s1 + $0x2b8] sm:$0xff]   ;;  %v3666_v42 = vld [vmem:[%s4717_s1 + $0x2d0] sm:$0xff]  }
  0x19   :  { %3259 = vmatpush3.bf16.msra.mxu1 %v3603_v23  ;;  %3238 = vmatprep.subr.bf16.mxu0 %v3604_v24  ;;  %v595_v23 = vcombine.high %v579_v18, %v579_v18  ;;  %v3649_v24 = vld [vmem:[%s4717_s1 + $0x270] sm:$0xff]   ;;  %v3658_v33 = vld [vmem:[%s4717_s1 + $0x2e0] sm:$0xff]   ;;  %v3661_v36 = vld [vmem:[%s4717_s1 + $0x258] sm:$0xff]  }
  0x1a   :  { %3260 = vmatprep.subr.bf16.mxu1 %v3605_v25  ;;  %v3650_v25 = vld [vmem:[%s4717_s1 + $0x2f0] sm:$0xff]   ;;  %v3659_v34 = vld [vmem:[%s4717_s1 + $0x220] sm:$0xff]   ;;  %v3662_v37 = vld [vmem:[%s4717_s1 + $0x2d8] sm:$0xff]  }
  0x1b   :  { %v3664_v39 = vld [vmem:[%s4717_s1 + $0x298] sm:$0xff]   ;;  %v3667_v43 = vld [vmem:[%s4717_s1 + $0x210] sm:$0xff]   ;;  %v30_v46 = vld [vmem:[%s4716_s0 + $0x8] sm:$0xff] }
  0x1c   :  { %3239 = vmatpush3.bf16.msra.mxu0 %v3606_v26  ;;  %v3651_v26 = vld [vmem:[%s4717_s1 + $0x230] sm:$0xff]   ;;  %v605_v48 = vrot.slane %v30_v46, %v3989_v41 }
  0x1d   :  { %3261 = vmatpush3.bf16.msra.mxu1 %v3607_v27  ;;  %3240 = vmatprep.subr.bf16.mxu0 %v3608_v29  ;;  %v3652_v27 = vld [vmem:[%s4717_s1 + $0x2b0] sm:$0xff]   ;;  %v3654_v29 = vld [vmem:[%s4717_s1 + $0x2e8] sm:$0xff]  }
  0x1e   :  { %3262 = vmatprep.subr.bf16.mxu1 %v3609_v30  ;;  %v3655_v30 = vld [vmem:[%s4717_s1 + $0x228] sm:$0xff]   ;;  %v3668_v44 = vld [vmem:[%s4717_s1 + $0x290] sm:$0xff]  }
  0x20   :  { %3241 = vmatpush3.bf16.msra.mxu0 %v3610_v31  ;;  %v3656_v31 = vld [vmem:[%s4717_s1 + $0x2a8] sm:$0xff]  }
  0x21   :  { %3263 = vmatpush3.bf16.msra.mxu1 %v3611_v32  ;;  %3270 = vmatprep.subr.bf16.mxu0 %v3613_v35  ;;  %v3657_v32 = vld [vmem:[%s4717_s1 + $0x260] sm:$0xff]  }
  0x22   :  { %3292 = vmatprep.subr.bf16.mxu1 %v3614_v38  ;;  %v3660_v35 = vld [vmem:[%s4717_s1 + $0x2a0] sm:$0xff]   ;;  %v3663_v38 = vld [vmem:[%s4717_s1 + $0x218] sm:$0xff]  }
  0x23   :  { %2346 = vmatmul.mubr.bf16.vlgmr.msra.gmra.mxu0 %v572_v45  ;;  %v3669_v45 = vld [vmem:[%s4717_s1 + $0x248] sm:$0xff]  }
  0x24   :  { %3271 = vmatpush3.bf16.msra.mxu0 %v3615_v47  ;;  %2386 = vmatmul.mubr.bf16.vlgmr.msra.gmra.mxu1 %v594_v51  ;;  %v3670_v47 = vld [vmem:[%s4717_s1 + $0x2c8] sm:$0xff]  }
  0x25   :  { %3272 = vmatprep.subr.bf16.mxu0 %v3617_v52  ;;  %3293 = vmatpush3.bf16.msra.mxu1 %v3616_v49  ;;  %v598_v49 = vcombine.high %v30_v46, %v30_v46  ;;  %v3672_v51 = vld [vmem:[%s4717_s1 + $0x288] sm:$0xff]   ;;  %v613_v52 = vcombine.high %v605_v48, %v605_v48 }
  0x26   :  { %2425 = vmatprep.mubr.bf16.mxu0 %v593_v50  ;;  %3294 = vmatprep.subr.bf16.mxu1 %v3618_v54  ;;  %v3671_v50 = vld [vmem:[%s4717_s1 + $0x208] sm:$0xff]   ;;  %v3673_v54 = vld [vmem:[%s4717_s1 + $0x240] sm:$0xff]  }
  0x27   :  { %2465 = vmatprep.mubr.bf16.mxu1 %v597_v56  ;;  %v4181_v53 = vrot.slane %v598_v49, %v3989_v41  ;;  %v635_v56 = vrot.slane %v613_v52, %v3989_v41  ;;  %v3720_v46 = vld [vmem:[%s4717_s1 + $0x428] sm:$0xff]   ;;  %v3723_v49 = vld [vmem:[%s4717_s1 + $0x4e0] sm:$0xff]   ;;  %v3726_v52 = vld [vmem:[%s4717_s1 + $0x458] sm:$0xff]  }
  0x28   :  { %3273 = vmatpush3.bf16.msra.mxu0 %v3619_v55  ;;  %v3674_v55 = vld [vmem:[%s4717_s1 + $0x2c0] sm:$0xff]  }
  0x29   :  { %3274 = vmatprep.subr.bf16.mxu0 %v3621_v58  ;;  %3295 = vmatpush3.bf16.msra.mxu1 %v3620_v57  ;;  %v614_v57 = vcombine.high %v4181_v53, %v4181_v53  ;;  %v3675_v58 = vld [vmem:[%s4717_s1 + $0x200] sm:$0xff]  }
  0x2a   :  { %3296 = vmatprep.subr.bf16.mxu1 %v3622_v59  ;;  %v3676_v59 = vld [vmem:[%s4717_s1 + $0x280] sm:$0xff]  }
  0x2c   :  { %3275 = vmatpush3.bf16.msra.mxu0 %v3623_v60  ;;  %v645_v60 = vcombine.high %v635_v56, %v635_v56 }
  0x2d   :  { %3276 = vmatprep.subr.bf16.mxu0 %v3625_v62  ;;  %3297 = vmatpush3.bf16.msra.mxu1 %v3624_v61  ;;  %v621_v61 = vrot.slane %v605_v48, %v3989_v41  ;;  %v3677_v62 = vld [vmem:[%s4717_s1 + $0x378] sm:$0xff]   ;;  %v3722_v48 = vld [vmem:[%s4717_s1 + $0x460] sm:$0xff]  }
  0x2e   :  { %3298 = vmatprep.subr.bf16.mxu1 %v3626_v63  ;;  %v3678_v63 = vld [vmem:[%s4717_s1 + $0x3f8] sm:$0xff]  }
  0x30   :  { %3277 = vmatpush3.bf16.msra.mxu0 %v3627_v0  ;;  %v642_v0 = vrot.slane %v614_v57, %v3989_v41  ;;  %v3731_v57 = vld [vmem:[%s4717_s1 + $0x4d0] sm:$0xff]  }
  0x31   :  { %3278 = vmatprep.subr.bf16.mxu0 %v3629_v2  ;;  %3299 = vmatpush3.bf16.msra.mxu1 %v3628_v1  ;;  %v3679_v1 = vld [vmem:[%s4717_s1 + $0x338] sm:$0xff]  }
  0x32   :  { %3300 = vmatprep.subr.bf16.mxu1 %v3630_v3  ;;  %v3680_v2 = vld [vmem:[%s4717_s1 + $0x3b8] sm:$0xff]   ;;  %v643_v3 = vcombine.high %v621_v61, %v621_v61 }
  0x34   :  { %3279 = vmatpush3.bf16.msra.mxu0 %v3631_v4  ;;  %v3681_v4 = vld [vmem:[%s4717_s1 + $0x370] sm:$0xff]  }
  0x35   :  { %3280 = vmatprep.subr.bf16.mxu0 %v3633_v6  ;;  %3301 = vmatpush3.bf16.msra.mxu1 %v3632_v5  ;;  %v3682_v5 = vld [vmem:[%s4717_s1 + $0x3f0] sm:$0xff]   ;;  %v646_v6 = vcombine.high %v642_v0, %v642_v0 }
  0x36   :  { %3302 = vmatprep.subr.bf16.mxu1 %v3634_v7  ;;  %v3683_v7 = vld [vmem:[%s4717_s1 + $0x330] sm:$0xff]  }
  0x38   :  { %3281 = vmatpush3.bf16.msra.mxu0 %v3635_v8  ;;  %v3684_v8 = vld [vmem:[%s4717_s1 + $0x3b0] sm:$0xff]  }
  0x39   :  { %3282 = vmatprep.subr.bf16.mxu0 %v3637_v10  ;;  %3303 = vmatpush3.bf16.msra.mxu1 %v3636_v9  ;;  %v3685_v9 = vld [vmem:[%s4717_s1 + $0x368] sm:$0xff]  }
  0x3a   :  { %3304 = vmatprep.subr.bf16.mxu1 %v3638_v11  ;;  %v3686_v10 = vld [vmem:[%s4717_s1 + $0x3e8] sm:$0xff]  }
  0x3b   :  { %v3687_v11 = vld [vmem:[%s4717_s1 + $0x328] sm:$0xff]  }
  0x3c   :  { %3283 = vmatpush3.bf16.msra.mxu0 %v3639_v12  ;;  %v3688_v12 = vld [vmem:[%s4717_s1 + $0x3a8] sm:$0xff]  }
  0x3d   :  { %3284 = vmatprep.subr.bf16.mxu0 %v3641_v14  ;;  %3305 = vmatpush3.bf16.msra.mxu1 %v3640_v13  ;;  %v3689_v13 = vld [vmem:[%s4717_s1 + $0x360] sm:$0xff]  }
  0x3e   :  { %3306 = vmatprep.subr.bf16.mxu1 %v3642_v15  ;;  %v3690_v14 = vld [vmem:[%s4717_s1 + $0x3e0] sm:$0xff]  }
  0x3f   :  { %v3691_v15 = vld [vmem:[%s4717_s1 + $0x320] sm:$0xff]  }
  0x40   :  { %3285 = vmatpush3.bf16.msra.mxu0 %v3643_v16  ;;  %v3692_v16 = vld [vmem:[%s4717_s1 + $0x3a0] sm:$0xff]  }
  0x41   :  { %3314 = vmatprep.subr.bf16.mxu0 %v3645_v19  ;;  %3307 = vmatpush3.bf16.msra.mxu1 %v3644_v17  ;;  %v3693_v17 = vld [vmem:[%s4717_s1 + $0x358] sm:$0xff]  }
  0x42   :  { %3336 = vmatprep.subr.bf16.mxu1 %v3646_v20  ;;  %v3695_v19 = vld [vmem:[%s4717_s1 + $0x318] sm:$0xff]  }
  0x43   :  { %2426 = vmatmul.mubr.bf16.vlgmr.msra.gmra.mxu0 %v579_v18  ;;  %v3694_v18 = vld [vmem:[%s4717_s1 + $0x3d8] sm:$0xff]  }
  0x44   :  { %3315 = vmatpush3.bf16.msra.mxu0 %v3647_v21  ;;  %2466 = vmatmul.mubr.bf16.vlgmr.msra.gmra.mxu1 %v595_v23  ;;  %v3696_v20 = vld [vmem:[%s4717_s1 + $0x398] sm:$0xff]   ;;  %v3697_v21 = vld [vmem:[%s4717_s1 + $0x350] sm:$0xff]  }
  0x45   :  { %3316 = vmatprep.subr.bf16.mxu0 %v3649_v24  ;;  %3337 = vmatpush3.bf16.msra.mxu1 %v3648_v22  ;;  %v3698_v22 = vld [vmem:[%s4717_s1 + $0x3d0] sm:$0xff]  }
  0x46   :  { %3338 = vmatprep.subr.bf16.mxu1 %v3650_v25  ;;  %2505 = vmatprep.mubr.bf16.mxu0 %v635_v56  ;;  %v3699_v23 = vld [vmem:[%s4717_s1 + $0x310] sm:$0xff]   ;;  %v3701_v25 = vld [vmem:[%s4717_s1 + $0x348] sm:$0xff]  }
  0x47   :  { %2545 = vmatprep.mubr.bf16.mxu1 %v645_v60  ;;  %v3700_v24 = vld [vmem:[%s4717_s1 + $0x390] sm:$0xff]   ;;  %v3734_v60 = vld [vmem:[%s4717_s1 + $0x448] sm:$0xff]  }
  0x48   :  { %3317 = vmatpush3.bf16.msra.mxu0 %v3651_v26  ;;  %v3702_v26 = vld [vmem:[%s4717_s1 + $0x3c8] sm:$0xff]   ;;  %v3730_v56 = vld [vmem:[%s4717_s1 + $0x450] sm:$0xff]  }
  0x49   :  { %3318 = vmatprep.subr.bf16.mxu0 %v3653_v28  ;;  %3339 = vmatpush3.bf16.msra.mxu1 %v3652_v27  ;;  %v3703_v27 = vld [vmem:[%s4717_s1 + $0x308] sm:$0xff]  }
  0x4a   :  { %3340 = vmatprep.subr.bf16.mxu1 %v3654_v29  ;;  %v3704_v28 = vld [vmem:[%s4717_s1 + $0x388] sm:$0xff]   ;;  %v3705_v29 = vld [vmem:[%s4717_s1 + $0x340] sm:$0xff]  }
  0x4c   :  { %3319 = vmatpush3.bf16.msra.mxu0 %v3655_v30  ;;  %v3706_v30 = vld [vmem:[%s4717_s1 + $0x3c0] sm:$0xff]  }
  0x4d   :  { %3320 = vmatprep.subr.bf16.mxu0 %v3657_v32  ;;  %3341 = vmatpush3.bf16.msra.mxu1 %v3656_v31  ;;  %v3707_v31 = vld [vmem:[%s4717_s1 + $0x300] sm:$0xff]  }
  0x4e   :  { %3342 = vmatprep.subr.bf16.mxu1 %v3658_v33  ;;  %v3708_v32 = vld [vmem:[%s4717_s1 + $0x380] sm:$0xff]   ;;  %v628_v33 = vrot.slane %v4181_v53, %v3989_v41  ;;  %v3727_v53 = vld [vmem:[%s4717_s1 + $0x4d8] sm:$0xff]  }
  0x50   :  { %3321 = vmatpush3.bf16.msra.mxu0 %v3659_v34  ;;  %v3710_v34 = vld [vmem:[%s4717_s1 + $0x478] sm:$0xff]  }
  0x51   :  { %3322 = vmatprep.subr.bf16.mxu0 %v3661_v36  ;;  %3343 = vmatpush3.bf16.msra.mxu1 %v3660_v35  ;;  %v3711_v35 = vld [vmem:[%s4717_s1 + $0x4f8] sm:$0xff]  }
  0x52   :  { %3344 = vmatprep.subr.bf16.mxu1 %v3662_v37  ;;  %v3712_v36 = vld [vmem:[%s4717_s1 + $0x438] sm:$0xff]  }
  0x53   :  { %v3713_v37 = vld [vmem:[%s4717_s1 + $0x4b8] sm:$0xff]  }
  0x54   :  { %3323 = vmatpush3.bf16.msra.mxu0 %v3663_v38  ;;  %v644_v38 = vcombine.high %v628_v33, %v628_v33 }
  0x55   :  { %3324 = vmatprep.subr.bf16.mxu0 %v3665_v40  ;;  %3345 = vmatpush3.bf16.msra.mxu1 %v3664_v39  ;;  %v3714_v39 = vld [vmem:[%s4717_s1 + $0x470] sm:$0xff]  }
  0x56   :  { %3346 = vmatprep.subr.bf16.mxu1 %v3666_v42  ;;  %v3715_v40 = vld [vmem:[%s4717_s1 + $0x4f0] sm:$0xff]  }
  0x57   :  { %v3716_v42 = vld [vmem:[%s4717_s1 + $0x430] sm:$0xff]  }
  0x58   :  { %3325 = vmatpush3.bf16.msra.mxu0 %v3667_v43  ;;  %v3717_v43 = vld [vmem:[%s4717_s1 + $0x4b0] sm:$0xff]  }
  0x59   :  { %3326 = vmatprep.subr.bf16.mxu0 %v3669_v45  ;;  %3347 = vmatpush3.bf16.msra.mxu1 %v3668_v44  ;;  %v3718_v44 = vld [vmem:[%s4717_s1 + $0x468] sm:$0xff]  }
  0x5a   :  { %3348 = vmatprep.subr.bf16.mxu1 %v3670_v47  ;;  %v3719_v45 = vld [vmem:[%s4717_s1 + $0x4e8] sm:$0xff]  }
  0x5b   :  { %v3721_v47 = vld [vmem:[%s4717_s1 + $0x4a8] sm:$0xff]  }
  0x5c   :  { %3327 = vmatpush3.bf16.msra.mxu0 %v3671_v50  ;;  %v3724_v50 = vld [vmem:[%s4717_s1 + $0x420] sm:$0xff]  }
  0x5d   :  { %3328 = vmatprep.subr.bf16.mxu0 %v3673_v54  ;;  %3349 = vmatpush3.bf16.msra.mxu1 %v3672_v51  ;;  %v3725_v51 = vld [vmem:[%s4717_s1 + $0x4a0] sm:$0xff]   ;;  %v3728_v54 = vld [vmem:[%s4717_s1 + $0x418] sm:$0xff]  }
  0x5e   :  { %3350 = vmatprep.subr.bf16.mxu1 %v3674_v55  ;;  %v3729_v55 = vld [vmem:[%s4717_s1 + $0x498] sm:$0xff]  }
  0x60   :  { %3329 = vmatpush3.bf16.msra.mxu0 %v3675_v58  ;;  %v3732_v58 = vld [vmem:[%s4717_s1 + $0x410] sm:$0xff]  }
  0x61   :  { %3358 = vmatprep.subr.bf16.mxu0 %v3677_v62  ;;  %3351 = vmatpush3.bf16.msra.mxu1 %v3676_v59  ;;  %v3733_v59 = vld [vmem:[%s4717_s1 + $0x490] sm:$0xff]   ;;  %v3735_v62 = vld [vmem:[%s4717_s1 + $0x4c8] sm:$0xff]  }
  0x62   :  { %3380 = vmatprep.subr.bf16.mxu1 %v3678_v63 }
  0x63   :  { %2506 = vmatmul.mubr.bf16.vlgmr.msra.gmra.mxu0 %v621_v61  ;;  %v31_v61 = vld [vmem:[%s4716_s0 + $0x10] sm:$0xff] }
  0x64   :  { %3359 = vmatpush3.bf16.msra.mxu0 %v3679_v1  ;;  %2585 = vmatprep.mubr.bf16.mxu0 %v642_v0  ;;  %v654_v63 = vrot.slane %v31_v61, %v3989_v41  ;;  %v647_v0 = vcombine.high %v31_v61, %v31_v61  ;;  %v3736_v1 = vld [vmem:[%s4717_s1 + $0x408] sm:$0xff]  }
  0x65   :  { %2546 = vmatmul.mubr.bf16.vlgmr.msra.gmra.mxu1 %v643_v3  ;;  %3360 = vmatprep.subr.bf16.mxu0 %v3681_v4  ;;  %v3785_v61 = vld [vmem:[%s4717_s1 + $0x628] sm:$0xff]  }
  0x66   :  { %3381 = vmatpush3.bf16.msra.mxu1 %v3680_v2  ;;  %2625 = vmatprep.mubr.bf16.mxu1 %v646_v6  ;;  %v3737_v2 = vld [vmem:[%s4717_s1 + $0x488] sm:$0xff]   ;;  %v662_v3 = vcombine.high %v654_v63, %v654_v63  ;;  %v4387_v4 = vrot.slane %v647_v0, %v3989_v41  ;;  %v3739_v6 = vld [vmem:[%s4717_s1 + $0x4c0] sm:$0xff]  }
  0x67   :  { %3382 = vmatprep.subr.bf16.mxu1 %v3682_v5  ;;  %v3738_v5 = vld [vmem:[%s4717_s1 + $0x440] sm:$0xff]  }
  0x68   :  { %3361 = vmatpush3.bf16.msra.mxu0 %v3683_v7  ;;  %v684_v7 = vrot.slane %v662_v3, %v3989_v41  ;;  %v3788_v0 = vld [vmem:[%s4717_s1 + $0x6e0] sm:$0xff]   ;;  %v3791_v3 = vld [vmem:[%s4717_s1 + $0x658] sm:$0xff]  }
  0x69   :  { %3362 = vmatprep.subr.bf16.mxu0 %v3685_v9  ;;  %v3740_v9 = vld [vmem:[%s4717_s1 + $0x400] sm:$0xff]  }
  0x6a   :  { %3383 = vmatpush3.bf16.msra.mxu1 %v3684_v8  ;;  %v663_v8 = vcombine.high %v4387_v4, %v4387_v4 }
  0x6b   :  { %3384 = vmatprep.subr.bf16.mxu1 %v3686_v10  ;;  %v3741_v10 = vld [vmem:[%s4717_s1 + $0x480] sm:$0xff]  }
  0x6c   :  { %3363 = vmatpush3.bf16.msra.mxu0 %v3687_v11  ;;  %v694_v11 = vcombine.high %v684_v7, %v684_v7 }
  0x6d   :  { %3364 = vmatprep.subr.bf16.mxu0 %v3689_v13  ;;  %v3742_v13 = vld [vmem:[%s4717_s1 + $0x578] sm:$0xff]  }
  0x6e   :  { %3385 = vmatpush3.bf16.msra.mxu1 %v3688_v12  ;;  %v670_v12 = vrot.slane %v654_v63, %v3989_v41  ;;  %v3787_v63 = vld [vmem:[%s4717_s1 + $0x660] sm:$0xff]  }
  0x6f   :  { %3386 = vmatprep.subr.bf16.mxu1 %v3690_v14  ;;  %v3743_v14 = vld [vmem:[%s4717_s1 + $0x5f8] sm:$0xff]  }
  0x70   :  { %3365 = vmatpush3.bf16.msra.mxu0 %v3691_v15  ;;  %v691_v15 = vrot.slane %v663_v8, %v3989_v41  ;;  %v3796_v8 = vld [vmem:[%s4717_s1 + $0x6d0] sm:$0xff]  }
  0x71   :  { %3366 = vmatprep.subr.bf16.mxu0 %v3693_v17  ;;  %v3745_v17 = vld [vmem:[%s4717_s1 + $0x5b8] sm:$0xff]  }
  0x72   :  { %3387 = vmatpush3.bf16.msra.mxu1 %v3692_v16  ;;  %v3744_v16 = vld [vmem:[%s4717_s1 + $0x538] sm:$0xff]  }
  0x73   :  { %3388 = vmatprep.subr.bf16.mxu1 %v3694_v18  ;;  %v692_v18 = vcombine.high %v670_v12, %v670_v12 }
  0x74   :  { %3367 = vmatpush3.bf16.msra.mxu0 %v3695_v19  ;;  %v3746_v19 = vld [vmem:[%s4717_s1 + $0x570] sm:$0xff]  }
  0x75   :  { %3368 = vmatprep.subr.bf16.mxu0 %v3697_v21  ;;  %v695_v21 = vcombine.high %v691_v15, %v691_v15 }
  0x76   :  { %3389 = vmatpush3.bf16.msra.mxu1 %v3696_v20  ;;  %v3747_v20 = vld [vmem:[%s4717_s1 + $0x5f0] sm:$0xff]  }
  0x77   :  { %3390 = vmatprep.subr.bf16.mxu1 %v3698_v22  ;;  %v3748_v22 = vld [vmem:[%s4717_s1 + $0x530] sm:$0xff]  }
  0x78   :  { %3369 = vmatpush3.bf16.msra.mxu0 %v3699_v23  ;;  %v3749_v23 = vld [vmem:[%s4717_s1 + $0x5b0] sm:$0xff]  }
  0x79   :  { %3370 = vmatprep.subr.bf16.mxu0 %v3701_v25  ;;  %v3751_v25 = vld [vmem:[%s4717_s1 + $0x5e8] sm:$0xff]  }
  0x7a   :  { %3391 = vmatpush3.bf16.msra.mxu1 %v3700_v24  ;;  %v3750_v24 = vld [vmem:[%s4717_s1 + $0x568] sm:$0xff]  }
  0x7b   :  { %3392 = vmatprep.subr.bf16.mxu1 %v3702_v26  ;;  %v3752_v26 = vld [vmem:[%s4717_s1 + $0x528] sm:$0xff]  }
  0x7c   :  { %3371 = vmatpush3.bf16.msra.mxu0 %v3703_v27  ;;  %v3753_v27 = vld [vmem:[%s4717_s1 + $0x5a8] sm:$0xff]  }
  0x7d   :  { %3372 = vmatprep.subr.bf16.mxu0 %v3705_v29  ;;  %v3755_v29 = vld [vmem:[%s4717_s1 + $0x5e0] sm:$0xff]  }
  0x7e   :  { %3393 = vmatpush3.bf16.msra.mxu1 %v3704_v28  ;;  %v3754_v28 = vld [vmem:[%s4717_s1 + $0x560] sm:$0xff]  }
  0x7f   :  { %3394 = vmatprep.subr.bf16.mxu1 %v3706_v30  ;;  %v3756_v30 = vld [vmem:[%s4717_s1 + $0x520] sm:$0xff]  }
  0x80   :  { %3373 = vmatpush3.bf16.msra.mxu0 %v3707_v31  ;;  %v3757_v31 = vld [vmem:[%s4717_s1 + $0x5a0] sm:$0xff]  }
  0x81   :  { %3402 = vmatprep.subr.bf16.mxu0 %v3710_v34  ;;  %v3760_v34 = vld [vmem:[%s4717_s1 + $0x518] sm:$0xff]  }
  0x82   :  { %3395 = vmatpush3.bf16.msra.mxu1 %v3708_v32  ;;  %v3758_v32 = vld [vmem:[%s4717_s1 + $0x558] sm:$0xff]  }
  0x83   :  { %2586 = vmatmul.mubr.bf16.vlgmr.msra.gmra.mxu0 %v628_v33  ;;  %3424 = vmatprep.subr.bf16.mxu1 %v3711_v35  ;;  %v3759_v33 = vld [vmem:[%s4717_s1 + $0x5d8] sm:$0xff]  }
  0x84   :  { %3403 = vmatpush3.bf16.msra.mxu0 %v3712_v36  ;;  %2665 = vmatprep.mubr.bf16.mxu0 %v684_v7  ;;  %v3761_v35 = vld [vmem:[%s4717_s1 + $0x598] sm:$0xff]   ;;  %v3762_v36 = vld [vmem:[%s4717_s1 + $0x550] sm:$0xff]  }
  0x85   :  { %2626 = vmatmul.mubr.bf16.vlgmr.msra.gmra.mxu1 %v644_v38  ;;  %3404 = vmatprep.subr.bf16.mxu0 %v3714_v39  ;;  %v3764_v38 = vld [vmem:[%s4717_s1 + $0x510] sm:$0xff]  }
  0x86   :  { %3425 = vmatpush3.bf16.msra.mxu1 %v3713_v37  ;;  %2705 = vmatprep.mubr.bf16.mxu1 %v694_v11  ;;  %v3763_v37 = vld [vmem:[%s4717_s1 + $0x5d0] sm:$0xff]   ;;  %v3799_v11 = vld [vmem:[%s4717_s1 + $0x648] sm:$0xff]  }
  0x87   :  { %3426 = vmatprep.subr.bf16.mxu1 %v3715_v40  ;;  %v3765_v39 = vld [vmem:[%s4717_s1 + $0x590] sm:$0xff]   ;;  %v3766_v40 = vld [vmem:[%s4717_s1 + $0x548] sm:$0xff]  }
  0x88   :  { %3405 = vmatpush3.bf16.msra.mxu0 %v3716_v42  ;;  %v3767_v42 = vld [vmem:[%s4717_s1 + $0x5c8] sm:$0xff]   ;;  %v3795_v7 = vld [vmem:[%s4717_s1 + $0x650] sm:$0xff]  }
  0x89   :  { %3406 = vmatprep.subr.bf16.mxu0 %v3718_v44  ;;  %v3769_v44 = vld [vmem:[%s4717_s1 + $0x588] sm:$0xff]  }
  0x8a   :  { %3427 = vmatpush3.bf16.msra.mxu1 %v3717_v43  ;;  %v3768_v43 = vld [vmem:[%s4717_s1 + $0x508] sm:$0xff]  }
  0x8b   :  { %3428 = vmatprep.subr.bf16.mxu1 %v3719_v45  ;;  %v3770_v45 = vld [vmem:[%s4717_s1 + $0x540] sm:$0xff]  }
  0x8c   :  { %3407 = vmatpush3.bf16.msra.mxu0 %v3720_v46  ;;  %v3771_v46 = vld [vmem:[%s4717_s1 + $0x5c0] sm:$0xff]  }
  0x8d   :  { %3408 = vmatprep.subr.bf16.mxu0 %v3722_v48  ;;  %v3773_v48 = vld [vmem:[%s4717_s1 + $0x580] sm:$0xff]  }
  0x8e   :  { %3429 = vmatpush3.bf16.msra.mxu1 %v3721_v47  ;;  %v3772_v47 = vld [vmem:[%s4717_s1 + $0x500] sm:$0xff]  }
  0x8f   :  { %3430 = vmatprep.subr.bf16.mxu1 %v3723_v49  ;;  %v677_v49 = vrot.slane %v4387_v4, %v3989_v41  ;;  %v3792_v4 = vld [vmem:[%s4717_s1 + $0x6d8] sm:$0xff]  }
  0x90   :  { %3409 = vmatpush3.bf16.msra.mxu0 %v3724_v50  ;;  %v3775_v50 = vld [vmem:[%s4717_s1 + $0x678] sm:$0xff]  }
  0x91   :  { %3410 = vmatprep.subr.bf16.mxu0 %v3726_v52  ;;  %v3777_v52 = vld [vmem:[%s4717_s1 + $0x638] sm:$0xff]  }
  0x92   :  { %3431 = vmatpush3.bf16.msra.mxu1 %v3725_v51  ;;  %v3776_v51 = vld [vmem:[%s4717_s1 + $0x6f8] sm:$0xff]  }
  0x93   :  { %3432 = vmatprep.subr.bf16.mxu1 %v3727_v53  ;;  %v3778_v53 = vld [vmem:[%s4717_s1 + $0x6b8] sm:$0xff]  }
  0x94   :  { %3411 = vmatpush3.bf16.msra.mxu0 %v3728_v54  ;;  %v693_v54 = vcombine.high %v677_v49, %v677_v49 }
  0x95   :  { %3412 = vmatprep.subr.bf16.mxu0 %v3730_v56  ;;  %v3780_v56 = vld [vmem:[%s4717_s1 + $0x6f0] sm:$0xff]  }
  0x96   :  { %3433 = vmatpush3.bf16.msra.mxu1 %v3729_v55  ;;  %v3779_v55 = vld [vmem:[%s4717_s1 + $0x670] sm:$0xff]  }
  0x97   :  { %3434 = vmatprep.subr.bf16.mxu1 %v3731_v57  ;;  %v3781_v57 = vld [vmem:[%s4717_s1 + $0x630] sm:$0xff]  }
  0x98   :  { %3413 = vmatpush3.bf16.msra.mxu0 %v3732_v58  ;;  %v3782_v58 = vld [vmem:[%s4717_s1 + $0x6b0] sm:$0xff]  }
  0x99   :  { %3414 = vmatprep.subr.bf16.mxu0 %v3734_v60  ;;  %v3784_v60 = vld [vmem:[%s4717_s1 + $0x6e8] sm:$0xff]  }
  0x9a   :  { %3435 = vmatpush3.bf16.msra.mxu1 %v3733_v59  ;;  %v3783_v59 = vld [vmem:[%s4717_s1 + $0x668] sm:$0xff]  }
  0x9b   :  { %3436 = vmatprep.subr.bf16.mxu1 %v3735_v62  ;;  %v3786_v62 = vld [vmem:[%s4717_s1 + $0x6a8] sm:$0xff]  }
  0x9c   :  { %3415 = vmatpush3.bf16.msra.mxu0 %v3736_v1  ;;  %v3789_v1 = vld [vmem:[%s4717_s1 + $0x620] sm:$0xff]  }
  0x9d   :  { %3416 = vmatprep.subr.bf16.mxu0 %v3738_v5  ;;  %v3793_v5 = vld [vmem:[%s4717_s1 + $0x618] sm:$0xff]  }
  0x9e   :  { %3437 = vmatpush3.bf16.msra.mxu1 %v3737_v2  ;;  %v3790_v2 = vld [vmem:[%s4717_s1 + $0x6a0] sm:$0xff]  }
  0x9f   :  { %3438 = vmatprep.subr.bf16.mxu1 %v3739_v6  ;;  %v3794_v6 = vld [vmem:[%s4717_s1 + $0x698] sm:$0xff]  }
  0xa0   :  { %3417 = vmatpush3.bf16.msra.mxu0 %v3740_v9  ;;  %v3797_v9 = vld [vmem:[%s4717_s1 + $0x610] sm:$0xff]  }
  0xa1   :  { %3446 = vmatprep.subr.bf16.mxu0 %v3742_v13  ;;  %v3800_v13 = vld [vmem:[%s4717_s1 + $0x6c8] sm:$0xff]  }
  0xa2   :  { %3439 = vmatpush3.bf16.msra.mxu1 %v3741_v10  ;;  %v3798_v10 = vld [vmem:[%s4717_s1 + $0x690] sm:$0xff]  }
  0xa3   :  { %2666 = vmatmul.mubr.bf16.vlgmr.msra.gmra.mxu0 %v670_v12  ;;  %3468 = vmatprep.subr.bf16.mxu1 %v3743_v14  ;;  %v32_v12 = vld [vmem:[%s4716_s0 + $0x18] sm:$0xff] }
  0xa4   :  { %3447 = vmatpush3.bf16.msra.mxu0 %v3744_v16  ;;  %2745 = vmatprep.mubr.bf16.mxu0 %v691_v15  ;;  %v703_v14 = vrot.slane %v32_v12, %v3989_v41  ;;  %v696_v15 = vcombine.high %v32_v12, %v32_v12  ;;  %v3801_v16 = vld [vmem:[%s4717_s1 + $0x608] sm:$0xff]  }
  0xa5   :  { %2706 = vmatmul.mubr.bf16.vlgmr.msra.gmra.mxu1 %v692_v18  ;;  %3448 = vmatprep.subr.bf16.mxu0 %v3746_v19 }
  0xa6   :  { %3469 = vmatpush3.bf16.msra.mxu1 %v3745_v17  ;;  %2785 = vmatprep.mubr.bf16.mxu1 %v695_v21  ;;  %v3803_v17 = vld [vmem:[%s4717_s1 + $0x640] sm:$0xff]   ;;  %v711_v18 = vcombine.high %v703_v14, %v703_v14  ;;  %v4593_v19 = vrot.slane %v696_v15, %v3989_v41 }
  0xa7   :  { %3470 = vmatprep.subr.bf16.mxu1 %v3747_v20  ;;  %v3802_v20 = vld [vmem:[%s4717_s1 + $0x688] sm:$0xff]   ;;  %v3804_v21 = vld [vmem:[%s4717_s1 + $0x6c0] sm:$0xff]  }
  0xa8   :  { %3449 = vmatpush3.bf16.msra.mxu0 %v3748_v22  ;;  %v733_v22 = vrot.slane %v711_v18, %v3989_v41 }
  0xa9   :  { %3450 = vmatprep.subr.bf16.mxu0 %v3750_v24  ;;  %v3805_v24 = vld [vmem:[%s4717_s1 + $0x600] sm:$0xff]  }
  0xaa   :  { %3471 = vmatpush3.bf16.msra.mxu1 %v3749_v23  ;;  %v712_v23 = vcombine.high %v4593_v19, %v4593_v19 }
  0xab   :  { %3472 = vmatprep.subr.bf16.mxu1 %v3751_v25  ;;  %v743_v25 = vcombine.high %v733_v22, %v733_v22 }
  0xac   :  { %3451 = vmatpush3.bf16.msra.mxu0 %v3752_v26  ;;  %v719_v26 = vrot.slane %v703_v14, %v3989_v41 }
  0xad   :  { %3452 = vmatprep.subr.bf16.mxu0 %v3754_v28  ;;  %v3806_v28 = vld [vmem:[%s4717_s1 + $0x680] sm:$0xff]  }
  0xae   :  { %3473 = vmatpush3.bf16.msra.mxu1 %v3753_v27  ;;  %v3807_v27 = vld [vmem:[%s4717_s1 + $0x778] sm:$0xff]  }
  0xaf   :  { %3474 = vmatprep.subr.bf16.mxu1 %v3755_v29  ;;  %v740_v29 = vrot.slane %v712_v23, %v3989_v41 }
  0xb0   :  { %3453 = vmatpush3.bf16.msra.mxu0 %v3756_v30  ;;  %v3808_v30 = vld [vmem:[%s4717_s1 + $0x7f8] sm:$0xff]  }
  0xb1   :  { %3454 = vmatprep.subr.bf16.mxu0 %v3758_v32  ;;  %v741_v32 = vcombine.high %v719_v26, %v719_v26 }
  0xb2   :  { %3475 = vmatpush3.bf16.msra.mxu1 %v3757_v31  ;;  %v3809_v31 = vld [vmem:[%s4717_s1 + $0x738] sm:$0xff]  }
  0xb3   :  { %3476 = vmatprep.subr.bf16.mxu1 %v3759_v33  ;;  %v3811_v33 = vld [vmem:[%s4717_s1 + $0x770] sm:$0xff]  }
  0xb4   :  { %3455 = vmatpush3.bf16.msra.mxu0 %v3760_v34  ;;  %v3810_v34 = vld [vmem:[%s4717_s1 + $0x7b8] sm:$0xff]  }
  0xb5   :  { %3456 = vmatprep.subr.bf16.mxu0 %v3762_v36 }
  0xb6   :  { %3477 = vmatpush3.bf16.msra.mxu1 %v3761_v35  ;;  %v744_v35 = vcombine.high %v740_v29, %v740_v29 }
  0xb7   :  { %3478 = vmatprep.subr.bf16.mxu1 %v3763_v37  ;;  %v3812_v37 = vld [vmem:[%s4717_s1 + $0x7f0] sm:$0xff]  }
  0xb8   :  { %3457 = vmatpush3.bf16.msra.mxu0 %v3764_v38  ;;  %v3813_v38 = vld [vmem:[%s4717_s1 + $0x730] sm:$0xff]  }
  0xb9   :  { %3458 = vmatprep.subr.bf16.mxu0 %v3766_v40 }
  0xba   :  { %3479 = vmatpush3.bf16.msra.mxu1 %v3765_v39 }
  0xbb   :  { %3480 = vmatprep.subr.bf16.mxu1 %v3767_v42  ;;  %v3815_v42 = vld [vmem:[%s4717_s1 + $0x768] sm:$0xff]  }
  0xbc   :  { %3459 = vmatpush3.bf16.msra.mxu0 %v3768_v43 }
  0xbd   :  { %3460 = vmatprep.subr.bf16.mxu0 %v3770_v45 }
  0xbe   :  { %3481 = vmatpush3.bf16.msra.mxu1 %v3769_v44  ;;  %v3814_v44 = vld [vmem:[%s4717_s1 + $0x7b0] sm:$0xff]  }
  0xbf   :  { %3482 = vmatprep.subr.bf16.mxu1 %v3771_v46 }
  0xc0   :  { %3461 = vmatpush3.bf16.msra.mxu0 %v3772_v47  ;;  %v3816_v47 = vld [vmem:[%s4717_s1 + $0x7e8] sm:$0xff]  }
  0xc1   :  { %3490 = vmatprep.subr.bf16.mxu0 %v3775_v50 }
  0xc2   :  { %3483 = vmatpush3.bf16.msra.mxu1 %v3773_v48 }
  0xc3   :  { %2746 = vmatmul.mubr.bf16.vlgmr.msra.gmra.mxu0 %v677_v49  ;;  %3512 = vmatprep.subr.bf16.mxu1 %v3776_v51  ;;  %v3817_v49 = vld [vmem:[%s4717_s1 + $0x728] sm:$0xff]  }
  0xc4   :  { %3491 = vmatpush3.bf16.msra.mxu0 %v3777_v52  ;;  %2825 = vmatprep.mubr.bf16.mxu0 %v733_v22  ;;  %v3819_v52 = vld [vmem:[%s4717_s1 + $0x760] sm:$0xff]  }
  0xc5   :  { %2786 = vmatmul.mubr.bf16.vlgmr.msra.gmra.mxu1 %v693_v54  ;;  %3492 = vmatprep.subr.bf16.mxu0 %v3779_v55  ;;  %v3818_v54 = vld [vmem:[%s4717_s1 + $0x7a8] sm:$0xff]  }
  0xc6   :  { %3513 = vmatpush3.bf16.msra.mxu1 %v3778_v53  ;;  %2865 = vmatprep.mubr.bf16.mxu1 %v743_v25 }
  0xc7   :  { %3514 = vmatprep.subr.bf16.mxu1 %v3780_v56  ;;  %v3820_v56 = vld [vmem:[%s4717_s1 + $0x7e0] sm:$0xff]  }
  0xc8   :  { %3493 = vmatpush3.bf16.msra.mxu0 %v3781_v57  ;;  %v3821_v57 = vld [vmem:[%s4717_s1 + $0x720] sm:$0xff]  }
  0xc9   :  { %3494 = vmatprep.subr.bf16.mxu0 %v3783_v59  ;;  %v3822_v59 = vld [vmem:[%s4717_s1 + $0x7a0] sm:$0xff]  }
  0xca   :  { %3515 = vmatpush3.bf16.msra.mxu1 %v3782_v58  ;;  %v3823_v58 = vld [vmem:[%s4717_s1 + $0x758] sm:$0xff]  }
  0xcb   :  { %3516 = vmatprep.subr.bf16.mxu1 %v3784_v60  ;;  %v3824_v60 = vld [vmem:[%s4717_s1 + $0x7d8] sm:$0xff]  }
  0xcc   :  { %3495 = vmatpush3.bf16.msra.mxu0 %v3785_v61  ;;  %v3825_v61 = vld [vmem:[%s4717_s1 + $0x718] sm:$0xff]  }
  0xcd   :  { %3496 = vmatprep.subr.bf16.mxu0 %v3787_v63  ;;  %v3826_v63 = vld [vmem:[%s4717_s1 + $0x798] sm:$0xff]  }
  0xce   :  { %3517 = vmatpush3.bf16.msra.mxu1 %v3786_v62  ;;  %v3827_v62 = vld [vmem:[%s4717_s1 + $0x750] sm:$0xff]  }
  0xcf   :  { %3518 = vmatprep.subr.bf16.mxu1 %v3788_v0  ;;  %v3828_v0 = vld [vmem:[%s4717_s1 + $0x7d0] sm:$0xff]  }
  0xd0   :  { %3497 = vmatpush3.bf16.msra.mxu0 %v3789_v1  ;;  %v3829_v1 = vld [vmem:[%s4717_s1 + $0x710] sm:$0xff]  }
  0xd1   :  { %3498 = vmatprep.subr.bf16.mxu0 %v3791_v3  ;;  %v3830_v3 = vld [vmem:[%s4717_s1 + $0x790] sm:$0xff]  }
  0xd2   :  { %3519 = vmatpush3.bf16.msra.mxu1 %v3790_v2  ;;  %v3831_v2 = vld [vmem:[%s4717_s1 + $0x748] sm:$0xff]  }
  0xd3   :  { %3520 = vmatprep.subr.bf16.mxu1 %v3792_v4 }
  0xd4   :  { %3499 = vmatpush3.bf16.msra.mxu0 %v3793_v5 }
  0xd5   :  { %3500 = vmatprep.subr.bf16.mxu0 %v3795_v7 }
  0xd6   :  { %3521 = vmatpush3.bf16.msra.mxu1 %v3794_v6 }
  0xd7   :  { %3522 = vmatprep.subr.bf16.mxu1 %v3796_v8 }
  0xd8   :  { %3501 = vmatpush3.bf16.msra.mxu0 %v3797_v9 }
  0xd9   :  { %3502 = vmatprep.subr.bf16.mxu0 %v3799_v11 }
  0xda   :  { %3523 = vmatpush3.bf16.msra.mxu1 %v3798_v10 }
  0xdb   :  { %3524 = vmatprep.subr.bf16.mxu1 %v3800_v13 }
  0xdc   :  { %3503 = vmatpush3.bf16.msra.mxu0 %v3801_v16 }
  0xdd   :  { %3504 = vmatprep.subr.bf16.mxu0 %v3803_v17 }
  0xde   :  { %3525 = vmatpush3.bf16.msra.mxu1 %v3802_v20 }
  0xdf   :  { %3526 = vmatprep.subr.bf16.mxu1 %v3804_v21 }
  0xe0   :  { %3505 = vmatpush3.bf16.msra.mxu0 %v3805_v24 }
  0xe1   :  { %3534 = vmatprep.subr.bf16.mxu0 %v3807_v27 }
  0xe2   :  { %3527 = vmatpush3.bf16.msra.mxu1 %v3806_v28 }
  0xe3   :  { %v3242_v36 = vpop.f32.mrf.mxu0  ;;  %2826 = vmatmul.mubr.bf16.vlgmr.msra.gmra.mxu0 %v719_v26  ;;  %3556 = vmatprep.subr.bf16.mxu1 %v3808_v30 }
  0xe4   :  { %3535 = vmatpush3.bf16.msra.mxu0 %v3809_v31  ;;  %2905 = vmatprep.mubr.bf16.mxu0 %v740_v29  ;;  %v3264_v39 = vpop.f32.mrf.mxu1 }
  0xe5   :  { %2866 = vmatmul.mubr.bf16.vlgmr.msra.gmra.mxu1 %v741_v32  ;;  %v3243_v40 = vpop.f32.mrf.mxu0  ;;  %3536 = vmatprep.subr.bf16.mxu0 %v3811_v33 }
  0xe6   :  { %3557 = vmatpush3.bf16.msra.mxu1 %v3810_v34  ;;  %v3244_v43 = vadd.f32 %v3243_v40, %v3242_v36  ;;  %2945 = vmatprep.mubr.bf16.mxu1 %v744_v35  ;;  %v3265_v45 = vpop.f32.mrf.mxu1 }
  0xe7   :  { %v3245_v46 = vpop.f32.mrf.mxu0  ;;  %3558 = vmatprep.subr.bf16.mxu1 %v3812_v37  ;;  %v3266_v48 = vadd.f32 %v3265_v45, %v3264_v39 }
  0xe8   :  { %3537 = vmatpush3.bf16.msra.mxu0 %v3813_v38  ;;  %v3267_v50 = vpop.f32.mrf.mxu1 }
  0xe9   :  { %v3246_v51 = vpop.f32.mrf.mxu0  ;;  %3538 = vmatprep.subr.bf16.mxu0 %v3815_v42  ;;  %v2388_v53 = vadd.f32 %v3266_v48, %v3244_v43 }
  0xea   :  { %3559 = vmatpush3.bf16.msra.mxu1 %v3814_v44  ;;  %v3268_v55 = vpop.f32.mrf.mxu1 }
  0xeb   :  { %3560 = vmatprep.subr.bf16.mxu1 %v3816_v47 }
  0xec   :  { %3539 = vmatpush3.bf16.msra.mxu0 %v3817_v49 }
  0xed   :  { %3540 = vmatprep.subr.bf16.mxu0 %v3819_v52 }
  0xee   :  { %3561 = vmatpush3.bf16.msra.mxu1 %v3818_v54 }
  0xef   :  { %3562 = vmatprep.subr.bf16.mxu1 %v3820_v56 }
  0xf0   :  { %3541 = vmatpush3.bf16.msra.mxu0 %v3821_v57 }
  0xf1   :  { %3542 = vmatprep.subr.bf16.mxu0 %v3823_v58 }
  0xf2   :  { %3563 = vmatpush3.bf16.msra.mxu1 %v3822_v59 }
  0xf3   :  { %3564 = vmatprep.subr.bf16.mxu1 %v3824_v60 }
  0xf4   :  { %3543 = vmatpush3.bf16.msra.mxu0 %v3825_v61 }
  0xf5   :  { %3544 = vmatprep.subr.bf16.mxu0 %v3827_v62 }
  0xf6   :  { %3565 = vmatpush3.bf16.msra.mxu1 %v3826_v63 }
  0xf7   :  { %8 = vsyncpa [#allocation3], 0  ;;  %3566 = vmatprep.subr.bf16.mxu1 %v3828_v0  ;;  %v3832_v4 = vld [vmem:[%s4717_s1 + $0x7c8] sm:$0xff]   ;;  %v3835_v6 = vld [vmem:[%s4717_s1 + $0x740] sm:$0xff]   ;;  %v726_v10 = vrot.slane %v4593_v19, %v3989_v41 }
  0xf8   :  { %3545 = vmatpush3.bf16.msra.mxu0 %v3829_v1  ;;  %v3833_v5 = vld [vmem:[%s4717_s1 + $0x708] sm:$0xff]   ;;  %v3836_v8 = vld [vmem:[%s4717_s1 + $0x7c0] sm:$0xff]  }
  0xf9   :  { %3546 = vmatprep.subr.bf16.mxu0 %v3831_v2  ;;  %v3834_v7 = vld [vmem:[%s4717_s1 + $0x788] sm:$0xff]   ;;  %v3837_v9 = vld [vmem:[%s4717_s1 + $0x700] sm:$0xff]   ;;  %v742_v12 = vcombine.high %v726_v10, %v726_v10 }
  0xfa   :  { %3567 = vmatpush3.bf16.msra.mxu1 %v3830_v3  ;;  %v3838_v11 = vld [vmem:[%s4717_s1 + $0x780] sm:$0xff]  }
  0xfb   :  { %3568 = vmatprep.subr.bf16.mxu1 %v3832_v4  ;;  %v2969_v39 = vld [vmem:[%s4718_s2] ss:$0 sm:$0xff]  ;;  %s3863_s2 = smov [#allocation2]  }
  0xfc   :  { %3547 = vmatpush3.bf16.msra.mxu0 %v3833_v5  ;;  %27 = vst [vmem:[#allocation2] sm:$0x3] %v2969_v39  ;;  %s2961_s17 = sshll.u32 %s3863_s2, 4  ;;  %s2962_s17 = int_to_ptr.vmem [resolvable:$true] %s2961_s17 }
  0xfd   :  { %3548 = vmatprep.subr.bf16.mxu0 %v3835_v6  ;;  %s3840_s18 = scalar_lea.vmem %s2962_s17, 32  ;;  %p3845_p1 = scmp.lt.s32.totalorder %s2962_s17, %s2962_s17 }
  0xfe   :  { %3569 = vmatpush3.bf16.msra.mxu1 %v3834_v7  ;;  %p3841_p0 = scmp.ne.s32.totalorder %s2962_s17, %s3840_s18  ;;  %p3846_p2 = scmp.lt.s32.totalorder %s3840_s18, %s3840_s18 }
  0xff   :  { %3570 = vmatprep.subr.bf16.mxu1 %v3836_v8 }
 0x100   :  { %3549 = vmatpush3.bf16.msra.mxu0 %v3837_v9  ;;  %p3847_p3 = por %p3846_p2, %p3845_p1 }
 0x102   :  { %3571 = vmatpush3.bf16.msra.mxu1 %v3838_v11  ;;  %p3848_p4 = pnand %p3847_p3, %p3841_p0 }
 0x103   :  { %v3286_v13 = vpop.f32.mrf.mxu0  ;;  %2906 = vmatmul.mubr.bf16.vlgmr.msra.gmra.mxu0 %v726_v10 }
 0x104   :  { %v3308_v14 = vpop.f32.mrf.mxu1 }
 0x105   :  { %2946 = vmatmul.mubr.bf16.vlgmr.msra.gmra.mxu1 %v742_v12  ;;  %v3287_v15 = vpop.f32.mrf.mxu0 }
 0x106   :  { %v3288_v16 = vadd.f32 %v3287_v15, %v3286_v13  ;;  %v3309_v17 = vpop.f32.mrf.mxu1 }
 0x107   :  { %v3289_v18 = vpop.f32.mrf.mxu0  ;;  %v3310_v21 = vadd.f32 %v3309_v17, %v3308_v14 }
 0x108   :  { %v2428_v20 = vadd.f32 %v3288_v16, %v2388_v53  ;;  %v3311_v41 = vpop.f32.mrf.mxu1 }
 0x109   :  { %v3290_v19 = vpop.f32.mrf.mxu0 }
 0x10a   :  { %v2468_v22 = vadd.f32 %v3310_v21, %v2428_v20  ;;  %v3312_v23 = vpop.f32.mrf.mxu1 }
 0x123   :  { %v3330_v24 = vpop.f32.mrf.mxu0 }
 0x125   :  { %v3352_v25 = vpop.f32.mrf.mxu1  ;;  %v3331_v26 = vpop.f32.mrf.mxu0 }
 0x126   :  { %v3332_v27 = vadd.f32 %v3331_v26, %v3330_v24 }
 0x127   :  { %v3353_v28 = vpop.f32.mrf.mxu1  ;;  %v3333_v29 = vpop.f32.mrf.mxu0 }
 0x128   :  { %v2508_v30 = vadd.f32 %v3332_v27, %v2468_v22  ;;  %v3354_v31 = vadd.f32 %v3353_v28, %v3352_v25 }
 0x129   :  { %v3355_v32 = vpop.f32.mrf.mxu1  ;;  %v3334_v33 = vpop.f32.mrf.mxu0 }
 0x12a   :  { %v2548_v34 = vadd.f32 %v3354_v31, %v2508_v30  ;;  %v28_v31 = vld [vmem:[#allocation2] sm:$0x3] }
 0x12b   :  { %v3356_v35 = vpop.f32.mrf.mxu1 }
 0x143   :  { %v3374_v36 = vpop.f32.mrf.mxu0 }
 0x145   :  { %v3396_v37 = vpop.f32.mrf.mxu1  ;;  %v3375_v38 = vpop.f32.mrf.mxu0 }
 0x146   :  { %v3376_v40 = vadd.f32 %v3375_v38, %v3374_v36 }
 0x147   :  { %v3397_v42 = vpop.f32.mrf.mxu1  ;;  %v3377_v43 = vpop.f32.mrf.mxu0 }
 0x148   :  { %v2588_v44 = vadd.f32 %v3376_v40, %v2548_v34  ;;  %v3398_v45 = vadd.f32 %v3397_v42, %v3396_v37 }
 0x149   :  { %v3399_v46 = vpop.f32.mrf.mxu1  ;;  %v3378_v47 = vpop.f32.mrf.mxu0 }
 0x14a   :  { %v2628_v48 = vadd.f32 %v3398_v45, %v2588_v44 }
 0x14b   :  { %v3400_v49 = vpop.f32.mrf.mxu1 }
 0x163   :  { %v3418_v50 = vpop.f32.mrf.mxu0 }
 0x165   :  { %v3440_v51 = vpop.f32.mrf.mxu1  ;;  %v3419_v52 = vpop.f32.mrf.mxu0 }
 0x166   :  { %v3420_v53 = vadd.f32 %v3419_v52, %v3418_v50 }
 0x167   :  { %v3441_v54 = vpop.f32.mrf.mxu1  ;;  %v3421_v55 = vpop.f32.mrf.mxu0 }
 0x168   :  { %v2668_v56 = vadd.f32 %v3420_v53, %v2628_v48  ;;  %v3442_v57 = vadd.f32 %v3441_v54, %v3440_v51 }
 0x169   :  { %v3443_v58 = vpop.f32.mrf.mxu1  ;;  %v3422_v59 = vpop.f32.mrf.mxu0 }
 0x16a   :  { %v2708_v60 = vadd.f32 %v3442_v57, %v2668_v56 }
 0x16b   :  { %v3444_v61 = vpop.f32.mrf.mxu1 }
 0x183   :  { %v3462_v62 = vpop.f32.mrf.mxu0 }
 0x185   :  { %v3484_v63 = vpop.f32.mrf.mxu1  ;;  %v3463_v0 = vpop.f32.mrf.mxu0 }
 0x186   :  { %v3464_v14 = vadd.f32 %v3463_v0, %v3462_v62 }
 0x187   :  { %v3485_v1 = vpop.f32.mrf.mxu1  ;;  %v3465_v2 = vpop.f32.mrf.mxu0 }
 0x188   :  { %v2748_v15 = vadd.f32 %v3464_v14, %v2708_v60  ;;  %v3486_v16 = vadd.f32 %v3485_v1, %v3484_v63 }
 0x189   :  { %v3487_v3 = vpop.f32.mrf.mxu1  ;;  %v3466_v4 = vpop.f32.mrf.mxu0 }
 0x18a   :  { %v2788_v18 = vadd.f32 %v3486_v16, %v2748_v15 }
 0x18b   :  { %v3488_v5 = vpop.f32.mrf.mxu1 }
 0x1a3   :  { %v3506_v6 = vpop.f32.mrf.mxu0 }
 0x1a5   :  { %v3528_v7 = vpop.f32.mrf.mxu1  ;;  %v3507_v8 = vpop.f32.mrf.mxu0 }
 0x1a6   :  { %v3508_v17 = vadd.f32 %v3507_v8, %v3506_v6 }
 0x1a7   :  { %v3529_v9 = vpop.f32.mrf.mxu1  ;;  %v3509_v10 = vpop.f32.mrf.mxu0 }
 0x1a8   :  { %v2828_v20 = vadd.f32 %v3508_v17, %v2788_v18  ;;  %v3530_v21 = vadd.f32 %v3529_v9, %v3528_v7 }
 0x1a9   :  { %v3531_v11 = vpop.f32.mrf.mxu1  ;;  %v3510_v12 = vpop.f32.mrf.mxu0 }
 0x1aa   :  { %v2868_v23 = vadd.f32 %v3530_v21, %v2828_v20 }
 0x1ab   :  { %v3532_v13 = vpop.f32.mrf.mxu1 }
 0x1c3   :  { %v3550_v41 = vpop.f32.mrf.mxu0 }
 0x1c5   :  { %v3572_v19 = vpop.f32.mrf.mxu1  ;;  %v3551_v22 = vpop.f32.mrf.mxu0 }
 0x1c6   :  { %v3552_v24 = vadd.f32 %v3551_v22, %v3550_v41 }
 0x1c7   :  { %v3573_v25 = vpop.f32.mrf.mxu1  ;;  %v3553_v26 = vpop.f32.mrf.mxu0 }
 0x1c8   :  { %v2908_v27 = vadd.f32 %v3552_v24, %v2868_v23  ;;  %v3574_v28 = vadd.f32 %v3573_v25, %v3572_v19 }
 0x1c9   :  { %v3575_v29 = vpop.f32.mrf.mxu1  ;;  %v3554_v30 = vpop.f32.mrf.mxu0 }
 0x1ca   :  { %v2948_v32 = vadd.f32 %v3574_v28, %v2908_v27 }
 0x1cb   :  { %v3576_v33 = vpop.f32.mrf.mxu1 }
 0x1cc   :  { %v2953_v34 = vadd.f32 %v2948_v32, %v28_v31 }
 0x1ce   :  { %2954 = vst [vmem:[#allocation2] sm:$0x3] %v2953_v34 }
 0x1cf   :  { %3851 = shalt.err (!%p3848_p4)
}
 0x1d0   :  { %2964 = dma.vmem_to_hbm [thread:$0]  %s2962_s17, 32, %s4719_s3, [#allocation3]  }
 0x1d1   :  { %3860 = dma.done.wait [#allocation3], 32  }
 0x1d2   :  { %3861 = vsyncadd [#allocation3], 4294967264 }
 0x1d3   :  { %2968 = vsyncpa [#allocation3], 1 }

// kernel: coatnet_forward.2
= control target key start
LH: loop header
LB: loop body
LE: loop exit
PB: predicated region body
PF: predicated region fallthrough
CT: control target
= control target key end

     0   :  { %15 = vsyncpa [#allocation3], 0  ;;  %s15338_s0 = inlined_call_operand.vmem [shape: bf16[2,16,32,1], index: 0, kind: input, shape index: {}]   ;;  %s15339_s1 = inlined_call_operand.vmem [shape: bf16[3,3,32], index: 1, kind: input, shape index: {}]   ;;  %s15340_s2 = inlined_call_operand.hbm [shape: f32[1,32], index: 2, kind: input, shape index: {}]   ;;  %s15341_s3 = inlined_call_operand.hbm [shape: f32[1,32], index: 3, kind: input, shape index: {}]   ;;  %s15342_s4 = inlined_call_operand.vmem [shape: bf16[3,96,64], index: 4, kind: input, shape index: {}]   ;;  %s15343_s5 = inlined_call_operand.hbm [shape: f32[1,64], index: 5, kind: input, shape index: {}]   ;;  %s15344_s6 = inlined_call_operand.hbm [shape: f32[1,64], index: 6, kind: input, shape index: {}]   ;;  %s15345_s7 = inlined_call_operand.vmem [shape: bf16[3,192,128], index: 7, kind: input, shape index: {}]   ;;  %s15346_s8 = inlined_call_operand.hbm [shape: f32[1,128], index: 8, kind: input, shape index: {}]   ;;  %s15347_s9 = inlined_call_operand.hbm [shape: f32[1,128], index: 9, kind: input, shape index: {}]   ;;  %s15348_s10 = inlined_call_operand.vmem [shape: bf16[2,4,8,128], index: 10, kind: output, shape index: {}]  }
   0x1   :  { %16 = vsyncpa [#allocation5], 0 }
   0x2   :  { %17 = vsyncpa [#allocation8], 0 }
   0x3   :  { %18 = vsyncpa [#allocation11], 0  ;;  %s10941_s13 = smov 0  }
   0x4 LB: > { %s10873_s14 = smov [#allocation4]   ;;  %s10947_s16 = sadd.s32 4294967295, %s10871_s13   ;;  %s10871_s13 = sphi %s10941_s13, %s24_s13  }
   0x5   : > { %s297_s15 = sshll.u32 %s10873_s14, 4  ;;  %p9142_p0 = scmp.ge.s32.totalorder %s10871_s13, 1  ;;  %s298_s15 = int_to_ptr.vmem [resolvable:$true] %s297_s15 }
   0x6   : > { %p270_p1 = scmp.lt.s32.totalorder %s10871_s13, 3  ;;  %p15349_p2 = scmp.eq.s32.totalorder %s10947_s16, 0 }
   0x7   : > { %s10874_s18 = smov [#allocation7]   ;;  %s10875_s20 = smov [#allocation2]  }
   0x8   : > { %p10952_p3 = pnand %p9142_p0, %p270_p1  ;;  %s322_s19 = sshll.u32 %s10874_s18, 4  ;;  %s10958_s19 = int_to_ptr.vmem [resolvable:$true] %s322_s19 }
   0x9   : > { %s286_s21 = sshll.u32 %s10875_s20, 4  ;;  %s10876_s23 = smov [#allocation6]   ;;  %s10966_s21 = int_to_ptr.vmem [resolvable:$true] %s286_s21 }
   0xa   : > { %p10538_p4 = pneg %p10952_p3  ;;  %s311_s24 = sshll.u32 %s10876_s23, 4  ;;  %s10968_s24 = int_to_ptr.vmem [resolvable:$true] %s311_s24 }
   0xb   : > { %s10704_s26 = scalar_lea.vmem %s298_s15, 16  ;;  %s10711_s27 = scalar_lea.vmem %s298_s15, 32 }
   0xc   : > { %p10962_p5 = pnand %p15349_p2, %p10538_p4  ;;  %p10705_p7 = scmp.ne.s32.totalorder %s298_s15, %s10704_s26 }
   0xd   : > { %p10712_p10 = scmp.lt.s32.totalorder %s298_s15, %s298_s15  ;;  %p10713_p11 = scmp.lt.s32.totalorder %s10711_s27, %s10704_s26 }
   0xe   : > { %p10972_p6 = pneg %p10962_p5 }
   0xf   : > { %p10714_p12 = por %p10713_p11, %p10712_p10 }
  0x10   : > { %p10707_p8 = pnand %p10705_p7, %p10972_p6 }
  0x12   : > { %p10708_p9 = pneg %p10707_p8 }
  0x14   : > { %p10715_p13 = pnand %p10714_p12, %p10708_p9 }
  0x16   : > { %10718 = shalt.err (!%p10715_p13)
}
  0x17   : > { %10544 = dma.hbm_to_vmem [thread:$0]  (!%p10962_p5), %s15341_s3, 16, %s298_s15, [#allocation5]  }
  0x18   : > { %s10730_s30 = scalar_lea.vmem %s10958_s19, 16  ;;  %s10737_s11 = scalar_lea.vmem %s10958_s19, 32 }
  0x19   : > { %p10731_p0 = scmp.ne.s32.totalorder %s10958_s19, %s10730_s30  ;;  %p10738_p7 = scmp.lt.s32.totalorder %s10958_s19, %s10958_s19 }
  0x1a   : > { %p10739_p8 = scmp.lt.s32.totalorder %s10737_s11, %s10730_s30 }
  0x1b   : > { %p10733_p1 = pnand %p10731_p0, %p10972_p6 }
  0x1c   : > { %p10740_p9 = por %p10739_p8, %p10738_p7 }
  0x1d   : > { %p10734_p4 = pneg %p10733_p1 }
  0x1f   : > { %p10741_p10 = pnand %p10740_p9, %p10734_p4 }
  0x21   : > { %10744 = shalt.err (!%p10741_p10)
}
  0x22   : > { %10550 = dma.hbm_to_vmem [thread:$0]  (!%p10962_p5), %s15344_s6, 16, %s10958_s19, [#allocation8]  }
  0x23   : > { %s10756_s15 = scalar_lea.vmem %s10966_s21, 16  ;;  %s10763_s18 = scalar_lea.vmem %s10966_s21, 32 }
  0x24   : > { %p10757_p11 = scmp.ne.s32.totalorder %s10966_s21, %s10756_s15  ;;  %p10764_p0 = scmp.lt.s32.totalorder %s10966_s21, %s10966_s21 }
  0x25   : > { %p10765_p1 = scmp.lt.s32.totalorder %s10763_s18, %s10756_s15 }
  0x26   : > { %p10759_p12 = pnand %p10757_p11, %p10972_p6 }
  0x27   : > { %p10766_p4 = por %p10765_p1, %p10764_p0 }
  0x28   : > { %p10760_p13 = pneg %p10759_p12 }
  0x2a   : > { %p10767_p7 = pnand %p10766_p4, %p10760_p13 }
  0x2c   : > { %10770 = shalt.err (!%p10767_p7)
}
  0x2d   : > { %10541 = dma.hbm_to_vmem [thread:$0]  (!%p10962_p5), %s15340_s2, 16, %s10966_s21, [#allocation3]  }
  0x2e   : > { %s10782_s19 = scalar_lea.vmem %s10968_s24, 16  ;;  %s10789_s26 = scalar_lea.vmem %s10968_s24, 32 }
  0x2f   : > { %p10783_p8 = scmp.ne.s32.totalorder %s10968_s24, %s10782_s19  ;;  %p10790_p11 = scmp.lt.s32.totalorder %s10968_s24, %s10968_s24 }
  0x30   : > { %p10791_p12 = scmp.lt.s32.totalorder %s10789_s26, %s10782_s19 }
  0x31   : > { %p10785_p9 = pnand %p10783_p8, %p10972_p6 }
  0x32   : > { %p10792_p13 = por %p10791_p12, %p10790_p11 }
  0x33   : > { %p10786_p10 = pneg %p10785_p9 }
  0x35   : > { %p10793_p0 = pnand %p10792_p13, %p10786_p10 }
  0x37   : > { %10796 = shalt.err (!%p10793_p0)
}
  0x38   : > { %10547 = dma.hbm_to_vmem [thread:$0]  (!%p10962_p5), %s15343_s5, 16, %s10968_s24, [#allocation5]  }
  0x39   : > { %s10877_s21 = smov [#allocation9]   ;;  %s10878_s30 = smov [#allocation10]  }
  0x3a   : > { %s336_s29 = sshll.u32 %s10877_s21, 4  ;;  %s347_s11 = sshll.u32 %s10878_s30, 4  ;;  %s337_s29 = int_to_ptr.vmem [resolvable:$true] %s336_s29  ;;  %s348_s11 = int_to_ptr.vmem [resolvable:$true] %s347_s11 }
  0x3b   : > { %s10808_s12 = scalar_lea.vmem %s337_s29, 16  ;;  %s10815_s14 = scalar_lea.vmem %s337_s29, 32 }
  0x3c   : > { %p10809_p1 = scmp.ne.s32.totalorder %s337_s29, %s10808_s12  ;;  %p10816_p8 = scmp.lt.s32.totalorder %s337_s29, %s337_s29 }
  0x3d   : > { %p10817_p9 = scmp.lt.s32.totalorder %s10815_s14, %s10808_s12 }
  0x3e   : > { %p10811_p4 = pnand %p10809_p1, %p10972_p6 }
  0x3f   : > { %p10818_p10 = por %p10817_p9, %p10816_p8 }
  0x40   : > { %p10812_p7 = pneg %p10811_p4 }
  0x42   : > { %p10819_p11 = pnand %p10818_p10, %p10812_p7 }
  0x44   : > { %10822 = shalt.err (!%p10819_p11)
}
  0x45   : > { %10553 = dma.hbm_to_vmem [thread:$0]  (!%p10962_p5), %s15346_s8, 16, %s337_s29, [#allocation8]  }
  0x46   : > { %s10834_s18 = scalar_lea.vmem %s348_s11, 16  ;;  %s10841_s20 = scalar_lea.vmem %s348_s11, 32 }
  0x47   : > { %p10835_p12 = scmp.ne.s32.totalorder %s348_s11, %s10834_s18  ;;  %p10842_p1 = scmp.lt.s32.totalorder %s348_s11, %s348_s11 }
  0x48   : > { %p10843_p4 = scmp.lt.s32.totalorder %s10841_s20, %s10834_s18 }
  0x49   : > { %p10837_p13 = pnand %p10835_p12, %p10972_p6 }
  0x4a   : > { %p10844_p2 = por %p10843_p4, %p10842_p1 }
  0x4b   : > { %p10838_p0 = pneg %p10837_p13 }
  0x4d   : > { %p10845_p8 = pnand %p10844_p2, %p10838_p0 }
  0x4f   : > { %10848 = shalt.err (!%p10845_p8)
}
  0x50   : > { %10556 = dma.hbm_to_vmem [thread:$0]  (!%p10962_p5), %s15347_s9, 16, %s348_s11, [#allocation11]  }
  0x51   : > { %368 = sbr.rel (%p10952_p3) target bundleno = 1940 (0x794), region = 60 }
  0x56   : > { %p15394_p7 = scmp.eq.s32.totalorder %s10947_s16, 0 }
  0x58   : > { %10854 = dma.done.wait (%p15394_p7), [#allocation3], 16   ;;  %p15395_p6 = pmov %p15394_p7 }
  0x5a   : > { %10856 = vsyncadd (%p15395_p6), [#allocation3], 4294967280  ;;  %p15396_p9 = pmov %p15395_p6 }
  0x5b   : > { %p15397_p2 = pmov %p15395_p6 }
  0x5c   : > { %10858 = dma.done.wait (%p15396_p9), [#allocation5], 32  }
  0x5d   : > { %10860 = vsyncadd (%p15397_p2), [#allocation5], 4294967264  ;;  %p15398_p10 = pmov %p15397_p2 }
  0x5e   : > { %p15399_p5 = pmov %p15397_p2 }
  0x5f   : > { %10862 = dma.done.wait (%p15398_p10), [#allocation8], 32  }
  0x60   : > { %10864 = vsyncadd (%p15399_p5), [#allocation8], 4294967264  ;;  %p15400_p3 = pmov %p15397_p2 }
  0x61   : > { %p15401_p11 = pmov %p15397_p2 }
  0x62   : > { %10866 = dma.done.wait (%p15400_p3), [#allocation11], 16  }
  0x63   : > { %10868 = vsyncadd (%p15401_p11), [#allocation11], 4294967280  ;;  %vm663_vm0 = vsmask.f32 256  ;;  %vm946_vm1 = vcmask 1040384   ;;  %v15352_v0 = vmov 0  }
  0x64   : > { %v11055_v1 = vrot.slane %v15352_v0, 7  ;;  %vm11059_vm2 = vmand %vm946_vm1, %vm663_vm0  ;;  %v15403_v2 = vmov 0  ;;  %vm982_vm3 = vsmask.f32 7424  ;;  %vm1425_vm4 = vcmask 1046528   ;;  %p426_p12 = scmp.lt.s32.totalorder %s10947_s16, 1 }
  0x65   : > { %v15404_v2 = vsel %vm11059_vm2, 4294967295, %v15403_v2  ;;  %vm1788_vm5 = vcmask 1041408   ;;  %v10880_v14 = vmov 65535   ;;  %v1717_v23 = vld [vmem:[%s15339_s1] sm:$0x3]  ;;  %s10881_s21 = smov 2  }
  0x66   : > { %15402 = vst [vmem:[#allocation16_spill] sm:$0xff] %v11055_v1  ;;  %15405 = vst [vmem:[#allocation17_spill] sm:$0xff] %v15404_v2  ;;  %v11067_v3 = vsel %vm11059_vm2, %v11055_v1, 0  ;;  %v991_v4 = vshll.u32 %v11055_v1, 16  ;;  %v995_v5 = vshrl.u32 %v11055_v1, 16  ;;  %v11074_v6 = vsel %vm11059_vm2, 0, %v11055_v1 }
  0x67   : > { %15406 = vst [vmem:[#allocation18_spill] sm:$0xff] %v11067_v3  ;;  %15407 = vst [vmem:[#allocation19_spill] sm:$0xff] %v11074_v6  ;;  %v999_v7 = vshll.u32 %v11067_v3, 16  ;;  %v15350_v8 = vrot.slane %v11074_v6, 1  ;;  %v1427_v9 = vrot.slane %v11055_v1, 1  ;;  %v15351_v10 = vrot.slane %v11067_v3, 1 }
  0x68   : > { %s15685_s16 = smov (!%p426_p12, %s10947_s16), 1  ;;  %v993_v11 = vrot.slane %v991_v4, 1  ;;  %v984_v12 = vshrl.u32 %v11074_v6, 16  ;;  %v986_v13 = vshll.u32 %v11074_v6, 16  ;;  %v1789_v15 = vsel %vm946_vm1, 4294967295, %v10880_v14  ;;  %s10882_s29 = smov 1  }
  0x69   : > { %v11086_v16 = vrot.slane %v999_v7, 1  ;;  %v1428_v17 = vsel %vm1425_vm4, %v15350_v8, %v1427_v9  ;;  %v1430_v18 = vsel %vm1425_vm4, %v1427_v9, %v15351_v10  ;;  %s9767_s17 = sshll.u32 %s15685_s16, 8  ;;  %v11096_v19 = vsel %vm1788_vm5, %v1789_v15, 0  ;;  %s10883_s18 = smov 32  }
  0x6a   : > { %v997_v20 = vor.u32 %v995_v5, %v993_v11  ;;  %v11098_v21 = vpack.i.bf16 %v1430_v18, %v1428_v17  ;;  %v988_v22 = vrot.slane %v986_v13, 1  ;;  %s11103_s26 = scalar_lea.vmem %s15338_s0, %s9767_s17  ;;  %v1792_v24 = vand.u32 %v11096_v19, %v1717_v23  ;;  %s10884_s20 = smov 64  }
  0x6b   : > { %15408 = vst [vmem:[#allocation20_spill] sm:$0xff] %v11086_v16  ;;  %v10600_v27 = vld [vmem:[%s11103_s26] sm:$0xff]   ;;  %v10601_v28 = vld [vmem:[%s11103_s26 + $0x8] sm:$0xff]   ;;  %v10602_v33 = vld [vmem:[%s11103_s26 + $0x10] sm:$0xff]   ;;  %vm1579_vm6 = vcmask 7168   ;;  %vm1648_vm7 = vcmask 15360  }
  0x6c   : > { %15409 = vst [vmem:[#allocation21_spill] sm:$0xff] %v11098_v21  ;;  %v11111_v25 = vsel %vm982_vm3, %v997_v20, %v11086_v16  ;;  %10591 = vrot.lane.b32.xlu1 %v11098_v21, %s10881_s21  ;;  %v11115_v26 = vor.u32 %v988_v22, %v984_v12  ;;  %10038 = vmatprep.subr.bf16.mxu0 %v1792_v24  ;;  %v673_v30 = vshrl.u32 %v10600_v27, 16  ;;  %v680_v31 = vshrl.u32 %v10601_v28, 16  ;;  %v10603_v35 = vld [vmem:[%s11103_s26 + $0x18] sm:$0xff]   ;;  %v10604_v42 = vld [vmem:[%s11103_s26 + $0x20] sm:$0xff]   ;;  %v10605_v59 = vld [vmem:[%s11103_s26 + $0x28] sm:$0xff]  }
  0x6d   : > { %15410 = vst [vmem:[#allocation22_spill] sm:$0xff] %v11111_v25  ;;  %1325 = vrot.lane.b32.xlu0 %v11111_v25, %s10882_s29  ;;  %v683_v32 = vshll.u32 %v10601_v28, 16  ;;  %10039 = vmatpush3.bf16.msra.mxu0 %v1792_v24  ;;  %v676_v34 = vshll.u32 %v10600_v27, 16  ;;  %v688_v38 = vshrl.u32 %v10602_v33, 16  ;;  %v691_v39 = vshll.u32 %v10602_v33, 16 }
  0x6e   : > { %15411 = vst [vmem:[#allocation23_spill] sm:$0xff] %v11115_v26  ;;  %v11123_v29 = vsel %vm982_vm3, %v11115_v26, %v993_v11  ;;  %10512 = vmatprep.subr.bf16.mxu1 %v1792_v24  ;;  %v675_v36 = vrot.slane %v673_v30, 7  ;;  %v682_v37 = vrot.slane %v680_v31, 7  ;;  %v695_v40 = vshrl.u32 %v10603_v35, 16 }
  0x6f   : > { %15412 = vst [vmem:[#allocation24_spill] sm:$0xff] %v11123_v29  ;;  %10513 = vmatpush3.bf16.msra.mxu1 %v1792_v24  ;;  %v698_v41 = vshll.u32 %v10603_v35, 16  ;;  %v690_v46 = vrot.slane %v688_v38, 7  ;;  %v703_v50 = vshrl.u32 %v10604_v42, 16  ;;  %v706_v54 = vshll.u32 %v10604_v42, 16 }
  0x70   : > { %v685_v43 = vor.u32 %v683_v32, %v682_v37  ;;  %v966_v44 = vsel %vm11059_vm2, %v682_v37, 0  ;;  %v678_v45 = vor.u32 %v676_v34, %v675_v36  ;;  %v697_v48 = vrot.slane %v695_v40, 7 }
  0x71   : > { %1323 = vrot.lane.b32.xlu0 %v11123_v29, %s10882_s29  ;;  %v1434_v47 = vrot.slane %v966_v44, 1  ;;  %v1019_v49 = vshll.u32 %v966_v44, 16  ;;  %v693_v53 = vor.u32 %v691_v39, %v690_v46  ;;  %v705_v14 = vrot.slane %v703_v50, 7 }
  0x72   : > { %v11133_v51 = vsel %vm663_vm0, %v675_v36, %v685_v43  ;;  %v11137_v52 = vsel %vm11059_vm2, 0, %v678_v45  ;;  %v700_v57 = vor.u32 %v698_v41, %v697_v48  ;;  %v967_v58 = vsel %vm11059_vm2, %v697_v48, 0  ;;  %v10606_v36 = vld [vmem:[%s11103_s26 + $0x30] sm:$0xff]   ;;  %v10607_v41 = vld [vmem:[%s11103_s26 + $0x38] sm:$0xff]  }
  0x73   : > { %v1432_v55 = vrot.slane %v11133_v51, 1  ;;  %v1431_v56 = vrot.slane %v11137_v52, 1  ;;  %v1439_v60 = vrot.slane %v967_v58, 1  ;;  %v11146_v61 = vsel %vm11059_vm2, 0, %v693_v53 }
  0x74   : > { %v1011_v62 = vshll.u32 %v11133_v51, 16  ;;  %v1015_v63 = vshrl.u32 %v11133_v51, 16  ;;  %v11153_v7 = vsel %vm663_vm0, %v690_v46, %v700_v57  ;;  %v1436_v9 = vrot.slane %v11146_v61, 1  ;;  %v10608_v46 = vld [vmem:[%s11103_s26 + $0x40] sm:$0xff]   ;;  %v10609_v57 = vld [vmem:[%s11103_s26 + $0x48] sm:$0xff]  }
  0x75   : > { %v1435_v4 = vsel %vm1425_vm4, %v1432_v55, %v1434_v47  ;;  %v1433_v5 = vsel %vm1425_vm4, %v1431_v56, %v1432_v55  ;;  %v1437_v11 = vrot.slane %v11153_v7, 1  ;;  %v1021_v13 = vrot.slane %v1019_v49, 1 }
  0x76   : > { %1517 = vrot.lane.b32.xlu0 %v1435_v4, %s10881_s21  ;;  %1515 = vrot.lane.b32.xlu1 %v1433_v5, %s10881_s21  ;;  %v1013_v12 = vrot.slane %v1011_v62, 1  ;;  %v710_v15 = vshrl.u32 %v10605_v59, 16  ;;  %v713_v17 = vshll.u32 %v10605_v59, 16  ;;  %v1031_v18 = vshll.u32 %v11153_v7, 16 }
  0x77   : > { %v1035_v20 = vshrl.u32 %v11153_v7, 16  ;;  %v1440_v22 = vsel %vm1425_vm4, %v1437_v11, %v1439_v60  ;;  %v1438_v23 = vsel %vm1425_vm4, %v1436_v9, %v1437_v11  ;;  %v708_v27 = vor.u32 %v706_v54, %v705_v14 }
  0x78   : > { %v1017_v24 = vor.u32 %v1015_v63, %v1013_v12  ;;  %v712_v28 = vrot.slane %v710_v15, 7  ;;  %v1033_v30 = vrot.slane %v1031_v18, 1  ;;  %v1039_v31 = vshll.u32 %v967_v58, 16 }
  0x79   : > { %v11168_v33 = vsel %vm11059_vm2, 0, %v708_v27  ;;  %v1004_v34 = vshrl.u32 %v11137_v52, 16  ;;  %v1006_v35 = vshll.u32 %v11137_v52, 16  ;;  %v1024_v40 = vshrl.u32 %v11146_v61, 16 }
  0x7a   : > { %1521 = vrot.lane.b32.xlu0 %v1440_v22, %s10881_s21  ;;  %1519 = vrot.lane.b32.xlu1 %v1438_v23, %s10881_s21  ;;  %v1022_v32 = vsel %vm982_vm3, %v1017_v24, %v1021_v13  ;;  %v715_v37 = vor.u32 %v713_v17, %v712_v28  ;;  %v1037_v38 = vor.u32 %v1035_v20, %v1033_v30  ;;  %v1041_v39 = vrot.slane %v1039_v31, 1 }
  0x7b   : > { %v1441_v42 = vrot.slane %v11168_v33, 1  ;;  %v1008_v43 = vrot.slane %v1006_v35, 1  ;;  %v968_v44 = vsel %vm11059_vm2, %v712_v28, 0  ;;  %v1026_v45 = vshll.u32 %v11146_v61, 16 }
  0x7c   : > { %v11181_v47 = vsel %vm663_vm0, %v705_v14, %v715_v37  ;;  %v1042_v48 = vsel %vm982_vm3, %v1037_v38, %v1041_v39  ;;  %v1059_v49 = vshll.u32 %v968_v44, 16  ;;  %v1044_v50 = vshrl.u32 %v11168_v33, 16 }
  0x7d   : > { %v1442_v53 = vrot.slane %v11181_v47, 1  ;;  %v1009_v54 = vor.u32 %v1008_v43, %v1004_v34  ;;  %v1051_v55 = vshll.u32 %v11181_v47, 16  ;;  %v1055_v56 = vshrl.u32 %v11181_v47, 16 }
  0x7e   : > { %1329 = vrot.lane.b32.xlu0 %v1022_v32, %s10882_s29  ;;  %v1028_v58 = vrot.slane %v1026_v45, 1  ;;  %v1444_v59 = vrot.slane %v968_v44, 1  ;;  %v1046_v60 = vshll.u32 %v11168_v33, 16  ;;  %v718_v62 = vshrl.u32 %v10606_v36, 16 }
  0x7f   : > { %v1443_v63 = vsel %vm1425_vm4, %v1441_v42, %v1442_v53  ;;  %v1014_v4 = vsel %vm982_vm3, %v1009_v54, %v1013_v12  ;;  %v1053_v5 = vrot.slane %v1051_v55, 1  ;;  %v1061_v9 = vrot.slane %v1059_v49, 1  ;;  %v10610_v55 = vld [vmem:[%s11103_s26 + $0x50] sm:$0xff]  }
  0x80   : > { %1523 = vrot.lane.b32.xlu1 %v1443_v63, %s10881_s21  ;;  %v1029_v11 = vor.u32 %v1028_v58, %v1024_v40  ;;  %v1048_v13 = vrot.slane %v1046_v60, 1  ;;  %v720_v14 = vrot.slane %v718_v62, 7  ;;  %v725_v15 = vshrl.u32 %v10607_v41, 16 }
  0x81   : > { %v1057_v17 = vor.u32 %v1055_v56, %v1053_v5  ;;  %v728_v18 = vshll.u32 %v10607_v41, 16  ;;  %v721_v20 = vshll.u32 %v10606_v36, 16  ;;  %v733_v22 = vshrl.u32 %v10608_v46, 16 }
  0x82   : > { %1333 = vrot.lane.b32.xlu0 %v1042_v48, %s10882_s29  ;;  %v727_v23 = vrot.slane %v725_v15, 7  ;;  %v740_v24 = vshrl.u32 %v10609_v57, 16  ;;  %v1034_v12 = vsel %vm982_vm3, %v1029_v11, %v1033_v30  ;;  %v743_v37 = vshll.u32 %v10609_v57, 16 }
  0x83   : > { %v1062_v27 = vsel %vm982_vm3, %v1057_v17, %v1061_v9  ;;  %v723_v28 = vor.u32 %v721_v20, %v720_v14  ;;  %v735_v31 = vrot.slane %v733_v22, 7  ;;  %v1049_v36 = vor.u32 %v1048_v13, %v1044_v50  ;;  %v10612_v20 = vld [vmem:[%s11103_s26 + $0x60] sm:$0xff]   ;;  %v10613_v22 = vld [vmem:[%s11103_s26 + $0x68] sm:$0xff]  }
  0x84   : > { %1327 = vrot.lane.b32.xlu1 %v1014_v4, %s10882_s29  ;;  %v730_v32 = vor.u32 %v728_v18, %v727_v23  ;;  %v969_v34 = vsel %vm11059_vm2, %v727_v23, 0  ;;  %v742_v35 = vrot.slane %v740_v24, 7  ;;  %v736_v30 = vshll.u32 %v10608_v46, 16  ;;  %v10611_v4 = vld [vmem:[%s11103_s26 + $0x58] sm:$0xff]  }
  0x85   : > { %v1079_v38 = vshll.u32 %v969_v34, 16  ;;  %v11203_v39 = vsel %vm11059_vm2, 0, %v723_v28  ;;  %v1445_v40 = vsel %vm1425_vm4, %v1442_v53, %v1444_v59  ;;  %v1449_v49 = vrot.slane %v969_v34, 1 }
  0x86   : > { %1337 = vrot.lane.b32.xlu0 %v1062_v27, %s10882_s29  ;;  %v11207_v41 = vsel %vm663_vm0, %v720_v14, %v730_v32  ;;  %v1064_v42 = vshrl.u32 %v11203_v39, 16  ;;  %v1066_v43 = vshll.u32 %v11203_v39, 16  ;;  %v745_v50 = vor.u32 %v743_v37, %v742_v35 }
  0x87   : > { %v1071_v44 = vshll.u32 %v11207_v41, 16  ;;  %v1075_v45 = vshrl.u32 %v11207_v41, 16  ;;  %v1447_v48 = vrot.slane %v11207_v41, 1  ;;  %v11217_v53 = vsel %vm11059_vm2, %v742_v35, 0 }
  0x88   : > { %1331 = vrot.lane.b32.xlu1 %v1034_v12, %s10882_s29  ;;  %v1068_v46 = vrot.slane %v1066_v43, 1  ;;  %v738_v54 = vor.u32 %v736_v30, %v735_v31  ;;  %v1054_v56 = vsel %vm982_vm3, %v1049_v36, %v1053_v5  ;;  %v1081_v58 = vrot.slane %v1079_v38, 1 }
  0x89   : > { %v1073_v57 = vrot.slane %v1071_v44, 1  ;;  %v11223_v60 = vsel %vm663_vm0, %v735_v31, %v745_v50  ;;  %v1099_v62 = vshll.u32 %v11217_v53, 16  ;;  %v1446_v11 = vrot.slane %v11203_v39, 1 }
  0x8a   : > { %1525 = vrot.lane.b32.xlu0 %v1445_v40, %s10881_s21  ;;  %v1069_v59 = vor.u32 %v1068_v46, %v1064_v42  ;;  %v11228_v63 = vsel %vm11059_vm2, 0, %v738_v54  ;;  %v1091_v5 = vshll.u32 %v11223_v60, 16  ;;  %v1095_v13 = vshrl.u32 %v11223_v60, 16 }
  0x8b   : > { %v1077_v9 = vor.u32 %v1075_v45, %v1073_v57  ;;  %v1450_v15 = vsel %vm1425_vm4, %v1447_v48, %v1449_v49  ;;  %v1086_v17 = vshll.u32 %v11228_v63, 16  ;;  %v1454_v18 = vrot.slane %v11217_v53, 1 }
  0x8c   : > { %1335 = vrot.lane.b32.xlu1 %v1054_v56, %s10882_s29  ;;  %v1074_v14 = vsel %vm982_vm3, %v1069_v59, %v1073_v57  ;;  %v1093_v24 = vrot.slane %v1091_v5, 1  ;;  %v1084_v27 = vshrl.u32 %v11228_v63, 16  ;;  %v748_v12 = vshrl.u32 %v10610_v55, 16 }
  0x8d   : > { %v1082_v23 = vsel %vm982_vm3, %v1077_v9, %v1081_v58  ;;  %v1101_v28 = vrot.slane %v1099_v62, 1  ;;  %v1088_v31 = vrot.slane %v1086_v17, 1  ;;  %v755_v32 = vshrl.u32 %v10611_v4, 16 }
  0x8e   : > { %1341 = vrot.lane.b32.xlu0 %v1082_v23, %s10882_s29  ;;  %v758_v34 = vshll.u32 %v10611_v4, 16  ;;  %v1448_v35 = vsel %vm1425_vm4, %v1446_v11, %v1447_v48  ;;  %v1097_v37 = vor.u32 %v1095_v13, %v1093_v24  ;;  %v750_v36 = vrot.slane %v748_v12, 7 }
  0x8f   : > { %v751_v38 = vshll.u32 %v10610_v55, 16  ;;  %v1452_v30 = vrot.slane %v11223_v60, 1  ;;  %v757_v40 = vrot.slane %v755_v32, 7  ;;  %v763_v42 = vshrl.u32 %v10612_v20, 16 }
  0x90   : > { %1339 = vrot.lane.b32.xlu1 %v1074_v14, %s10882_s29  ;;  %v770_v43 = vshrl.u32 %v10613_v22, 16  ;;  %v1089_v44 = vor.u32 %v1088_v31, %v1084_v27  ;;  %v773_v49 = vshll.u32 %v10613_v22, 16  ;;  %v766_v46 = vshll.u32 %v10612_v20, 16  ;;  %v10615_v27 = vld [vmem:[%s11103_s26 + $0x78] sm:$0xff]  }
  0x91   : > { %v753_v45 = vor.u32 %v751_v38, %v750_v36  ;;  %v760_v50 = vor.u32 %v758_v34, %v757_v40  ;;  %v971_v48 = vsel %vm11059_vm2, %v757_v40, 0  ;;  %v765_v53 = vrot.slane %v763_v42, 7  ;;  %v10617_v38 = vld [vmem:[%s11103_s26 + $0xc8] sm:$0xff]  }
  0x92   : > { %1529 = vrot.lane.b32.xlu0 %v1450_v15, %s10881_s21  ;;  %v1102_v54 = vsel %vm982_vm3, %v1097_v37, %v1101_v28  ;;  %v1119_v55 = vshll.u32 %v971_v48, 16  ;;  %v772_v57 = vrot.slane %v770_v43, 7  ;;  %v1451_v58 = vrot.slane %v11228_v63, 1 }
  0x93   : > { %v11253_v56 = vsel %vm11059_vm2, 0, %v753_v45  ;;  %v11258_v59 = vsel %vm663_vm0, %v750_v36, %v760_v50  ;;  %v1094_v4 = vsel %vm982_vm3, %v1089_v44, %v1093_v24  ;;  %v768_v15 = vor.u32 %v766_v46, %v765_v53  ;;  %v10614_v24 = vld [vmem:[%s11103_s26 + $0x70] sm:$0xff]   ;;  %v10616_v36 = vld [vmem:[%s11103_s26 + $0xc0] sm:$0xff]  }
  0x94   : > { %1527 = vrot.lane.b32.xlu1 %v1448_v35, %s10881_s21  ;;  %v1106_v62 = vshll.u32 %v11253_v56, 16  ;;  %v1111_v9 = vshll.u32 %v11258_v59, 16  ;;  %v1115_v11 = vshrl.u32 %v11258_v59, 16  ;;  %v1104_v5 = vshrl.u32 %v11253_v56, 16 }
  0x95   : > { %v775_v14 = vor.u32 %v773_v49, %v772_v57  ;;  %v1455_v17 = vsel %vm1425_vm4, %v1452_v30, %v1454_v18  ;;  %v1121_v22 = vrot.slane %v1119_v55, 1  ;;  %v11269_v23 = vsel %vm11059_vm2, %v772_v57, 0 }
  0x96   : > { %1345 = vrot.lane.b32.xlu0 %v1102_v54, %s10882_s29  ;;  %v1108_v13 = vrot.slane %v1106_v62, 1  ;;  %v1113_v20 = vrot.slane %v1111_v9, 1  ;;  %v1453_v12 = vsel %vm1425_vm4, %v1451_v58, %v1452_v30  ;;  %v1459_v28 = vrot.slane %v971_v48, 1 }
  0x97   : > { %v11276_v31 = vsel %vm663_vm0, %v765_v53, %v775_v14  ;;  %v11280_v18 = vsel %vm11059_vm2, 0, %v768_v15  ;;  %v1457_v35 = vrot.slane %v11258_v59, 1  ;;  %v1456_v30 = vrot.slane %v11253_v56, 1 }
  0x98   : > { %1343 = vrot.lane.b32.xlu1 %v1094_v4, %s10882_s29  ;;  %v1117_v32 = vor.u32 %v1115_v11, %v1113_v20  ;;  %v1109_v34 = vor.u32 %v1108_v13, %v1104_v5  ;;  %v1131_v37 = vshll.u32 %v11276_v31, 16  ;;  %v1139_v40 = vshll.u32 %v11269_v23, 16 }
  0x99   : > { %v1126_v42 = vshll.u32 %v11280_v18, 16  ;;  %v1464_v43 = vrot.slane %v11269_v23, 1  ;;  %v1135_v49 = vshrl.u32 %v11276_v31, 16  ;;  %v778_v46 = vshrl.u32 %v10614_v24, 16 }
  0x9a   : > { %1533 = vrot.lane.b32.xlu0 %v1455_v17, %s10881_s21  ;;  %v1122_v44 = vsel %vm982_vm3, %v1117_v32, %v1121_v22  ;;  %v1133_v45 = vrot.slane %v1131_v37, 1  ;;  %v1124_v50 = vshrl.u32 %v11280_v18, 16  ;;  %v785_v53 = vshrl.u32 %v10615_v27, 16 }
  0x9b   : > { %v1128_v48 = vrot.slane %v1126_v42, 1  ;;  %v788_v54 = vshll.u32 %v10615_v27, 16  ;;  %v1114_v55 = vsel %vm982_vm3, %v1109_v34, %v1113_v20  ;;  %v1460_v57 = vsel %vm1425_vm4, %v1457_v35, %v1459_v28 }
  0x9c   : > { %1531 = vrot.lane.b32.xlu1 %v1453_v12, %s10881_s21  ;;  %v780_v58 = vrot.slane %v778_v46, 7  ;;  %v781_v62 = vshll.u32 %v10614_v24, 16  ;;  %v1141_v4 = vrot.slane %v1139_v40, 1  ;;  %v787_v9 = vrot.slane %v785_v53, 7 }
  0x9d   : > { %v853_v11 = vshrl.u32 %v10616_v36, 16  ;;  %v860_v5 = vshrl.u32 %v10617_v38, 16  ;;  %v1137_v13 = vor.u32 %v1135_v49, %v1133_v45  ;;  %v863_v15 = vshll.u32 %v10617_v38, 16 }
  0x9e   : > { %1349 = vrot.lane.b32.xlu0 %v1122_v44, %s10882_s29  ;;  %v783_v14 = vor.u32 %v781_v62, %v780_v58  ;;  %v856_v17 = vshll.u32 %v10616_v36, 16  ;;  %v1458_v22 = vsel %vm1425_vm4, %v1456_v30, %v1457_v35  ;;  %v790_v20 = vor.u32 %v788_v54, %v787_v9  ;;  %v10618_v36 = vld [vmem:[%s11103_s26 + $0x80] sm:$0xff]   ;;  %v10619_v44 = vld [vmem:[%s11103_s26 + $0x88] sm:$0xff]  }
  0x9f   : > { %v11302_v23 = vsel %vm11059_vm2, %v787_v9, 0  ;;  %v855_v24 = vrot.slane %v853_v11, 7  ;;  %v1129_v27 = vor.u32 %v1128_v48, %v1124_v50  ;;  %v1462_v12 = vrot.slane %v11276_v31, 1 }
  0xa0   : > { %1347 = vrot.lane.b32.xlu1 %v1114_v55, %s10882_s29  ;;  %v11307_v28 = vsel %vm11059_vm2, 0, %v783_v14  ;;  %v862_v32 = vrot.slane %v860_v5, 7  ;;  %v1461_v34 = vrot.slane %v11280_v18, 1  ;;  %v11312_v35 = vsel %vm663_vm0, %v780_v58, %v790_v20  ;;  %v10621_v14 = vld [vmem:[%s11103_s26 + $0xd8] sm:$0xff]  }
  0xa1   : > { %v1146_v37 = vshll.u32 %v11307_v28, 16  ;;  %v1142_v38 = vsel %vm982_vm3, %v1137_v13, %v1141_v4  ;;  %v1151_v30 = vshll.u32 %v11312_v35, 16  ;;  %v1155_v40 = vshrl.u32 %v11312_v35, 16 }
  0xa2   : > { %1537 = vrot.lane.b32.xlu0 %v1460_v57, %s10881_s21  ;;  %v1159_v42 = vshll.u32 %v11302_v23, 16  ;;  %v1144_v49 = vshrl.u32 %v11307_v28, 16  ;;  %v865_v50 = vor.u32 %v863_v15, %v862_v32  ;;  %v858_v48 = vor.u32 %v856_v17, %v855_v24 }
  0xa3   : > { %v1148_v46 = vrot.slane %v1146_v37, 1  ;;  %v1134_v53 = vsel %vm982_vm3, %v1129_v27, %v1133_v45  ;;  %v1465_v54 = vsel %vm1425_vm4, %v1462_v12, %v1464_v43  ;;  %v1153_v55 = vrot.slane %v1151_v30, 1  ;;  %v11339_v45 = vld [vmem:[%s11103_s26 + $0xd0] sm:$0xff]  }
  0xa4   : > { %1535 = vrot.lane.b32.xlu1 %v1458_v22, %s10881_s21  ;;  %v11327_v57 = vsel %vm11059_vm2, %v862_v32, 0  ;;  %v1463_v58 = vsel %vm1425_vm4, %v1461_v34, %v1462_v12  ;;  %v11332_v62 = vsel %vm663_vm0, %v855_v24, %v865_v50  ;;  %v11336_v4 = vsel %vm11059_vm2, 0, %v858_v48 }
  0xa5   : > { %v793_v9 = vshrl.u32 %v10618_v36, 16  ;;  %v1157_v43 = vor.u32 %v1155_v40, %v1153_v55  ;;  %v1161_v11 = vrot.slane %v1159_v42, 1  ;;  %v1469_v5 = vrot.slane %v11302_v23, 1 }
  0xa6   : > { %1353 = vrot.lane.b32.xlu0 %v1142_v38, %s10882_s29  ;;  %v1251_v13 = vshll.u32 %v11332_v62, 16  ;;  %v1467_v15 = vrot.slane %v11312_v35, 1  ;;  %v1466_v17 = vrot.slane %v11307_v28, 1  ;;  %v1246_v22 = vshll.u32 %v11336_v4, 16 }
  0xa7   : > { %v795_v20 = vrot.slane %v793_v9, 7  ;;  %v1149_v24 = vor.u32 %v1148_v46, %v1144_v49  ;;  %v1259_v27 = vshll.u32 %v11327_v57, 16  ;;  %v796_v12 = vshll.u32 %v10618_v36, 16 }
  0xa8   : > { %1351 = vrot.lane.b32.xlu1 %v1134_v53, %s10882_s29  ;;  %v800_v32 = vshrl.u32 %v10619_v44, 16  ;;  %v1253_v23 = vrot.slane %v1251_v13, 1  ;;  %v1255_v34 = vshrl.u32 %v11332_v62, 16  ;;  %v1244_v37 = vshrl.u32 %v11336_v4, 16 }
  0xa9   : > { %v803_v38 = vshll.u32 %v10619_v44, 16  ;;  %v1162_v30 = vsel %vm982_vm3, %v1157_v43, %v1161_v11  ;;  %v1248_v40 = vrot.slane %v1246_v22, 1  ;;  %v798_v42 = vor.u32 %v796_v12, %v795_v20  ;;  %v10622_v43 = vld [vmem:[%s11103_s26 + $0x90] sm:$0xff]  }
  0xaa   : > { %1541 = vrot.lane.b32.xlu0 %v1465_v54, %s10881_s21  ;;  %v802_v50 = vrot.slane %v800_v32, 7  ;;  %v868_v49 = vshrl.u32 %v11339_v45, 16  ;;  %v875_v36 = vshrl.u32 %v10621_v14, 16  ;;  %v1154_v46 = vsel %vm982_vm3, %v1149_v24, %v1153_v55 }
  0xab   : > { %v11358_v53 = vsel %vm11059_vm2, 0, %v798_v42  ;;  %v1470_v54 = vsel %vm1425_vm4, %v1467_v15, %v1469_v5  ;;  %v1468_v55 = vsel %vm1425_vm4, %v1466_v17, %v1467_v15  ;;  %v1257_v11 = vor.u32 %v1255_v34, %v1253_v23 }
  0xac   : > { %1539 = vrot.lane.b32.xlu1 %v1463_v58, %s10881_s21  ;;  %v805_v48 = vor.u32 %v803_v38, %v802_v50  ;;  %v11362_v44 = vsel %vm11059_vm2, %v802_v50, 0  ;;  %v1164_v58 = vshrl.u32 %v11358_v53, 16  ;;  %v1166_v9 = vshll.u32 %v11358_v53, 16  ;;  %v10623_v38 = vld [vmem:[%s11103_s26 + $0x98] sm:$0xff]  }
  0xad   : > { %v1261_v13 = vrot.slane %v1259_v27, 1  ;;  %v1249_v24 = vor.u32 %v1248_v40, %v1244_v37  ;;  %v1179_v5 = vshll.u32 %v11362_v44, 16  ;;  %v870_v42 = vrot.slane %v868_v49, 7 }
  0xae   : > { %1357 = vrot.lane.b32.xlu0 %v1162_v30, %s10882_s29  ;;  %v11371_v22 = vsel %vm663_vm0, %v795_v20, %v805_v48  ;;  %v1168_v12 = vrot.slane %v1166_v9, 1  ;;  %v877_v50 = vrot.slane %v875_v36, 7  ;;  %v878_v8 = vshll.u32 %v10621_v14, 16 }
  0xaf   : > { %v1171_v32 = vshll.u32 %v11371_v22, 16  ;;  %v1175_v30 = vshrl.u32 %v11371_v22, 16  ;;  %v871_v20 = vshll.u32 %v11339_v45, 16  ;;  %v808_v27 = vshrl.u32 %v10622_v43, 16 }
  0xb0   : > { %1355 = vrot.lane.b32.xlu1 %v1154_v46, %s10882_s29  ;;  %v1169_v15 = vor.u32 %v1168_v12, %v1164_v58  ;;  %v1262_v34 = vsel %vm982_vm3, %v1257_v11, %v1261_v13  ;;  %v1491_v37 = vrot.slane %v11336_v4, 1  ;;  %v1492_v40 = vrot.slane %v11332_v62, 1 }
  0xb1   : > { %v1173_v17 = vrot.slane %v1171_v32, 1  ;;  %v880_v46 = vor.u32 %v878_v8, %v877_v50  ;;  %v1254_v49 = vsel %vm982_vm3, %v1249_v24, %v1253_v23  ;;  %v1494_v14 = vrot.slane %v11327_v57, 1 }
  0xb2   : > { %1545 = vrot.lane.b32.xlu0 %v1470_v54, %s10881_s21  ;;  %v11388_v36 = vsel %vm11059_vm2, %v877_v50, 0  ;;  %v873_v48 = vor.u32 %v871_v20, %v870_v42  ;;  %v810_v54 = vrot.slane %v808_v27, 7  ;;  %v811_v58 = vshll.u32 %v10622_v43, 16 }
  0xb3   : > { %v11391_v45 = vsel %vm663_vm0, %v870_v42, %v880_v46  ;;  %v815_v9 = vshrl.u32 %v10623_v38, 16  ;;  %v1174_v8 = vsel %vm982_vm3, %v1169_v15, %v1173_v17  ;;  %v1181_v23 = vrot.slane %v1179_v5, 1 }
  0xb4   : > { %1543 = vrot.lane.b32.xlu1 %v1468_v55, %s10881_s21  ;;  %15413 = vst [vmem:[#allocation25_spill] sm:$0xff] %v11391_v45  ;;  %v1177_v55 = vor.u32 %v1175_v30, %v1173_v17  ;;  %v1271_v57 = vshll.u32 %v11391_v45, 16  ;;  %v11398_v11 = vsel %vm11059_vm2, 0, %v873_v48  ;;  %v813_v13 = vor.u32 %v811_v58, %v810_v54  ;;  %v10624_v17 = vld [vmem:[%s11103_s26 + $0xe0] sm:$0xff]  }
  0xb5   : > { %v817_v24 = vrot.slane %v815_v9, 7  ;;  %v818_v12 = vshll.u32 %v10623_v38, 16  ;;  %v1275_v32 = vshrl.u32 %v11391_v45, 16  ;;  %v1279_v42 = vshll.u32 %v11388_v36, 16  ;;  %v10626_v48 = vld [vmem:[%s11103_s26 + $0xa0] sm:$0xff]  }
  0xb6   : > { %1377 = vrot.lane.b32.xlu0 %v1262_v34, %s10882_s29  ;;  %v1273_v43 = vrot.slane %v1271_v57, 1  ;;  %v1493_v5 = vsel %vm1425_vm4, %v1491_v37, %v1492_v40  ;;  %v1266_v30 = vshll.u32 %v11398_v11, 16  ;;  %v11407_v15 = vsel %vm11059_vm2, 0, %v813_v13  ;;  %v10625_v34 = vld [vmem:[%s11103_s26 + $0xe8] sm:$0xff]  }
  0xb7   : > { %v820_v50 = vor.u32 %v818_v12, %v817_v24  ;;  %15414 = vst [vmem:[#allocation26_spill] sm:$0xff] %v11407_v15  ;;  %v1472_v38 = vrot.slane %v11371_v22, 1  ;;  %v1474_v20 = vrot.slane %v11362_v44, 1  ;;  %v1186_v27 = vshll.u32 %v11407_v15, 16  ;;  %v10627_v44 = vld [vmem:[%s11103_s26 + $0xa8] sm:$0xff]  }
  0xb8   : > { %1375 = vrot.lane.b32.xlu1 %v1254_v49, %s10882_s29  ;;  %v1182_v37 = vsel %vm982_vm3, %v1177_v55, %v1181_v23  ;;  %v1495_v46 = vsel %vm1425_vm4, %v1492_v40, %v1494_v14  ;;  %v1471_v49 = vrot.slane %v11358_v53, 1  ;;  %v1277_v58 = vor.u32 %v1275_v32, %v1273_v43 }
  0xb9   : > { %v1281_v9 = vrot.slane %v1279_v42, 1  ;;  %v11422_v57 = vsel %vm663_vm0, %v810_v54, %v820_v50  ;;  %v1268_v13 = vrot.slane %v1266_v30, 1  ;;  %v1496_v12 = vrot.slane %v11398_v11, 1 }
  0xba   : > { %1359 = vrot.lane.b32.xlu0 %v1174_v8, %s10882_s29  ;;  %v1264_v8 = vshrl.u32 %v11398_v11, 16  ;;  %15415 = vst [vmem:[#allocation27_spill] sm:$0xff] %v11422_v57  ;;  %v1497_v55 = vrot.slane %v11391_v45, 1  ;;  %v11429_v40 = vsel %vm11059_vm2, %v817_v24, 0  ;;  %v1475_v14 = vsel %vm1425_vm4, %v1472_v38, %v1474_v20 }
  0xbb   : > { %v1184_v23 = vshrl.u32 %v11407_v15, 16  ;;  %v1188_v32 = vrot.slane %v1186_v27, 1  ;;  %v1191_v54 = vshll.u32 %v11422_v57, 16  ;;  %v883_v42 = vshrl.u32 %v10624_v17, 16 }
  0xbc   : > { %1563 = vrot.lane.b32.xlu1 %v1493_v5, %s10881_s21  ;;  %v890_v5 = vshrl.u32 %v10625_v34, 16  ;;  %v893_v30 = vshll.u32 %v10625_v34, 16  ;;  %v1473_v50 = vsel %vm1425_vm4, %v1471_v49, %v1472_v38  ;;  %v1282_v10 = vsel %vm982_vm3, %v1277_v58, %v1281_v9 }
  0xbd   : > { %v1199_v24 = vshll.u32 %v11429_v40, 16  ;;  %v886_v0 = vshll.u32 %v10624_v17, 16  ;;  %v885_v3 = vrot.slane %v883_v42, 7  ;;  %v823_v26 = vshrl.u32 %v10626_v48, 16 }
  0xbe   : > { %1361 = vrot.lane.b32.xlu0 %v1182_v37, %s10882_s29  ;;  %v1269_v37 = vor.u32 %v1268_v13, %v1264_v8  ;;  %v892_v20 = vrot.slane %v890_v5, 7  ;;  %v1189_v27 = vor.u32 %v1188_v32, %v1184_v23  ;;  %v1195_v16 = vshrl.u32 %v11422_v57, 16  ;;  %v10628_v13 = vld [vmem:[%s11103_s26 + $0xf0] sm:$0xff]   ;;  %v10629_v32 = vld [vmem:[%s11103_s26 + $0xf8] sm:$0xff]  }
  0xbf   : > { %v826_v34 = vshll.u32 %v10626_v48, 16  ;;  %v1193_v21 = vrot.slane %v1191_v54, 1  ;;  %v888_v49 = vor.u32 %v886_v0, %v885_v3  ;;  %v825_v58 = vrot.slane %v823_v26, 7 }
  0xc0   : > { %1565 = vrot.lane.b32.xlu1 %v1495_v46, %s10881_s21  ;;  %v830_v46 = vshrl.u32 %v10627_v44, 16  ;;  %v895_v38 = vor.u32 %v893_v30, %v892_v20  ;;  %v1498_v17 = vsel %vm1425_vm4, %v1496_v12, %v1497_v55  ;;  %v833_v8 = vshll.u32 %v10627_v44, 16 }
  0xc1   : > { %v1274_v42 = vsel %vm982_vm3, %v1269_v37, %v1273_v43  ;;  %v11450_v48 = vsel %vm11059_vm2, 0, %v888_v49  ;;  %v828_v23 = vor.u32 %v826_v34, %v825_v58  ;;  %v1201_v0 = vrot.slane %v1199_v24, 1 }
  0xc2   : > { %1549 = vrot.lane.b32.xlu0 %v1475_v14, %s10881_s21  ;;  %v832_v9 = vrot.slane %v830_v46, 7  ;;  %v11446_v14 = vsel %vm663_vm0, %v885_v3, %v895_v38  ;;  %v1499_v26 = vrot.slane %v11388_v36, 1  ;;  %v11457_v44 = vsel %vm11059_vm2, %v892_v20, 0  ;;  %v10630_v46 = vld [vmem:[%s11103_s26 + $0xb0] sm:$0xff]   ;;  %v10631_v38 = vld [vmem:[%s11103_s26 + $0xb8] sm:$0xff]  }
  0xc3   : > { %v1291_v43 = vshll.u32 %v11446_v14, 16  ;;  %v1194_v3 = vsel %vm982_vm3, %v1189_v27, %v1193_v21  ;;  %v1197_v12 = vor.u32 %v1195_v16, %v1193_v21  ;;  %v1477_v54 = vrot.slane %v11422_v57, 1 }
  0xc4   : > { %1547 = vrot.lane.b32.xlu1 %v1473_v50, %s10881_s21  ;;  %v11464_v5 = vsel %vm11059_vm2, 0, %v828_v23  ;;  %v1476_v36 = vrot.slane %v11407_v15, 1  ;;  %v1286_v30 = vshll.u32 %v11450_v48, 16  ;;  %v835_v50 = vor.u32 %v833_v8, %v832_v9 }
  0xc5   : > { %v1295_v24 = vshrl.u32 %v11446_v14, 16  ;;  %v1299_v16 = vshll.u32 %v11457_v44, 16  ;;  %v898_v21 = vshrl.u32 %v10628_v13, 16  ;;  %v905_v37 = vshrl.u32 %v10629_v32, 16 }
  0xc6   : > { %1381 = vrot.lane.b32.xlu0 %v1282_v10, %s10882_s29  ;;  %v1479_v10 = vrot.slane %v11429_v40, 1  ;;  %v1293_v20 = vrot.slane %v1291_v43, 1  ;;  %v1206_v27 = vshll.u32 %v11464_v5, 16  ;;  %v1202_v34 = vsel %vm982_vm3, %v1197_v12, %v1201_v0 }
  0xc7   : > { %v1500_v40 = vsel %vm1425_vm4, %v1497_v55, %v1499_v26  ;;  %v1284_v8 = vshrl.u32 %v11450_v48, 16  ;;  %v11482_v23 = vsel %vm663_vm0, %v825_v58, %v835_v50  ;;  %v1204_v43 = vshrl.u32 %v11464_v5, 16 }
  0xc8   : > { %1379 = vrot.lane.b32.xlu1 %v1274_v42, %s10882_s29  ;;  %v1480_v49 = vsel %vm1425_vm4, %v1477_v54, %v1479_v10  ;;  %v1288_v42 = vrot.slane %v1286_v30, 1  ;;  %v11487_v0 = vsel %vm11059_vm2, %v832_v9, 0  ;;  %v900_v55 = vrot.slane %v898_v21, 7 }
  0xc9   : > { %v1478_v26 = vsel %vm1425_vm4, %v1476_v36, %v1477_v54  ;;  %v1297_v12 = vor.u32 %v1295_v24, %v1293_v20  ;;  %v1208_v10 = vrot.slane %v1206_v27, 1  ;;  %v907_v58 = vrot.slane %v905_v37, 7 }
  0xca   : > { %1363 = vrot.lane.b32.xlu0 %v1194_v3, %s10882_s29  ;;  %v1301_v3 = vrot.slane %v1299_v16, 1  ;;  %v1211_v30 = vshll.u32 %v11482_v23, 16  ;;  %v908_v50 = vshll.u32 %v10629_v32, 16  ;;  %v901_v16 = vshll.u32 %v10628_v13, 16 }
  0xcb   : > { %v838_v25 = vshrl.u32 %v10630_v46, 16  ;;  %v1289_v9 = vor.u32 %v1288_v42, %v1284_v8  ;;  %v1501_v21 = vrot.slane %v11450_v48, 1  ;;  %v841_v29 = vshll.u32 %v10630_v46, 16 }
  0xcc   : > { %1567 = vrot.lane.b32.xlu1 %v1498_v17, %s10881_s21  ;;  %v9266_v17 = vld [vmem:[%s15339_s1 + $0x4] sm:$0x3]  ;;  %v845_v15 = vshrl.u32 %v10631_v38, 16  ;;  %v1215_v57 = vshrl.u32 %v11482_v23, 16  ;;  %v903_v45 = vor.u32 %v901_v16, %v900_v55  ;;  %v1302_v36 = vsel %vm982_vm3, %v1297_v12, %v1301_v3 }
  0xcd   : > { %v840_v54 = vrot.slane %v838_v25, 7  ;;  %v1219_v32 = vshll.u32 %v11487_v0, 16  ;;  %v11503_v13 = vsel %vm11059_vm2, %v907_v58, 0  ;;  %v11506_v24 = vand.u32 %v9266_v17, %v11096_v19 }
  0xce   : > { %1365 = vrot.lane.b32.xlu0 %v1202_v34, %s10882_s29  ;;  %v910_v34 = vor.u32 %v908_v50, %v907_v58  ;;  %v1209_v37 = vor.u32 %v1208_v10, %v1204_v43  ;;  %v1213_v27 = vrot.slane %v1211_v30, 1  ;;  %v11513_v25 = vsel %vm11059_vm2, 0, %v903_v45 }
  0xcf   : > { %v1502_v46 = vrot.slane %v11446_v14, 1  ;;  %v847_v8 = vrot.slane %v845_v15, 7  ;;  %v848_v42 = vshll.u32 %v10631_v38, 16  ;;  %10186 = vmatprep.subr.bf16.mxu0 %v11506_v24  ;;  %v1294_v3 = vsel %vm982_vm3, %v1289_v9, %v1293_v20 }
  0xd0   : > { %1569 = vrot.lane.b32.xlu1 %v1500_v40, %s10881_s21  ;;  %v11509_v40 = vsel %vm663_vm0, %v900_v55, %v910_v34  ;;  %v1504_v43 = vrot.slane %v11457_v44, 1  ;;  %v1319_v17 = vshll.u32 %v11503_v13, 16  ;;  %v1481_v45 = vrot.slane %v11464_v5, 1 }
  0xd1   : > { %v1311_v55 = vshll.u32 %v11509_v40, 16  ;;  %v1214_v15 = vsel %vm982_vm3, %v1209_v37, %v1213_v27  ;;  %v1217_v20 = vor.u32 %v1215_v57, %v1213_v27  ;;  %v1221_v38 = vrot.slane %v1219_v32, 1 }
  0xd2   : > { %1553 = vrot.lane.b32.xlu0 %v1480_v49, %s10881_s21  ;;  %v843_v49 = vor.u32 %v841_v29, %v840_v54  ;;  %v9229_v29 = vld [vmem:[%s15339_s1 + $0x2] sm:$0x3]  ;;  %v1482_v44 = vrot.slane %v11482_v23, 1  ;;  %v1503_v12 = vsel %vm1425_vm4, %v1501_v21, %v1502_v46  ;;  %v1484_v10 = vrot.slane %v11487_v0, 1 }
  0xd3   : > { %v850_v58 = vor.u32 %v848_v42, %v847_v8  ;;  %v1313_v50 = vrot.slane %v1311_v55, 1  ;;  %v1315_v16 = vshrl.u32 %v11509_v40, 16  ;;  %v1321_v9 = vrot.slane %v1319_v17, 1 }
  0xd4   : > { %1551 = vrot.lane.b32.xlu1 %v1478_v26, %s10881_s21  ;;  %v1306_v26 = vshll.u32 %v11513_v25, 16  ;;  %v11535_v30 = vsel %vm11059_vm2, 0, %v843_v49  ;;  %v1304_v57 = vshrl.u32 %v11513_v25, 16  ;;  %v1222_v21 = vsel %vm982_vm3, %v1217_v20, %v1221_v38 }
  0xd5   : > { %v1226_v0 = vshll.u32 %v11535_v30, 16  ;;  %v977_v32 = vsel %vm11059_vm2, %v847_v8, 0  ;;  %v11546_v37 = vand.u32 %v9229_v29, %v11096_v19  ;;  %v11550_v42 = vsel %vm663_vm0, %v840_v54, %v850_v58 }
  0xd6   : > { %1385 = vrot.lane.b32.xlu0 %v1302_v36, %s10882_s29  ;;  %v1308_v34 = vrot.slane %v1306_v26, 1  ;;  %v1224_v36 = vshrl.u32 %v11535_v30, 16  ;;  %v1485_v17 = vsel %vm1425_vm4, %v1482_v44, %v1484_v10  ;;  %v1317_v26 = vor.u32 %v1315_v16, %v1313_v50 }
  0xd7   : > { %10112 = vmatprep.subr.bf16.mxu1 %v11546_v37  ;;  %v1228_v19 = vrot.slane %v1226_v0, 1  ;;  %v1231_v29 = vshll.u32 %v11550_v42, 16  ;;  %vm1718_vm8 = vcmask 23552   ;;  %v1239_v10 = vshll.u32 %v977_v32, 16 }
  0xd8   : > { %1383 = vrot.lane.b32.xlu1 %v1294_v3, %s10882_s29  ;;  %v1505_v3 = vsel %vm1425_vm4, %v1502_v46, %v1504_v43  ;;  %v1483_v43 = vsel %vm1425_vm4, %v1481_v45, %v1482_v44  ;;  %v1309_v20 = vor.u32 %v1308_v34, %v1304_v57  ;;  %v1322_v16 = vsel %vm982_vm3, %v1317_v26, %v1321_v9 }
  0xd9   : > { %v1233_v0 = vrot.slane %v1231_v29, 1  ;;  %v1506_v44 = vrot.slane %v11513_v25, 1  ;;  %v1507_v57 = vrot.slane %v11509_v40, 1  ;;  %v1486_v29 = vrot.slane %v11535_v30, 1 }
  0xda   : > { %1367 = vrot.lane.b32.xlu0 %v1214_v15, %s10882_s29  ;;  %v1314_v45 = vsel %vm982_vm3, %v1309_v20, %v1313_v50  ;;  %v1509_v50 = vrot.slane %v11503_v13, 1  ;;  %vm3981_vm9 = vcmask 261120   ;;  %vm4050_vm10 = vcmask 523264  }
  0xdb   : > { %vm4167_vm11 = vcmask 785408   ;;  %vm7240_vm12 = vcmask 1041409   ;;  %vm7243_vm13 = vcmask 1042434   ;;  %vm7246_vm14 = vcmask 1043459  }
  0xdc   : > { %1571 = vrot.lane.b32.xlu1 %v1503_v12, %s10881_s21  ;;  %v1235_v12 = vshrl.u32 %v11550_v42, 16  ;;  %vm7249_vm15 = vcmask 1044484   ;;  %vm7255_vm1 = vcmask 1046534   ;;  %vm7258_vm5 = vcmask 1047559  }
  0xde   : > { %v10592_v49 = vpop.permute.xlu1 %10591  ;;  %1369 = vrot.lane.b32.xlu0 %v1222_v21, %s10882_s29  ;;  %v1229_v21 = vor.u32 %v1228_v19, %v1224_v36  ;;  %v1237_v36 = vor.u32 %v1235_v12, %v1233_v0  ;;  %v1510_v19 = vsel %vm1425_vm4, %v1507_v57, %v1509_v50 }
  0xdf   : > { %v1326_v27 = vpop.permute.xlu0 %1325  ;;  %v10593_v55 = vunpack.i.l.bf16 %v10592_v49  ;;  %v10594_v8 = vunpack.i.h.bf16 %v10592_v49  ;;  %v1241_v49 = vrot.slane %v1239_v10, 1 }
  0xe0   : > { %v1583_v15 = vsel %vm1579_vm6, %v11055_v1, %v1326_v27  ;;  %1573 = vrot.lane.b32.xlu1 %v1505_v3, %s10881_s21  ;;  %v1234_v9 = vsel %vm982_vm3, %v1229_v21, %v1233_v0  ;;  %v1508_v3 = vsel %vm1425_vm4, %v1506_v44, %v1507_v57 }
  0xe1   : > { %v11569_v58 = vsel %vm1648_vm7, %v1583_v15, %v10594_v8  ;;  %v1489_v8 = vrot.slane %v977_v32, 1 }
  0xe2   : > { %1557 = vrot.lane.b32.xlu0 %v1485_v17, %s10881_s21  ;;  %v1242_v17 = vsel %vm982_vm3, %v1237_v36, %v1241_v49 }
  0xe3   : > { %v1324_v54 = vpop.permute.xlu0 %1323 }
  0xe4   : > { %v1581_v46 = vsel %vm1579_vm6, %v11074_v6, %v1324_v54  ;;  %1555 = vrot.lane.b32.xlu1 %v1483_v43, %s10881_s21 }
  0xe5   : > { %v11564_v38 = vsel %vm1648_vm7, %v1581_v46, %v10593_v55 }
  0xe6   : > { %10040 = vmatprep.mubr.msk.bf16.mxu0 %vm1718_vm8, %v11564_v38  ;;  %1389 = vrot.lane.b32.xlu0 %v1322_v16, %s10882_s29 }
  0xe7   : > { %10041 = vmatmul.mubr.msk.bf16.vlgmr.msra.gmra.mxu0 %vm1718_vm8, %v11569_v58 }
  0xe8   : > { %10187 = vmatpush3.bf16.msra.mxu0 %v11506_v24  ;;  %v1518_v34 = vpop.permute.xlu0 %1517  ;;  %v1516_v27 = vpop.permute.xlu1 %1515  ;;  %1387 = vrot.lane.b32.xlu1 %v1314_v45, %s10882_s29  ;;  %v1487_v24 = vrot.slane %v11550_v42, 1 }
  0xea   : > { %1371 = vrot.lane.b32.xlu0 %v1234_v9, %s10882_s29  ;;  %v1490_v13 = vsel %vm1425_vm4, %v1487_v24, %v1489_v8  ;;  %v1488_v54 = vsel %vm1425_vm4, %v1486_v29, %v1487_v24 }
  0xec   : > { %v1522_v55 = vpop.permute.xlu0 %1521  ;;  %1575 = vrot.lane.b32.xlu1 %v1508_v3, %s10881_s21  ;;  %v1520_v26 = vpop.permute.xlu1 %1519 }
  0xee   : > { %1373 = vrot.lane.b32.xlu0 %v1242_v17, %s10882_s29 }
  0xf0   : > { %v1330_v15 = vpop.permute.xlu0 %1329  ;;  %1577 = vrot.lane.b32.xlu1 %v1510_v19, %s10881_s21 }
  0xf1   : > { %v1587_v43 = vsel %vm1579_vm6, %v11133_v51, %v1330_v15 }
  0xf2   : > { %v1524_v46 = vpop.permute.xlu1 %1523  ;;  %1561 = vrot.lane.b32.xlu0 %v1490_v13, %s10881_s21  ;;  %v11608_v21 = vsel %vm1648_vm7, %v1587_v43, %v1518_v34 }
  0xf4   : > { %v1334_v32 = vpop.permute.xlu0 %1333  ;;  %1559 = vrot.lane.b32.xlu1 %v1488_v54, %s10881_s21 }
  0xf5   : > { %v1591_v44 = vsel %vm1579_vm6, %v11153_v7, %v1334_v32 }
  0xf6   : > { %v1328_v20 = vpop.permute.xlu1 %1327  ;;  %v11624_v9 = vsel %vm1648_vm7, %v1591_v44, %v1522_v55 }
  0xf7   : > { %v1585_v12 = vsel %vm1579_vm6, %v11137_v52, %v1328_v20 }
  0xf8   : > { %v1338_v10 = vpop.permute.xlu0 %1337  ;;  %v11603_v16 = vsel %vm1648_vm7, %v1585_v12, %v1516_v27 }
  0xf9   : > { %10044 = vmatprep.mubr.msk.bf16.mxu0 %vm1718_vm8, %v11603_v16  ;;  %v1595_v3 = vsel %vm1579_vm6, %v11181_v47, %v1338_v10 }
  0xfa   : > { %10045 = vmatmul.mubr.msk.bf16.gmra.mxu0 %vm1718_vm8, %v11608_v21  ;;  %v1332_v0 = vpop.permute.xlu1 %1331 }
  0xfb   : > { %v1589_v51 = vsel %vm1579_vm6, %v11146_v61, %v1332_v0 }
  0xfc   : > { %v1526_v45 = vpop.permute.xlu0 %1525  ;;  %v11615_v52 = vsel %vm1648_vm7, %v1589_v51, %v1520_v26 }
  0xfd   : > { %10048 = vmatprep.mubr.msk.bf16.mxu0 %vm1718_vm8, %v11615_v52  ;;  %v11636_v50 = vsel %vm1648_vm7, %v1595_v3, %v1526_v45 }
  0xfe   : > { %v1336_v57 = vpop.permute.xlu1 %1335 }
  0xff   : > { %v1593_v34 = vsel %vm1579_vm6, %v11168_v33, %v1336_v57 }
 0x100   : > { %v1342_v27 = vpop.permute.xlu0 %1341  ;;  %v11629_v36 = vsel %vm1648_vm7, %v1593_v34, %v1524_v46 }
 0x101   : > { %v1599_v47 = vsel %vm1579_vm6, %v11207_v41, %v1342_v27 }
 0x102   : > { %10049 = vmatmul.mubr.msk.bf16.gmra.mxu0 %vm1718_vm8, %v11624_v9  ;;  %v1340_v61 = vpop.permute.xlu1 %1339 }
 0x103   : > { %10052 = vmatprep.mubr.msk.bf16.mxu0 %vm1718_vm8, %v11629_v36  ;;  %v1597_v55 = vsel %vm1579_vm6, %v11203_v39, %v1340_v61 }
 0x104   : > { %v1530_v49 = vpop.permute.xlu0 %1529 }
 0x105   : > { %v11650_v29 = vsel %vm1648_vm7, %v1599_v47, %v1530_v49 }
 0x106   : > { %v1528_v7 = vpop.permute.xlu1 %1527 }
 0x107   : > { %v11641_v17 = vsel %vm1648_vm7, %v1597_v55, %v1528_v7 }
 0x108   : > { %v1346_v33 = vpop.permute.xlu0 %1345 }
 0x109   : > { %v1603_v41 = vsel %vm1579_vm6, %v11223_v60, %v1346_v33 }
 0x10a   : > { %10053 = vmatmul.mubr.msk.bf16.gmra.mxu0 %vm1718_vm8, %v11636_v50  ;;  %v1344_v24 = vpop.permute.xlu1 %1343 }
 0x10b   : > { %10056 = vmatprep.mubr.msk.bf16.mxu0 %vm1718_vm8, %v11641_v17  ;;  %v1601_v39 = vsel %vm1579_vm6, %v11228_v63, %v1344_v24 }
 0x10c   : > { %v1534_v8 = vpop.permute.xlu0 %1533 }
 0x10d   : > { %v11664_v43 = vsel %vm1648_vm7, %v1603_v41, %v1534_v8 }
 0x10e   : > { %v1532_v26 = vpop.permute.xlu1 %1531 }
 0x10f   : > { %v11655_v15 = vsel %vm1648_vm7, %v1601_v39, %v1532_v26 }
 0x110   : > { %v1350_v19 = vpop.permute.xlu0 %1349 }
 0x111   : > { %v1607_v60 = vsel %vm1579_vm6, %v11258_v59, %v1350_v19 }
 0x112   : > { %10057 = vmatmul.mubr.msk.bf16.gmra.mxu0 %vm1718_vm8, %v11650_v29  ;;  %v1348_v13 = vpop.permute.xlu1 %1347 }
 0x113   : > { %10060 = vmatprep.mubr.msk.bf16.mxu0 %vm1718_vm8, %v11655_v15  ;;  %v1605_v63 = vsel %vm1579_vm6, %v11253_v56, %v1348_v13 }
 0x114   : > { %v1538_v54 = vpop.permute.xlu0 %1537 }
 0x115   : > { %v11678_v45 = vsel %vm1648_vm7, %v1607_v60, %v1538_v54 }
 0x116   : > { %v1536_v46 = vpop.permute.xlu1 %1535 }
 0x117   : > { %v11669_v20 = vsel %vm1648_vm7, %v1605_v63, %v1536_v46 }
 0x118   : > { %v1354_v32 = vpop.permute.xlu0 %1353 }
 0x119   : > { %v1611_v59 = vsel %vm1579_vm6, %v11276_v31, %v1354_v32 }
 0x11a   : > { %10061 = vmatmul.mubr.msk.bf16.gmra.mxu0 %vm1718_vm8, %v11664_v43  ;;  %v1352_v12 = vpop.permute.xlu1 %1351 }
 0x11b   : > { %10064 = vmatprep.mubr.msk.bf16.mxu0 %vm1718_vm8, %v11669_v20  ;;  %v1609_v56 = vsel %vm1579_vm6, %v11280_v18, %v1352_v12 }
 0x11c   : > { %v1542_v10 = vpop.permute.xlu0 %1541 }
 0x11d   : > { %v11692_v49 = vsel %vm1648_vm7, %v1611_v59, %v1542_v10  ;;  %v15416_v10 = vld [vmem:[#allocation25_spill] sm:$0xff] }
 0x11e   : > { %v1540_v0 = vpop.permute.xlu1 %1539 }
 0x11f   : > { %v11683_v44 = vsel %vm1648_vm7, %v1609_v56, %v1540_v0 }
 0x120   : > { %v1358_v51 = vpop.permute.xlu0 %1357 }
 0x122   : > { %10065 = vmatmul.mubr.msk.bf16.gmra.mxu0 %vm1718_vm8, %v11678_v45  ;;  %v1356_v57 = vpop.permute.xlu1 %1355 }
 0x123   : > { %10068 = vmatprep.mubr.msk.bf16.mxu0 %vm1718_vm8, %v11683_v44  ;;  %v1613_v18 = vsel %vm1579_vm6, %v11307_v28, %v1356_v57  ;;  %v1615_v28 = vsel %vm1579_vm6, %v11312_v35, %v1358_v51 }
 0x124   : > { %v1546_v34 = vpop.permute.xlu0 %1545 }
 0x125   : > { %v11713_v26 = vsel %vm1648_vm7, %v1615_v28, %v1546_v34  ;;  %v15418_v34 = vld [vmem:[#allocation26_spill] sm:$0xff] }
 0x126   : > { %v1544_v27 = vpop.permute.xlu1 %1543 }
 0x127   : > { %v11697_v7 = vsel %vm1648_vm7, %v1613_v18, %v1544_v27 }
 0x128   : > { %v1378_v61 = vpop.permute.xlu0 %1377 }
 0x129   : > { %v1635_v47 = vsel %vm1579_vm6, %v11332_v62, %v1378_v61 }
 0x12a   : > { %10069 = vmatmul.mubr.msk.bf16.gmra.mxu0 %vm1718_vm8, %v11692_v49  ;;  %v1376_v3 = vpop.permute.xlu1 %1375 }
 0x12b   : > { %10072 = vmatprep.mubr.msk.bf16.mxu0 %vm1718_vm8, %v11697_v7  ;;  %v1633_v31 = vsel %vm1579_vm6, %v11336_v4, %v1376_v3 }
 0x12c   : > { %v1360_v33 = vpop.permute.xlu0 %1359 }
 0x12d   : > { %v1617_v39 = vsel %vm1579_vm6, %v11358_v53, %v1360_v33 }
 0x12e   : > { %v1564_v55 = vpop.permute.xlu1 %1563 }
 0x12f   : > { %v11706_v24 = vsel %vm1648_vm7, %v1633_v31, %v1564_v55 }
 0x130   : > { %10092 = vmatprep.mubr.msk.bf16.mxu1 %vm1718_vm8, %v11706_v24  ;;  %v1362_v8 = vpop.permute.xlu0 %1361 }
 0x131   : > { %v1619_v62 = vsel %vm1579_vm6, %v11371_v22, %v1362_v8 }
 0x132   : > { %10073 = vmatmul.mubr.msk.bf16.gmra.mxu0 %vm1718_vm8, %v11713_v26  ;;  %v1566_v4 = vpop.permute.xlu1 %1565 }
 0x133   : > { %v11720_v19 = vsel %vm1648_vm7, %v1635_v47, %v1566_v4 }
 0x134   : > { %10093 = vmatmul.mubr.msk.bf16.vlgmr.msra.gmra.mxu1 %vm1718_vm8, %v11720_v19  ;;  %v1550_v35 = vpop.permute.xlu0 %1549 }
 0x135   : > { %10113 = vmatpush3.bf16.msra.mxu1 %v11546_v37  ;;  %v11735_v41 = vsel %vm1648_vm7, %v1619_v62, %v1550_v35 }
 0x136   : > { %v1548_v13 = vpop.permute.xlu1 %1547 }
 0x137   : > { %v11728_v54 = vsel %vm1648_vm7, %v1617_v39, %v1548_v13 }
 0x138   : > { %10076 = vmatprep.mubr.msk.bf16.mxu0 %vm1718_vm8, %v11728_v54  ;;  %v1382_v46 = vpop.permute.xlu0 %1381 }
 0x139   : > { %v1639_v0 = vsel %vm1579_vm6, %v15416_v10, %v1382_v46 }
 0x13a   : > { %10077 = vmatmul.mubr.msk.bf16.gmra.mxu0 %vm1718_vm8, %v11735_v41  ;;  %v1380_v37 = vpop.permute.xlu1 %1379 }
 0x13b   : > { %v1637_v53 = vsel %vm1579_vm6, %v11398_v11, %v1380_v37  ;;  %v15417_v11 = vld [vmem:[#allocation27_spill] sm:$0xff] }
 0x13c   : > { %v1364_v32 = vpop.permute.xlu0 %1363 }
 0x13d   : > { %v1621_v27 = vsel %vm1579_vm6, %v15418_v34, %v1364_v32 }
 0x13e   : > { %v1568_v63 = vpop.permute.xlu1 %1567 }
 0x13f   : > { %v11742_v12 = vsel %vm1648_vm7, %v1637_v53, %v1568_v63 }
 0x140   : > { %10096 = vmatprep.mubr.msk.bf16.mxu1 %vm1718_vm8, %v11742_v12  ;;  %v1366_v22 = vpop.permute.xlu0 %1365 }
 0x141   : > { %v1623_v57 = vsel %vm1579_vm6, %v15417_v11, %v1366_v22 }
 0x142   : > { %v1570_v60 = vpop.permute.xlu1 %1569 }
 0x143   : > { %v11749_v51 = vsel %vm1648_vm7, %v1639_v0, %v1570_v60 }
 0x144   : > { %10097 = vmatmul.mubr.msk.bf16.gmra.mxu1 %vm1718_vm8, %v11749_v51  ;;  %v1554_v56 = vpop.permute.xlu0 %1553 }
 0x145   : > { %v11758_v59 = vsel %vm1648_vm7, %v1623_v57, %v1554_v56 }
 0x146   : > { %v1552_v61 = vpop.permute.xlu1 %1551 }
 0x147   : > { %v11761_v18 = vsel %vm1648_vm7, %v1621_v27, %v1552_v61  ;;  %v15421_v61 = vld [vmem:[#allocation21_spill] sm:$0xff] }
 0x148   : > { %10080 = vmatprep.mubr.msk.bf16.mxu0 %vm1718_vm8, %v11761_v18  ;;  %v1386_v3 = vpop.permute.xlu0 %1385 }
 0x149   : > { %10081 = vmatmul.mubr.msk.bf16.gmra.mxu0 %vm1718_vm8, %v11758_v59  ;;  %v1643_v4 = vsel %vm1579_vm6, %v11446_v14, %v1386_v3 }
 0x14a   : > { %v1384_v33 = vpop.permute.xlu1 %1383 }
 0x14b   : > { %v1641_v55 = vsel %vm1579_vm6, %v11450_v48, %v1384_v33 }
 0x14c   : > { %v1368_v31 = vpop.permute.xlu0 %1367 }
 0x14d   : > { %v1625_v62 = vsel %vm1579_vm6, %v11464_v5, %v1368_v31 }
 0x14e   : > { %v1572_v28 = vpop.permute.xlu1 %1571 }
 0x14f   : > { %v11770_v8 = vsel %vm1648_vm7, %v1641_v55, %v1572_v28 }
 0x150   : > { %10100 = vmatprep.mubr.msk.bf16.mxu1 %vm1718_vm8, %v11770_v8  ;;  %v1370_v47 = vpop.permute.xlu0 %1369 }
 0x151   : > { %v1627_v48 = vsel %vm1579_vm6, %v11482_v23, %v1370_v47 }
 0x152   : > { %v1574_v35 = vpop.permute.xlu1 %1573 }
 0x153   : > { %v11777_v39 = vsel %vm1648_vm7, %v1643_v4, %v1574_v35 }
 0x154   : > { %10101 = vmatmul.mubr.msk.bf16.gmra.mxu1 %vm1718_vm8, %v11777_v39  ;;  %v1558_v13 = vpop.permute.xlu0 %1557 }
 0x155   : > { %v11786_v46 = vsel %vm1648_vm7, %v1627_v48, %v1558_v13 }
 0x156   : > { %v1556_v37 = vpop.permute.xlu1 %1555 }
 0x157   : > { %v11789_v14 = vsel %vm1648_vm7, %v1625_v62, %v1556_v37 }
 0x158   : > { %10084 = vmatprep.mubr.msk.bf16.mxu0 %vm1718_vm8, %v11789_v14  ;;  %v1390_v32 = vpop.permute.xlu0 %1389 }
 0x159   : > { %10085 = vmatmul.mubr.msk.bf16.gmra.mxu0 %vm1718_vm8, %v11786_v46  ;;  %v1647_v0 = vsel %vm1579_vm6, %v11509_v40, %v1390_v32 }
 0x15a   : > { %v1388_v53 = vpop.permute.xlu1 %1387 }
 0x15b   : > { %v1645_v23 = vsel %vm1579_vm6, %v11513_v25, %v1388_v53 }
 0x15c   : > { %v1372_v63 = vpop.permute.xlu0 %1371 }
 0x15d   : > { %v1629_v57 = vsel %vm1579_vm6, %v11535_v30, %v1372_v63 }
 0x15e   : > { %v1576_v5 = vpop.permute.xlu1 %1575 }
 0x15f   : > { %v11798_v22 = vsel %vm1648_vm7, %v1645_v23, %v1576_v5 }
 0x160   : > { %10104 = vmatprep.mubr.msk.bf16.mxu1 %vm1718_vm8, %v11798_v22  ;;  %v1374_v10 = vpop.permute.xlu0 %1373 }
 0x161   : > { %v1631_v25 = vsel %vm1579_vm6, %v11550_v42, %v1374_v10 }
 0x162   : > { %v1578_v60 = vpop.permute.xlu1 %1577 }
 0x163   : > { %v11805_v56 = vsel %vm1648_vm7, %v1647_v0, %v1578_v60 }
 0x164   : > { %10105 = vmatmul.mubr.msk.bf16.gmra.mxu1 %vm1718_vm8, %v11805_v56  ;;  %v1562_v11 = vpop.permute.xlu0 %1561 }
 0x165   : > { %10108 = vmatprep.mubr.msk.bf16.mxu1 %vm1718_vm8, %v11564_v38  ;;  %v11816_v34 = vsel %vm1648_vm7, %v1631_v25, %v1562_v11 }
 0x166   : > { %v1560_v40 = vpop.permute.xlu1 %1559 }
 0x167   : > { %v11819_v27 = vsel %vm1648_vm7, %v1629_v57, %v1560_v40 }
 0x168   : > { %10088 = vmatprep.mubr.msk.bf16.mxu0 %vm1718_vm8, %v11819_v27 }
 0x169   : > { %10089 = vmatmul.mubr.msk.bf16.gmra.mxu0 %vm1718_vm8, %v11816_v34 }
 0x16a   : > { %10188 = vmatprep.mubr.msk.bf16.mxu0 %vm1718_vm8, %v11564_v38 }
 0x16c   : > { %10109 = vmatmul.mubr.msk.bf16.gmra.mxu1 %vm1718_vm8, %v11569_v58 }
 0x16d   : > { %10114 = vmatprep.mubr.msk.bf16.mxu1 %vm1718_vm8, %v11564_v38 }
 0x171   : > { %10189 = vmatmul.mubr.msk.bf16.vlgmr.msra.gmra.mxu0 %vm1718_vm8, %v11569_v58 }
 0x172   : > { %10192 = vmatprep.mubr.msk.bf16.mxu0 %vm1718_vm8, %v11603_v16 }
 0x174   : > { %10115 = vmatmul.mubr.msk.bf16.vlgmr.msra.gmra.mxu1 %vm1718_vm8, %v11569_v58 }
 0x175   : > { %10118 = vmatprep.mubr.msk.bf16.mxu1 %vm1718_vm8, %v11603_v16 }
 0x179   : > { %10193 = vmatmul.mubr.msk.bf16.gmra.mxu0 %vm1718_vm8, %v11608_v21 }
 0x17a   : > { %10196 = vmatprep.mubr.msk.bf16.mxu0 %vm1718_vm8, %v11615_v52 }
 0x17c   : > { %10119 = vmatmul.mubr.msk.bf16.gmra.mxu1 %vm1718_vm8, %v11608_v21 }
 0x17d   : > { %10122 = vmatprep.mubr.msk.bf16.mxu1 %vm1718_vm8, %v11615_v52 }
 0x181   : > { %10197 = vmatmul.mubr.msk.bf16.gmra.mxu0 %vm1718_vm8, %v11624_v9 }
 0x182   : > { %10200 = vmatprep.mubr.msk.bf16.mxu0 %vm1718_vm8, %v11629_v36 }
 0x184   : > { %10123 = vmatmul.mubr.msk.bf16.gmra.mxu1 %vm1718_vm8, %v11624_v9 }
 0x185   : > { %10126 = vmatprep.mubr.msk.bf16.mxu1 %vm1718_vm8, %v11629_v36 }
 0x189   : > { %10201 = vmatmul.mubr.msk.bf16.gmra.mxu0 %vm1718_vm8, %v11636_v50 }
 0x18a   : > { %10204 = vmatprep.mubr.msk.bf16.mxu0 %vm1718_vm8, %v11641_v17 }
 0x18c   : > { %10127 = vmatmul.mubr.msk.bf16.gmra.mxu1 %vm1718_vm8, %v11636_v50 }
 0x18d   : > { %10130 = vmatprep.mubr.msk.bf16.mxu1 %vm1718_vm8, %v11641_v17  ;;  %v10632_v17 = vld [vmem:[%s15342_s4 + $0x28] sm:$0xff]  }
 0x18e   : > { %10260 = vmatprep.subr.bf16.mxu1 %v10632_v17 }
 0x18f   : > { %10261 = vmatpush3.bf16.msra.mxu1 %v10632_v17 }
 0x191   : > { %10205 = vmatmul.mubr.msk.bf16.gmra.mxu0 %vm1718_vm8, %v11650_v29 }
 0x192   : > { %10208 = vmatprep.mubr.msk.bf16.mxu0 %vm1718_vm8, %v11655_v15 }
 0x194   : > { %10131 = vmatmul.mubr.msk.bf16.gmra.mxu1 %vm1718_vm8, %v11650_v29 }
 0x195   : > { %10134 = vmatprep.mubr.msk.bf16.mxu1 %vm1718_vm8, %v11655_v15 }
 0x199   : > { %10209 = vmatmul.mubr.msk.bf16.gmra.mxu0 %vm1718_vm8, %v11664_v43 }
 0x19a   : > { %10212 = vmatprep.mubr.msk.bf16.mxu0 %vm1718_vm8, %v11669_v20 }
 0x19c   : > { %10135 = vmatmul.mubr.msk.bf16.gmra.mxu1 %vm1718_vm8, %v11664_v43 }
 0x19d   : > { %10138 = vmatprep.mubr.msk.bf16.mxu1 %vm1718_vm8, %v11669_v20 }
 0x1a1   : > { %10213 = vmatmul.mubr.msk.bf16.gmra.mxu0 %vm1718_vm8, %v11678_v45 }
 0x1a2   : > { %10216 = vmatprep.mubr.msk.bf16.mxu0 %vm1718_vm8, %v11683_v44 }
 0x1a4   : > { %10139 = vmatmul.mubr.msk.bf16.gmra.mxu1 %vm1718_vm8, %v11678_v45 }
 0x1a5   : > { %10142 = vmatprep.mubr.msk.bf16.mxu1 %vm1718_vm8, %v11683_v44 }
 0x1a7   : > { %v11891_v30 = vpop.f32.mrf.mxu0 }
 0x1a9   : > { %10217 = vmatmul.mubr.msk.bf16.gmra.mxu0 %vm1718_vm8, %v11692_v49  ;;  %v11897_v42 = vpop.f32.mrf.mxu0 }
 0x1aa   : > { %10220 = vmatprep.mubr.msk.bf16.mxu0 %vm1718_vm8, %v11697_v7 }
 0x1ab   : > { %v11903_v16 = vpop.f32.mrf.mxu0 }
 0x1ac   : > { %10143 = vmatmul.mubr.msk.bf16.gmra.mxu1 %vm1718_vm8, %v11692_v49 }
 0x1ad   : > { %10146 = vmatprep.mubr.msk.bf16.mxu1 %vm1718_vm8, %v11697_v7  ;;  %v11909_v21 = vpop.f32.mrf.mxu0 }
 0x1b1   : > { %10221 = vmatmul.mubr.msk.bf16.gmra.mxu0 %vm1718_vm8, %v11713_v26 }
 0x1b2   : > { %10224 = vmatprep.mubr.msk.bf16.mxu0 %vm1718_vm8, %v11728_v54 }
 0x1b4   : > { %10147 = vmatmul.mubr.msk.bf16.gmra.mxu1 %vm1718_vm8, %v11713_v26  ;;  %v15419_v26 = vld [vmem:[#allocation24_spill] sm:$0xff] }
 0x1b5   : > { %10150 = vmatprep.mubr.msk.bf16.mxu1 %vm1718_vm8, %v11728_v54  ;;  %3733 = vrot.lane.b32.xlu1 %v15419_v26, %s10883_s18  ;;  %v15420_v54 = vld [vmem:[#allocation22_spill] sm:$0xff] }
 0x1b6   : > { %3735 = vrot.lane.b32.xlu0 %v15420_v54, %s10883_s18 }
 0x1b9   : > { %10225 = vmatmul.mubr.msk.bf16.gmra.mxu0 %vm1718_vm8, %v11735_v41  ;;  %10596 = vrot.lane.b32.xlu1 %v15421_v61, %s10884_s20 }
 0x1ba   : > { %v11913_v52 = vpop.f32.mrf.mxu0  ;;  %10228 = vmatprep.mubr.msk.bf16.mxu0 %vm1718_vm8, %v11761_v18 }
 0x1bc   : > { %v11917_v9 = vpop.f32.mrf.mxu0  ;;  %10151 = vmatmul.mubr.msk.bf16.gmra.mxu1 %vm1718_vm8, %v11735_v41 }
 0x1bd   : > { %10154 = vmatprep.mubr.msk.bf16.mxu1 %vm1718_vm8, %v11761_v18 }
 0x1be   : > { %v11923_v36 = vpop.f32.mrf.mxu0 }
 0x1c0   : > { %v11925_v50 = vpop.f32.mrf.mxu0 }
 0x1c1   : > { %10229 = vmatmul.mubr.msk.bf16.gmra.mxu0 %vm1718_vm8, %v11758_v59 }
 0x1c2   : > { %v11932_v29 = vpop.f32.mrf.mxu0  ;;  %10232 = vmatprep.mubr.msk.bf16.mxu0 %vm1718_vm8, %v11789_v14 }
 0x1c4   : > { %v11936_v15 = vpop.f32.mrf.mxu0  ;;  %10155 = vmatmul.mubr.msk.bf16.gmra.mxu1 %vm1718_vm8, %v11758_v59 }
 0x1c5   : > { %10158 = vmatprep.mubr.msk.bf16.mxu1 %vm1718_vm8, %v11789_v14 }
 0x1c6   : > { %v11942_v43 = vpop.f32.mrf.mxu0 }
 0x1c8   : > { %v11944_v20 = vpop.f32.mrf.mxu0 }
 0x1c9   : > { %10233 = vmatmul.mubr.msk.bf16.gmra.mxu0 %vm1718_vm8, %v11786_v46 }
 0x1ca   : > { %v11948_v45 = vpop.f32.mrf.mxu0  ;;  %10236 = vmatprep.mubr.msk.bf16.mxu0 %vm1718_vm8, %v11819_v27 }
 0x1cc   : > { %v11952_v44 = vpop.f32.mrf.mxu0  ;;  %10159 = vmatmul.mubr.msk.bf16.gmra.mxu1 %vm1718_vm8, %v11786_v46 }
 0x1cd   : > { %10162 = vmatprep.mubr.msk.bf16.mxu1 %vm1718_vm8, %v11819_v27 }
 0x1ce   : > { %v11958_v49 = vpop.f32.mrf.mxu0 }
 0x1d0   : > { %v11960_v7 = vpop.f32.mrf.mxu0 }
 0x1d1   : > { %10237 = vmatmul.mubr.msk.bf16.gmra.mxu0 %vm1718_vm8, %v11816_v34 }
 0x1d2   : > { %v11968_v41 = vpop.f32.mrf.mxu0  ;;  %10240 = vmatprep.mubr.msk.bf16.mxu0 %vm1718_vm8, %v11706_v24 }
 0x1d4   : > { %v11972_v59 = vpop.f32.mrf.mxu0  ;;  %10163 = vmatmul.mubr.msk.bf16.gmra.mxu1 %vm1718_vm8, %v11816_v34 }
 0x1d5   : > { %10166 = vmatprep.mubr.msk.bf16.mxu1 %vm1718_vm8, %v11706_v24 }
 0x1d6   : > { %v11980_v18 = vpop.f32.mrf.mxu0 }
 0x1d8   : > { %v11982_v3 = vpop.f32.mrf.mxu0 }
 0x1d9   : > { %10241 = vmatmul.mubr.msk.bf16.gmra.mxu0 %vm1718_vm8, %v11720_v19 }
 0x1da   : > { %v11986_v33 = vpop.f32.mrf.mxu0  ;;  %10244 = vmatprep.mubr.msk.bf16.mxu0 %vm1718_vm8, %v11742_v12 }
 0x1dc   : > { %v11990_v31 = vpop.f32.mrf.mxu0  ;;  %10167 = vmatmul.mubr.msk.bf16.gmra.mxu1 %vm1718_vm8, %v11720_v19 }
 0x1dd   : > { %10170 = vmatprep.mubr.msk.bf16.mxu1 %vm1718_vm8, %v11742_v12  ;;  %v10633_v12 = vld [vmem:[%s15342_s4 + $0x20] sm:$0xff]  }
 0x1de   : > { %v11996_v24 = vpop.f32.mrf.mxu0  ;;  %10262 = vmatprep.subr.bf16.mxu1 %v10633_v12 }
 0x1df   : > { %10263 = vmatpush3.bf16.msra.mxu1 %v10633_v12 }
 0x1e0   : > { %v11998_v55 = vpop.f32.mrf.mxu0 }
 0x1e1   : > { %10245 = vmatmul.mubr.msk.bf16.gmra.mxu0 %vm1718_vm8, %v11749_v51 }
 0x1e2   : > { %v12002_v28 = vpop.f32.mrf.mxu0  ;;  %10248 = vmatprep.mubr.msk.bf16.mxu0 %vm1718_vm8, %v11770_v8 }
 0x1e4   : > { %v12006_v47 = vpop.f32.mrf.mxu0  ;;  %10171 = vmatmul.mubr.msk.bf16.gmra.mxu1 %vm1718_vm8, %v11749_v51 }
 0x1e5   : > { %10174 = vmatprep.mubr.msk.bf16.mxu1 %vm1718_vm8, %v11770_v8 }
 0x1e6   : > { %v12012_v19 = vpop.f32.mrf.mxu0 }
 0x1e8   : > { %v12017_v4 = vpop.f32.mrf.mxu0 }
 0x1e9   : > { %10249 = vmatmul.mubr.msk.bf16.gmra.mxu0 %vm1718_vm8, %v11777_v39 }
 0x1ea   : > { %v12021_v35 = vpop.f32.mrf.mxu0  ;;  %10252 = vmatprep.mubr.msk.bf16.mxu0 %vm1718_vm8, %v11798_v22 }
 0x1ec   : > { %v12025_v51 = vpop.f32.mrf.mxu0  ;;  %10175 = vmatmul.mubr.msk.bf16.gmra.mxu1 %vm1718_vm8, %v11777_v39 }
 0x1ed   : > { %10178 = vmatprep.mubr.msk.bf16.mxu1 %vm1718_vm8, %v11798_v22  ;;  %v10634_v22 = vld [vmem:[%s15342_s4 + $0x18] sm:$0xff]  }
 0x1ee   : > { %v12031_v8 = vpop.f32.mrf.mxu0  ;;  %10264 = vmatprep.subr.bf16.mxu1 %v10634_v22 }
 0x1ef   : > { %10265 = vmatpush3.bf16.msra.mxu1 %v10634_v22 }
 0x1f0   : > { %v12033_v13 = vpop.f32.mrf.mxu0 }
 0x1f1   : > { %10253 = vmatmul.mubr.msk.bf16.gmra.mxu0 %vm1718_vm8, %v11805_v56 }
 0x1f2   : > { %v12037_v48 = vpop.f32.mrf.mxu0  ;;  %10256 = vmatprep.mubr.msk.bf16.mxu0 %vm1718_vm8, %v11564_v38 }
 0x1f4   : > { %v12041_v62 = vpop.f32.mrf.mxu0  ;;  %10179 = vmatmul.mubr.msk.bf16.gmra.mxu1 %vm1718_vm8, %v11805_v56  ;;  %v12051_v46 = vpop.f32.mrf.mxu1 }
 0x1f5   : > { %10182 = vmatprep.mubr.msk.bf16.mxu1 %vm1718_vm8, %v11564_v38  ;;  %15422 = vst [vmem:[#allocation25_spill] sm:$0xff] %v12051_v46 }
 0x1f6   : > { %v12047_v39 = vpop.f32.mrf.mxu0  ;;  %v12057_v14 = vpop.f32.mrf.mxu1 }
 0x1f7   : > { %15423 = vst [vmem:[#allocation27_spill] sm:$0xff] %v12057_v14 }
 0x1f8   : > { %v12053_v37 = vpop.f32.mrf.mxu0  ;;  %v12061_v53 = vpop.f32.mrf.mxu1 }
 0x1f9   : > { %10257 = vmatmul.mubr.msk.bf16.gmra.mxu0 %vm1718_vm8, %v11569_v58  ;;  %15424 = vst [vmem:[#allocation26_spill] sm:$0xff] %v12061_v53 }
 0x1fa   : > { %v12059_v32 = vpop.f32.mrf.mxu0  ;;  %v12065_v38 = vpop.f32.mrf.mxu1 }
 0x1fb   : > { %15425 = vst [vmem:[#allocation24_spill] sm:$0xff] %v12065_v38 }
 0x1fc   : > { %10183 = vmatmul.mubr.msk.bf16.gmra.mxu1 %vm1718_vm8, %v11569_v58  ;;  %v12063_v63 = vpop.f32.mrf.mxu0 }
 0x1fe   : > { %v12067_v23 = vpop.f32.mrf.mxu0 }
 0x200   : > { %v12074_v10 = vpop.f32.mrf.mxu0 }
 0x201   : > { %15427 = vst [vmem:[#allocation21_spill] sm:$0xff] %v12074_v10 }
 0x204   : > { %v12069_v5 = vpop.f32.mrf.mxu1 }
 0x205   : > { %15426 = vst [vmem:[#allocation22_spill] sm:$0xff] %v12069_v5 }
 0x206   : > { %v12076_v58 = vpop.f32.mrf.mxu1 }
 0x207   : > { %15428 = vst [vmem:[#allocation28_spill] sm:$0xff] %v12076_v58 }
 0x208   : > { %v12080_v60 = vpop.f32.mrf.mxu1 }
 0x209   : > { %v12078_v0 = vpop.f32.mrf.mxu0  ;;  %15430 = vst [vmem:[#allocation30_spill] sm:$0xff] %v12080_v60 }
 0x20a   : > { %15429 = vst [vmem:[#allocation29_spill] sm:$0xff] %v12078_v0  ;;  %v12084_v11 = vpop.f32.mrf.mxu1 }
 0x20b   : > { %v12082_v56 = vpop.f32.mrf.mxu0  ;;  %15432 = vst [vmem:[#allocation32_spill] sm:$0xff] %v12084_v11 }
 0x20c   : > { %15431 = vst [vmem:[#allocation31_spill] sm:$0xff] %v12082_v56 }
 0x20d   : > { %v12086_v25 = vpop.f32.mrf.mxu0 }
 0x20e   : > { %15433 = vst [vmem:[#allocation33_spill] sm:$0xff] %v12086_v25 }
 0x20f   : > { %v12090_v34 = vpop.f32.mrf.mxu0 }
 0x210   : > { %15435 = vst [vmem:[#allocation35_spill] sm:$0xff] %v12090_v34 }
 0x214   : > { %v12088_v57 = vpop.f32.mrf.mxu1 }
 0x215   : > { %15434 = vst [vmem:[#allocation34_spill] sm:$0xff] %v12088_v57 }
 0x216   : > { %v12092_v40 = vpop.f32.mrf.mxu1 }
 0x217   : > { %15436 = vst [vmem:[#allocation36_spill] sm:$0xff] %v12092_v40 }
 0x218   : > { %v12096_v17 = vpop.f32.mrf.mxu1 }
 0x219   : > { %v12094_v27 = vpop.f32.mrf.mxu0  ;;  %15438 = vst [vmem:[#allocation38_spill] sm:$0xff] %v12096_v17 }
 0x21a   : > { %15437 = vst [vmem:[#allocation37_spill] sm:$0xff] %v12094_v27  ;;  %v12100_v54 = vpop.f32.mrf.mxu1 }
 0x21b   : > { %v12098_v26 = vpop.f32.mrf.mxu0  ;;  %15440 = vst [vmem:[#allocation40_spill] sm:$0xff] %v12100_v54 }
 0x21c   : > { %15439 = vst [vmem:[#allocation39_spill] sm:$0xff] %v12098_v26 }
 0x21d   : > { %v12102_v61 = vpop.f32.mrf.mxu0 }
 0x21e   : > { %15441 = vst [vmem:[#allocation41_spill] sm:$0xff] %v12102_v61 }
 0x21f   : > { %v12104_v1 = vpop.f32.mrf.mxu0 }
 0x220   : > { %15442 = vst [vmem:[#allocation42_spill] sm:$0xff] %v12104_v1 }
 0x224   : > { %v10106_v12 = vpop.f32.mrf.mxu1 }
 0x225   : > { %v10635_v12 = vld [vmem:[%s15342_s4 + $0x10] sm:$0xff]  }
 0x226   : > { %v2084_v22 = vpop.f32.mrf.mxu1  ;;  %10266 = vmatprep.subr.bf16.mxu1 %v10635_v12 }
 0x227   : > { %10267 = vmatpush3.bf16.msra.mxu1 %v10635_v12 }
 0x228   : > { %v10107_v6 = vpop.f32.mrf.mxu1 }
 0x229   : > { %v12106_v57 = vpop.f32.mrf.mxu0 }
 0x22a   : > { %15443 = vst [vmem:[#allocation43_spill] sm:$0xff] %v12106_v57  ;;  %v2086_v11 = vpop.f32.mrf.mxu1 }
 0x22b   : > { %v12108_v60 = vpop.f32.mrf.mxu0 }
 0x22c   : > { %15444 = vst [vmem:[#allocation44_spill] sm:$0xff] %v12108_v60  ;;  %v10110_v40 = vpop.f32.mrf.mxu1 }
 0x22d   : > { %v12110_v58 = vpop.f32.mrf.mxu0 }
 0x22e   : > { %15445 = vst [vmem:[#allocation45_spill] sm:$0xff] %v12110_v58  ;;  %v2096_v17 = vpop.f32.mrf.mxu1 }
 0x22f   : > { %v12112_v5 = vpop.f32.mrf.mxu0 }
 0x230   : > { %15446 = vst [vmem:[#allocation46_spill] sm:$0xff] %v12112_v5  ;;  %v10111_v38 = vpop.f32.mrf.mxu1 }
 0x231   : > { %v10190_v22 = vpop.f32.mrf.mxu0 }
 0x232   : > { %v2098_v54 = vpop.f32.mrf.mxu1  ;;  %v12118_v22 = vld [vmem:[#allocation2] ss:$0 sm:$0xff] }
 0x233   : > { %v2528_v6 = vpop.f32.mrf.mxu0 }
 0x234   : > { %v10116_v53 = vpop.f32.mrf.mxu1 }
 0x235   : > { %v10191_v11 = vpop.f32.mrf.mxu0 }
 0x236   : > { %v2146_v14 = vpop.f32.mrf.mxu1 }
 0x237   : > { %v2530_v46 = vpop.f32.mrf.mxu0 }
 0x238   : > { %v10117_v40 = vpop.f32.mrf.mxu1 }
 0x239   : > { %v10194_v60 = vpop.f32.mrf.mxu0 }
 0x23a   : > { %v2148_v58 = vpop.f32.mrf.mxu1  ;;  %v12122_v60 = vld [vmem:[#allocation4] ss:$0 sm:$0xff] }
 0x23b   : > { %v2540_v17 = vpop.f32.mrf.mxu0 }
 0x23c   : > { %v10120_v57 = vpop.f32.mrf.mxu1 }
 0x23d   : > { %v10195_v5 = vpop.f32.mrf.mxu0  ;;  %v2427_v61 = vadd.f32 %v10120_v57, %v11891_v30 }
 0x23e   : > { %v2158_v38 = vpop.f32.mrf.mxu1 }
 0x23f   : > { %v2542_v1 = vpop.f32.mrf.mxu0  ;;  %v2425_v12 = vadd.f32 %v2158_v38, %v11897_v42 }
 0x240   : > { %v10121_v26 = vpop.f32.mrf.mxu1 }
 0x241   : > { %v10198_v54 = vpop.f32.mrf.mxu0  ;;  %v2428_v46 = vadd.f32 %v10121_v26, %v11903_v16 }
 0x242   : > { %v2809_v53 = vadd.f32 %v10198_v54, %v2427_v61  ;;  %v2161_v6 = vpop.f32.mrf.mxu1 }
 0x243   : > { %v2552_v14 = vpop.f32.mrf.mxu0  ;;  %v2426_v30 = vadd.f32 %v2161_v6, %v11909_v21 }
 0x244   : > { %v2879_v58 = vmul.f32 %v12118_v22, %v2809_v53  ;;  %v2807_v5 = vadd.f32 %v2552_v14, %v2425_v12  ;;  %v10124_v11 = vpop.f32.mrf.mxu1 }
 0x245   : > { %v10199_v1 = vpop.f32.mrf.mxu0  ;;  %v2431_v38 = vadd.f32 %v10124_v11, %v11913_v52 }
 0x246   : > { %v2877_v57 = vmul.f32 %v12118_v22, %v2807_v5  ;;  %v2810_v40 = vadd.f32 %v10199_v1, %v2428_v46  ;;  %v2174_v17 = vpop.f32.mrf.mxu1  ;;  %v2949_v42 = vadd.f32 %v12122_v60, %v2879_v58 }
 0x247   : > { %v2555_v61 = vpop.f32.mrf.mxu0  ;;  %v2429_v53 = vadd.f32 %v2174_v17, %v11917_v9 }
 0x248   : > { %v2880_v16 = vmul.f32 %v12118_v22, %v2810_v40  ;;  %v2808_v26 = vadd.f32 %v2555_v61, %v2426_v30  ;;  %v10125_v54 = vpop.f32.mrf.mxu1  ;;  %v2947_v14 = vadd.f32 %v12122_v60, %v2877_v57  ;;  %v3013_v1 = vmax.f32 %v2949_v42, 0.0 }
 0x249   : > { %v10202_v12 = vpop.f32.mrf.mxu0  ;;  %v2432_v9 = vadd.f32 %v10125_v54, %v11923_v36 }
 0x24a   : > { %v2950_v21 = vadd.f32 %v12122_v60, %v2880_v16  ;;  %v2878_v6 = vmul.f32 %v12118_v22, %v2808_v26  ;;  %v2813_v46 = vadd.f32 %v10202_v12, %v2431_v38  ;;  %v2177_v5 = vpop.f32.mrf.mxu1  ;;  %v3011_v61 = vmax.f32 %v2947_v14, 0.0 }
 0x24b   : > { %v2568_v58 = vpop.f32.mrf.mxu0  ;;  %v2430_v42 = vadd.f32 %v2177_v5, %v11925_v50 }
 0x24c   : > { %v3014_v27 = vmax.f32 %v2950_v21, 0.0  ;;  %v2948_v52 = vadd.f32 %v12122_v60, %v2878_v6  ;;  %v2883_v11 = vmul.f32 %v12118_v22, %v2813_v46  ;;  %v2811_v30 = vadd.f32 %v2568_v58, %v2429_v53  ;;  %v10128_v40 = vpop.f32.mrf.mxu1 }
 0x24d   : > { %v10203_v17 = vpop.f32.mrf.mxu0  ;;  %v2435_v53 = vadd.f32 %v10128_v40, %v11932_v29 }
 0x24e   : > { %v3078_v57 = vpack.c.bf16 %v3014_v27, %v3013_v1  ;;  %v3012_v34 = vmax.f32 %v2948_v52, 0.0  ;;  %v2881_v16 = vmul.f32 %v12118_v22, %v2811_v30  ;;  %v2190_v26 = vpop.f32.mrf.mxu1  ;;  %v2953_v38 = vadd.f32 %v12122_v60, %v2883_v11 }
 0x24f   : > { %v2814_v12 = vadd.f32 %v10203_v17, %v2432_v9  ;;  %v2571_v21 = vpop.f32.mrf.mxu0  ;;  %v2433_v52 = vadd.f32 %v2190_v26, %v11936_v15 }
 0x250   : > { %v3117_v6 = vshrl.u32 %v3078_v57, 16  ;;  %v3077_v25 = vpack.c.bf16 %v3012_v34, %v3011_v61  ;;  %v10129_v46 = vpop.f32.mrf.mxu1  ;;  %v2951_v36 = vadd.f32 %v12122_v60, %v2881_v16  ;;  %v2812_v27 = vadd.f32 %v2571_v21, %v2430_v42 }
 0x251   : > { %v2884_v54 = vmul.f32 %v12118_v22, %v2814_v12  ;;  %v10206_v14 = vpop.f32.mrf.mxu0  ;;  %v3120_v50 = vshll.u32 %v3078_v57, 16  ;;  %v3017_v5 = vmax.f32 %v2953_v38, 0.0  ;;  %v2436_v17 = vadd.f32 %v10129_v46, %v11942_v43  ;;  %v10636_v57 = vld [vmem:[%s15342_s4 + $0x8] sm:$0xff]  }
 0x252   : > { %v3119_v1 = vrot.slane %v3117_v6, 7  ;;  %v3110_v58 = vshrl.u32 %v3077_v25, 16  ;;  %v2817_v11 = vadd.f32 %v10206_v14, %v2435_v53  ;;  %v2193_v30 = vpop.f32.mrf.mxu1  ;;  %v2882_v34 = vmul.f32 %v12118_v22, %v2812_v27  ;;  %10268 = vmatprep.subr.bf16.mxu1 %v10636_v57 }
 0x253   : > { %v2954_v9 = vadd.f32 %v12122_v60, %v2884_v54  ;;  %v2584_v29 = vpop.f32.mrf.mxu0  ;;  %v3113_v12 = vshll.u32 %v3077_v25, 16  ;;  %v3015_v21 = vmax.f32 %v2951_v36, 0.0  ;;  %v2434_v53 = vadd.f32 %v2193_v30, %v11944_v20  ;;  %10269 = vmatpush3.bf16.msra.mxu1 %v10636_v57 }
 0x254   : > { %v3112_v40 = vrot.slane %v3110_v58, 7  ;;  %v2887_v61 = vmul.f32 %v12118_v22, %v2817_v11  ;;  %v2815_v16 = vadd.f32 %v2584_v29, %v2433_v52  ;;  %v10132_v42 = vpop.f32.mrf.mxu1  ;;  %v2952_v15 = vadd.f32 %v12122_v60, %v2882_v34 }
 0x255   : > { %v3018_v6 = vmax.f32 %v2954_v9, 0.0  ;;  %v10207_v26 = vpop.f32.mrf.mxu0  ;;  %v3122_v38 = vor.u32 %v3120_v50, %v3119_v1  ;;  %v2439_v36 = vadd.f32 %v10132_v42, %v11948_v45  ;;  %v12161_v20 = vsel %vm11059_vm2, %v3119_v1, 0 }
 0x256   : > { %v2885_v54 = vmul.f32 %v12118_v22, %v2815_v16  ;;  %v2818_v43 = vadd.f32 %v10207_v26, %v2436_v17  ;;  %v2206_v46 = vpop.f32.mrf.mxu1  ;;  %v3016_v14 = vmax.f32 %v2952_v15, 0.0  ;;  %v2957_v25 = vadd.f32 %v12122_v60, %v2887_v61 }
 0x257   : > { %v3080_v27 = vpack.c.bf16 %v3018_v6, %v3017_v5  ;;  %v2587_v58 = vpop.f32.mrf.mxu0  ;;  %v12156_v52 = vor.u32 %v3113_v12, %v3112_v40  ;;  %v2437_v29 = vadd.f32 %v2206_v46, %v11952_v44  ;;  %v12168_v12 = vsel %vm663_vm0, %v3112_v40, %v3122_v38 }
 0x258   : > { %v2888_v11 = vmul.f32 %v12118_v22, %v2818_v43  ;;  %v2816_v9 = vadd.f32 %v2587_v58, %v2434_v53  ;;  %v10133_v50 = vpop.f32.mrf.mxu1  ;;  %v3079_v5 = vpack.c.bf16 %v3016_v14, %v3015_v21  ;;  %v2955_v34 = vadd.f32 %v12122_v60, %v2885_v54  ;;  %15447 = vst [vmem:[#allocation47_spill] sm:$0xff] %v12168_v12 }
 0x259   : > { %v3132_v30 = vshrl.u32 %v3080_v27, 16  ;;  %v10210_v45 = vpop.f32.mrf.mxu0  ;;  %v3135_v1 = vshll.u32 %v3080_v27, 16  ;;  %v3021_v26 = vmax.f32 %v2957_v25, 0.0  ;;  %v3421_v38 = vshll.u32 %v12168_v12, 16 }
 0x25a   : > { %v2958_v17 = vadd.f32 %v12122_v60, %v2888_v11  ;;  %v2886_v61 = vmul.f32 %v12118_v22, %v2816_v9  ;;  %v2821_v16 = vadd.f32 %v10210_v45, %v2439_v36  ;;  %v2209_v42 = vpop.f32.mrf.mxu1  ;;  %v3125_v15 = vshrl.u32 %v3079_v5, 16 }
 0x25b   : > { %v12170_v6 = vrot.slane %v3132_v30, 7  ;;  %v2600_v21 = vpop.f32.mrf.mxu0  ;;  %v3019_v14 = vmax.f32 %v2955_v34, 0.0  ;;  %v2440_v36 = vadd.f32 %v10133_v50, %v11958_v49  ;;  %v3128_v58 = vshll.u32 %v3079_v5, 16 }
 0x25c   : > { %v3022_v57 = vmax.f32 %v2958_v17, 0.0  ;;  %v2956_v53 = vadd.f32 %v12122_v60, %v2886_v61  ;;  %v2891_v44 = vmul.f32 %v12118_v22, %v2821_v16  ;;  %v2819_v54 = vadd.f32 %v2600_v21, %v2437_v29  ;;  %v10136_v43 = vpop.f32.mrf.mxu1 }
 0x25d   : > { %v12174_v46 = vrot.slane %v3125_v15, 7  ;;  %v10211_v40 = vpop.f32.mrf.mxu0  ;;  %v12180_v30 = vor.u32 %v3135_v1, %v12170_v6  ;;  %v2438_v29 = vadd.f32 %v2209_v42, %v11960_v7  ;;  %v12183_v17 = vrot.slane %v3421_v38, 1 }
 0x25e   : > { %v3082_v27 = vpack.c.bf16 %v3022_v57, %v3021_v26  ;;  %v3020_v11 = vmax.f32 %v2956_v53, 0.0  ;;  %v2889_v25 = vmul.f32 %v12118_v22, %v2819_v54  ;;  %v2222_v9 = vpop.f32.mrf.mxu1  ;;  %v2822_v45 = vadd.f32 %v10211_v40, %v2440_v36 }
 0x25f   : > { %v2603_v34 = vpop.f32.mrf.mxu0  ;;  %v2961_v50 = vadd.f32 %v12122_v60, %v2891_v44  ;;  %v2443_v5 = vadd.f32 %v10136_v43, %v11968_v41  ;;  %v12188_v15 = vor.u32 %v3128_v58, %v12174_v46  ;;  %v3425_v1 = vshrl.u32 %v12168_v12, 16 }
 0x260   : > { %v3147_v61 = vshrl.u32 %v3082_v27, 16  ;;  %v3081_v49 = vpack.c.bf16 %v3020_v11, %v3019_v14  ;;  %v10137_v16 = vpop.f32.mrf.mxu1  ;;  %v2892_v26 = vmul.f32 %v12118_v22, %v2822_v45  ;;  %v3429_v7 = vshll.u32 %v12161_v20, 16 }
 0x261   : > { %v10214_v42 = vpop.f32.mrf.mxu0  ;;  %v2959_v57 = vadd.f32 %v12122_v60, %v2889_v25  ;;  %v2441_v53 = vadd.f32 %v2222_v9, %v11972_v59  ;;  %v2820_v54 = vadd.f32 %v2603_v34, %v2438_v29  ;;  %v3150_v14 = vshll.u32 %v3082_v27, 16 }
 0x262   : > { %v3140_v21 = vshrl.u32 %v3081_v49, 16  ;;  %v2225_v44 = vpop.f32.mrf.mxu1  ;;  %v2962_v41 = vadd.f32 %v12122_v60, %v2892_v26  ;;  %v3427_v43 = vor.u32 %v3425_v1, %v12183_v17  ;;  %v3431_v36 = vrot.slane %v3429_v7, 1 }
 0x263   : > { %v2616_v40 = vpop.f32.mrf.mxu0  ;;  %v12197_v38 = vrot.slane %v3147_v61, 7  ;;  %v3143_v58 = vshll.u32 %v3081_v49, 16  ;;  %v3025_v11 = vmax.f32 %v2961_v50, 0.0  ;;  %v2890_v45 = vmul.f32 %v12118_v22, %v2820_v54 }
 0x264   : > { %v10140_v56 = vpop.f32.mrf.mxu1  ;;  %v3026_v0 = vmax.f32 %v2962_v41, 0.0  ;;  %v3432_v25 = vsel %vm982_vm3, %v3427_v43, %v3431_v36  ;;  %v12204_v59 = vsel %vm11059_vm2, 0, %v12156_v52  ;;  %v2825_v27 = vadd.f32 %v10214_v42, %v2443_v5 }
 0x265   : > { %15448 = vst [vmem:[#allocation48_spill] sm:$0xff] %v12204_v59  ;;  %v10215_v9 = vpop.f32.mrf.mxu0  ;;  %v12206_v29 = vrot.slane %v3140_v21, 7  ;;  %v3023_v34 = vmax.f32 %v2959_v57, 0.0  ;;  %3739 = vrot.lane.b32.xlu1 %v3432_v25, %s10883_s18  ;;  %v2960_v61 = vadd.f32 %v12122_v60, %v2890_v45  ;;  %v3416_v49 = vshll.u32 %v12204_v59, 16 }
 0x266   : > { %v2238_v50 = vpop.f32.mrf.mxu1  ;;  %v3084_v26 = vpack.c.bf16 %v3026_v0, %v3025_v11  ;;  %v3414_v1 = vshrl.u32 %v12204_v59, 16  ;;  %v2895_v7 = vmul.f32 %v12118_v22, %v2825_v27  ;;  %v3834_v52 = vrot.slane %v12168_v12, 1 }
 0x267   : > { %v2619_v54 = vpop.f32.mrf.mxu0  ;;  %v3024_v5 = vmax.f32 %v2960_v61, 0.0  ;;  %v3418_v42 = vrot.slane %v3416_v49, 1  ;;  %v3836_v21 = vrot.slane %v12161_v20, 1  ;;  %v2823_v57 = vadd.f32 %v2616_v40, %v2441_v53  ;;  %v10637_v40 = vld [vmem:[%s15342_s4 + $0x58] sm:$0xff]  }
 0x268   : > { %v12215_v41 = vpop.f32.mrf.mxu1  ;;  %v12218_v43 = vor.u32 %v3150_v14, %v12197_v38  ;;  %v3162_v36 = vshrl.u32 %v3084_v26, 16  ;;  %v2444_v0 = vadd.f32 %v10137_v16, %v11980_v18  ;;  %v2965_v11 = vadd.f32 %v12122_v60, %v2895_v7  ;;  %10344 = vmatprep.subr.bf16.mxu0 %v10637_v40 }
 0x269   : > { %v10218_v45 = vpop.f32.mrf.mxu0  ;;  %v3083_v25 = vpack.c.bf16 %v3024_v5, %v3023_v34  ;;  %v3419_v27 = vor.u32 %v3418_v42, %v3414_v1  ;;  %v3837_v12 = vsel %vm1425_vm4, %v3834_v52, %v3836_v21  ;;  %v2893_v61 = vmul.f32 %v12118_v22, %v2823_v57  ;;  %10345 = vmatpush3.bf16.msra.mxu0 %v10637_v40 }
 0x26a   : > { %v12224_v49 = vpop.f32.mrf.mxu1  ;;  %v12227_v20 = vor.u32 %v3143_v58, %v12206_v29  ;;  %v12229_v53 = vrot.slane %v3162_v36, 7  ;;  %v2442_v14 = vadd.f32 %v2225_v44, %v11982_v3  ;;  %3919 = vrot.lane.b32.xlu1 %v3837_v12, %s10884_s20  ;;  %v2826_v18 = vadd.f32 %v10215_v9, %v2444_v0 }
 0x26b   : > { %v2632_v16 = vpop.f32.mrf.mxu0  ;;  %v3165_v34 = vshll.u32 %v3084_v26, 16  ;;  %v3155_v1 = vshrl.u32 %v3083_v25, 16  ;;  %v3424_v7 = vsel %vm982_vm3, %v3419_v27, %v12183_v17  ;;  %v3833_v58 = vrot.slane %v12204_v59, 1 }
 0x26c   : > { %v12239_v5 = vpop.f32.mrf.mxu1  ;;  %3737 = vrot.lane.b32.xlu0 %v3424_v7, %s10883_s18  ;;  %v3029_v3 = vmax.f32 %v2965_v11, 0.0  ;;  %v12243_v12 = vadd.f32 %v12122_v60, %v2893_v61  ;;  %v2447_v44 = vadd.f32 %v10140_v56, %v11986_v33  ;;  %v2896_v9 = vmul.f32 %v12118_v22, %v2826_v18 }
 0x26d   : > { %v10219_v42 = vpop.f32.mrf.mxu0  ;;  %v12247_v26 = vrot.slane %v3155_v1, 7  ;;  %v3158_v21 = vshll.u32 %v3083_v25, 16  ;;  %v12252_v17 = vsel %vm663_vm0, %v12174_v46, %v12180_v30  ;;  %v12257_v57 = vsel %vm11059_vm2, %v12170_v6, 0 }
 0x26e   : > { %15449 = vst [vmem:[#allocation49_spill] sm:$0xff] %v12252_v17  ;;  %v12259_v36 = vpop.f32.mrf.mxu1  ;;  %v12262_v33 = vor.u32 %v3165_v34, %v12229_v53  ;;  %v2966_v56 = vadd.f32 %v12122_v60, %v2896_v9  ;;  %v3441_v0 = vshll.u32 %v12252_v17, 16  ;;  %v3449_v11 = vshll.u32 %v12257_v57, 16 }
 0x26f   : > { %v12267_v25 = vpop.f32.mrf.mxu0  ;;  %v3835_v46 = vsel %vm1425_vm4, %v3833_v58, %v3834_v52  ;;  %v2445_v6 = vadd.f32 %v2238_v50, %v11990_v31  ;;  %v2824_v30 = vadd.f32 %v2619_v54, %v2442_v14  ;;  %v12274_v27 = vsel %vm11059_vm2, 0, %v12188_v15 }
 0x270   : > { %15450 = vst [vmem:[#allocation50_spill] sm:$0xff] %v12274_v27  ;;  %v12276_v61 = vpop.f32.mrf.mxu1  ;;  %v3027_v18 = vmax.f32 %v12243_v12, 0.0  ;;  %3917 = vrot.lane.b32.xlu0 %v3835_v46, %s10884_s20  ;;  %v3030_v34 = vmax.f32 %v2966_v56, 0.0  ;;  %v3443_v1 = vrot.slane %v3441_v0, 1  ;;  %v3445_v40 = vshrl.u32 %v12252_v17, 16  ;;  %v10638_v0 = vld [vmem:[%s15342_s4 + $0x50] sm:$0xff]  }
 0x271   : > { %v12281_v7 = vpop.f32.mrf.mxu0  ;;  %v12284_v31 = vor.u32 %v3158_v21, %v12247_v26  ;;  %v2894_v50 = vmul.f32 %v12118_v22, %v2824_v30  ;;  %v3436_v15 = vshll.u32 %v12274_v27, 16  ;;  %v2829_v52 = vadd.f32 %v10218_v45, %v2447_v44  ;;  %10346 = vmatprep.subr.bf16.mxu0 %v10638_v0 }
 0x272   : > { %v12288_v54 = vpop.f32.mrf.mxu1  ;;  %v3086_v14 = vpack.c.bf16 %v3030_v34, %v3029_v3  ;;  %v3447_v58 = vor.u32 %v3445_v40, %v3443_v1  ;;  %v3451_v12 = vrot.slane %v3449_v11, 1  ;;  %v3434_v9 = vshrl.u32 %v12274_v27, 16  ;;  %10347 = vmatpush3.bf16.msra.mxu0 %v10638_v0 }
 0x273   : > { %v12291_v56 = vpop.f32.mrf.mxu0  ;;  %v2964_v21 = vadd.f32 %v12122_v60, %v2894_v50  ;;  %v3438_v46 = vrot.slane %v3436_v15, 1  ;;  %v2899_v30 = vmul.f32 %v12118_v22, %v2829_v52  ;;  %v2827_v59 = vadd.f32 %v2632_v16, %v2445_v6 }
 0x274   : > { %v12298_v45 = vpop.f32.mrf.mxu1  ;;  %v3177_v44 = vshrl.u32 %v3086_v14, 16  ;;  %v3452_v3 = vsel %vm982_vm3, %v3447_v58, %v3451_v12  ;;  %v2448_v11 = vadd.f32 %v12215_v41, %v11996_v24  ;;  %v3839_v34 = vrot.slane %v12252_v17, 1 }
 0x275   : > { %v12304_v40 = vpop.f32.mrf.mxu0  ;;  %3743 = vrot.lane.b32.xlu1 %v3452_v3, %s10883_s18  ;;  %v3028_v50 = vmax.f32 %v2964_v21, 0.0  ;;  %v3439_v15 = vor.u32 %v3438_v46, %v3434_v9  ;;  %v2969_v52 = vadd.f32 %v12122_v60, %v2899_v30  ;;  %v2897_v16 = vmul.f32 %v12118_v22, %v2827_v59  ;;  %v10640_v9 = vld [vmem:[%s15342_s4 + $0x48] sm:$0xff]  }
 0x276   : > { %v12309_v6 = vpop.f32.mrf.mxu1  ;;  %v12311_v58 = vrot.slane %v3177_v44, 7  ;;  %v3841_v24 = vrot.slane %v12257_v57, 1  ;;  %v3838_v41 = vrot.slane %v12274_v27, 1  ;;  %v2830_v12 = vadd.f32 %v10219_v42, %v2448_v11  ;;  %10348 = vmatprep.subr.bf16.mxu0 %v10640_v9 }
 0x277   : > { %v12315_v17 = vpop.f32.mrf.mxu0  ;;  %v3180_v21 = vshll.u32 %v3086_v14, 16  ;;  %v3085_v46 = vpack.c.bf16 %v3028_v50, %v3027_v18  ;;  %v3444_v59 = vsel %vm982_vm3, %v3439_v15, %v3443_v1  ;;  %v2446_v0 = vadd.f32 %v12224_v49, %v11998_v55  ;;  %10349 = vmatpush3.bf16.msra.mxu0 %v10640_v9 }
 0x278   : > { %v12323_v30 = vpop.f32.mrf.mxu1  ;;  %3741 = vrot.lane.b32.xlu0 %v3444_v59, %s10883_s18  ;;  %v3033_v57 = vmax.f32 %v2969_v52, 0.0  ;;  %v3842_v42 = vsel %vm1425_vm4, %v3839_v34, %v3841_v24  ;;  %v2451_v44 = vadd.f32 %v12239_v5, %v12002_v28  ;;  %v2900_v3 = vmul.f32 %v12118_v22, %v2830_v12  ;;  %v10639_v28 = vld [vmem:[%s15342_s4] sm:$0xff]  }
 0x279   : > { %v12330_v11 = vpop.f32.mrf.mxu0  ;;  %v12333_v18 = vor.u32 %v3180_v21, %v12311_v58  ;;  %v3170_v1 = vshrl.u32 %v3085_v46, 16  ;;  %3923 = vrot.lane.b32.xlu1 %v3842_v42, %s10884_s20  ;;  %v2967_v55 = vadd.f32 %v12122_v60, %v2897_v16  ;;  %v12340_v49 = vsel %vm663_vm0, %v12206_v29, %v12218_v43  ;;  %10270 = vmatprep.subr.bf16.mxu1 %v10639_v28 }
 0x27a   : > { %15451 = vst [vmem:[#allocation51_spill] sm:$0xff] %v12340_v49  ;;  %v12342_v14 = vpop.f32.mrf.mxu1  ;;  %v3840_v5 = vsel %vm1425_vm4, %v3838_v41, %v3839_v34  ;;  %v2970_v50 = vadd.f32 %v12122_v60, %v2900_v3  ;;  %v3399_v15 = vsel %vm11059_vm2, %v12197_v38, 0  ;;  %v3461_v52 = vshll.u32 %v12340_v49, 16  ;;  %10271 = vmatpush3.bf16.msra.mxu1 %v10639_v28 }
 0x27b   : > { %v12353_v16 = vpop.f32.mrf.mxu0  ;;  %v2449_v29 = vadd.f32 %v12259_v36, %v12006_v47  ;;  %v3465_v43 = vshrl.u32 %v12340_v49, 16  ;;  %v3469_v24 = vshll.u32 %v3399_v15, 16  ;;  %v2828_v12 = vadd.f32 %v12267_v25, %v2446_v0 }
 0x27c   : > { %v12359_v34 = vpop.f32.mrf.mxu1  ;;  %3921 = vrot.lane.b32.xlu0 %v3840_v5, %s10884_s20  ;;  %v3034_v41 = vmax.f32 %v2970_v50, 0.0  ;;  %v3463_v38 = vrot.slane %v3461_v52, 1  ;;  %v12365_v21 = vsel %vm11059_vm2, 0, %v12227_v20  ;;  %v2833_v9 = vadd.f32 %v12281_v7, %v2451_v44  ;;  %v10641_v7 = vld [vmem:[%s15342_s4 + $0x40] sm:$0xff]  }
 0x27d   : > { %15452 = vst [vmem:[#allocation52_spill] sm:$0xff] %v12365_v21  ;;  %v12368_v47 = vpop.f32.mrf.mxu0  ;;  %v12370_v36 = vrot.slane %v3170_v1, 7  ;;  %v3173_v25 = vshll.u32 %v3085_v46, 16  ;;  %v3471_v59 = vrot.slane %v3469_v24, 1  ;;  %v2898_v0 = vmul.f32 %v12118_v22, %v2828_v12  ;;  %10350 = vmatprep.subr.bf16.mxu0 %v10641_v7 }
 0x27e   : > { %v12373_v42 = vpop.f32.mrf.mxu1  ;;  %v3088_v3 = vpack.c.bf16 %v3034_v41, %v3033_v57  ;;  %v3467_v5 = vor.u32 %v3465_v43, %v3463_v38  ;;  %v3456_v50 = vshll.u32 %v12365_v21, 16  ;;  %v2903_v20 = vmul.f32 %v12118_v22, %v2833_v9  ;;  %10351 = vmatpush3.bf16.msra.mxu0 %v10641_v7 }
 0x27f   : > { %v12377_v52 = vpop.f32.mrf.mxu0  ;;  %v3031_v44 = vmax.f32 %v2967_v55, 0.0  ;;  %v2968_v46 = vadd.f32 %v12122_v60, %v2898_v0  ;;  %v2452_v1 = vadd.f32 %v12276_v61, %v12012_v19  ;;  %v3454_v28 = vshrl.u32 %v12365_v21, 16 }
 0x280   : > { %v12386_v57 = vpop.f32.mrf.mxu1  ;;  %v3192_v43 = vshrl.u32 %v3088_v3, 16  ;;  %v3472_v24 = vsel %vm982_vm3, %v3467_v5, %v3471_v59  ;;  %v3458_v12 = vrot.slane %v3456_v50, 1  ;;  %v3844_v41 = vrot.slane %v12340_v49, 1 }
 0x281   : > { %v12390_v9 = vpop.f32.mrf.mxu0  ;;  %v12393_v55 = vor.u32 %v3173_v25, %v12370_v36  ;;  %3747 = vrot.lane.b32.xlu1 %v3472_v24, %s10883_s18  ;;  %v3032_v0 = vmax.f32 %v2968_v46, 0.0  ;;  %v2973_v19 = vadd.f32 %v12122_v60, %v2903_v20  ;;  %v2831_v61 = vadd.f32 %v12291_v56, %v2449_v29  ;;  %v10642_v25 = vld [vmem:[%s15342_s4 + $0x38] sm:$0xff]  }
 0x282   : > { %v12398_v27 = vpop.f32.mrf.mxu1  ;;  %v12400_v59 = vrot.slane %v3192_v43, 7  ;;  %v3459_v5 = vor.u32 %v3458_v12, %v3454_v28  ;;  %v3846_v50 = vrot.slane %v3399_v15, 1  ;;  %v3843_v49 = vrot.slane %v12365_v21, 1  ;;  %10352 = vmatprep.subr.bf16.mxu0 %v10642_v25 }
 0x283   : > { %v12403_v10 = vpop.f32.mrf.mxu0  ;;  %v3195_v46 = vshll.u32 %v3088_v3, 16  ;;  %v12408_v24 = vpack.c.bf16 %v3032_v0, %v3031_v44  ;;  %v2901_v56 = vmul.f32 %v12118_v22, %v2831_v61  ;;  %v2834_v29 = vadd.f32 %v12304_v40, %v2452_v1  ;;  %10353 = vmatpush3.bf16.msra.mxu0 %v10642_v25 }
 0x284   : > { %v12412_v20 = vpop.f32.mrf.mxu1  ;;  %v3464_v7 = vsel %vm982_vm3, %v3459_v5, %v3463_v38  ;;  %v2450_v15 = vadd.f32 %v12288_v54, %v12017_v4  ;;  %v3847_v28 = vsel %vm1425_vm4, %v3844_v41, %v3846_v50  ;;  %v2455_v43 = vadd.f32 %v12298_v45, %v12021_v35 }
 0x285   : > { %v12420_v12 = vpop.f32.mrf.mxu0  ;;  %v12423_v3 = vor.u32 %v3195_v46, %v12400_v59  ;;  %3745 = vrot.lane.b32.xlu0 %v3464_v7, %s10883_s18  ;;  %v3037_v40 = vmax.f32 %v2973_v19, 0.0  ;;  %3927 = vrot.lane.b32.xlu1 %v3847_v28, %s10884_s20  ;;  %v3845_v38 = vsel %vm1425_vm4, %v3843_v49, %v3844_v41  ;;  %v2904_v4 = vmul.f32 %v12118_v22, %v2834_v29  ;;  %v10643_v49 = vld [vmem:[%s15342_s4 + $0x30] sm:$0xff]  }
 0x286   : > { %v12429_v54 = vpop.f32.mrf.mxu1  ;;  %v3185_v44 = vshrl.u32 %v12408_v24, 16  ;;  %v12435_v35 = vsel %vm663_vm0, %v12247_v26, %v12262_v33  ;;  %v12440_v45 = vsel %vm11059_vm2, %v12229_v53, 0  ;;  %v2832_v1 = vadd.f32 %v12315_v17, %v2450_v15  ;;  %10354 = vmatprep.subr.bf16.mxu0 %v10643_v49 }
 0x287   : > { %v12443_v0 = vpop.f32.mrf.mxu0  ;;  %v2971_v41 = vadd.f32 %v12122_v60, %v2901_v56  ;;  %v2974_v19 = vadd.f32 %v12122_v60, %v2904_v4  ;;  %v2453_v26 = vadd.f32 %v12309_v6, %v12025_v51  ;;  %v3481_v33 = vshll.u32 %v12435_v35, 16  ;;  %10355 = vmatpush3.bf16.msra.mxu0 %v10643_v49 }
 0x288   : > { %v12453_v53 = vpop.f32.mrf.mxu1  ;;  %v3188_v17 = vshll.u32 %v12408_v24, 16  ;;  %v3489_v61 = vshll.u32 %v12440_v45, 16  ;;  %v2902_v5 = vmul.f32 %v12118_v22, %v2832_v1  ;;  %v12461_v50 = vsel %vm11059_vm2, 0, %v12284_v31 }
 0x289   : > { %v12463_v25 = vpop.f32.mrf.mxu0  ;;  %3925 = vrot.lane.b32.xlu0 %v3845_v38, %s10884_s20  ;;  %v3038_v51 = vmax.f32 %v2974_v19, 0.0  ;;  %v3483_v6 = vrot.slane %v3481_v33, 1  ;;  %v3485_v46 = vshrl.u32 %v12435_v35, 16  ;;  %v2456_v24 = vadd.f32 %v12323_v30, %v12031_v8 }
 0x28a   : > { %v12469_v56 = vpop.f32.mrf.mxu1  ;;  %v12471_v29 = vrot.slane %v3185_v44, 7  ;;  %v2972_v7 = vadd.f32 %v12122_v60, %v2902_v5  ;;  %v3476_v31 = vshll.u32 %v12461_v50, 16  ;;  %v2837_v15 = vadd.f32 %v12330_v11, %v2455_v43 }
 0x28b   : > { %15453 = vst [vmem:[#allocation53_spill] sm:$0xff] %v12469_v56  ;;  %v3035_v28 = vmax.f32 %v2971_v41, 0.0  ;;  %v3090_v38 = vpack.c.bf16 %v3038_v51, %v3037_v40  ;;  %v3487_v4 = vor.u32 %v3485_v46, %v3483_v6  ;;  %v3491_v1 = vrot.slane %v3489_v61, 1  ;;  %v12481_v5 = vpop.f32.mrf.mxu0 }
 0x28c   : > { %v12476_v19 = vpop.f32.mrf.mxu1  ;;  %v15454_v33 = vmov 0   ;;  %v3036_v8 = vmax.f32 %v2972_v7, 0.0  ;;  %v3474_v30 = vshrl.u32 %v12461_v50, 16  ;;  %v3478_v44 = vrot.slane %v3476_v31, 1 }
 0x28d   : > { %7872 = vmatprep.subr.bf16.mxu0 %v15454_v33  ;;  %v2907_v21 = vmul.f32 %v12118_v22, %v2837_v15  ;;  %v3207_v56 = vshrl.u32 %v3090_v38, 16  ;;  %v3492_v11 = vsel %vm982_vm3, %v3487_v4, %v3491_v1  ;;  %v3849_v43 = vrot.slane %v12435_v35, 1 }
 0x28e   : > { %v2835_v40 = vadd.f32 %v12353_v16, %v2453_v26  ;;  %v12486_v49 = vpop.f32.mrf.mxu1  ;;  %v12489_v41 = vor.u32 %v3188_v17, %v12471_v29  ;;  %3751 = vrot.lane.b32.xlu1 %v3492_v11, %s10883_s18  ;;  %v3089_v61 = vpack.c.bf16 %v3036_v8, %v3035_v28  ;;  %v3479_v51 = vor.u32 %v3478_v44, %v3474_v30  ;;  %v10644_v26 = vld [vmem:[%s15342_s4 + $0x88] sm:$0xff]  }
 0x28f   : > { %v2977_v46 = vadd.f32 %v12122_v60, %v2907_v21  ;;  %v12493_v7 = vrot.slane %v3207_v56, 7  ;;  %v3851_v31 = vrot.slane %v12440_v45, 1  ;;  %v3848_v4 = vrot.slane %v12461_v50, 1  ;;  %v12506_v56 = vpop.f32.mrf.mxu0  ;;  %10428 = vmatprep.subr.bf16.mxu1 %v10644_v26 }
 0x290   : > { %v2905_v15 = vmul.f32 %v12118_v22, %v2835_v40  ;;  %v12498_v16 = vpop.f32.mrf.mxu1  ;;  %v3210_v17 = vshll.u32 %v3090_v38, 16  ;;  %v3200_v1 = vshrl.u32 %v3089_v61, 16  ;;  %v3484_v28 = vsel %vm982_vm3, %v3479_v51, %v3483_v6 }
 0x291   : > { %v2454_v21 = vadd.f32 %v12342_v14, %v12033_v13  ;;  %v3203_v45 = vshll.u32 %v3089_v61, 16  ;;  %3749 = vrot.lane.b32.xlu0 %v3484_v28, %s10883_s18  ;;  %v3852_v8 = vsel %vm1425_vm4, %v3849_v43, %v3851_v31  ;;  %v2459_v30 = vadd.f32 %v12359_v34, %v12037_v48 }
 0x292   : > { %v2838_v44 = vadd.f32 %v12368_v47, %v2456_v24  ;;  %v12513_v11 = vpop.f32.mrf.mxu1  ;;  %v3041_v38 = vmax.f32 %v2977_v46, 0.0  ;;  %3931 = vrot.lane.b32.xlu1 %v3852_v8, %s10884_s20  ;;  %v2975_v6 = vadd.f32 %v12122_v60, %v2905_v15  ;;  %v12520_v13 = vsel %vm663_vm0, %v12370_v36, %v12333_v18 }
 0x293   : > { %15455 = vst [vmem:[#allocation54_spill] sm:$0xff] %v12520_v13  ;;  %v3401_v14 = vsel %vm11059_vm2, %v12311_v58, 0  ;;  %v12526_v48 = vor.u32 %v3210_v17, %v12493_v7  ;;  %v3850_v34 = vsel %vm1425_vm4, %v3848_v4, %v3849_v43  ;;  %v3501_v24 = vshll.u32 %v12520_v13, 16  ;;  %v12537_v58 = vpop.f32.mrf.mxu0 }
 0x294   : > { %v2908_v47 = vmul.f32 %v12118_v22, %v2838_v44  ;;  %v12531_v40 = vpop.f32.mrf.mxu1  ;;  %v12533_v61 = vrot.slane %v3200_v1, 7  ;;  %v3505_v18 = vshrl.u32 %v12520_v13, 16  ;;  %v3509_v36 = vshll.u32 %v3401_v14, 16 }
 0x295   : > { %v2836_v51 = vadd.f32 %v12377_v52, %v2454_v21  ;;  %3929 = vrot.lane.b32.xlu0 %v3850_v34, %s10884_s20  ;;  %v3503_v43 = vrot.slane %v3501_v24, 1  ;;  %v12544_v31 = vsel %vm11059_vm2, 0, %v12393_v55  ;;  %v2841_v15 = vadd.f32 %v12390_v9, %v2459_v30 }
 0x296   : > { %v2978_v46 = vadd.f32 %v12122_v60, %v2908_v47  ;;  %v12547_v4 = vpop.f32.mrf.mxu1  ;;  %v3039_v26 = vmax.f32 %v2975_v6, 0.0  ;;  %v2457_v52 = vadd.f32 %v12373_v42, %v12041_v62  ;;  %v3496_v1 = vshll.u32 %v12544_v31, 16  ;;  %v12561_v62 = vpop.f32.mrf.mxu0 }
 0x297   : > { %v2906_v17 = vmul.f32 %v12118_v22, %v2836_v51  ;;  %v3507_v21 = vor.u32 %v3505_v18, %v3503_v43  ;;  %v3511_v8 = vrot.slane %v3509_v36, 1  ;;  %v2911_v44 = vmul.f32 %v12118_v22, %v2841_v15 }
 0x298   : > { %v3042_v28 = vmax.f32 %v2978_v46, 0.0  ;;  %v12554_v34 = vpop.f32.mrf.mxu1  ;;  %v12557_v55 = vor.u32 %v3203_v45, %v12533_v61  ;;  %v3494_v30 = vshrl.u32 %v12544_v31, 16  ;;  %v3498_v6 = vrot.slane %v3496_v1, 1 }
 0x299   : > { %v2976_v9 = vadd.f32 %v12122_v60, %v2906_v17  ;;  %v3512_v47 = vsel %vm982_vm3, %v3507_v21, %v3511_v8  ;;  %v3854_v24 = vrot.slane %v12520_v13, 1  ;;  %v2839_v18 = vadd.f32 %v12403_v10, %v2457_v52  ;;  %v15465_v13 = vld [vmem:[#allocation35_spill] sm:$0xff] }
 0x29a   : > { %v3092_v42 = vpack.c.bf16 %v3042_v28, %v3041_v38  ;;  %v12566_v36 = vpop.f32.mrf.mxu1  ;;  %3755 = vrot.lane.b32.xlu1 %v3512_v47, %s10883_s18  ;;  %v2460_v51 = vadd.f32 %v12386_v57, %v12047_v39  ;;  %v3499_v46 = vor.u32 %v3498_v6, %v3494_v30  ;;  %v2981_v15 = vadd.f32 %v12122_v60, %v2911_v44  ;;  %v12580_v39 = vpop.f32.mrf.mxu0 }
 0x29b   : > { %v3040_v45 = vmax.f32 %v2976_v9, 0.0  ;;  %v2458_v38 = vadd.f32 %v12398_v27, %v12053_v37  ;;  %v3856_v1 = vrot.slane %v3401_v14, 1  ;;  %v2909_v28 = vmul.f32 %v12118_v22, %v2839_v18 }
 0x29c   : > { %v3222_v17 = vshrl.u32 %v3092_v42, 16  ;;  %v12575_v21 = vpop.f32.mrf.mxu1  ;;  %v3504_v52 = vsel %vm982_vm3, %v3499_v46, %v3503_v43  ;;  %v3853_v8 = vrot.slane %v12544_v31, 1  ;;  %v2842_v9 = vadd.f32 %v12420_v12, %v2460_v51  ;;  %v12608_v51 = vpop.f32.mrf.mxu0 }
 0x29d   : > { %v3091_v10 = vpack.c.bf16 %v3040_v45, %v3039_v26  ;;  %v3225_v57 = vshll.u32 %v3092_v42, 16  ;;  %3753 = vrot.lane.b32.xlu0 %v3504_v52, %s10883_s18  ;;  %v3857_v44 = vsel %vm1425_vm4, %v3854_v24, %v3856_v1  ;;  %v2463_v37 = vadd.f32 %v12412_v20, %v12059_v32 }
 0x29e   : > { %v12589_v27 = vsel %vm663_vm0, %v12471_v29, %v12423_v3  ;;  %v12591_v14 = vpop.f32.mrf.mxu1  ;;  %v12593_v43 = vrot.slane %v3222_v17, 7  ;;  %v3045_v26 = vmax.f32 %v2981_v15, 0.0  ;;  %3935 = vrot.lane.b32.xlu1 %v3857_v44, %s10884_s20  ;;  %v2912_v30 = vmul.f32 %v12118_v22, %v2842_v9 }
 0x29f   : > { %15456 = vst [vmem:[#allocation55_spill] sm:$0xff] %v12589_v27  ;;  %v3215_v12 = vshrl.u32 %v3091_v10, 16  ;;  %v2979_v6 = vadd.f32 %v12122_v60, %v2909_v28  ;;  %v2461_v32 = vadd.f32 %v12429_v54, %v12063_v63  ;;  %v3402_v20 = vsel %vm11059_vm2, %v12400_v59, 0 }
 0x2a0   : > { %v3521_v3 = vshll.u32 %v12589_v27, 16  ;;  %v12604_v29 = vpop.f32.mrf.mxu1  ;;  %v3218_v42 = vshll.u32 %v3091_v10, 16  ;;  %v3855_v47 = vsel %vm1425_vm4, %v3853_v8, %v3854_v24  ;;  %v2982_v18 = vadd.f32 %v12122_v60, %v2912_v30  ;;  %v12632_v30 = vpop.f32.mrf.mxu0 }
 0x2a1   : > { %v3529_v45 = vshll.u32 %v3402_v20, 16  ;;  %3933 = vrot.lane.b32.xlu0 %v3855_v47, %s10884_s20  ;;  %v3525_v63 = vshrl.u32 %v12589_v27, 16  ;;  %v2840_v54 = vadd.f32 %v12443_v0, %v2458_v38  ;;  %v12616_v59 = vsel %vm11059_vm2, 0, %v12489_v41 }
 0x2a2   : > { %v3523_v46 = vrot.slane %v3521_v3, 1  ;;  %15457 = vst [vmem:[#allocation56_spill] sm:$0xff] %v12616_v59  ;;  %v12618_v15 = vpop.f32.mrf.mxu1  ;;  %v12621_v24 = vor.u32 %v3225_v57, %v12593_v43  ;;  %v12623_v17 = vrot.slane %v3215_v12, 7  ;;  %v3046_v1 = vmax.f32 %v2982_v18, 0.0 }
 0x2a3   : > { %v3531_v28 = vrot.slane %v3529_v45, 1  ;;  %v2910_v52 = vmul.f32 %v12118_v22, %v2840_v54  ;;  %v3516_v8 = vshll.u32 %v12616_v59, 16  ;;  %v2845_v0 = vadd.f32 %v12463_v25, %v2463_v37  ;;  %v12636_v22 = vld [vmem:[#allocation2] ss:$0 sm:$0xff]  ;;  %v12648_v54 = vld [vmem:[#allocation4] ss:$0 sm:$0xff] }
 0x2a4   : > { %v3527_v10 = vor.u32 %v3525_v63, %v3523_v46  ;;  %v12628_v38 = vpop.f32.mrf.mxu1  ;;  %v3043_v41 = vmax.f32 %v2979_v6, 0.0  ;;  %v3094_v9 = vpack.c.bf16 %v3046_v1, %v3045_v26  ;;  %v3514_v44 = vshrl.u32 %v12616_v59, 16 }
 0x2a5   : > { %v3859_v57 = vrot.slane %v12589_v27, 1  ;;  %v2980_v3 = vadd.f32 %v12122_v60, %v2910_v52  ;;  %v3518_v47 = vrot.slane %v3516_v8, 1  ;;  %v2915_v18 = vmul.f32 %v12636_v22, %v2845_v0  ;;  %v15459_v8 = vld [vmem:[#allocation53_spill] sm:$0xff] }
 0x2a6   : > { %v3532_v12 = vsel %vm982_vm3, %v3527_v10, %v3531_v28  ;;  %v12639_v25 = vpop.f32.mrf.mxu1  ;;  %v12642_v37 = vor.u32 %v3218_v42, %v12623_v17  ;;  %v3237_v26 = vshrl.u32 %v3094_v9, 16  ;;  %v2464_v6 = vadd.f32 %v12453_v53, %v12067_v23  ;;  %v15458_v42 = vld [vmem:[#allocation21_spill] sm:$0xff]  ;;  %v12659_v53 = vpop.f32.mrf.mxu0 }
 0x2a7   : > { %3759 = vrot.lane.b32.xlu1 %v3532_v12, %s10883_s18  ;;  %v2843_v45 = vadd.f32 %v12481_v5, %v2461_v32  ;;  %v3044_v63 = vmax.f32 %v2980_v3, 0.0  ;;  %v3519_v60 = vor.u32 %v3518_v47, %v3514_v44  ;;  %v2985_v1 = vadd.f32 %v12648_v54, %v2915_v18 }
 0x2a8   : > { %v3861_v28 = vrot.slane %v3402_v20, 1  ;;  %v12651_v10 = vpop.f32.mrf.mxu1  ;;  %v12653_v52 = vrot.slane %v3237_v26, 7  ;;  %v2462_v0 = vadd.f32 %v15459_v8, %v15458_v42  ;;  %v2846_v23 = vadd.f32 %v12506_v56, %v2464_v6  ;;  %v15460_v26 = vld [vmem:[#allocation29_spill] sm:$0xff]  ;;  %v12688_v42 = vpop.f32.mrf.mxu0 }
 0x2a9   : > { %v2913_v12 = vmul.f32 %v12636_v22, %v2843_v45  ;;  %v3093_v5 = vpack.c.bf16 %v3044_v63, %v3043_v41  ;;  %v3524_v32 = vsel %vm982_vm3, %v3519_v60, %v3523_v46  ;;  %v3858_v20 = vrot.slane %v12616_v59, 1 }
 0x2aa   : > { %v3862_v44 = vsel %vm1425_vm4, %v3859_v57, %v3861_v28  ;;  %v12664_v3 = vpop.f32.mrf.mxu1  ;;  %v3240_v47 = vshll.u32 %v3094_v9, 16  ;;  %3757 = vrot.lane.b32.xlu0 %v3524_v32, %s10883_s18  ;;  %v3049_v18 = vmax.f32 %v2985_v1, 0.0  ;;  %v2467_v56 = vadd.f32 %v12476_v19, %v15460_v26  ;;  %v15462_v19 = vld [vmem:[#allocation31_spill] sm:$0xff] }
 0x2ab   : > { %3939 = vrot.lane.b32.xlu1 %v3862_v44, %s10884_s20  ;;  %v3403_v41 = vsel %vm11059_vm2, %v12493_v7, 0  ;;  %v3230_v46 = vshrl.u32 %v3093_v5, 16  ;;  %v2983_v6 = vadd.f32 %v12648_v54, %v2913_v12  ;;  %v2916_v45 = vmul.f32 %v12636_v22, %v2846_v23 }
 0x2ac   : > { %v12678_v9 = vsel %vm663_vm0, %v12533_v61, %v12526_v48  ;;  %v12680_v63 = vpop.f32.mrf.mxu1  ;;  %v12683_v60 = vor.u32 %v3240_v47, %v12653_v52  ;;  %v2465_v1 = vadd.f32 %v12486_v49, %v15462_v19  ;;  %v3549_v28 = vshll.u32 %v3403_v41, 16 }
 0x2ad   : > { %15461 = vst [vmem:[#allocation21_spill] sm:$0xff] %v12678_v9  ;;  %v3541_v7 = vshll.u32 %v12678_v9, 16  ;;  %v3233_v8 = vshll.u32 %v3093_v5, 16  ;;  %v3860_v12 = vsel %vm1425_vm4, %v3858_v20, %v3859_v57  ;;  %v2986_v23 = vadd.f32 %v12648_v54, %v2916_v45 }
 0x2ae   : > { %v2844_v48 = vadd.f32 %v12537_v58, %v2462_v0  ;;  %v12693_v61 = vpop.f32.mrf.mxu1  ;;  %3937 = vrot.lane.b32.xlu0 %v3860_v12, %s10884_s20  ;;  %v3545_v44 = vshrl.u32 %v12678_v9, 16  ;;  %v12700_v49 = vsel %vm11059_vm2, 0, %v12557_v55  ;;  %v2849_v5 = vadd.f32 %v12561_v62, %v2467_v56  ;;  %v12710_v12 = vpop.f32.mrf.mxu0  ;;  %v15464_v62 = vld [vmem:[#allocation33_spill] sm:$0xff] }
 0x2af   : > { %v3543_v32 = vrot.slane %v3541_v7, 1  ;;  %15463 = vst [vmem:[#allocation53_spill] sm:$0xff] %v12700_v49  ;;  %v12703_v47 = vrot.slane %v3230_v46, 7  ;;  %v3047_v57 = vmax.f32 %v2983_v6, 0.0  ;;  %v3050_v20 = vmax.f32 %v2986_v23, 0.0 }
 0x2b0   : > { %v2914_v58 = vmul.f32 %v12636_v22, %v2844_v48  ;;  %v12706_v0 = vpop.f32.mrf.mxu1  ;;  %v3551_v45 = vrot.slane %v3549_v28, 1  ;;  %v3536_v19 = vshll.u32 %v12700_v49, 16  ;;  %v2919_v7 = vmul.f32 %v12636_v22, %v2849_v5 }
 0x2b1   : > { %v3547_v26 = vor.u32 %v3545_v44, %v3543_v32  ;;  %v3096_v55 = vpack.c.bf16 %v3050_v20, %v3049_v18  ;;  %v2468_v56 = vadd.f32 %v12498_v16, %v15464_v62  ;;  %v3534_v46 = vshrl.u32 %v12700_v49, 16 }
 0x2b2   : > { %v2984_v27 = vadd.f32 %v12648_v54, %v2914_v58  ;;  %v12716_v6 = vpop.f32.mrf.mxu1  ;;  %v3538_v48 = vrot.slane %v3536_v19, 1  ;;  %v3864_v28 = vrot.slane %v12678_v9, 1  ;;  %v2847_v44 = vadd.f32 %v12580_v39, %v2465_v1  ;;  %v12731_v9 = vpop.f32.mrf.mxu0 }
 0x2b3   : > { %v3552_v23 = vsel %vm982_vm3, %v3547_v26, %v3551_v45  ;;  %v12722_v5 = vor.u32 %v3233_v8, %v12703_v47  ;;  %v3252_v18 = vshrl.u32 %v3096_v55, 16  ;;  %v2989_v16 = vadd.f32 %v12648_v54, %v2919_v7 }
 0x2b4   : > { %3763 = vrot.lane.b32.xlu1 %v3552_v23, %s10883_s18  ;;  %v3048_v20 = vmax.f32 %v2984_v27, 0.0  ;;  %v12726_v58 = vpop.f32.mrf.mxu1  ;;  %v3539_v62 = vor.u32 %v3538_v48, %v3534_v46  ;;  %v2466_v26 = vadd.f32 %v12513_v11, %v15465_v13  ;;  %v3866_v45 = vrot.slane %v3403_v41, 1 }
 0x2b5   : > { %v2917_v19 = vmul.f32 %v12636_v22, %v2847_v44  ;;  %v12733_v39 = vrot.slane %v3252_v18, 7  ;;  %v3863_v8 = vrot.slane %v12700_v49, 1  ;;  %v2850_v27 = vadd.f32 %v12608_v51, %v2468_v56  ;;  %v15468_v44 = vld [vmem:[#allocation39_spill] sm:$0xff] }
 0x2b6   : > { %v3095_v1 = vpack.c.bf16 %v3048_v20, %v3047_v57  ;;  %v12737_v23 = vpop.f32.mrf.mxu1  ;;  %v3255_v7 = vshll.u32 %v3096_v55, 16  ;;  %v3544_v46 = vsel %vm982_vm3, %v3539_v62, %v3543_v32  ;;  %v3867_v48 = vsel %vm1425_vm4, %v3864_v28, %v3866_v45  ;;  %v15467_v57 = vld [vmem:[#allocation37_spill] sm:$0xff]  ;;  %v12760_v20 = vpop.f32.mrf.mxu0 }
 0x2b7   : > { %v12744_v11 = vsel %vm663_vm0, %v12623_v17, %v12621_v24  ;;  %3761 = vrot.lane.b32.xlu0 %v3544_v46, %s10883_s18  ;;  %v3053_v41 = vmax.f32 %v2989_v16, 0.0  ;;  %v2987_v51 = vadd.f32 %v12648_v54, %v2917_v19  ;;  %v2471_v55 = vadd.f32 %v12531_v40, %v15467_v57 }
 0x2b8   : > { %15466 = vst [vmem:[#allocation29_spill] sm:$0xff] %v12744_v11  ;;  %v3245_v13 = vshrl.u32 %v3095_v1, 16  ;;  %3943 = vrot.lane.b32.xlu1 %v3867_v48, %s10884_s20  ;;  %v12751_v56 = vpop.f32.mrf.mxu1  ;;  %v2920_v32 = vmul.f32 %v12636_v22, %v2850_v27  ;;  %v2469_v18 = vadd.f32 %v12547_v4, %v15468_v44  ;;  %v3404_v24 = vsel %vm11059_vm2, %v12593_v43, 0 }
 0x2b9   : > { %v3561_v17 = vshll.u32 %v12744_v11, 16  ;;  %v12763_v16 = vor.u32 %v3255_v7, %v12733_v39  ;;  %v3865_v40 = vsel %vm1425_vm4, %v3863_v8, %v3864_v28  ;;  %v3569_v62 = vshll.u32 %v3404_v24, 16 }
 0x2ba   : > { %v2848_v45 = vadd.f32 %v12632_v30, %v2466_v26  ;;  %v12767_v19 = vpop.f32.mrf.mxu1  ;;  %v2990_v4 = vadd.f32 %v12648_v54, %v2920_v32  ;;  %v3565_v46 = vshrl.u32 %v12744_v11, 16  ;;  %v12774_v43 = vsel %vm11059_vm2, 0, %v12642_v37 }
 0x2bb   : > { %v3563_v27 = vrot.slane %v3561_v17, 1  ;;  %v12776_v48 = vrot.slane %v3245_v13, 7  ;;  %v3248_v7 = vshll.u32 %v3095_v1, 16  ;;  %3941 = vrot.lane.b32.xlu0 %v3865_v40, %s10884_s20  ;;  %v3571_v28 = vrot.slane %v3569_v62, 1  ;;  %v12782_v17 = vpop.f32.mrf.mxu0 }
 0x2bc   : > { %v2918_v30 = vmul.f32 %v12636_v22, %v2848_v45  ;;  %v10184_v26 = vpop.f32.mrf.mxu1  ;;  %v3054_v8 = vmax.f32 %v2990_v4, 0.0  ;;  %v3556_v32 = vshll.u32 %v12774_v43, 16  ;;  %v2853_v44 = vadd.f32 %v12659_v53, %v2471_v55 }
 0x2bd   : > { %v3567_v57 = vor.u32 %v3565_v46, %v3563_v27  ;;  %v3051_v49 = vmax.f32 %v2987_v51, 0.0  ;;  %v3554_v13 = vshrl.u32 %v12774_v43, 16  ;;  %v3869_v1 = vrot.slane %v12744_v11, 1  ;;  %v15469_v51 = vld [vmem:[#allocation41_spill] sm:$0xff] }
 0x2be   : > { %v2988_v37 = vadd.f32 %v12648_v54, %v2918_v30  ;;  %v2414_v40 = vpop.f32.mrf.mxu1  ;;  %v3098_v62 = vpack.c.bf16 %v3054_v8, %v3053_v41  ;;  %v3558_v26 = vrot.slane %v3556_v32, 1  ;;  %v2923_v4 = vmul.f32 %v12636_v22, %v2853_v44  ;;  %v12797_v8 = vpop.f32.mrf.mxu0 }
 0x2bf   : > { %v3572_v45 = vsel %vm982_vm3, %v3567_v57, %v3571_v28  ;;  %v12790_v46 = vor.u32 %v3248_v7, %v12776_v48  ;;  %v2472_v55 = vadd.f32 %v12554_v34, %v15469_v51  ;;  %v2851_v30 = vadd.f32 %v12688_v42, %v2469_v18 }
 0x2c0   : > { %3767 = vrot.lane.b32.xlu1 %v3572_v45, %s10883_s18  ;;  %v3052_v53 = vmax.f32 %v2988_v37, 0.0  ;;  %v10185_v59 = vpop.f32.mrf.mxu1  ;;  %v3267_v11 = vshrl.u32 %v3098_v62, 16  ;;  %v3559_v40 = vor.u32 %v3558_v26, %v3554_v13  ;;  %v2993_v41 = vadd.f32 %v12648_v54, %v2923_v4  ;;  %v15471_v26 = vld [vmem:[#allocation43_spill] sm:$0xff] }
 0x2c1   : > { %v3871_v28 = vrot.slane %v3404_v24, 1  ;;  %v2921_v7 = vmul.f32 %v12636_v22, %v2851_v30  ;;  %v3868_v32 = vrot.slane %v12774_v43, 1  ;;  %v2854_v44 = vadd.f32 %v12710_v12, %v2472_v55  ;;  %v15470_v59 = vld [vmem:[#allocation42_spill] sm:$0xff]  ;;  %v15472_v55 = vld [vmem:[#allocation44_spill] sm:$0xff] }
 0x2c2   : > { %v3097_v57 = vpack.c.bf16 %v3052_v53, %v3051_v49  ;;  %v2416_v37 = vpop.f32.mrf.mxu1  ;;  %v12802_v45 = vrot.slane %v3267_v11, 7  ;;  %v3564_v34 = vsel %vm982_vm3, %v3559_v40, %v3563_v27  ;;  %v2470_v42 = vadd.f32 %v12566_v36, %v15470_v59 }
 0x2c3   : > { %v3872_v18 = vsel %vm1425_vm4, %v3869_v1, %v3871_v28  ;;  %v3270_v24 = vshll.u32 %v3098_v62, 16  ;;  %3765 = vrot.lane.b32.xlu0 %v3564_v34, %s10883_s18  ;;  %v3057_v49 = vmax.f32 %v2993_v41, 0.0  ;;  %v2475_v12 = vadd.f32 %v12575_v21, %v15471_v26  ;;  %v12822_v62 = vpop.f32.mrf.mxu0 }
 0x2c4   : > { %v3260_v13 = vshrl.u32 %v3097_v57, 16  ;;  %3947 = vrot.lane.b32.xlu1 %v3872_v18, %s10884_s20  ;;  %v2991_v11 = vadd.f32 %v12648_v54, %v2921_v7  ;;  %v2924_v4 = vmul.f32 %v12636_v22, %v2854_v44  ;;  %v12817_v36 = vsel %vm663_vm0, %v12703_v47, %v12683_v60 }
 0x2c5   : > { %v3405_v27 = vsel %vm11059_vm2, %v12653_v52, 0  ;;  %v3263_v53 = vshll.u32 %v3097_v57, 16  ;;  %v3870_v51 = vsel %vm1425_vm4, %v3868_v32, %v3869_v1  ;;  %v2473_v21 = vadd.f32 %v12591_v14, %v15472_v55  ;;  %v10250_v37 = vpop.f32.mrf.mxu0 }
 0x2c6   : > { %v3581_v30 = vshll.u32 %v12817_v36, 16  ;;  %v12829_v40 = vor.u32 %v3270_v24, %v12802_v45  ;;  %v2994_v60 = vadd.f32 %v12648_v54, %v2924_v4  ;;  %v3589_v47 = vshll.u32 %v3405_v27, 16 }
 0x2c7   : > { %v2852_v41 = vadd.f32 %v12731_v9, %v2470_v42  ;;  %3945 = vrot.lane.b32.xlu0 %v3870_v51, %s10884_s20  ;;  %v3585_v28 = vshrl.u32 %v12817_v36, 16  ;;  %v12838_v1 = vsel %vm11059_vm2, 0, %v12722_v5  ;;  %v2857_v14 = vadd.f32 %v12760_v20, %v2475_v12  ;;  %v15473_v5 = vld [vmem:[#allocation45_spill] sm:$0xff] }
 0x2c8   : > { %v3583_v52 = vrot.slane %v3581_v30, 1  ;;  %v12841_v57 = vrot.slane %v3260_v13, 7  ;;  %v3055_v7 = vmax.f32 %v2991_v11, 0.0  ;;  %v3058_v32 = vmax.f32 %v2994_v60, 0.0  ;;  %v2760_v60 = vpop.f32.mrf.mxu0 }
 0x2c9   : > { %v2922_v44 = vmul.f32 %v12636_v22, %v2852_v41  ;;  %v3591_v34 = vrot.slane %v3589_v47, 1  ;;  %v3576_v59 = vshll.u32 %v12838_v1, 16  ;;  %v2927_v42 = vmul.f32 %v12636_v22, %v2857_v14  ;;  %v15474_v47 = vld [vmem:[#allocation46_spill] sm:$0xff] }
 0x2ca   : > { %v3587_v9 = vor.u32 %v3585_v28, %v3583_v52  ;;  %v3100_v18 = vpack.c.bf16 %v3058_v32, %v3057_v49  ;;  %v2476_v26 = vadd.f32 %v12604_v29, %v15473_v5  ;;  %v3574_v20 = vshrl.u32 %v12838_v1, 16 }
 0x2cb   : > { %v2992_v24 = vadd.f32 %v12648_v54, %v2922_v44  ;;  %v3578_v12 = vrot.slane %v3576_v59, 1  ;;  %v3874_v11 = vrot.slane %v12817_v36, 1  ;;  %v2855_v4 = vadd.f32 %v12782_v17, %v2473_v21 }
 0x2cc   : > { %v3592_v13 = vsel %vm982_vm3, %v3587_v9, %v3591_v34  ;;  %v12854_v51 = vor.u32 %v3263_v53, %v12841_v57  ;;  %v3282_v55 = vshrl.u32 %v3100_v18, 16  ;;  %v2997_v30 = vadd.f32 %v12648_v54, %v2927_v42  ;;  %v15475_v42 = vld [vmem:[#allocation25_spill] sm:$0xff] }
 0x2cd   : > { %3771 = vrot.lane.b32.xlu1 %v3592_v13, %s10883_s18  ;;  %v3056_v49 = vmax.f32 %v2992_v24, 0.0  ;;  %v3579_v29 = vor.u32 %v3578_v12, %v3574_v20  ;;  %v2474_v41 = vadd.f32 %v12618_v15, %v15474_v47  ;;  %v3876_v28 = vrot.slane %v3405_v27, 1  ;;  %v15476_v24 = vld [vmem:[#allocation27_spill] sm:$0xff] }
 0x2ce   : > { %v2925_v14 = vmul.f32 %v12636_v22, %v2855_v4  ;;  %v12861_v32 = vrot.slane %v3282_v55, 7  ;;  %v3873_v53 = vrot.slane %v12838_v1, 1  ;;  %v2858_v21 = vadd.f32 %v12797_v8, %v2476_v26 }
 0x2cf   : > { %v3099_v17 = vpack.c.bf16 %v3056_v49, %v3055_v7  ;;  %v3285_v44 = vshll.u32 %v3100_v18, 16  ;;  %v3584_v9 = vsel %vm982_vm3, %v3579_v29, %v3583_v52  ;;  %v3877_v34 = vsel %vm1425_vm4, %v3874_v11, %v3876_v28  ;;  %v10251_v18 = vpop.f32.mrf.mxu0 }
 0x2d0   : > { %v12870_v59 = vsel %vm663_vm0, %v12776_v48, %v12763_v16  ;;  %3769 = vrot.lane.b32.xlu0 %v3584_v9, %s10883_s18  ;;  %v3061_v27 = vmax.f32 %v2997_v30, 0.0  ;;  %v2995_v7 = vadd.f32 %v12648_v54, %v2925_v14  ;;  %v2479_v8 = vadd.f32 %v12628_v38, %v15475_v42  ;;  %v12901_v14 = vpop.permute.xlu1 %3733 }
 0x2d1   : > { %v3275_v15 = vshrl.u32 %v3099_v17, 16  ;;  %3951 = vrot.lane.b32.xlu1 %v3877_v34, %s10884_s20  ;;  %v2928_v52 = vmul.f32 %v12636_v22, %v2858_v21  ;;  %v2477_v5 = vadd.f32 %v12639_v25, %v15476_v24  ;;  %v3406_v16 = vsel %vm11059_vm2, %v12733_v39, 0  ;;  %v2763_v29 = vpop.f32.mrf.mxu0 }
 0x2d2   : > { %v3601_v48 = vshll.u32 %v12870_v59, 16  ;;  %v12885_v26 = vor.u32 %v3285_v44, %v12861_v32  ;;  %v3875_v20 = vsel %vm1425_vm4, %v3873_v53, %v3874_v11  ;;  %v3609_v13 = vshll.u32 %v3406_v16, 16 }
 0x2d3   : > { %v2856_v38 = vadd.f32 %v12822_v62, %v2474_v41  ;;  %v2998_v12 = vadd.f32 %v12648_v54, %v2928_v52  ;;  %v3605_v55 = vshrl.u32 %v12870_v59, 16  ;;  %v12894_v25 = vsel %vm11059_vm2, 0, %v12790_v46  ;;  %v10254_v24 = vpop.f32.mrf.mxu0 }
 0x2d4   : > { %v3603_v4 = vrot.slane %v3601_v48, 1  ;;  %v12896_v39 = vrot.slane %v3275_v15, 7  ;;  %v3278_v49 = vshll.u32 %v3099_v17, 16  ;;  %3949 = vrot.lane.b32.xlu0 %v3875_v20, %s10884_s20  ;;  %v3611_v30 = vrot.slane %v3609_v13, 1 }
 0x2d5   : > { %v2926_v11 = vmul.f32 %v12636_v22, %v2856_v38  ;;  %v3062_v62 = vmax.f32 %v2998_v12, 0.0  ;;  %v3596_v41 = vshll.u32 %v12894_v25, 16  ;;  %v2861_v28 = vadd.f32 %v10250_v37, %v2479_v8  ;;  %v15477_v8 = vld [vmem:[#allocation26_spill] sm:$0xff] }
 0x2d6   : > { %v3607_v47 = vor.u32 %v3605_v55, %v3603_v4  ;;  %v3059_v53 = vmax.f32 %v2995_v7, 0.0  ;;  %v3594_v21 = vshrl.u32 %v12894_v25, 16  ;;  %v3879_v17 = vrot.slane %v12870_v59, 1 }
 0x2d7   : > { %v2996_v46 = vadd.f32 %v12648_v54, %v2926_v11  ;;  %v3102_v44 = vpack.c.bf16 %v3062_v62, %v3061_v27  ;;  %v3598_v34 = vrot.slane %v3596_v41, 1  ;;  %v2931_v15 = vmul.f32 %v12636_v22, %v2861_v28  ;;  %v15478_v62 = vld [vmem:[#allocation24_spill] sm:$0xff]  ;;  %v15479_v28 = vld [vmem:[#allocation22_spill] sm:$0xff] }
 0x2d8   : > { %v3612_v9 = vsel %vm982_vm3, %v3607_v47, %v3611_v30  ;;  %v12909_v42 = vor.u32 %v3278_v49, %v12896_v39  ;;  %v2480_v7 = vadd.f32 %v12651_v10, %v15477_v8  ;;  %v2859_v52 = vadd.f32 %v2760_v60, %v2477_v5  ;;  %v12923_v5 = vpop.permute.xlu1 %10596 }
 0x2d9   : > { %3775 = vrot.lane.b32.xlu1 %v3612_v9, %s10883_s18  ;;  %v3060_v37 = vmax.f32 %v2996_v46, 0.0  ;;  %v3297_v48 = vshrl.u32 %v3102_v44, 16  ;;  %v3599_v20 = vor.u32 %v3598_v34, %v3594_v21  ;;  %v3001_v27 = vadd.f32 %v12648_v54, %v2931_v15 }
 0x2da   : > { %v3881_v13 = vrot.slane %v3406_v16, 1  ;;  %v2929_v12 = vmul.f32 %v12636_v22, %v2859_v52  ;;  %v3878_v55 = vrot.slane %v12894_v25, 1  ;;  %v2862_v49 = vadd.f32 %v10251_v18, %v2480_v7 }
 0x2db   : > { %v3101_v38 = vpack.c.bf16 %v3060_v37, %v3059_v53  ;;  %v12917_v30 = vrot.slane %v3297_v48, 7  ;;  %v3604_v11 = vsel %vm982_vm3, %v3599_v20, %v3603_v4  ;;  %v2478_v10 = vadd.f32 %v12664_v3, %v15478_v62  ;;  %v2776_v53 = vpop.f32.mrf.mxu0 }
 0x2dc   : > { %v3882_v60 = vsel %vm1425_vm4, %v3879_v17, %v3881_v13  ;;  %v3300_v47 = vshll.u32 %v3102_v44, 16  ;;  %3773 = vrot.lane.b32.xlu0 %v3604_v11, %s10883_s18  ;;  %v3065_v16 = vmax.f32 %v3001_v27, 0.0  ;;  %v2483_v18 = vadd.f32 %v12680_v63, %v15479_v28  ;;  %v12939_v44 = vpop.permute.xlu0 %3735  ;;  %v15480_v63 = vld [vmem:[#allocation28_spill] sm:$0xff]  ;;  %v12949_v52 = vpop.permute.xlu1 %3739 }
 0x2dd   : > { %v3290_v41 = vshrl.u32 %v3101_v38, 16  ;;  %3955 = vrot.lane.b32.xlu1 %v3882_v60, %s10884_s20  ;;  %v2999_v4 = vadd.f32 %v12648_v54, %v2929_v12  ;;  %v2932_v46 = vmul.f32 %v12636_v22, %v2862_v49  ;;  %v12934_v3 = vsel %vm663_vm0, %v12841_v57, %v12829_v40  ;;  %v10255_v20 = vpop.f32.mrf.mxu0  ;;  %v15481_v60 = vld [vmem:[#allocation30_spill] sm:$0xff] }
 0x2de   : > { %v3407_v21 = vsel %vm11059_vm2, %v12802_v45, 0  ;;  %v3293_v9 = vshll.u32 %v3101_v38, 16  ;;  %v3880_v34 = vsel %vm1425_vm4, %v3878_v55, %v3879_v17  ;;  %v2481_v15 = vadd.f32 %v12693_v61, %v15480_v63 }
 0x2df   : > { %v3621_v37 = vshll.u32 %v12934_v3, 16  ;;  %v12946_v8 = vor.u32 %v3300_v47, %v12917_v30  ;;  %v3002_v40 = vadd.f32 %v12648_v54, %v2932_v46  ;;  %v3629_v57 = vshll.u32 %v3407_v21, 16  ;;  %v2779_v46 = vpop.f32.mrf.mxu0 }
 0x2e0   : > { %v2860_v7 = vadd.f32 %v2763_v29, %v2478_v10  ;;  %3953 = vrot.lane.b32.xlu0 %v3880_v34, %s10884_s20  ;;  %v3625_v48 = vshrl.u32 %v12934_v3, 16  ;;  %v12956_v61 = vsel %vm11059_vm2, 0, %v12854_v51  ;;  %v2865_v17 = vadd.f32 %v10254_v24, %v2483_v18  ;;  %v12961_v12 = vpop.permute.xlu0 %3737 }
 0x2e1   : > { %v3623_v45 = vrot.slane %v3621_v37, 1  ;;  %v12958_v27 = vrot.slane %v3290_v41, 7  ;;  %v3063_v13 = vmax.f32 %v2999_v4, 0.0  ;;  %v3066_v38 = vmax.f32 %v3002_v40, 0.0  ;;  %v12976_v40 = vpop.permute.xlu1 %3919 }
 0x2e2   : > { %v2930_v29 = vmul.f32 %v12636_v22, %v2860_v7  ;;  %v3631_v49 = vrot.slane %v3629_v57, 1  ;;  %v3616_v11 = vshll.u32 %v12956_v61, 16  ;;  %v2935_v62 = vmul.f32 %v12636_v22, %v2865_v17  ;;  %v15482_v57 = vld [vmem:[#allocation32_spill] sm:$0xff] }
 0x2e3   : > { %v3627_v55 = vor.u32 %v3625_v48, %v3623_v45  ;;  %v3104_v10 = vpack.c.bf16 %v3066_v38, %v3065_v16  ;;  %v2484_v24 = vadd.f32 %v12706_v0, %v15481_v60  ;;  %v3614_v47 = vshrl.u32 %v12956_v61, 16 }
 0x2e4   : > { %v3000_v51 = vadd.f32 %v12648_v54, %v2930_v29  ;;  %v3618_v28 = vrot.slane %v3616_v11, 1  ;;  %v3884_v18 = vrot.slane %v12934_v3, 1  ;;  %v2863_v4 = vadd.f32 %v2776_v53, %v2481_v15  ;;  %v12984_v29 = vpop.permute.xlu0 %3917 }
 0x2e5   : > { %v3632_v41 = vsel %vm982_vm3, %v3627_v55, %v3631_v49  ;;  %v12972_v34 = vor.u32 %v3293_v9, %v12958_v27  ;;  %v3312_v63 = vshrl.u32 %v3104_v10, 16  ;;  %v3005_v37 = vadd.f32 %v12648_v54, %v2935_v62 }
 0x2e6   : > { %3779 = vrot.lane.b32.xlu1 %v3632_v41, %s10883_s18  ;;  %v3064_v16 = vmax.f32 %v3000_v51, 0.0  ;;  %v3619_v0 = vor.u32 %v3618_v28, %v3614_v47  ;;  %v2482_v7 = vadd.f32 %v12716_v6, %v15482_v57  ;;  %v3886_v48 = vrot.slane %v3407_v21, 1  ;;  %v10258_v21 = vpop.f32.mrf.mxu0  ;;  %v15484_v51 = vld [vmem:[#allocation36_spill] sm:$0xff] }
 0x2e7   : > { %v2933_v17 = vmul.f32 %v12636_v22, %v2863_v4  ;;  %v12981_v53 = vrot.slane %v3312_v63, 7  ;;  %v3883_v9 = vrot.slane %v12956_v61, 1  ;;  %v2866_v38 = vadd.f32 %v10255_v20, %v2484_v24 }
 0x2e8   : > { %v3103_v15 = vpack.c.bf16 %v3064_v16, %v3063_v13  ;;  %v3315_v55 = vshll.u32 %v3104_v10, 16  ;;  %v3624_v49 = vsel %vm982_vm3, %v3619_v0, %v3623_v45  ;;  %v3887_v11 = vsel %vm1425_vm4, %v3884_v18, %v3886_v48  ;;  %v15483_v13 = vld [vmem:[#allocation34_spill] sm:$0xff] }
 0x2e9   : > { %v12991_v6 = vsel %vm663_vm0, %v12896_v39, %v12885_v26  ;;  %3777 = vrot.lane.b32.xlu0 %v3624_v49, %s10883_s18  ;;  %v3069_v62 = vmax.f32 %v3005_v37, 0.0  ;;  %v3003_v20 = vadd.f32 %v12648_v54, %v2933_v17  ;;  %v2487_v10 = vadd.f32 %v12726_v58, %v15483_v13  ;;  %v13009_v58 = vpop.permute.xlu1 %3743 }
 0x2ea   : > { %3959 = vrot.lane.b32.xlu1 %v3887_v11, %s10884_s20  ;;  %v2485_v45 = vadd.f32 %v12737_v23, %v15484_v51  ;;  %v13001_v60 = vor.u32 %v3315_v55, %v12981_v53  ;;  %v2936_v26 = vmul.f32 %v12636_v22, %v2866_v38  ;;  %v3408_v39 = vsel %vm11059_vm2, %v12861_v32, 0  ;;  %v2792_v32 = vpop.f32.mrf.mxu0 }
 0x2eb   : > { %v3641_v24 = vshll.u32 %v12991_v6, 16  ;;  %v3305_v47 = vshrl.u32 %v3103_v15, 16  ;;  %v3885_v41 = vsel %vm1425_vm4, %v3883_v9, %v3884_v18  ;;  %v3649_v28 = vshll.u32 %v3408_v39, 16 }
 0x2ec   : > { %v2864_v4 = vadd.f32 %v2779_v46, %v2482_v7  ;;  %v3006_v23 = vadd.f32 %v12648_v54, %v2936_v26  ;;  %v3645_v16 = vshrl.u32 %v12991_v6, 16  ;;  %v13016_v37 = vsel %vm11059_vm2, 0, %v12909_v42  ;;  %v13020_v7 = vpop.permute.xlu0 %3741  ;;  %v10259_v26 = vpop.f32.mrf.mxu0 }
 0x2ed   : > { %v3643_v63 = vrot.slane %v3641_v24, 1  ;;  %v3308_v0 = vshll.u32 %v3103_v15, 16  ;;  %v3067_v57 = vmax.f32 %v3003_v20, 0.0  ;;  %3957 = vrot.lane.b32.xlu0 %v3885_v41, %s10884_s20  ;;  %v3651_v18 = vrot.slane %v3649_v28, 1  ;;  %v15485_v41 = vld [vmem:[#allocation38_spill] sm:$0xff]  ;;  %v13033_v28 = vpop.permute.xlu1 %3923 }
 0x2ee   : > { %v2934_v46 = vmul.f32 %v12636_v22, %v2864_v4  ;;  %v3070_v48 = vmax.f32 %v3006_v23, 0.0  ;;  %v3636_v9 = vshll.u32 %v13016_v37, 16  ;;  %v2869_v38 = vadd.f32 %v10258_v21, %v2487_v10 }
 0x2ef   : > { %v3647_v17 = vor.u32 %v3645_v16, %v3643_v63  ;;  %v13023_v55 = vrot.slane %v3305_v47, 7  ;;  %v3634_v49 = vshrl.u32 %v13016_v37, 16  ;;  %v3889_v15 = vrot.slane %v12991_v6, 1 }
 0x2f0   : > { %v3004_v42 = vadd.f32 %v12648_v54, %v2934_v46  ;;  %v3106_v11 = vpack.c.bf16 %v3070_v48, %v3069_v62  ;;  %v3638_v13 = vrot.slane %v3636_v9, 1  ;;  %v2939_v51 = vmul.f32 %v12636_v22, %v2869_v38  ;;  %v13041_v9 = vpop.permute.xlu0 %3921 }
 0x2f1   : > { %v3652_v20 = vsel %vm982_vm3, %v3647_v17, %v3651_v18  ;;  %v2488_v21 = vadd.f32 %v12751_v56, %v15485_v41  ;;  %v3891_v10 = vrot.slane %v3408_v39, 1  ;;  %v2867_v47 = vadd.f32 %v2792_v32, %v2485_v45  ;;  %v15486_v45 = vld [vmem:[#allocation40_spill] sm:$0xff] }
 0x2f2   : > { %3783 = vrot.lane.b32.xlu1 %v3652_v20, %s10883_s18  ;;  %v3068_v24 = vmax.f32 %v3004_v42, 0.0  ;;  %v3327_v4 = vshrl.u32 %v3106_v11, 16  ;;  %v3639_v23 = vor.u32 %v3638_v13, %v3634_v49  ;;  %v3009_v62 = vadd.f32 %v12648_v54, %v2939_v51  ;;  %v2795_v49 = vpop.f32.mrf.mxu0 }
 0x2f3   : > { %v3888_v16 = vrot.slane %v13016_v37, 1  ;;  %v13038_v18 = vor.u32 %v3308_v0, %v13023_v55  ;;  %v2937_v48 = vmul.f32 %v12636_v22, %v2867_v47  ;;  %v2870_v17 = vadd.f32 %v10259_v26, %v2488_v21 }
 0x2f4   : > { %v3105_v46 = vpack.c.bf16 %v3068_v24, %v3067_v57  ;;  %v3644_v56 = vsel %vm982_vm3, %v3639_v23, %v3643_v63  ;;  %v2486_v39 = vadd.f32 %v12767_v19, %v15486_v45  ;;  %v3892_v32 = vsel %vm1425_vm4, %v3889_v15, %v3891_v10  ;;  %v13066_v24 = vpop.permute.xlu1 %3747 }
 0x2f5   : > { %v13050_v38 = vsel %vm663_vm0, %v12958_v27, %v12946_v8  ;;  %v13052_v0 = vrot.slane %v3327_v4, 7  ;;  %v3330_v57 = vshll.u32 %v3106_v11, 16  ;;  %3781 = vrot.lane.b32.xlu0 %v3644_v56, %s10883_s18  ;;  %v2940_v63 = vmul.f32 %v12636_v22, %v2870_v17 }
 0x2f6   : > { %v3320_v42 = vshrl.u32 %v3105_v46, 16  ;;  %3963 = vrot.lane.b32.xlu1 %v3892_v32, %s10884_s20  ;;  %v3073_v20 = vmax.f32 %v3009_v62, 0.0  ;;  %v3890_v19 = vsel %vm1425_vm4, %v3888_v16, %v3889_v15  ;;  %v3409_v13 = vsel %vm11059_vm2, %v12917_v30, 0 }
 0x2f7   : > { %v3661_v8 = vshll.u32 %v13050_v38, 16  ;;  %v3007_v11 = vadd.f32 %v12648_v54, %v2937_v48  ;;  %v3010_v51 = vadd.f32 %v12648_v54, %v2940_v63  ;;  %v3669_v26 = vshll.u32 %v3409_v13, 16  ;;  %v13078_v23 = vpop.permute.xlu0 %3745 }
 0x2f8   : > { %v13062_v27 = vrot.slane %v3320_v42, 7  ;;  %v3665_v21 = vshrl.u32 %v13050_v38, 16  ;;  %v2868_v10 = vadd.f32 %v2795_v49, %v2486_v39  ;;  %v13072_v15 = vsel %vm11059_vm2, 0, %v12972_v34 }
 0x2f9   : > { %v3663_v41 = vrot.slane %v3661_v8, 1  ;;  %v13075_v30 = vor.u32 %v3330_v57, %v13052_v0  ;;  %v3323_v47 = vshll.u32 %v3105_v46, 16  ;;  %3961 = vrot.lane.b32.xlu0 %v3890_v19, %s10884_s20  ;;  %v3074_v4 = vmax.f32 %v3010_v51, 0.0  ;;  %v13093_v8 = vpop.permute.xlu1 %3927 }
 0x2fa   : > { %v3671_v16 = vrot.slane %v3669_v26, 1  ;;  %v2938_v48 = vmul.f32 %v12636_v22, %v2868_v10  ;;  %v3656_v17 = vshll.u32 %v13072_v15, 16  ;;  %v3071_v34 = vmax.f32 %v3007_v11, 0.0  ;;  %v15487_v22 = vld [vmem:[#allocation19_spill] sm:$0xff] }
 0x2fb   : > { %v3667_v62 = vor.u32 %v3665_v21, %v3663_v41  ;;  %v13083_v56 = vor.u32 %v3323_v47, %v13062_v27  ;;  %v3108_v45 = vpack.c.bf16 %v3074_v4, %v3073_v20  ;;  %v3654_v39 = vshrl.u32 %v13072_v15, 16  ;;  %v13109_v47 = vpop.permute.xlu0 %3925 }
 0x2fc   : > { %v3008_v32 = vadd.f32 %v12648_v54, %v2938_v48  ;;  %v3658_v57 = vrot.slane %v3656_v17, 1  ;;  %v3894_v42 = vrot.slane %v13050_v38, 1  ;;  %v3983_v49 = vsel %vm3981_vm9, %v15487_v22, %v12901_v14 }
 0x2fd   : > { %v3672_v46 = vsel %vm982_vm3, %v3667_v62, %v3671_v16  ;;  %v3342_v63 = vshrl.u32 %v3108_v45, 16  ;;  %v3896_v19 = vrot.slane %v3409_v13, 1  ;;  %v10599_v51 = vunpack.i.h.bf16 %v12923_v5  ;;  %v15488_v13 = vld [vmem:[#allocation16_spill] sm:$0xff] }
 0x2fe   : > { %3787 = vrot.lane.b32.xlu1 %v3672_v46, %s10883_s18  ;;  %v3072_v20 = vmax.f32 %v3008_v32, 0.0  ;;  %v3659_v11 = vor.u32 %v3658_v57, %v3654_v39  ;;  %v10598_v54 = vunpack.i.l.bf16 %v12923_v5  ;;  %v3893_v26 = vrot.slane %v13072_v15, 1 }
 0x2ff   : > { %v13101_v21 = vsel %vm663_vm0, %v13023_v55, %v13001_v60  ;;  %v3410_v14 = vsel %vm11059_vm2, %v12981_v53, 0  ;;  %v3985_v10 = vsel %vm3981_vm9, %v15488_v13, %v12939_v44  ;;  %v3897_v62 = vsel %vm1425_vm4, %v3894_v42, %v3896_v19 }
 0x300   : > { %v3107_v4 = vpack.c.bf16 %v3072_v20, %v3071_v34  ;;  %v3664_v5 = vsel %vm982_vm3, %v3659_v11, %v3663_v41  ;;  %v3681_v16 = vshll.u32 %v13101_v21, 16  ;;  %v13114_v48 = vrot.slane %v3342_v63, 7  ;;  %v13132_v57 = vpop.permute.xlu1 %3751  ;;  %v10645_v63 = vld [vmem:[%s15342_s4 + $0x80] sm:$0xff]  }
 0x301   : > { %3785 = vrot.lane.b32.xlu0 %v3664_v5, %s10883_s18  ;;  %v13119_v53 = vsel %vm4050_vm10, %v3983_v49, %v10598_v54  ;;  %v3685_v44 = vshrl.u32 %v13101_v21, 16  ;;  %v3689_v60 = vshll.u32 %v3410_v14, 16  ;;  %v13123_v41 = vsel %vm4050_vm10, %v3985_v10, %v10599_v51 }
 0x302   : > { %3967 = vrot.lane.b32.xlu1 %v3897_v62, %s10884_s20  ;;  %v3335_v55 = vshrl.u32 %v3107_v4, 16  ;;  %v3683_v17 = vrot.slane %v3681_v16, 1  ;;  %v13128_v34 = vsel %vm11059_vm2, 0, %v13038_v18  ;;  %v3345_v39 = vshll.u32 %v3108_v45, 16  ;;  %10272 = vmatprep.mubr.msk.bf16.mxu1 %vm4167_vm11, %v13119_v53  ;;  %v10646_v16 = vld [vmem:[%s15342_s4 + $0x78] sm:$0xff]  }
 0x303   : > { %v3895_v46 = vsel %vm1425_vm4, %v3893_v26, %v3894_v42  ;;  %v3676_v32 = vshll.u32 %v13128_v34, 16  ;;  %v3691_v20 = vrot.slane %v3689_v60, 1  ;;  %v3674_v11 = vshrl.u32 %v13128_v34, 16  ;;  %10356 = vmatprep.mubr.msk.bf16.mxu0 %vm4167_vm11, %v13119_v53  ;;  %10273 = vmatmul.mubr.msk.bf16.vlgmr.msra.gmra.mxu1 %vm4167_vm11, %v13123_v41  ;;  %v13156_v54 = vpop.permute.xlu0 %3749 }
 0x304   : > { %v3337_v49 = vrot.slane %v3335_v55, 7  ;;  %v3687_v19 = vor.u32 %v3685_v44, %v3683_v17  ;;  %v3899_v45 = vrot.slane %v13101_v21, 1  ;;  %v13149_v42 = vsel %vm663_vm0, %v13062_v27, %v13075_v30  ;;  %10357 = vmatmul.mubr.msk.bf16.vlgmr.msra.gmra.mxu0 %vm4167_vm11, %v13123_v41  ;;  %v10688_v27 = vld [vmem:[%s15342_s4 + $0x88] sm:$0xff]  }
 0x305   : > { %3965 = vrot.lane.b32.xlu0 %v3895_v46, %s10884_s20  ;;  %v3678_v18 = vrot.slane %v3676_v32, 1  ;;  %v13154_v51 = vsel %vm11059_vm2, %v13052_v0, 0  ;;  %v3347_v26 = vor.u32 %v3345_v39, %v13114_v48  ;;  %v3701_v10 = vshll.u32 %v13149_v42, 16  ;;  %10429 = vmatpush3.bf16.msra.mxu1 %v10688_v27 }
 0x306   : > { %v3692_v13 = vsel %vm982_vm3, %v3687_v19, %v3691_v20  ;;  %v3338_v30 = vshll.u32 %v3107_v4, 16  ;;  %v3901_v5 = vrot.slane %v3410_v14, 1  ;;  %v3709_v62 = vshll.u32 %v13154_v51, 16  ;;  %10430 = vmatprep.subr.bf16.mxu1 %v10645_v63  ;;  %v13181_v19 = vpop.permute.xlu1 %3931 }
 0x307   : > { %3791 = vrot.lane.b32.xlu1 %v3692_v13, %s10883_s18  ;;  %v3679_v0 = vor.u32 %v3678_v18, %v3674_v11  ;;  %v3898_v44 = vrot.slane %v13128_v34, 1  ;;  %v3703_v60 = vrot.slane %v3701_v10, 1  ;;  %v3705_v55 = vshrl.u32 %v13149_v42, 16  ;;  %v15489_v18 = vld [vmem:[#allocation47_spill] sm:$0xff] }
 0x308   : > { %v13176_v4 = vsel %vm11059_vm2, 0, %v13083_v56  ;;  %v3340_v39 = vor.u32 %v3338_v30, %v3337_v49  ;;  %v3902_v46 = vsel %vm1425_vm4, %v3899_v45, %v3901_v5  ;;  %v3711_v11 = vrot.slane %v3709_v62, 1  ;;  %v15490_v56 = vld [vmem:[#allocation48_spill] sm:$0xff]  ;;  %v13199_v5 = vpop.permute.xlu0 %3929 }
 0x309   : > { %v3684_v14 = vsel %vm982_vm3, %v3679_v0, %v3683_v17  ;;  %v3696_v32 = vshll.u32 %v13176_v4, 16  ;;  %v3707_v20 = vor.u32 %v3705_v55, %v3703_v60  ;;  %v3989_v13 = vsel %vm3981_vm9, %v15489_v18, %v12949_v52  ;;  %10431 = vmatpush3.bf16.msra.mxu1 %v10645_v63 }
 0x30a   : > { %3789 = vrot.lane.b32.xlu0 %v3684_v14, %s10883_s18  ;;  %v3987_v10 = vsel %vm3981_vm9, %v15490_v56, %v12961_v12  ;;  %v3694_v17 = vshrl.u32 %v13176_v4, 16  ;;  %v13197_v0 = vsel %vm663_vm0, %v3337_v49, %v3347_v26  ;;  %10432 = vmatprep.subr.bf16.mxu1 %v10646_v16  ;;  %v13204_v12 = vsel %vm4050_vm10, %v3989_v13, %v12976_v40 }
 0x30b   : > { %3971 = vrot.lane.b32.xlu1 %v3902_v46, %s10884_s20  ;;  %v3698_v27 = vrot.slane %v3696_v32, 1  ;;  %v13194_v30 = vsel %vm4050_vm10, %v3987_v10, %v12984_v29  ;;  %v3712_v52 = vsel %vm982_vm3, %v3707_v20, %v3711_v11  ;;  %v13209_v63 = vsel %vm11059_vm2, %v13114_v48, 0  ;;  %v10647_v29 = vld [vmem:[%s15342_s4 + $0x70] sm:$0xff]  }
 0x30c   : > { %10276 = vmatprep.mubr.msk.bf16.mxu1 %vm4167_vm11, %v13194_v30  ;;  %10360 = vmatprep.mubr.msk.bf16.mxu0 %vm4167_vm11, %v13194_v30  ;;  %v3900_v49 = vsel %vm1425_vm4, %v3898_v44, %v3899_v45  ;;  %v3721_v40 = vshll.u32 %v13197_v0, 16  ;;  %v3904_v48 = vrot.slane %v13149_v42, 1  ;;  %v3729_v62 = vshll.u32 %v13209_v63, 16  ;;  %v13234_v46 = vpop.permute.xlu1 %3755 }
 0x30d   : > { %v3699_v26 = vor.u32 %v3698_v27, %v3694_v17  ;;  %10277 = vmatmul.mubr.msk.bf16.gmra.mxu1 %vm4167_vm11, %v13204_v12  ;;  %v13227_v55 = vsel %vm11059_vm2, 0, %v3340_v39  ;;  %10361 = vmatmul.mubr.msk.bf16.gmra.mxu0 %vm4167_vm11, %v13204_v12  ;;  %v3725_v14 = vshrl.u32 %v13197_v0, 16  ;;  %v3906_v32 = vrot.slane %v13154_v51, 1  ;;  %v15491_v39 = vld [vmem:[#allocation50_spill] sm:$0xff] }
 0x30e   : > { %3969 = vrot.lane.b32.xlu0 %v3900_v49, %s10884_s20  ;;  %v3723_v44 = vrot.slane %v3721_v40, 1  ;;  %10433 = vmatpush3.bf16.msra.mxu1 %v10646_v16  ;;  %v3716_v20 = vshll.u32 %v13227_v55, 16  ;;  %v3991_v11 = vsel %vm3981_vm9, %v15491_v39, %v13020_v7  ;;  %v3903_v18 = vrot.slane %v13176_v4, 1  ;;  %v10648_v16 = vld [vmem:[%s15342_s4 + $0x68] sm:$0xff]  }
 0x30f   : > { %3795 = vrot.lane.b32.xlu1 %v3712_v52, %s10883_s18  ;;  %v3704_v45 = vsel %vm982_vm3, %v3699_v26, %v3703_v60  ;;  %10434 = vmatprep.subr.bf16.mxu1 %v10647_v29  ;;  %v13244_v60 = vsel %vm4050_vm10, %v3991_v11, %v13041_v9  ;;  %v3754_v56 = vpop.permute.xlu0 %3753  ;;  %v3907_v51 = vsel %vm1425_vm4, %v3904_v48, %v3906_v32  ;;  %v3731_v10 = vrot.slane %v3729_v62, 1  ;;  %v15492_v9 = vld [vmem:[#allocation49_spill] sm:$0xff]  ;;  %v15493_v52 = vld [vmem:[#allocation52_spill] sm:$0xff] }
 0x310   : > { %v3727_v13 = vor.u32 %v3725_v14, %v3723_v44  ;;  %v3714_v7 = vshrl.u32 %v13227_v55, 16  ;;  %v3718_v17 = vrot.slane %v3716_v20, 1  ;;  %10280 = vmatprep.mubr.msk.bf16.mxu1 %vm4167_vm11, %v13244_v60  ;;  %v3993_v27 = vsel %vm3981_vm9, %v15492_v9, %v13009_v58  ;;  %10364 = vmatprep.mubr.msk.bf16.mxu0 %vm4167_vm11, %v13244_v60  ;;  %v3936_v14 = vpop.permute.xlu1 %3935 }
 0x311   : > { %v3995_v49 = vsel %vm3981_vm9, %v15493_v52, %v13078_v23  ;;  %v13266_v62 = vsel %vm4050_vm10, %v3993_v27, %v13033_v28  ;;  %v3905_v58 = vsel %vm1425_vm4, %v3903_v18, %v3904_v48  ;;  %v10649_v23 = vld [vmem:[%s15342_s4 + $0x60] sm:$0xff]   ;;  %v3909_v28 = vrot.slane %v13197_v0, 1  ;;  %v15497_v52 = vld [vmem:[#allocation53_spill] sm:$0xff] }
 0x312   : > { %3793 = vrot.lane.b32.xlu0 %v3704_v45, %s10883_s18  ;;  %v3732_v26 = vsel %vm982_vm3, %v3727_v13, %v3731_v10  ;;  %v3719_v40 = vor.u32 %v3718_v17, %v3714_v7  ;;  %v13270_v45 = vsel %vm4050_vm10, %v3995_v49, %v13109_v47  ;;  %10435 = vmatpush3.bf16.msra.mxu1 %v10647_v29  ;;  %v3911_v48 = vrot.slane %v13209_v63, 1 }
 0x313   : > { %3975 = vrot.lane.b32.xlu1 %v3907_v51, %s10884_s20  ;;  %10436 = vmatprep.subr.bf16.mxu1 %v10648_v16  ;;  %v3934_v29 = vpop.permute.xlu0 %3933  ;;  %v3908_v32 = vrot.slane %v13227_v55, 1  ;;  %v3999_v63 = vsel %vm3981_vm9, %v12461_v50, %v13156_v54  ;;  %v4001_v54 = vsel %vm3981_vm9, %v12435_v35, %v13132_v57  ;;  %v15495_v57 = vld [vmem:[#allocation56_spill] sm:$0xff]  ;;  %vm7252_vm0 = vcmask 1045509  }
 0x314   : > { %v3724_v47 = vsel %vm982_vm3, %v3719_v40, %v3723_v44  ;;  %v3912_v20 = vsel %vm1425_vm4, %v3909_v28, %v3911_v48  ;;  %v15494_v44 = vld [vmem:[#allocation51_spill] sm:$0xff]  ;;  %v13305_v13 = vsel %vm4050_vm10, %v3999_v63, %v13199_v5  ;;  %v13328_v10 = vsel %vm4050_vm10, %v4001_v54, %v13181_v19  ;;  %v15496_v19 = vld [vmem:[#allocation54_spill] sm:$0xff] }
 0x315   : > { %10281 = vmatmul.mubr.msk.bf16.gmra.mxu1 %vm4167_vm11, %v13266_v62  ;;  %10365 = vmatmul.mubr.msk.bf16.gmra.mxu0 %vm4167_vm11, %v13266_v62  ;;  %v3997_v39 = vsel %vm3981_vm9, %v15494_v44, %v13066_v24  ;;  %v4005_v7 = vsel %vm3981_vm9, %v15496_v19, %v13234_v46 }
 0x316   : > { %3973 = vrot.lane.b32.xlu0 %v3905_v58, %s10884_s20  ;;  %10284 = vmatprep.mubr.msk.bf16.mxu1 %vm4167_vm11, %v13270_v45  ;;  %v13301_v18 = vsel %vm4050_vm10, %v3997_v39, %v13093_v8  ;;  %v4003_v8 = vsel %vm3981_vm9, %v12544_v31, %v3754_v56  ;;  %v13347_v9 = vsel %vm4050_vm10, %v4005_v7, %v3936_v14 }
 0x317   : > { %3799 = vrot.lane.b32.xlu1 %v3732_v26, %s10883_s18  ;;  %10368 = vmatprep.mubr.msk.bf16.mxu0 %vm4167_vm11, %v13270_v45  ;;  %v13324_v5 = vsel %vm4050_vm10, %v4003_v8, %v3934_v29  ;;  %v15498_v26 = vld [vmem:[#allocation55_spill] sm:$0xff] }
 0x318   : > { %10437 = vmatpush3.bf16.msra.mxu1 %v10648_v16  ;;  %v3910_v16 = vsel %vm1425_vm4, %v3908_v32, %v3909_v28  ;;  %v15499_v32 = vld [vmem:[#allocation21_spill] sm:$0xff] }
 0x319   : > { %10438 = vmatprep.subr.bf16.mxu1 %v10649_v23  ;;  %v3760_v11 = vpop.permute.xlu1 %3759 }
 0x31a   : > { %3797 = vrot.lane.b32.xlu0 %v3724_v47, %s10883_s18  ;;  %v4009_v40 = vsel %vm3981_vm9, %v15498_v26, %v3760_v11  ;;  %v15500_v11 = vld [vmem:[#allocation29_spill] sm:$0xff] }
 0x31b   : > { %3979 = vrot.lane.b32.xlu1 %v3912_v20, %s10884_s20 }
 0x31c   : > { %10439 = vmatpush3.bf16.msra.mxu1 %v10649_v23  ;;  %v3758_v24 = vpop.permute.xlu0 %3757 }
 0x31d   : > { %10285 = vmatmul.mubr.msk.bf16.gmra.mxu1 %vm4167_vm11, %v13301_v18  ;;  %8078 = vmatprep.subr.bf16.mxu1 %v15454_v33  ;;  %v3940_v50 = vpop.permute.xlu1 %3939  ;;  %v4007_v56 = vsel %vm3981_vm9, %v15495_v57, %v3758_v24 }
 0x31e   : > { %3977 = vrot.lane.b32.xlu0 %v3910_v16, %s10884_s20  ;;  %10369 = vmatmul.mubr.msk.bf16.gmra.mxu0 %vm4167_vm11, %v13301_v18  ;;  %v13365_v23 = vsel %vm4050_vm10, %v4009_v40, %v3940_v50 }
 0x31f   : > { %10288 = vmatprep.mubr.msk.bf16.mxu1 %vm4167_vm11, %v13305_v13  ;;  %10372 = vmatprep.mubr.msk.bf16.mxu0 %vm4167_vm11, %v13305_v13 }
 0x320   : > { %v3938_v51 = vpop.permute.xlu0 %3937 }
 0x321   : > { %v13344_v17 = vsel %vm4050_vm10, %v4007_v56, %v3938_v51 }
 0x325   : > { %10289 = vmatmul.mubr.msk.bf16.gmra.mxu1 %vm4167_vm11, %v13328_v10 }
 0x326   : > { %10373 = vmatmul.mubr.msk.bf16.gmra.mxu0 %vm4167_vm11, %v13328_v10  ;;  %10292 = vmatprep.mubr.msk.bf16.mxu1 %vm4167_vm11, %v13324_v5  ;;  %v3764_v35 = vpop.permute.xlu1 %3763 }
 0x327   : > { %10376 = vmatprep.mubr.msk.bf16.mxu0 %vm4167_vm11, %v13324_v5  ;;  %v4013_v20 = vsel %vm3981_vm9, %v15499_v32, %v3764_v35 }
 0x329   : > { %v3762_v31 = vpop.permute.xlu0 %3761 }
 0x32a   : > { %v3944_v27 = vpop.permute.xlu1 %3943  ;;  %v4011_v49 = vsel %vm3981_vm9, %v15497_v52, %v3762_v31 }
 0x32b   : > { %v13383_v39 = vsel %vm4050_vm10, %v4013_v20, %v3944_v27 }
 0x32d   : > { %10293 = vmatmul.mubr.msk.bf16.gmra.mxu1 %vm4167_vm11, %v13347_v9  ;;  %v3942_v46 = vpop.permute.xlu0 %3941 }
 0x32e   : > { %10377 = vmatmul.mubr.msk.bf16.gmra.mxu0 %vm4167_vm11, %v13347_v9  ;;  %10296 = vmatprep.mubr.msk.bf16.mxu1 %vm4167_vm11, %v13344_v17  ;;  %v13362_v58 = vsel %vm4050_vm10, %v4011_v49, %v3942_v46 }
 0x32f   : > { %10380 = vmatprep.mubr.msk.bf16.mxu0 %vm4167_vm11, %v13344_v17 }
 0x332   : > { %v3768_v14 = vpop.permute.xlu1 %3767 }
 0x333   : > { %v4017_v16 = vsel %vm3981_vm9, %v15500_v11, %v3768_v14 }
 0x335   : > { %10297 = vmatmul.mubr.msk.bf16.gmra.mxu1 %vm4167_vm11, %v13365_v23  ;;  %v3766_v28 = vpop.permute.xlu0 %3765 }
 0x336   : > { %10381 = vmatmul.mubr.msk.bf16.gmra.mxu0 %vm4167_vm11, %v13365_v23  ;;  %10300 = vmatprep.mubr.msk.bf16.mxu1 %vm4167_vm11, %v13362_v58  ;;  %v3948_v47 = vpop.permute.xlu1 %3947  ;;  %v4015_v48 = vsel %vm3981_vm9, %v12774_v43, %v3766_v28 }
 0x337   : > { %10384 = vmatprep.mubr.msk.bf16.mxu0 %vm4167_vm11, %v13362_v58  ;;  %v13396_v24 = vsel %vm4050_vm10, %v4017_v16, %v3948_v47 }
 0x339   : > { %v3946_v29 = vpop.permute.xlu0 %3945 }
 0x33a   : > { %v13380_v44 = vsel %vm4050_vm10, %v4015_v48, %v3946_v29 }
 0x33d   : > { %10301 = vmatmul.mubr.msk.bf16.gmra.mxu1 %vm4167_vm11, %v13383_v39 }
 0x33e   : > { %10385 = vmatmul.mubr.msk.bf16.gmra.mxu0 %vm4167_vm11, %v13383_v39  ;;  %10304 = vmatprep.mubr.msk.bf16.mxu1 %vm4167_vm11, %v13380_v44 }
 0x33f   : > { %v3772_v63 = vpop.permute.xlu1 %3771  ;;  %10388 = vmatprep.mubr.msk.bf16.mxu0 %vm4167_vm11, %v13380_v44 }
 0x340   : > { %v4021_v35 = vsel %vm3981_vm9, %v12817_v36, %v3772_v63 }
 0x342   : > { %v3770_v43 = vpop.permute.xlu0 %3769 }
 0x343   : > { %v3952_v50 = vpop.permute.xlu1 %3951  ;;  %v4019_v8 = vsel %vm3981_vm9, %v12838_v1, %v3770_v43 }
 0x344   : > { %v13414_v57 = vsel %vm4050_vm10, %v4021_v35, %v3952_v50 }
 0x345   : > { %10305 = vmatmul.mubr.msk.bf16.gmra.mxu1 %vm4167_vm11, %v13396_v24 }
 0x346   : > { %10389 = vmatmul.mubr.msk.bf16.gmra.mxu0 %vm4167_vm11, %v13396_v24  ;;  %v3950_v54 = vpop.permute.xlu0 %3949 }
 0x347   : > { %v13405_v51 = vsel %vm4050_vm10, %v4019_v8, %v3950_v54 }
 0x348   : > { %10308 = vmatprep.mubr.msk.bf16.mxu1 %vm4167_vm11, %v13405_v51  ;;  %10392 = vmatprep.mubr.msk.bf16.mxu0 %vm4167_vm11, %v13405_v51 }
 0x34b   : > { %v3776_v31 = vpop.permute.xlu1 %3775 }
 0x34c   : > { %v4025_v27 = vsel %vm3981_vm9, %v12870_v59, %v3776_v31 }
 0x34d   : > { %10309 = vmatmul.mubr.msk.bf16.gmra.mxu1 %vm4167_vm11, %v13414_v57 }
 0x34e   : > { %10393 = vmatmul.mubr.msk.bf16.gmra.mxu0 %vm4167_vm11, %v13414_v57  ;;  %v3774_v1 = vpop.permute.xlu0 %3773 }
 0x34f   : > { %v3956_v56 = vpop.permute.xlu1 %3955  ;;  %v4023_v19 = vsel %vm3981_vm9, %v12894_v25, %v3774_v1 }
 0x350   : > { %v13428_v46 = vsel %vm4050_vm10, %v4025_v27, %v3956_v56 }
 0x352   : > { %v3954_v7 = vpop.permute.xlu0 %3953 }
 0x353   : > { %v13425_v36 = vsel %vm4050_vm10, %v4023_v19, %v3954_v7 }
 0x354   : > { %10312 = vmatprep.mubr.msk.bf16.mxu1 %vm4167_vm11, %v13425_v36  ;;  %10396 = vmatprep.mubr.msk.bf16.mxu0 %vm4167_vm11, %v13425_v36 }
 0x355   : > { %10313 = vmatmul.mubr.msk.bf16.gmra.mxu1 %vm4167_vm11, %v13428_v46 }
 0x356   : > { %10397 = vmatmul.mubr.msk.bf16.gmra.mxu0 %vm4167_vm11, %v13428_v46 }
 0x358   : > { %v3780_v25 = vpop.permute.xlu1 %3779 }
 0x359   : > { %v4029_v40 = vsel %vm3981_vm9, %v12934_v3, %v3780_v25 }
 0x35b   : > { %v3778_v59 = vpop.permute.xlu0 %3777 }
 0x35c   : > { %v3960_v52 = vpop.permute.xlu1 %3959  ;;  %v4027_v49 = vsel %vm3981_vm9, %v12956_v61, %v3778_v59 }
 0x35d   : > { %v13446_v28 = vsel %vm4050_vm10, %v4029_v40, %v3960_v52 }
 0x35f   : > { %v3958_v26 = vpop.permute.xlu0 %3957 }
 0x360   : > { %v13443_v14 = vsel %vm4050_vm10, %v4027_v49, %v3958_v26 }
 0x361   : > { %10316 = vmatprep.mubr.msk.bf16.mxu1 %vm4167_vm11, %v13443_v14  ;;  %10400 = vmatprep.mubr.msk.bf16.mxu0 %vm4167_vm11, %v13443_v14 }
 0x362   : > { %10317 = vmatmul.mubr.msk.bf16.gmra.mxu1 %vm4167_vm11, %v13446_v28  ;;  %10401 = vmatmul.mubr.msk.bf16.gmra.mxu0 %vm4167_vm11, %v13446_v28 }
 0x364   : > { %v3784_v61 = vpop.permute.xlu1 %3783 }
 0x365   : > { %v4033_v32 = vsel %vm3981_vm9, %v12991_v6, %v3784_v61 }
 0x367   : > { %v3782_v3 = vpop.permute.xlu0 %3781 }
 0x368   : > { %v3964_v47 = vpop.permute.xlu1 %3963  ;;  %v4031_v29 = vsel %vm3981_vm9, %v13016_v37, %v3782_v3 }
 0x369   : > { %v13464_v63 = vsel %vm4050_vm10, %v4033_v32, %v3964_v47 }
 0x36b   : > { %v3962_v48 = vpop.permute.xlu0 %3961 }
 0x36c   : > { %v13461_v20 = vsel %vm4050_vm10, %v4031_v29, %v3962_v48 }
 0x36d   : > { %10320 = vmatprep.mubr.msk.bf16.mxu1 %vm4167_vm11, %v13461_v20  ;;  %10404 = vmatprep.mubr.msk.bf16.mxu0 %vm4167_vm11, %v13461_v20 }
 0x36e   : > { %10321 = vmatmul.mubr.msk.bf16.gmra.mxu1 %vm4167_vm11, %v13464_v63  ;;  %10405 = vmatmul.mubr.msk.bf16.gmra.mxu0 %vm4167_vm11, %v13464_v63 }
 0x370   : > { %v3788_v37 = vpop.permute.xlu1 %3787 }
 0x371   : > { %v4037_v50 = vsel %vm3981_vm9, %v13050_v38, %v3788_v37 }
 0x373   : > { %v3786_v6 = vpop.permute.xlu0 %3785 }
 0x374   : > { %v3968_v43 = vpop.permute.xlu1 %3967  ;;  %v4035_v11 = vsel %vm3981_vm9, %v13072_v15, %v3786_v6 }
 0x375   : > { %v13482_v54 = vsel %vm4050_vm10, %v4037_v50, %v3968_v43 }
 0x377   : > { %v3966_v16 = vpop.permute.xlu0 %3965 }
 0x378   : > { %v13479_v8 = vsel %vm4050_vm10, %v4035_v11, %v3966_v16 }
 0x379   : > { %v3792_v35 = vpop.permute.xlu1 %3791  ;;  %10324 = vmatprep.mubr.msk.bf16.mxu1 %vm4167_vm11, %v13479_v8  ;;  %10408 = vmatprep.mubr.msk.bf16.mxu0 %vm4167_vm11, %v13479_v8 }
 0x37a   : > { %10325 = vmatmul.mubr.msk.bf16.gmra.mxu1 %vm4167_vm11, %v13482_v54  ;;  %10409 = vmatmul.mubr.msk.bf16.gmra.mxu0 %vm4167_vm11, %v13482_v54  ;;  %v4041_v56 = vsel %vm3981_vm9, %v13101_v21, %v3792_v35 }
 0x37c   : > { %v3790_v38 = vpop.permute.xlu0 %3789 }
 0x37d   : > { %v3972_v15 = vpop.permute.xlu1 %3971  ;;  %v4039_v31 = vsel %vm3981_vm9, %v13128_v34, %v3790_v38 }
 0x37e   : > { %v13500_v27 = vsel %vm4050_vm10, %v4041_v56, %v3972_v15 }
 0x380   : > { %v3970_v1 = vpop.permute.xlu0 %3969 }
 0x381   : > { %v13497_v19 = vsel %vm4050_vm10, %v4039_v31, %v3970_v1  ;;  %v3796_v7 = vpop.permute.xlu1 %3795 }
 0x382   : > { %10328 = vmatprep.mubr.msk.bf16.mxu1 %vm4167_vm11, %v13497_v19  ;;  %10412 = vmatprep.mubr.msk.bf16.mxu0 %vm4167_vm11, %v13497_v19  ;;  %v4045_v52 = vsel %vm3981_vm9, %v13149_v42, %v3796_v7 }
 0x383   : > { %10329 = vmatmul.mubr.msk.bf16.gmra.mxu1 %vm4167_vm11, %v13500_v27  ;;  %10413 = vmatmul.mubr.msk.bf16.gmra.mxu0 %vm4167_vm11, %v13500_v27 }
 0x384   : > { %v3794_v21 = vpop.permute.xlu0 %3793 }
 0x385   : > { %v3976_v34 = vpop.permute.xlu1 %3975  ;;  %v4043_v25 = vsel %vm3981_vm9, %v13176_v4, %v3794_v21 }
 0x386   : > { %v13518_v40 = vsel %vm4050_vm10, %v4045_v52, %v3976_v34 }
 0x388   : > { %v3974_v59 = vpop.permute.xlu0 %3973 }
 0x389   : > { %v13515_v49 = vsel %vm4050_vm10, %v4043_v25, %v3974_v59  ;;  %v3800_v26 = vpop.permute.xlu1 %3799 }
 0x38a   : > { %10332 = vmatprep.mubr.msk.bf16.mxu1 %vm4167_vm11, %v13515_v49  ;;  %10416 = vmatprep.mubr.msk.bf16.mxu0 %vm4167_vm11, %v13515_v49  ;;  %v4049_v47 = vsel %vm3981_vm9, %v13197_v0, %v3800_v26  ;;  %v15501_v0 = vld [vmem:[#allocation20_spill] sm:$0xff] }
 0x38b   : > { %10333 = vmatmul.mubr.msk.bf16.gmra.mxu1 %vm4167_vm11, %v13518_v40  ;;  %10417 = vmatmul.mubr.msk.bf16.gmra.mxu0 %vm4167_vm11, %v13518_v40 }
 0x38c   : > { %v3798_v42 = vpop.permute.xlu0 %3797 }
 0x38d   : > { %v3980_v4 = vpop.permute.xlu1 %3979  ;;  %v4047_v61 = vsel %vm3981_vm9, %v13227_v55, %v3798_v42  ;;  %v15502_v55 = vld [vmem:[#allocation23_spill] sm:$0xff] }
 0x38e   : > { %v13536_v48 = vsel %vm4050_vm10, %v4049_v47, %v3980_v4  ;;  %v7566_v32 = vsel %vm982_vm3, %v15502_v55, %v15501_v0 }
 0x38f   : > { %7663 = vrot.lane.b32.xlu0 %v7566_v32, %s10884_s20 }
 0x390   : > { %v3978_v3 = vpop.permute.xlu0 %3977 }
 0x391   : > { %v13533_v29 = vsel %vm4050_vm10, %v4047_v61, %v3978_v3 }
 0x392   : > { %10336 = vmatprep.mubr.msk.bf16.mxu1 %vm4167_vm11, %v13533_v29  ;;  %10420 = vmatprep.mubr.msk.bf16.mxu0 %vm4167_vm11, %v13533_v29 }
 0x393   : > { %10337 = vmatmul.mubr.msk.bf16.gmra.mxu1 %vm4167_vm11, %v13536_v48  ;;  %10421 = vmatmul.mubr.msk.bf16.gmra.mxu0 %vm4167_vm11, %v13536_v48 }
 0x394   : > { %10340 = vmatprep.mubr.msk.bf16.mxu1 %vm4167_vm11, %v13119_v53  ;;  %10424 = vmatprep.mubr.msk.bf16.mxu0 %vm4167_vm11, %v13119_v53 }
 0x39b   : > { %10341 = vmatmul.mubr.msk.bf16.gmra.mxu1 %vm4167_vm11, %v13123_v41  ;;  %10425 = vmatmul.mubr.msk.bf16.gmra.mxu0 %vm4167_vm11, %v13123_v41 }
 0x39c   : > { %10440 = vmatprep.mubr.msk.bf16.mxu1 %vm4167_vm11, %v13119_v53 }
 0x3a3   : > { %10441 = vmatmul.mubr.msk.bf16.vlgmr.msra.gmra.mxu1 %vm4167_vm11, %v13123_v41 }
 0x3a4   : > { %10444 = vmatprep.mubr.msk.bf16.mxu1 %vm4167_vm11, %v13194_v30 }
 0x3ab   : > { %10445 = vmatmul.mubr.msk.bf16.gmra.mxu1 %vm4167_vm11, %v13204_v12 }
 0x3ac   : > { %10448 = vmatprep.mubr.msk.bf16.mxu1 %vm4167_vm11, %v13244_v60 }
 0x3b3   : > { %10449 = vmatmul.mubr.msk.bf16.gmra.mxu1 %vm4167_vm11, %v13266_v62 }
 0x3b4   : > { %10452 = vmatprep.mubr.msk.bf16.mxu1 %vm4167_vm11, %v13270_v45 }
 0x3bb   : > { %10453 = vmatmul.mubr.msk.bf16.gmra.mxu1 %vm4167_vm11, %v13301_v18 }
 0x3bc   : > { %10456 = vmatprep.mubr.msk.bf16.mxu1 %vm4167_vm11, %v13305_v13 }
 0x3c3   : > { %10457 = vmatmul.mubr.msk.bf16.gmra.mxu1 %vm4167_vm11, %v13328_v10  ;;  %v10274_v30 = vpop.f32.mrf.mxu1 }
 0x3c4   : > { %10460 = vmatprep.mubr.msk.bf16.mxu1 %vm4167_vm11, %v13324_v5  ;;  %v10358_v12 = vpop.f32.mrf.mxu0 }
 0x3c5   : > { %v4270_v60 = vpop.f32.mrf.mxu1 }
 0x3c6   : > { %v4632_v37 = vpop.f32.mrf.mxu0 }
 0x3c7   : > { %v10275_v62 = vpop.f32.mrf.mxu1 }
 0x3c8   : > { %v10359_v6 = vpop.f32.mrf.mxu0 }
 0x3c9   : > { %v13582_v45 = vpop.f32.mrf.mxu1 }
 0x3ca   : > { %v4634_v18 = vpop.f32.mrf.mxu0 }
 0x3cb   : > { %10461 = vmatmul.mubr.msk.bf16.gmra.mxu1 %vm4167_vm11, %v13347_v9 }
 0x3cc   : > { %10464 = vmatprep.mubr.msk.bf16.mxu1 %vm4167_vm11, %v13344_v17 }
 0x3cd   : > { %v10278_v13 = vpop.f32.mrf.mxu1  ;;  %v10362_v10 = vpop.f32.mrf.mxu0 }
 0x3ce   : > { %v13586_v43 = vadd.f32 %v10362_v10, %v10274_v30 }
 0x3cf   : > { %v4286_v5 = vpop.f32.mrf.mxu1  ;;  %v4644_v11 = vpop.f32.mrf.mxu0 }
 0x3d0   : > { %v13588_v16 = vadd.f32 %v4644_v11, %v4270_v60 }
 0x3d1   : > { %v10279_v50 = vpop.f32.mrf.mxu1  ;;  %v10363_v35 = vpop.f32.mrf.mxu0 }
 0x3d2   : > { %v13592_v9 = vadd.f32 %v10363_v35, %v10275_v62 }
 0x3d3   : > { %10465 = vmatmul.mubr.msk.bf16.gmra.mxu1 %vm4167_vm11, %v13365_v23  ;;  %v13594_v38 = vpop.f32.mrf.mxu1  ;;  %v13598_v17 = vpop.f32.mrf.mxu0 }
 0x3d4   : > { %10468 = vmatprep.mubr.msk.bf16.mxu1 %vm4167_vm11, %v13362_v58 }
 0x3d5   : > { %v10282_v15 = vpop.f32.mrf.mxu1  ;;  %v10366_v31 = vpop.f32.mrf.mxu0 }
 0x3d6   : > { %v13600_v1 = vadd.f32 %v10366_v31, %v10278_v13 }
 0x3d7   : > { %v4302_v56 = vpop.f32.mrf.mxu1  ;;  %v4660_v7 = vpop.f32.mrf.mxu0 }
 0x3d8   : > { %v13602_v21 = vadd.f32 %v4660_v7, %v4286_v5 }
 0x3d9   : > { %v10283_v34 = vpop.f32.mrf.mxu1  ;;  %v10367_v25 = vpop.f32.mrf.mxu0 }
 0x3da   : > { %v13606_v23 = vadd.f32 %v10367_v25, %v10279_v50 }
 0x3db   : > { %10469 = vmatmul.mubr.msk.bf16.gmra.mxu1 %vm4167_vm11, %v13383_v39  ;;  %v13608_v59 = vpop.f32.mrf.mxu1  ;;  %v13612_v58 = vpop.f32.mrf.mxu0 }
 0x3dc   : > { %10472 = vmatprep.mubr.msk.bf16.mxu1 %vm4167_vm11, %v13380_v44 }
 0x3dd   : > { %v10286_v52 = vpop.f32.mrf.mxu1 }
 0x3de   : > { %v10370_v26 = vpop.f32.mrf.mxu0 }
 0x3df   : > { %v13614_v42 = vadd.f32 %v10370_v26, %v10282_v15  ;;  %v4318_v4 = vpop.f32.mrf.mxu1 }
 0x3e0   : > { %v4676_v61 = vpop.f32.mrf.mxu0 }
 0x3e1   : > { %v13616_v3 = vadd.f32 %v4676_v61, %v4302_v56  ;;  %v10287_v47 = vpop.f32.mrf.mxu1 }
 0x3e2   : > { %v10371_v0 = vpop.f32.mrf.mxu0 }
 0x3e3   : > { %10473 = vmatmul.mubr.msk.bf16.gmra.mxu1 %vm4167_vm11, %v13396_v24  ;;  %v13620_v39 = vadd.f32 %v10371_v0, %v10283_v34  ;;  %v13622_v55 = vpop.f32.mrf.mxu1 }
 0x3e4   : > { %10476 = vmatprep.mubr.msk.bf16.mxu1 %vm4167_vm11, %v13405_v51  ;;  %v13626_v44 = vpop.f32.mrf.mxu0 }
 0x3e5   : > { %v10290_v32 = vpop.f32.mrf.mxu1 }
 0x3e6   : > { %v10374_v30 = vpop.f32.mrf.mxu0 }
 0x3e7   : > { %v13628_v12 = vadd.f32 %v10374_v30, %v10286_v52  ;;  %v4334_v60 = vpop.f32.mrf.mxu1  ;;  %v10650_v30 = vld [vmem:[%s15345_s7 + $0x38] sm:$0xff]  }
 0x3e8   : > { %v4692_v37 = vpop.f32.mrf.mxu0  ;;  %7873 = vmatpush1.bf16.msra.mxu0 %v10650_v30 }
 0x3e9   : > { %v13630_v62 = vadd.f32 %v4692_v37, %v4318_v4  ;;  %v10291_v6 = vpop.f32.mrf.mxu1  ;;  %7874 = vmatprep.subr.bf16.mxu0 %v15454_v33 }
 0x3ea   : > { %v10375_v18 = vpop.f32.mrf.mxu0 }
 0x3eb   : > { %10477 = vmatmul.mubr.msk.bf16.gmra.mxu1 %vm4167_vm11, %v13414_v57  ;;  %v13634_v24 = vadd.f32 %v10375_v18, %v10287_v47  ;;  %v13636_v13 = vpop.f32.mrf.mxu1 }
 0x3ec   : > { %10480 = vmatprep.mubr.msk.bf16.mxu1 %vm4167_vm11, %v13425_v36  ;;  %v13640_v51 = vpop.f32.mrf.mxu0 }
 0x3ed   : > { %v10294_v10 = vpop.f32.mrf.mxu1 }
 0x3ee   : > { %v10378_v5 = vpop.f32.mrf.mxu0 }
 0x3ef   : > { %v13642_v11 = vadd.f32 %v10378_v5, %v10290_v32  ;;  %v4350_v50 = vpop.f32.mrf.mxu1  ;;  %v10653_v5 = vld [vmem:[%s15345_s7 + $0x90] sm:$0xff]  }
 0x3f0   : > { %v4708_v35 = vpop.f32.mrf.mxu0 }
 0x3f1   : > { %v13644_v15 = vadd.f32 %v4708_v35, %v4334_v60  ;;  %v10295_v31 = vpop.f32.mrf.mxu1  ;;  %v10651_v60 = vld [vmem:[%s15345_s7 + $0x98] sm:$0xff]  }
 0x3f2   : > { %v10379_v56 = vpop.f32.mrf.mxu0  ;;  %8079 = vmatpush1.bf16.msra.mxu1 %v10651_v60 }
 0x3f3   : > { %10481 = vmatmul.mubr.msk.bf16.gmra.mxu1 %vm4167_vm11, %v13428_v46  ;;  %v13648_v57 = vadd.f32 %v10379_v56, %v10291_v6  ;;  %v13650_v7 = vpop.f32.mrf.mxu1  ;;  %8080 = vmatprep.subr.bf16.mxu1 %v15454_v33 }
 0x3f4   : > { %10484 = vmatprep.mubr.msk.bf16.mxu1 %vm4167_vm11, %v13443_v14  ;;  %v13654_v36 = vpop.f32.mrf.mxu0 }
 0x3f5   : > { %15503 = vst [vmem:[#allocation31_spill] sm:$0xff] %v13648_v57  ;;  %v10298_v34 = vpop.f32.mrf.mxu1 }
 0x3f6   : > { %v10382_v25 = vpop.f32.mrf.mxu0  ;;  %8081 = vmatpush1.bf16.msra.mxu1 %v10653_v5  ;;  %v10655_v5 = vld [vmem:[%s15345_s7 + $0x88] sm:$0xff]  }
 0x3f7   : > { %v13656_v52 = vadd.f32 %v10382_v25, %v10294_v10  ;;  %v4366_v26 = vpop.f32.mrf.mxu1  ;;  %v10652_v10 = vld [vmem:[%s15345_s7 + $0x30] sm:$0xff]   ;;  %8082 = vmatprep.subr.bf16.mxu1 %v15454_v33 }
 0x3f8   : > { %v4724_v4 = vpop.f32.mrf.mxu0  ;;  %7875 = vmatpush1.bf16.msra.mxu0 %v10652_v10 }
 0x3f9   : > { %15504 = vst [vmem:[#allocation33_spill] sm:$0xff] %v13656_v52  ;;  %v13658_v61 = vadd.f32 %v4724_v4, %v4350_v50  ;;  %v10299_v47 = vpop.f32.mrf.mxu1  ;;  %7876 = vmatprep.subr.bf16.mxu0 %v15454_v33 }
 0x3fa   : > { %v10383_v0 = vpop.f32.mrf.mxu0  ;;  %8083 = vmatpush1.bf16.msra.mxu1 %v10655_v5 }
 0x3fb   : > { %15505 = vst [vmem:[#allocation35_spill] sm:$0xff] %v13658_v61  ;;  %10485 = vmatmul.mubr.msk.bf16.gmra.mxu1 %vm4167_vm11, %v13446_v28  ;;  %v13662_v46 = vadd.f32 %v10383_v0, %v10295_v31  ;;  %v13664_v32 = vpop.f32.mrf.mxu1  ;;  %8084 = vmatprep.subr.bf16.mxu1 %v15454_v33 }
 0x3fc   : > { %10488 = vmatprep.mubr.msk.bf16.mxu1 %vm4167_vm11, %v13461_v20  ;;  %v13668_v14 = vpop.f32.mrf.mxu0 }
 0x3fd   : > { %15506 = vst [vmem:[#allocation37_spill] sm:$0xff] %v13662_v46  ;;  %v10302_v37 = vpop.f32.mrf.mxu1 }
 0x3fe   : > { %v10386_v6 = vpop.f32.mrf.mxu0 }
 0x3ff   : > { %v13676_v28 = vadd.f32 %v10386_v6, %v10298_v34  ;;  %v4382_v18 = vpop.f32.mrf.mxu1 }
 0x400   : > { %v4740_v20 = vpop.f32.mrf.mxu0 }
 0x401   : > { %15507 = vst [vmem:[#allocation39_spill] sm:$0xff] %v13676_v28  ;;  %v13686_v50 = vadd.f32 %v4740_v20, %v4366_v26  ;;  %v10303_v35 = vpop.f32.mrf.mxu1 }
 0x402   : > { %v10387_v31 = vpop.f32.mrf.mxu0 }
 0x403   : > { %15508 = vst [vmem:[#allocation41_spill] sm:$0xff] %v13686_v50  ;;  %10489 = vmatmul.mubr.msk.bf16.gmra.mxu1 %vm4167_vm11, %v13464_v63  ;;  %v13690_v56 = vadd.f32 %v10387_v31, %v10299_v47  ;;  %v13692_v34 = vpop.f32.mrf.mxu1 }
 0x404   : > { %10492 = vmatprep.mubr.msk.bf16.mxu1 %vm4167_vm11, %v13479_v8  ;;  %v13697_v25 = vpop.f32.mrf.mxu0 }
 0x405   : > { %15509 = vst [vmem:[#allocation42_spill] sm:$0xff] %v13690_v56  ;;  %v10306_v26 = vpop.f32.mrf.mxu1 }
 0x406   : > { %v10390_v4 = vpop.f32.mrf.mxu0 }
 0x407   : > { %v13700_v0 = vadd.f32 %v10390_v4, %v10302_v37  ;;  %v4398_v30 = vpop.f32.mrf.mxu1 }
 0x408   : > { %v4756_v60 = vpop.f32.mrf.mxu0 }
 0x409   : > { %15510 = vst [vmem:[#allocation43_spill] sm:$0xff] %v13700_v0  ;;  %v13702_v63 = vadd.f32 %v4756_v60, %v4382_v18  ;;  %v10307_v47 = vpop.f32.mrf.mxu1  ;;  %v10654_v18 = vld [vmem:[%s15345_s7 + $0x28] sm:$0xff]  }
 0x40a   : > { %v10391_v6 = vpop.f32.mrf.mxu0  ;;  %7877 = vmatpush1.bf16.msra.mxu0 %v10654_v18 }
 0x40b   : > { %15511 = vst [vmem:[#allocation44_spill] sm:$0xff] %v13702_v63  ;;  %10493 = vmatmul.mubr.msk.bf16.gmra.mxu1 %vm4167_vm11, %v13482_v54  ;;  %v13706_v20 = vadd.f32 %v10391_v6, %v10303_v35  ;;  %v13708_v8 = vpop.f32.mrf.mxu1  ;;  %7878 = vmatprep.subr.bf16.mxu0 %v15454_v33  ;;  %v10664_v63 = vld [vmem:[%s15345_s7] sm:$0xff]  }
 0x40c   : > { %10496 = vmatprep.mubr.msk.bf16.mxu1 %vm4167_vm11, %v13497_v19  ;;  %v13712_v10 = vpop.f32.mrf.mxu0 }
 0x40d   : > { %15512 = vst [vmem:[#allocation45_spill] sm:$0xff] %v13706_v20  ;;  %v10310_v37 = vpop.f32.mrf.mxu1 }
 0x40e   : > { %v10394_v31 = vpop.f32.mrf.mxu0 }
 0x40f   : > { %v13720_v54 = vadd.f32 %v10394_v31, %v10306_v26  ;;  %v4414_v35 = vpop.f32.mrf.mxu1 }
 0x410   : > { %v4772_v4 = vpop.f32.mrf.mxu0 }
 0x411   : > { %15513 = vst [vmem:[#allocation46_spill] sm:$0xff] %v13720_v54  ;;  %v13724_v19 = vadd.f32 %v4772_v4, %v4398_v30  ;;  %v10311_v60 = vpop.f32.mrf.mxu1  ;;  %v10656_v4 = vld [vmem:[%s15345_s7 + $0x20] sm:$0xff]  }
 0x412   : > { %v10395_v6 = vpop.f32.mrf.mxu0  ;;  %7879 = vmatpush1.bf16.msra.mxu0 %v10656_v4  ;;  %v10658_v4 = vld [vmem:[%s15345_s7 + $0x18] sm:$0xff]  }
 0x413   : > { %15514 = vst [vmem:[#allocation25_spill] sm:$0xff] %v13724_v19  ;;  %10497 = vmatmul.mubr.msk.bf16.gmra.mxu1 %vm4167_vm11, %v13500_v27  ;;  %v13728_v2 = vadd.f32 %v10395_v6, %v10307_v47  ;;  %v13730_v20 = vpop.f32.mrf.mxu1  ;;  %v10657_v27 = vld [vmem:[%s15345_s7 + $0x80] sm:$0xff]   ;;  %7880 = vmatprep.subr.bf16.mxu0 %v15454_v33 }
 0x414   : > { %10500 = vmatprep.mubr.msk.bf16.mxu1 %vm4167_vm11, %v13515_v49  ;;  %v13734_v26 = vpop.f32.mrf.mxu0  ;;  %8085 = vmatpush1.bf16.msra.mxu1 %v10657_v27  ;;  %v10659_v27 = vld [vmem:[%s15345_s7 + $0x78] sm:$0xff]  }
 0x415   : > { %15515 = vst [vmem:[#allocation27_spill] sm:$0xff] %v13728_v2  ;;  %v10314_v18 = vpop.f32.mrf.mxu1  ;;  %8086 = vmatprep.subr.bf16.mxu1 %v15454_v33 }
 0x416   : > { %v10398_v5 = vpop.f32.mrf.mxu0  ;;  %7881 = vmatpush1.bf16.msra.mxu0 %v10658_v4 }
 0x417   : > { %v13736_v31 = vadd.f32 %v10398_v5, %v10310_v37  ;;  %v4430_v30 = vpop.f32.mrf.mxu1  ;;  %7882 = vmatprep.subr.bf16.mxu0 %v15454_v33 }
 0x418   : > { %v4788_v47 = vpop.f32.mrf.mxu0  ;;  %8087 = vmatpush1.bf16.msra.mxu1 %v10659_v27 }
 0x419   : > { %15516 = vst [vmem:[#allocation26_spill] sm:$0xff] %v13736_v31  ;;  %v13744_v6 = vadd.f32 %v4788_v47, %v4414_v35  ;;  %v10315_v49 = vpop.f32.mrf.mxu1  ;;  %8088 = vmatprep.subr.bf16.mxu1 %v15454_v33  ;;  %v10661_v47 = vld [vmem:[%s15345_s7 + $0x70] sm:$0xff]  }
 0x41a   : > { %v10399_v2 = vpop.f32.mrf.mxu0 }
 0x41b   : > { %15517 = vst [vmem:[#allocation24_spill] sm:$0xff] %v13744_v6  ;;  %10501 = vmatmul.mubr.msk.bf16.gmra.mxu1 %vm4167_vm11, %v13518_v40  ;;  %v13750_v37 = vadd.f32 %v10399_v2, %v10311_v60  ;;  %v13754_v5 = vpop.f32.mrf.mxu1  ;;  %v10660_v60 = vld [vmem:[%s15345_s7 + $0x10] sm:$0xff]  }
 0x41c   : > { %10504 = vmatprep.mubr.msk.bf16.mxu1 %vm4167_vm11, %v13533_v29  ;;  %v13756_v35 = vpop.f32.mrf.mxu0  ;;  %7883 = vmatpush1.bf16.msra.mxu0 %v10660_v60  ;;  %v10662_v60 = vld [vmem:[%s15345_s7 + $0x8] sm:$0xff]  }
 0x41d   : > { %15518 = vst [vmem:[#allocation22_spill] sm:$0xff] %v13750_v37  ;;  %8089 = vmatpush1.bf16.msra.mxu1 %v10661_v47  ;;  %7884 = vmatprep.subr.bf16.mxu0 %v15454_v33 }
 0x41e   : > { %8090 = vmatprep.subr.bf16.mxu1 %v15454_v33 }
 0x420   : > { %7885 = vmatpush1.bf16.msra.mxu0 %v10662_v60 }
 0x421   : > { %7886 = vmatprep.subr.bf16.mxu0 %v15454_v33 }
 0x422   : > { %v10318_v40 = vpop.f32.mrf.mxu1  ;;  %v10402_v2 = vpop.f32.mrf.mxu0 }
 0x423   : > { %10505 = vmatmul.mubr.msk.bf16.gmra.mxu1 %vm4167_vm11, %v13536_v48  ;;  %v13768_v29 = vadd.f32 %v10402_v2, %v10314_v18 }
 0x424   : > { %10508 = vmatprep.mubr.msk.bf16.mxu1 %vm4167_vm11, %v13119_v53  ;;  %v4446_v4 = vpop.f32.mrf.mxu1  ;;  %v4804_v27 = vpop.f32.mrf.mxu0  ;;  %7887 = vmatpush1.bf16.msra.mxu0 %v10664_v63 }
 0x425   : > { %15519 = vst [vmem:[#allocation28_spill] sm:$0xff] %v13768_v29  ;;  %v13778_v37 = vadd.f32 %v4804_v27, %v4430_v30  ;;  %7896 = vmatprep.subr.bf16.mxu0 %v15454_v33 }
 0x426   : > { %v10319_v48 = vpop.f32.mrf.mxu1  ;;  %v10403_v18 = vpop.f32.mrf.mxu0 }
 0x427   : > { %15520 = vst [vmem:[#allocation30_spill] sm:$0xff] %v13778_v37  ;;  %v13782_v2 = vadd.f32 %v10403_v18, %v10315_v49  ;;  %v10663_v49 = vld [vmem:[%s15345_s7 + $0x68] sm:$0xff]  }
 0x428   : > { %v13784_v29 = vpop.f32.mrf.mxu1  ;;  %v13786_v6 = vpop.f32.mrf.mxu0  ;;  %8091 = vmatpush1.bf16.msra.mxu1 %v10663_v49 }
 0x429   : > { %15521 = vst [vmem:[#allocation32_spill] sm:$0xff] %v13782_v2  ;;  %8092 = vmatprep.subr.bf16.mxu1 %v15454_v33 }
 0x42b   : > { %10509 = vmatmul.mubr.msk.bf16.gmra.mxu1 %vm4167_vm11, %v13123_v41 }
 0x42e   : > { %v10322_v53 = vpop.f32.mrf.mxu1  ;;  %v10406_v30 = vpop.f32.mrf.mxu0 }
 0x42f   : > { %v13790_v27 = vadd.f32 %v10406_v30, %v10318_v40 }
 0x430   : > { %v4462_v47 = vpop.f32.mrf.mxu1  ;;  %v4820_v18 = vpop.f32.mrf.mxu0 }
 0x431   : > { %15522 = vst [vmem:[#allocation34_spill] sm:$0xff] %v13790_v27  ;;  %v13798_v2 = vadd.f32 %v4820_v18, %v4446_v4 }
 0x432   : > { %v10323_v37 = vpop.f32.mrf.mxu1  ;;  %v10407_v41 = vpop.f32.mrf.mxu0 }
 0x433   : > { %15523 = vst [vmem:[#allocation36_spill] sm:$0xff] %v13798_v2  ;;  %v13802_v40 = vadd.f32 %v10407_v41, %v10319_v48  ;;  %v10665_v48 = vld [vmem:[%s15345_s7 + $0x60] sm:$0xff]  }
 0x434   : > { %v13804_v30 = vpop.f32.mrf.mxu1  ;;  %v13806_v27 = vpop.f32.mrf.mxu0  ;;  %8093 = vmatpush1.bf16.msra.mxu1 %v10665_v48 }
 0x435   : > { %15524 = vst [vmem:[#allocation38_spill] sm:$0xff] %v13802_v40  ;;  %8102 = vmatprep.subr.bf16.mxu1 %v15454_v33 }
 0x43a   : > { %v10326_v31 = vpop.f32.mrf.mxu1  ;;  %v10410_v19 = vpop.f32.mrf.mxu0 }
 0x43b   : > { %v13808_v54 = vadd.f32 %v10410_v19, %v10322_v53  ;;  %v10666_v53 = vld [vmem:[%s15345_s7 + $0x58] sm:$0xff]  }
 0x43c   : > { %v4478_v4 = vpop.f32.mrf.mxu1  ;;  %v4836_v18 = vpop.f32.mrf.mxu0  ;;  %7897 = vmatpush2.bf16.msra.mxu0 %v10666_v53 }
 0x43d   : > { %15525 = vst [vmem:[#allocation40_spill] sm:$0xff] %v13808_v54  ;;  %v13810_v60 = vadd.f32 %v4836_v18, %v4462_v47  ;;  %v10667_v47 = vld [vmem:[%s15345_s7 + $0xb8] sm:$0xff]   ;;  %7898 = vmatprep.subr.bf16.mxu0 %v15454_v33  ;;  %v10669_v54 = vld [vmem:[%s15345_s7 + $0xb0] sm:$0xff]  }
 0x43e   : > { %v10327_v49 = vpop.f32.mrf.mxu1  ;;  %v10411_v2 = vpop.f32.mrf.mxu0  ;;  %8103 = vmatpush2.bf16.msra.mxu1 %v10667_v47 }
 0x43f   : > { %15526 = vst [vmem:[#allocation19_spill] sm:$0xff] %v13810_v60  ;;  %v13818_v41 = vadd.f32 %v10411_v2, %v10323_v37  ;;  %8104 = vmatprep.subr.bf16.mxu1 %v15454_v33  ;;  %v10668_v60 = vld [vmem:[%s15345_s7 + $0x50] sm:$0xff]  }
 0x440   : > { %v13820_v40 = vpop.f32.mrf.mxu1  ;;  %v13822_v19 = vpop.f32.mrf.mxu0  ;;  %7899 = vmatpush2.bf16.msra.mxu0 %v10668_v60 }
 0x441   : > { %15527 = vst [vmem:[#allocation16_spill] sm:$0xff] %v13818_v41  ;;  %7900 = vmatprep.subr.bf16.mxu0 %v15454_v33 }
 0x442   : > { %8105 = vmatpush2.bf16.msra.mxu1 %v10669_v54 }
 0x443   : > { %v10330_v37 = vpop.f32.mrf.mxu1  ;;  %v10414_v2 = vpop.f32.mrf.mxu0  ;;  %8106 = vmatprep.subr.bf16.mxu1 %v15454_v33 }
 0x444   : > { %v13832_v18 = vadd.f32 %v10414_v2, %v10326_v31 }
 0x445   : > { %v4494_v63 = vpop.f32.mrf.mxu1  ;;  %v4852_v48 = vpop.f32.mrf.mxu0 }
 0x446   : > { %15528 = vst [vmem:[#allocation47_spill] sm:$0xff] %v13832_v18  ;;  %v13836_v41 = vadd.f32 %v4852_v48, %v4478_v4 }
 0x447   : > { %v10331_v31 = vpop.f32.mrf.mxu1  ;;  %v10415_v2 = vpop.f32.mrf.mxu0 }
 0x448   : > { %15529 = vst [vmem:[#allocation48_spill] sm:$0xff] %v13836_v41  ;;  %v13844_v53 = vadd.f32 %v10415_v2, %v10327_v49 }
 0x449   : > { %v13846_v47 = vpop.f32.mrf.mxu1  ;;  %v13848_v18 = vpop.f32.mrf.mxu0 }
 0x44a   : > { %15530 = vst [vmem:[#allocation50_spill] sm:$0xff] %v13844_v53 }
 0x44b   : > { %v10334_v4 = vpop.f32.mrf.mxu1  ;;  %v10418_v48 = vpop.f32.mrf.mxu0 }
 0x44c   : > { %v13852_v41 = vadd.f32 %v10418_v48, %v10330_v37 }
 0x44d   : > { %v4510_v0 = vpop.f32.mrf.mxu1  ;;  %v4868_v56 = vpop.f32.mrf.mxu0 }
 0x44e   : > { %15531 = vst [vmem:[#allocation49_spill] sm:$0xff] %v13852_v41  ;;  %v13854_v50 = vadd.f32 %v4868_v56, %v4494_v63  ;;  %v10670_v56 = vld [vmem:[%s15345_s7 + $0x48] sm:$0xff]   ;;  %v5673_v41 = vlaneseq }
 0x44f   : > { %v10335_v49 = vpop.f32.mrf.mxu1  ;;  %v10419_v2 = vpop.f32.mrf.mxu0  ;;  %v10671_v63 = vld [vmem:[%s15345_s7 + $0xa8] sm:$0xff]   ;;  %7901 = vmatpush2.bf16.msra.mxu0 %v10670_v56 }
 0x450   : > { %15532 = vst [vmem:[#allocation52_spill] sm:$0xff] %v13854_v50  ;;  %v13856_v60 = vadd.f32 %v10419_v2, %v10331_v31  ;;  %8107 = vmatpush2.bf16.msra.mxu1 %v10671_v63  ;;  %7902 = vmatprep.subr.bf16.mxu0 %v15454_v33  ;;  %v15537_v63 = vld [vmem:[#allocation18_spill] sm:$0xff] }
 0x451   : > { %v13858_v54 = vpop.f32.mrf.mxu1  ;;  %v13860_v53 = vpop.f32.mrf.mxu0  ;;  %8108 = vmatprep.subr.bf16.mxu1 %v15454_v33 }
 0x452   : > { %15533 = vst [vmem:[#allocation51_spill] sm:$0xff] %v13856_v60 }
 0x453   : > { %v10338_v28 = vpop.f32.mrf.mxu1  ;;  %v10422_v46 = vpop.f32.mrf.mxu0 }
 0x454   : > { %v13862_v61 = vadd.f32 %v10422_v46, %v10334_v4 }
 0x455   : > { %v4526_v52 = vpop.f32.mrf.mxu1  ;;  %v4884_v57 = vpop.f32.mrf.mxu0 }
 0x456   : > { %15534 = vst [vmem:[#allocation56_spill] sm:$0xff] %v13862_v61  ;;  %v13864_v37 = vadd.f32 %v4884_v57, %v4510_v0  ;;  %v10672_v57 = vld [vmem:[%s15345_s7 + $0x40] sm:$0xff]  }
 0x457   : > { %v10339_v31 = vpop.f32.mrf.mxu1  ;;  %v10423_v48 = vpop.f32.mrf.mxu0  ;;  %v10673_v52 = vld [vmem:[%s15345_s7 + $0xa0] sm:$0xff]   ;;  %7903 = vmatpush2.bf16.msra.mxu0 %v10672_v57 }
 0x458   : > { %15535 = vst [vmem:[#allocation54_spill] sm:$0xff] %v13864_v37  ;;  %v13872_v2 = vadd.f32 %v10423_v48, %v10335_v49  ;;  %8109 = vmatpush2.bf16.msra.mxu1 %v10673_v52  ;;  %v15538_v31 = vrot.slane %v15537_v63, 1  ;;  %v15539_v48 = vrot.slane %v15487_v22, 1  ;;  %8300 = vmatprep.subr.bf16.mxu0 %v15454_v33 }
 0x459   : > { %v4528_v46 = vpop.f32.mrf.mxu1  ;;  %v13874_v28 = vpop.f32.mrf.mxu0 }
 0x45a   : > { %15536 = vst [vmem:[#allocation53_spill] sm:$0xff] %v13872_v2  ;;  %v13889_v46 = vsel %vm1425_vm4, %v15539_v48, %v15538_v31  ;;  %v7664_v2 = vpop.permute.xlu0 %7663 }
 0x45b   : > { %v10342_v0 = vpop.f32.mrf.mxu1  ;;  %v10426_v4 = vpop.f32.mrf.mxu0  ;;  %15540 = vst [vmem:[#allocation55_spill] sm:$0xff] %v13889_v46  ;;  %9597 = vmatprep.mubr.msk.bf16.mxu0 %vm4050_vm10, %v13889_v46  ;;  %9643 = vmatprep.mubr.msk.bf16.mxu1 %vm4050_vm10, %v13889_v46 }
 0x45c   : > { %v13898_v0 = vsel %vm4050_vm10, %v15487_v22, %v7664_v2  ;;  %v13903_v22 = vld [vmem:[#allocation6] ss:$0 sm:$0xff]  ;;  %v10885_v2 = vmov 1983009808  }
 0x45d   : > { %v4538_v49 = vpop.f32.mrf.mxu1  ;;  %v4900_v56 = vpop.f32.mrf.mxu0  ;;  %15541 = vst [vmem:[#allocation21_spill] sm:$0xff] %v13898_v0  ;;  %7905 = vmatmul.mubr.bf16.vlgmr.msra.gmra.mxu0 %v13898_v0  ;;  %8111 = vmatmul.mubr.bf16.vlgmr.msra.gmra.mxu1 %v13898_v0  ;;  %v5671_v50 = vunpack.c.l.s4 %v10885_v2 }
 0x45f   : > { %v10343_v57 = vpop.f32.mrf.mxu1  ;;  %v10427_v52 = vpop.f32.mrf.mxu0 }
 0x461   : > { %v4540_v4 = vpop.f32.mrf.mxu1  ;;  %v4902_v49 = vpop.f32.mrf.mxu0 }
 0x463   : > { %v10442_v56 = vpop.f32.mrf.mxu1 }
 0x464   : > { %v4912_v56 = vadd.f32 %v13598_v17, %v13582_v45  ;;  %v13921_v45 = vadd.f32 %v13640_v51, %v13622_v55  ;;  %v13926_v17 = vadd.f32 %v13654_v36, %v13636_v13  ;;  %v13944_v51 = vadd.f32 %v13712_v10, %v13692_v34 }
 0x465   : > { %v5058_v63 = vpop.f32.mrf.mxu1  ;;  %v13961_v10 = vadd.f32 %v13786_v6, %v13754_v5  ;;  %v13976_v6 = vadd.f32 %v13848_v18, %v13820_v40 }
 0x466   : > { %v5674_v63 = vshrl.u32 %v5673_v41, 7 }
 0x467   : > { %v10443_v31 = vpop.f32.mrf.mxu1  ;;  %15544 = vst [vmem:[#allocation23_spill] sm:$0xff] %v13961_v10  ;;  %15547 = vst [vmem:[#allocation58_spill] sm:$0xff] %v13976_v6 }
 0x469   : > { %v5060_v48 = vpop.f32.mrf.mxu1 }
 0x46b   : > { %v10446_v37 = vpop.f32.mrf.mxu1 }
 0x46d   : > { %v5070_v61 = vpop.f32.mrf.mxu1 }
 0x46f   : > { %v10447_v33 = vpop.f32.mrf.mxu1 }
 0x471   : > { %v5072_v46 = vpop.f32.mrf.mxu1 }
 0x472   : > { %v13910_v46 = vld [vmem:[#allocation7] ss:$0 sm:$0xff] }
 0x473   : > { %v10450_v57 = vpop.f32.mrf.mxu1 }
 0x474   : > { %v5339_v52 = vadd.f32 %v10450_v57, %v13586_v43  ;;  %v5672_v43 = vunpack.c.0.s8 %v5671_v50  ;;  %v13930_v50 = vadd.f32 %v13668_v14, %v13650_v7  ;;  %v13948_v7 = vadd.f32 %v13734_v26, %v13708_v8 }
 0x475   : > { %v5082_v60 = vpop.f32.mrf.mxu1  ;;  %v13965_v8 = vadd.f32 %v13806_v27, %v13784_v29 }
 0x476   : > { %v5337_v4 = vadd.f32 %v5082_v60, %v13588_v16  ;;  %v5409_v37 = vmul.f32 %v13903_v22, %v5339_v52  ;;  %v4916_v16 = vadd.f32 %v13612_v58, %v13594_v38  ;;  %v13917_v60 = vadd.f32 %v13626_v44, %v13608_v59  ;;  %15542 = vst [vmem:[#allocation29_spill] sm:$0xff] %v13948_v7 }
 0x477   : > { %v10451_v49 = vpop.f32.mrf.mxu1  ;;  %v13936_v44 = vadd.f32 %v13697_v25, %v13664_v32  ;;  %v13954_v25 = vadd.f32 %v13756_v35, %v13730_v20  ;;  %15545 = vst [vmem:[#allocation18_spill] sm:$0xff] %v13965_v8 }
 0x478   : > { %v5340_v33 = vadd.f32 %v10451_v49, %v13592_v9  ;;  %v5407_v31 = vmul.f32 %v13903_v22, %v5337_v4  ;;  %v5479_v38 = vadd.f32 %v13910_v46, %v5409_v37 }
 0x479   : > { %v5085_v61 = vpop.f32.mrf.mxu1  ;;  %15543 = vst [vmem:[#allocation20_spill] sm:$0xff] %v13954_v25 }
 0x47a   : > { %v5338_v48 = vadd.f32 %v5085_v61, %v4912_v56  ;;  %v5410_v58 = vmul.f32 %v13903_v22, %v5340_v33  ;;  %v5477_v36 = vadd.f32 %v13910_v46, %v5407_v31  ;;  %v5543_v26 = vmax.f32 %v5479_v38, 0.0 }
 0x47b   : > { %v10454_v57 = vpop.f32.mrf.mxu1 }
 0x47c   : > { %v5343_v9 = vadd.f32 %v10454_v57, %v13600_v1  ;;  %v13939_v1 = vsub.s32 %v5672_v43, %v5674_v63  ;;  %v5408_v14 = vmul.f32 %v13903_v22, %v5338_v48  ;;  %v5480_v52 = vadd.f32 %v13910_v46, %v5410_v58 }
 0x47d   : > { %v5098_v59 = vpop.f32.mrf.mxu1  ;;  %v5541_v5 = vmax.f32 %v5477_v36, 0.0  ;;  %v13985_v43 = vadd.f32 %v13860_v53, %v13846_v47 }
 0x47e   : > { %v5413_v55 = vmul.f32 %v13903_v22, %v5343_v9  ;;  %v5341_v13 = vadd.f32 %v5098_v59, %v13602_v21  ;;  %v13979_v29 = vadd.f32 %v13910_v46, %v5408_v14  ;;  %v5544_v40 = vmax.f32 %v5480_v52, 0.0 }
 0x47f   : > { %v10455_v32 = vpop.f32.mrf.mxu1  ;;  %15548 = vst [vmem:[#allocation59_spill] sm:$0xff] %v13985_v43 }
 0x480   : > { %v5483_v41 = vadd.f32 %v13910_v46, %v5413_v55  ;;  %v5411_v21 = vmul.f32 %v13903_v22, %v5341_v13  ;;  %v5344_v34 = vadd.f32 %v10455_v32, %v13606_v23  ;;  %v13972_v23 = vadd.f32 %v13822_v19, %v13804_v30 }
 0x481   : > { %v5101_v2 = vpop.f32.mrf.mxu1  ;;  %v13989_v30 = vadd.f32 %v13874_v28, %v13858_v54 }
 0x482   : > { %v5547_v20 = vmax.f32 %v5483_v41, 0.0  ;;  %v5481_v35 = vadd.f32 %v13910_v46, %v5411_v21  ;;  %v5414_v4 = vmul.f32 %v13903_v22, %v5344_v34  ;;  %v5342_v49 = vadd.f32 %v5101_v2, %v4916_v16  ;;  %15546 = vst [vmem:[#allocation57_spill] sm:$0xff] %v13972_v23 }
 0x483   : > { %v10458_v27 = vpop.f32.mrf.mxu1  ;;  %15549 = vst [vmem:[#allocation60_spill] sm:$0xff] %v13989_v30 }
 0x484   : > { %v5607_v56 = vmax.f32 %v5543_v26, %v5547_v20  ;;  %v5545_v37 = vmax.f32 %v5481_v35, 0.0  ;;  %v5484_v33 = vadd.f32 %v13910_v46, %v5414_v4  ;;  %v5412_v61 = vmul.f32 %v13903_v22, %v5342_v49 }
 0x485   : > { %v5347_v19 = vadd.f32 %v10458_v27, %v13614_v42  ;;  %v5114_v18 = vpop.f32.mrf.mxu1 }
 0x486   : > { %v5703_v63 = vcombine.high %v5607_v56, %v5607_v56  ;;  %v5710_v31 = vrot.slane %v5607_v56, %v13939_v1  ;;  %v5605_v48 = vmax.f32 %v5541_v5, %v5545_v37  ;;  %v5548_v57 = vmax.f32 %v5484_v33, 0.0 }
 0x487   : > { %v13995_v9 = vadd.f32 %v13910_v46, %v5412_v61  ;;  %v5417_v53 = vmul.f32 %v13903_v22, %v5347_v19  ;;  %v13999_v47 = vadd.f32 %v5114_v18, %v13616_v3  ;;  %v14001_v54 = vpop.f32.mrf.mxu1 }
 0x488   : > { %v5717_v42 = vrot.slane %v5703_v63, %v13939_v1  ;;  %v5718_v28 = vcombine.high %v5710_v31, %v5710_v31  ;;  %v9465_v38 = vrot.slane %v5710_v31, 9  ;;  %v5669_v58 = vcombine.high %v5605_v48, %v5605_v48 }
 0x489   : > { %v5676_v59 = vrot.slane %v5605_v48, %v13939_v1  ;;  %v5608_v55 = vmax.f32 %v5544_v40, %v5548_v57  ;;  %v5546_v13 = vmax.f32 %v13995_v9, 0.0  ;;  %v14007_v36 = vadd.f32 %v13910_v46, %v5417_v53  ;;  %v14009_v14 = vpop.f32.mrf.mxu1 }
 0x48a   : > { %v5719_v3 = vcombine.high %v5717_v42, %v5717_v42  ;;  %v9466_v32 = vrot.slane %v5718_v28, 9  ;;  %v9467_v41 = vrot.slane %v5717_v42, 9  ;;  %v6733_v21 = vmax.f32 %v5710_v31, %v9465_v38 }
 0x48b   : > { %v5683_v34 = vrot.slane %v5669_v58, %v13939_v1  ;;  %v5684_v26 = vcombine.high %v5676_v59, %v5676_v59  ;;  %v9457_v52 = vrot.slane %v5676_v59, 9  ;;  %v5720_v2 = vcombine.high %v5608_v55, %v5608_v55  ;;  %v14012_v20 = vpop.f32.mrf.mxu1 }
 0x48c   : > { %v9468_v35 = vrot.slane %v5719_v3, 9  ;;  %v6734_v4 = vmax.f32 %v5718_v28, %v9466_v32  ;;  %v6735_v49 = vmax.f32 %v5717_v42, %v9467_v41  ;;  %v6863_v5 = vpack.c.bf16 %v6733_v21, %v6733_v21 }
 0x48d   : > { %v5685_v27 = vcombine.high %v5683_v34, %v5683_v34  ;;  %v9458_v56 = vrot.slane %v5684_v26, 9  ;;  %v9459_v37 = vrot.slane %v5683_v34, 9  ;;  %v6725_v33 = vmax.f32 %v5676_v59, %v9457_v52  ;;  %v14014_v61 = vpop.f32.mrf.mxu1 }
 0x48e   : > { %v6736_v40 = vmax.f32 %v5719_v3, %v9468_v35  ;;  %v6864_v19 = vpack.c.bf16 %v6734_v4, %v6734_v4  ;;  %v6865_v18 = vpack.c.bf16 %v6735_v49, %v6735_v49  ;;  %v7119_v63 = vunpack.c.l.b16 %v6863_v5 }
 0x48f   : > { %v9460_v31 = vrot.slane %v5685_v27, 9  ;;  %v6726_v48 = vmax.f32 %v5684_v26, %v9458_v56  ;;  %v6727_v57 = vmax.f32 %v5683_v34, %v9459_v37  ;;  %v6855_v53 = vpack.c.bf16 %v6725_v33, %v6725_v33  ;;  %v14016_v38 = vpop.f32.mrf.mxu1 }
 0x490   : > { %v6866_v28 = vpack.c.bf16 %v6736_v40, %v6736_v40  ;;  %v7120_v42 = vunpack.c.l.b16 %v6864_v19  ;;  %v7121_v58 = vunpack.c.l.b16 %v6865_v18  ;;  %v5727_v32 = vrot.slane %v5608_v55, %v13939_v1 }
 0x491   : > { %v6728_v41 = vmax.f32 %v5685_v27, %v9460_v31  ;;  %v6856_v21 = vpack.c.bf16 %v6726_v48, %v6726_v48  ;;  %v6857_v59 = vpack.c.bf16 %v6727_v57, %v6727_v57  ;;  %v7111_v52 = vunpack.c.l.b16 %v6855_v53  ;;  %v14019_v16 = vpop.f32.mrf.mxu1 }
 0x492   : > { %v7122_v3 = vunpack.c.l.b16 %v6866_v28  ;;  %v7260_v35 = vrot.slane %v7120_v42, 7  ;;  %v7262_v4 = vrot.slane %v7121_v58, 6  ;;  %v5734_v26 = vrot.slane %v5720_v2, %v13939_v1 }
 0x493   : > { %v6858_v34 = vpack.c.bf16 %v6728_v41, %v6728_v41  ;;  %v7112_v49 = vunpack.c.l.b16 %v6856_v21  ;;  %v7113_v5 = vunpack.c.l.b16 %v6857_v59  ;;  %v5735_v56 = vcombine.high %v5727_v32, %v5727_v32  ;;  %v14022_v37 = vpop.f32.mrf.mxu1 }
 0x494   : > { %v7261_v33 = vsel %vm7240_vm12, %v7260_v35, %v7119_v63  ;;  %v7264_v55 = vrot.slane %v7122_v3, 5  ;;  %v5736_v27 = vcombine.high %v5734_v26, %v5734_v26  ;;  %v9469_v40 = vrot.slane %v5727_v32, 9 }
 0x495   : > { %v7263_v19 = vsel %vm7243_vm13, %v7262_v4, %v7261_v33  ;;  %v7114_v18 = vunpack.c.l.b16 %v6858_v34  ;;  %v7239_v31 = vrot.slane %v7112_v49, 7  ;;  %v7242_v48 = vrot.slane %v7113_v5, 6  ;;  %v14026_v57 = vpop.f32.mrf.mxu1 }
 0x496   : > { %v9470_v2 = vrot.slane %v5735_v56, 9  ;;  %v9471_v53 = vrot.slane %v5734_v26, 9  ;;  %v9472_v28 = vrot.slane %v5736_v27, 9  ;;  %v6737_v42 = vmax.f32 %v5727_v32, %v9469_v40 }
 0x497   : > { %v7241_v58 = vsel %vm7240_vm12, %v7239_v31, %v7111_v52  ;;  %v7245_v41 = vrot.slane %v7114_v18, 5  ;;  %v7265_v63 = vsel %vm7246_vm14, %v7264_v55, %v7263_v19  ;;  %v15550_v21 = vmax.f32 %v13979_v29, 0.0  ;;  %v14034_v3 = vpop.f32.mrf.mxu1 }
 0x498   : > { %v7244_v35 = vsel %vm7243_vm13, %v7242_v48, %v7241_v58  ;;  %v6738_v4 = vmax.f32 %v5735_v56, %v9470_v2  ;;  %v6739_v34 = vmax.f32 %v5734_v26, %v9471_v53  ;;  %v6740_v49 = vmax.f32 %v5736_v27, %v9472_v28 }
 0x499   : > { %v5606_v59 = vmax.f32 %v15550_v21, %v5546_v13  ;;  %v6867_v5 = vpack.c.bf16 %v6737_v42, %v6737_v42  ;;  %v7247_v52 = vsel %vm7246_vm14, %v7245_v41, %v7244_v35  ;;  %v14039_v40 = vpop.f32.mrf.mxu1  ;;  %v5551_v29 = vmax.f32 %v14007_v36, 0.0 }
 0x49a   : > { %v6868_v55 = vpack.c.bf16 %v6738_v4, %v6738_v4  ;;  %v6869_v9 = vpack.c.bf16 %v6739_v34, %v6739_v34  ;;  %v6870_v19 = vpack.c.bf16 %v6740_v49, %v6740_v49  ;;  %v5415_v53 = vmul.f32 %v13903_v22, %v13999_v47 }
 0x49b   : > { %v5686_v33 = vcombine.high %v5606_v59, %v5606_v59  ;;  %v5693_v32 = vrot.slane %v5606_v59, %v13939_v1  ;;  %v7123_v13 = vunpack.c.l.b16 %v6867_v5  ;;  %v14043_v26 = vpop.f32.mrf.mxu1  ;;  %v5346_v59 = vadd.f32 %v14009_v14, %v13917_v60 }
 0x49c   : > { %v14045_v27 = vunpack.c.l.b16 %v6868_v55  ;;  %v14047_v48 = vunpack.c.l.b16 %v6869_v9  ;;  %v14049_v2 = vunpack.c.l.b16 %v6870_v19  ;;  %v5485_v34 = vadd.f32 %v13910_v46, %v5415_v53 }
 0x49d   : > { %v5700_v18 = vrot.slane %v5686_v33, %v13939_v1  ;;  %v5701_v31 = vcombine.high %v5693_v32, %v5693_v32  ;;  %v9461_v56 = vrot.slane %v5693_v32, 9  ;;  %v7266_v28 = vrot.slane %v7123_v13, 4  ;;  %v14053_v21 = vpop.f32.mrf.mxu1 }
 0x49e   : > { %v5549_v19 = vmax.f32 %v5485_v34, 0.0  ;;  %v5348_v13 = vadd.f32 %v14001_v54, %v13620_v39 }
 0x49f   : > { %v5702_v42 = vcombine.high %v5700_v18, %v5700_v18  ;;  %v9462_v58 = vrot.slane %v5701_v31, 9  ;;  %v9463_v41 = vrot.slane %v5700_v18, 9  ;;  %v6729_v4 = vmax.f32 %v5693_v32, %v9461_v56  ;;  %v14061_v47 = vpop.f32.mrf.mxu1 }
 0x4a0   : > { %v14059_v49 = vsel %vm7249_vm15, %v7266_v28, %v7265_v63  ;;  %v5351_v63 = vadd.f32 %v14012_v20, %v13628_v12  ;;  %v5416_v28 = vmul.f32 %v13903_v22, %v5346_v59 }
 0x4a1   : > { %v9464_v5 = vrot.slane %v5702_v42, 9  ;;  %v6730_v33 = vmax.f32 %v5701_v31, %v9462_v58  ;;  %v6731_v55 = vmax.f32 %v5700_v18, %v9463_v41  ;;  %v6859_v9 = vpack.c.bf16 %v6729_v4, %v6729_v4  ;;  %v14069_v53 = vpop.f32.mrf.mxu1 }
 0x4a2   : > { %v5418_v18 = vmul.f32 %v13903_v22, %v5348_v13  ;;  %v5349_v58 = vadd.f32 %v14014_v61, %v13630_v62  ;;  %v5421_v14 = vmul.f32 %v13903_v22, %v5351_v63  ;;  %v14086_v41 = vadd.f32 %v13910_v46, %v5416_v28  ;;  %v15551_v28 = vld [vmem:[#allocation31_spill] sm:$0xff] }
 0x4a3   : > { %v6732_v35 = vmax.f32 %v5702_v42, %v9464_v5  ;;  %v6860_v32 = vpack.c.bf16 %v6730_v33, %v6730_v33  ;;  %v6861_v56 = vpack.c.bf16 %v6731_v55, %v6731_v55  ;;  %v7115_v31 = vunpack.c.l.b16 %v6859_v9  ;;  %v14080_v42 = vpop.f32.mrf.mxu1 }
 0x4a4   : > { %v14083_v20 = vadd.f32 %v13910_v46, %v5418_v18  ;;  %v5419_v59 = vmul.f32 %v13903_v22, %v5349_v58  ;;  %v5355_v63 = vadd.f32 %v14022_v37, %v13642_v11  ;;  %v5353_v18 = vadd.f32 %v14026_v57, %v13644_v15 }
 0x4a5   : > { %v6862_v39 = vpack.c.bf16 %v6732_v35, %v6732_v35  ;;  %v14075_v54 = vunpack.c.l.b16 %v6860_v32  ;;  %v14077_v60 = vunpack.c.l.b16 %v6861_v56  ;;  %v7248_v12 = vrot.slane %v7115_v31, 4  ;;  %v14094_v34 = vpop.f32.mrf.mxu1 }
 0x4a6   : > { %v5491_v35 = vadd.f32 %v13910_v46, %v5421_v14  ;;  %v5489_v9 = vadd.f32 %v13910_v46, %v5419_v59  ;;  %v5352_v32 = vadd.f32 %v14016_v38, %v13634_v24  ;;  %v5350_v56 = vadd.f32 %v14019_v16, %v13921_v45 }
 0x4a7   : > { %v14089_v4 = vunpack.c.l.b16 %v6862_v39  ;;  %v14097_v5 = vsel %vm7249_vm15, %v7248_v12, %v7247_v52  ;;  %v14108_v31 = vpop.f32.mrf.mxu1  ;;  %v5356_v58 = vadd.f32 %v14034_v3, %v15551_v28  ;;  %v5354_v39 = vadd.f32 %v14039_v40, %v13926_v17 }
 0x4a8   : > { %v5555_v13 = vmax.f32 %v5491_v35, 0.0  ;;  %v5553_v52 = vmax.f32 %v5489_v9, 0.0  ;;  %v5422_v45 = vmul.f32 %v13903_v22, %v5352_v32  ;;  %v5420_v16 = vmul.f32 %v13903_v22, %v5350_v56 }
 0x4a9   : > { %v5425_v11 = vmul.f32 %v13903_v22, %v5355_v63  ;;  %v14121_v38 = vpop.f32.mrf.mxu1  ;;  %v5423_v15 = vmul.f32 %v13903_v22, %v5353_v18  ;;  %v14125_v57 = vmul.f32 %v13903_v22, %v5356_v58  ;;  %v14128_v3 = vmul.f32 %v13903_v22, %v5354_v39 }
 0x4aa   : > { %v5611_v24 = vmax.f32 %v5551_v29, %v5555_v13  ;;  %v5609_v37 = vmax.f32 %v5549_v19, %v5553_v52  ;;  %v5492_v40 = vadd.f32 %v13910_v46, %v5422_v45  ;;  %v5490_v29 = vadd.f32 %v13910_v46, %v5420_v16 }
 0x4ab   : > { %v14133_v14 = vpop.f32.mrf.mxu1  ;;  %v14137_v59 = vadd.f32 %v13910_v46, %v5425_v11  ;;  %v14140_v35 = vadd.f32 %v13910_v46, %v5423_v15 }
 0x4ac   : > { %v5771_v17 = vcombine.high %v5611_v24, %v5611_v24  ;;  %v5778_v36 = vrot.slane %v5611_v24, %v13939_v1  ;;  %v5737_v12 = vcombine.high %v5609_v37, %v5609_v37  ;;  %v5744_v19 = vrot.slane %v5609_v37, %v13939_v1 }
 0x4ad   : > { %v5556_v56 = vmax.f32 %v5492_v40, 0.0  ;;  %v14143_v63 = vpop.f32.mrf.mxu1  ;;  %v5554_v58 = vmax.f32 %v5490_v29, 0.0 }
 0x4ae   : > { %v5785_v9 = vrot.slane %v5771_v17, %v13939_v1  ;;  %v5786_v13 = vcombine.high %v5778_v36, %v5778_v36  ;;  %v9481_v32 = vrot.slane %v5778_v36, 9  ;;  %v5751_v52 = vrot.slane %v5737_v12, %v13939_v1 }
 0x4af   : > { %v5752_v18 = vcombine.high %v5744_v19, %v5744_v19  ;;  %v9473_v28 = vrot.slane %v5744_v19, 9  ;;  %v14146_v11 = vpop.f32.mrf.mxu1 }
 0x4b0   : > { %v5787_v39 = vcombine.high %v5785_v9, %v5785_v9  ;;  %v9482_v24 = vrot.slane %v5786_v13, 9  ;;  %v9483_v45 = vrot.slane %v5785_v9, 9  ;;  %v6749_v16 = vmax.f32 %v5778_v36, %v9481_v32 }
 0x4b1   : > { %v5753_v37 = vcombine.high %v5751_v52, %v5751_v52  ;;  %v9474_v15 = vrot.slane %v5752_v18, 9  ;;  %v9475_v61 = vrot.slane %v5751_v52, 9  ;;  %v6741_v17 = vmax.f32 %v5744_v19, %v9473_v28  ;;  %v14148_v0 = vpop.f32.mrf.mxu1 }
 0x4b2   : > { %v9484_v62 = vrot.slane %v5787_v39, 9  ;;  %v6750_v55 = vmax.f32 %v5786_v13, %v9482_v24  ;;  %v6751_v40 = vmax.f32 %v5785_v9, %v9483_v45  ;;  %v6879_v33 = vpack.c.bf16 %v6749_v16, %v6749_v16 }
 0x4b3   : > { %v9476_v12 = vrot.slane %v5753_v37, 9  ;;  %v6742_v30 = vmax.f32 %v5752_v18, %v9474_v15  ;;  %v6743_v43 = vmax.f32 %v5751_v52, %v9475_v61  ;;  %v6871_v29 = vpack.c.bf16 %v6741_v17, %v6741_v17  ;;  %v14150_v32 = vpop.f32.mrf.mxu1 }
 0x4b4   : > { %v6752_v6 = vmax.f32 %v5787_v39, %v9484_v62  ;;  %v6880_v23 = vpack.c.bf16 %v6750_v55, %v6750_v55  ;;  %v6881_v8 = vpack.c.bf16 %v6751_v40, %v6751_v40  ;;  %v7135_v36 = vunpack.c.l.b16 %v6879_v33 }
 0x4b5   : > { %v6744_v10 = vmax.f32 %v5753_v37, %v9476_v12  ;;  %v6872_v25 = vpack.c.bf16 %v6742_v30, %v6742_v30  ;;  %v6873_v7 = vpack.c.bf16 %v6743_v43, %v6743_v43  ;;  %v7127_v19 = vunpack.c.l.b16 %v6871_v29  ;;  %v14154_v16 = vpop.f32.mrf.mxu1 }
 0x4b6   : > { %v6882_v28 = vpack.c.bf16 %v6752_v6, %v6752_v6  ;;  %v7136_v13 = vunpack.c.l.b16 %v6880_v23  ;;  %v7137_v9 = vunpack.c.l.b16 %v6881_v8  ;;  %v15552_v24 = vmax.f32 %v14083_v20, 0.0 }
 0x4b7   : > { %v6874_v61 = vpack.c.bf16 %v6744_v10, %v6744_v10  ;;  %v7128_v52 = vunpack.c.l.b16 %v6872_v25  ;;  %v7129_v62 = vunpack.c.l.b16 %v6873_v7  ;;  %v15553_v55 = vmax.f32 %v14086_v41, 0.0  ;;  %v14159_v23 = vpop.f32.mrf.mxu1 }
 0x4b8   : > { %v5612_v45 = vmax.f32 %v15552_v24, %v5556_v56  ;;  %v7138_v18 = vunpack.c.l.b16 %v6882_v28  ;;  %v7288_v39 = vrot.slane %v7136_v13, 7  ;;  %v7290_v37 = vrot.slane %v7137_v9, 6 }
 0x4b9   : > { %v5610_v33 = vmax.f32 %v15553_v55, %v5554_v58  ;;  %v7130_v43 = vunpack.c.l.b16 %v6874_v61  ;;  %v7274_v15 = vrot.slane %v7128_v52, 7  ;;  %v7276_v6 = vrot.slane %v7129_v62, 6 }
 0x4ba   : > { %v5788_v30 = vcombine.high %v5612_v45, %v5612_v45  ;;  %v5795_v8 = vrot.slane %v5612_v45, %v13939_v1  ;;  %v7289_v20 = vsel %vm7240_vm12, %v7288_v39, %v7135_v36  ;;  %v7292_v56 = vrot.slane %v7138_v18, 5  ;;  %v14169_v45 = vpop.f32.mrf.mxu1 }
 0x4bb   : > { %v5754_v7 = vcombine.high %v5610_v33, %v5610_v33  ;;  %v7291_v10 = vsel %vm7243_vm13, %v7290_v37, %v7289_v20  ;;  %v7275_v41 = vsel %vm7240_vm12, %v7274_v15, %v7127_v19  ;;  %v7278_v58 = vrot.slane %v7130_v43, 5  ;;  %15554 = vst [vmem:[#allocation31_spill] sm:$0xff] %v14169_v45 }
 0x4bc   : > { %v5802_v25 = vrot.slane %v5788_v30, %v13939_v1  ;;  %v5803_v17 = vcombine.high %v5795_v8, %v5795_v8  ;;  %v7277_v40 = vsel %vm7243_vm13, %v7276_v6, %v7275_v41  ;;  %v9485_v29 = vrot.slane %v5795_v8, 9 }
 0x4bd   : > { %v7293_v9 = vsel %vm7246_vm14, %v7292_v56, %v7291_v10  ;;  %v5761_v36 = vrot.slane %v5610_v33, %v13939_v1  ;;  %v5768_v24 = vrot.slane %v5754_v7, %v13939_v1  ;;  %v7279_v19 = vsel %vm7246_vm14, %v7278_v58, %v7277_v40  ;;  %v14172_v7 = vpop.f32.mrf.mxu1 }
 0x4be   : > { %v5804_v12 = vcombine.high %v5802_v25, %v5802_v25  ;;  %v9487_v28 = vrot.slane %v5802_v25, 9  ;;  %v9486_v13 = vrot.slane %v5803_v17, 9  ;;  %v6753_v52 = vmax.f32 %v5795_v8, %v9485_v29 }
 0x4bf   : > { %v5769_v18 = vcombine.high %v5761_v36, %v5761_v36  ;;  %v5770_v39 = vcombine.high %v5768_v24, %v5768_v24  ;;  %v9477_v37 = vrot.slane %v5761_v36, 9  ;;  %v9479_v6 = vrot.slane %v5768_v24, 9 }
 0x4c0   : > { %v9488_v61 = vrot.slane %v5804_v12, 9  ;;  %v6755_v62 = vmax.f32 %v5802_v25, %v9487_v28  ;;  %v6754_v55 = vmax.f32 %v5803_v17, %v9486_v13  ;;  %v6883_v43 = vpack.c.bf16 %v6753_v52, %v6753_v52 }
 0x4c1   : > { %v9478_v56 = vrot.slane %v5769_v18, 9  ;;  %v9480_v33 = vrot.slane %v5770_v39, 9  ;;  %v6745_v10 = vmax.f32 %v5761_v36, %v9477_v37  ;;  %v6747_v25 = vmax.f32 %v5768_v24, %v9479_v6  ;;  %v14182_v37 = vpop.f32.mrf.mxu1 }
 0x4c2   : > { %v6756_v30 = vmax.f32 %v5804_v12, %v9488_v61  ;;  %v6885_v15 = vpack.c.bf16 %v6755_v62, %v6755_v62  ;;  %v6884_v20 = vpack.c.bf16 %v6754_v55, %v6754_v55  ;;  %v7139_v45 = vunpack.c.l.b16 %v6883_v43  ;;  %15556 = vst [vmem:[#allocation62_spill] sm:$0xff] %v14182_v37 }
 0x4c3   : > { %v6746_v17 = vmax.f32 %v5769_v18, %v9478_v56  ;;  %v6748_v40 = vmax.f32 %v5770_v39, %v9480_v33  ;;  %v6875_v29 = vpack.c.bf16 %v6745_v10, %v6745_v10  ;;  %v6877_v61 = vpack.c.bf16 %v6747_v25, %v6747_v25  ;;  %v15557_v33 = vld [vmem:[#allocation33_spill] sm:$0xff] }
 0x4c4   : > { %v6886_v41 = vpack.c.bf16 %v6756_v30, %v6756_v30  ;;  %v14174_v8 = vunpack.c.l.b16 %v6885_v15  ;;  %v14176_v58 = vunpack.c.l.b16 %v6884_v20  ;;  %v7294_v28 = vrot.slane %v7139_v45, 4 }
 0x4c5   : > { %v6876_v52 = vpack.c.bf16 %v6746_v17, %v6746_v17  ;;  %v6878_v62 = vpack.c.bf16 %v6748_v40, %v6748_v40  ;;  %v7131_v55 = vunpack.c.l.b16 %v6875_v29  ;;  %v14188_v39 = vunpack.c.l.b16 %v6877_v61  ;;  %v15558_v17 = vld [vmem:[#allocation35_spill] sm:$0xff]  ;;  %v14210_v40 = vpop.f32.mrf.mxu1 }
 0x4c6   : > { %v14178_v12 = vunpack.c.l.b16 %v6886_v41  ;;  %v14185_v24 = vsel %vm7249_vm15, %v7294_v28, %v7293_v9  ;;  %v5559_v30 = vmax.f32 %v14137_v59, 0.0  ;;  %v5557_v6 = vmax.f32 %v14140_v35, 0.0  ;;  %15559 = vst [vmem:[#allocation33_spill] sm:$0xff] %v14210_v40 }
 0x4c7   : > { %v14191_v45 = vunpack.c.l.b16 %v6876_v52  ;;  %v14193_v43 = vunpack.c.l.b16 %v6878_v62  ;;  %v7280_v15 = vrot.slane %v7131_v55, 4  ;;  %v5496_v56 = vadd.f32 %v13910_v46, %v14125_v57  ;;  %v15561_v52 = vld [vmem:[#allocation39_spill] sm:$0xff]  ;;  %v15562_v55 = vld [vmem:[#allocation41_spill] sm:$0xff] }
 0x4c8   : > { %15555 = vst [vmem:[#allocation61_spill] sm:$0xff] %v14178_v12  ;;  %v5494_v9 = vadd.f32 %v13910_v46, %v14128_v3  ;;  %v5359_v10 = vadd.f32 %v14043_v26, %v15557_v33  ;;  %v5357_v35 = vadd.f32 %v14053_v21, %v15558_v17  ;;  %v15560_v3 = vld [vmem:[#allocation37_spill] sm:$0xff]  ;;  %v5363_v62 = vadd.f32 %v14080_v42, %v15561_v52  ;;  %v14232_v17 = vpop.f32.mrf.mxu1 }
 0x4c9   : > { %v14204_v59 = vsel %vm7249_vm15, %v7280_v15, %v7279_v19  ;;  %v5560_v29 = vmax.f32 %v5496_v56, 0.0  ;;  %v5360_v61 = vadd.f32 %v14061_v47, %v15560_v3  ;;  %v5358_v19 = vadd.f32 %v14069_v53, %v13930_v50  ;;  %15564 = vst [vmem:[#allocation35_spill] sm:$0xff] %v14232_v17 }
 0x4ca   : > { %v5558_v57 = vmax.f32 %v5494_v9, 0.0  ;;  %v5429_v28 = vmul.f32 %v13903_v22, %v5359_v10  ;;  %v5427_v26 = vmul.f32 %v13903_v22, %v5357_v35  ;;  %v5361_v21 = vadd.f32 %v14094_v34, %v15562_v55  ;;  %v15563_v9 = vld [vmem:[#allocation42_spill] sm:$0xff] }
 0x4cb   : > { %v5430_v56 = vmul.f32 %v13903_v22, %v5360_v61  ;;  %v5364_v33 = vadd.f32 %v14108_v31, %v15563_v9  ;;  %v5362_v47 = vadd.f32 %v14121_v38, %v13936_v44  ;;  %v5428_v50 = vmul.f32 %v13903_v22, %v5358_v19 }
 0x4cc   : > { %v5499_v15 = vadd.f32 %v13910_v46, %v5429_v28  ;;  %v5497_v10 = vadd.f32 %v13910_v46, %v5427_v26  ;;  %v5433_v53 = vmul.f32 %v13903_v22, %v5363_v62  ;;  %v5431_v42 = vmul.f32 %v13903_v22, %v5361_v21 }
 0x4cd   : > { %v5500_v35 = vadd.f32 %v13910_v46, %v5430_v56  ;;  %v5434_v28 = vmul.f32 %v13903_v22, %v5364_v33  ;;  %v5432_v31 = vmul.f32 %v13903_v22, %v5362_v47  ;;  %v5498_v44 = vadd.f32 %v13910_v46, %v5428_v50  ;;  %v14252_v56 = vpop.f32.mrf.mxu1 }
 0x4ce   : > { %v5563_v34 = vmax.f32 %v5499_v15, 0.0  ;;  %v5561_v3 = vmax.f32 %v5497_v10, 0.0  ;;  %v14239_v38 = vadd.f32 %v13910_v46, %v5433_v53  ;;  %v14242_v61 = vadd.f32 %v13910_v46, %v5431_v42  ;;  %15565 = vst [vmem:[#allocation37_spill] sm:$0xff] %v14252_v56 }
 0x4cf   : > { %v5564_v19 = vmax.f32 %v5500_v35, 0.0  ;;  %v14245_v52 = vadd.f32 %v13910_v46, %v5434_v28  ;;  %v14248_v62 = vadd.f32 %v13910_v46, %v5432_v31  ;;  %v5562_v21 = vmax.f32 %v5498_v44, 0.0  ;;  %v14263_v44 = vpop.f32.mrf.mxu1 }
 0x4d0   : > { %v5615_v26 = vmax.f32 %v5559_v30, %v5563_v34  ;;  %v5613_v55 = vmax.f32 %v5557_v6, %v5561_v3  ;;  %15566 = vst [vmem:[#allocation39_spill] sm:$0xff] %v14263_v44 }
 0x4d1   : > { %v5616_v47 = vmax.f32 %v5560_v29, %v5564_v19  ;;  %v14257_v53 = vmax.f32 %v5558_v57, %v5562_v21  ;;  %v14265_v22 = vpop.f32.mrf.mxu1 }
 0x4d2   : > { %v5839_v9 = vcombine.high %v5615_v26, %v5615_v26  ;;  %v5846_v33 = vrot.slane %v5615_v26, %v13939_v1  ;;  %v5805_v10 = vcombine.high %v5613_v55, %v5613_v55  ;;  %v5812_v50 = vrot.slane %v5613_v55, %v13939_v1 }
 0x4d3   : > { %v5856_v35 = vcombine.high %v5616_v47, %v5616_v47  ;;  %v5863_v29 = vrot.slane %v5616_v47, %v13939_v1 }
 0x4d4   : > { %v5853_v6 = vrot.slane %v5839_v9, %v13939_v1  ;;  %v5854_v42 = vcombine.high %v5846_v33, %v5846_v33  ;;  %v9497_v34 = vrot.slane %v5846_v33, 9  ;;  %v5819_v28 = vrot.slane %v5805_v10, %v13939_v1 }
 0x4d5   : > { %v5820_v31 = vcombine.high %v5812_v50, %v5812_v50  ;;  %v9489_v3 = vrot.slane %v5812_v50, 9 }
 0x4d6   : > { %v5855_v26 = vcombine.high %v5853_v6, %v5853_v6  ;;  %v9498_v19 = vrot.slane %v5854_v42, 9  ;;  %v9499_v55 = vrot.slane %v5853_v6, 9  ;;  %v6765_v57 = vmax.f32 %v5846_v33, %v9497_v34 }
 0x4d7   : > { %v5821_v21 = vcombine.high %v5819_v28, %v5819_v28  ;;  %v9490_v18 = vrot.slane %v5820_v31, 9  ;;  %v9491_v13 = vrot.slane %v5819_v28, 9  ;;  %v6757_v36 = vmax.f32 %v5812_v50, %v9489_v3 }
 0x4d8   : > { %v9500_v9 = vrot.slane %v5855_v26, 9  ;;  %v6766_v25 = vmax.f32 %v5854_v42, %v9498_v19  ;;  %v6767_v20 = vmax.f32 %v5853_v6, %v9499_v55  ;;  %v6895_v41 = vpack.c.bf16 %v6765_v57, %v6765_v57 }
 0x4d9   : > { %v9492_v46 = vrot.slane %v5821_v21, 9  ;;  %v6758_v10 = vmax.f32 %v5820_v31, %v9490_v18  ;;  %v6759_v30 = vmax.f32 %v5819_v28, %v9491_v13  ;;  %v6887_v15 = vpack.c.bf16 %v6757_v36, %v6757_v36  ;;  %v14268_v36 = vpop.f32.mrf.mxu1 }
 0x4da   : > { %v6768_v47 = vmax.f32 %v5855_v26, %v9500_v9  ;;  %v6896_v44 = vpack.c.bf16 %v6766_v25, %v6766_v25  ;;  %v6897_v56 = vpack.c.bf16 %v6767_v20, %v6767_v20  ;;  %v7151_v17 = vunpack.c.l.b16 %v6895_v41 }
 0x4db   : > { %v6760_v12 = vmax.f32 %v5821_v21, %v9492_v46  ;;  %v6888_v33 = vpack.c.bf16 %v6758_v10, %v6758_v10  ;;  %v6889_v34 = vpack.c.bf16 %v6759_v30, %v6759_v30  ;;  %v7143_v40 = vunpack.c.l.b16 %v6887_v15 }
 0x4dc   : > { %v6898_v37 = vpack.c.bf16 %v6768_v47, %v6768_v47  ;;  %v7152_v50 = vunpack.c.l.b16 %v6896_v44  ;;  %v7153_v3 = vunpack.c.l.b16 %v6897_v56  ;;  %v5870_v6 = vrot.slane %v5856_v35, %v13939_v1 }
 0x4dd   : > { %v6890_v42 = vpack.c.bf16 %v6760_v12, %v6760_v12  ;;  %v7144_v19 = vunpack.c.l.b16 %v6888_v33  ;;  %v7145_v18 = vunpack.c.l.b16 %v6889_v34  ;;  %v5871_v13 = vcombine.high %v5863_v29, %v5863_v29 }
 0x4de   : > { %v7154_v28 = vunpack.c.l.b16 %v6898_v37  ;;  %v7316_v25 = vrot.slane %v7152_v50, 7  ;;  %v7318_v20 = vrot.slane %v7153_v3, 6  ;;  %v5872_v41 = vcombine.high %v5870_v6, %v5870_v6  ;;  %v14273_v37 = vpop.f32.mrf.mxu1 }
 0x4df   : > { %v7146_v46 = vunpack.c.l.b16 %v6890_v42  ;;  %v7302_v31 = vrot.slane %v7144_v19, 7  ;;  %v7304_v30 = vrot.slane %v7145_v18, 6  ;;  %v9501_v15 = vrot.slane %v5863_v29, 9 }
 0x4e0   : > { %v7317_v44 = vsel %vm7240_vm12, %v7316_v25, %v7151_v17  ;;  %v7320_v56 = vrot.slane %v7154_v28, 5  ;;  %v9502_v26 = vrot.slane %v5871_v13, 9  ;;  %v9503_v35 = vrot.slane %v5870_v6, 9  ;;  %v14283_v25 = vpop.f32.mrf.mxu1 }
 0x4e1   : > { %v7319_v12 = vsel %vm7243_vm13, %v7318_v20, %v7317_v44  ;;  %v7303_v55 = vsel %vm7240_vm12, %v7302_v31, %v7143_v40  ;;  %v7306_v57 = vrot.slane %v7146_v46, 5  ;;  %v9504_v21 = vrot.slane %v5872_v41, 9 }
 0x4e2   : > { %v7305_v9 = vsel %vm7243_vm13, %v7304_v30, %v7303_v55  ;;  %v6769_v10 = vmax.f32 %v5863_v29, %v9501_v15  ;;  %v6770_v47 = vmax.f32 %v5871_v13, %v9502_v26  ;;  %v6771_v33 = vmax.f32 %v5870_v6, %v9503_v35 }
 0x4e3   : > { %v6772_v34 = vmax.f32 %v5872_v41, %v9504_v21  ;;  %v7321_v17 = vsel %vm7246_vm14, %v7320_v56, %v7319_v12  ;;  %v5822_v50 = vcombine.high %v14257_v53, %v14257_v53  ;;  %v5829_v3 = vrot.slane %v14257_v53, %v13939_v1 }
 0x4e4   : > { %v6899_v40 = vpack.c.bf16 %v6769_v10, %v6769_v10  ;;  %v6900_v42 = vpack.c.bf16 %v6770_v47, %v6770_v47  ;;  %v6901_v19 = vpack.c.bf16 %v6771_v33, %v6771_v33  ;;  %v7307_v18 = vsel %vm7246_vm14, %v7306_v57, %v7305_v9  ;;  %v14298_v47 = vpop.f32.mrf.mxu1 }
 0x4e5   : > { %v6902_v28 = vpack.c.bf16 %v6772_v34, %v6772_v34  ;;  %v5836_v29 = vrot.slane %v5822_v50, %v13939_v1  ;;  %v5837_v13 = vcombine.high %v5829_v3, %v5829_v3  ;;  %v9493_v6 = vrot.slane %v5829_v3, 9 }
 0x4e6   : > { %v7155_v20 = vunpack.c.l.b16 %v6899_v40  ;;  %v14285_v41 = vunpack.c.l.b16 %v6900_v42  ;;  %v14287_v46 = vunpack.c.l.b16 %v6901_v19  ;;  %v15567_v53 = vrot.slane %v14075_v54, 3 }
 0x4e7   : > { %v14293_v30 = vunpack.c.l.b16 %v6902_v28  ;;  %v5838_v15 = vcombine.high %v5836_v29, %v5836_v29  ;;  %v9494_v44 = vrot.slane %v5837_v13, 9  ;;  %v9495_v56 = vrot.slane %v5836_v29, 9 }
 0x4e8   : > { %v7253_v31 = vsel %vm7252_vm0, %v15567_v53, %v14097_v5  ;;  %v7322_v26 = vrot.slane %v7155_v20, 4  ;;  %v6761_v55 = vmax.f32 %v5829_v3, %v9493_v6  ;;  %v15568_v33 = vrot.slane %v14077_v60, 2 }
 0x4e9   : > { %v9496_v21 = vrot.slane %v5838_v15, 9  ;;  %v6762_v9 = vmax.f32 %v5837_v13, %v9494_v44  ;;  %v6763_v10 = vmax.f32 %v5836_v29, %v9495_v56  ;;  %v7257_v50 = vrot.slane %v14089_v4, 1  ;;  %v15572_v56 = vld [vmem:[#allocation44_spill] sm:$0xff] }
 0x4ea   : > { %v14301_v54 = vsel %vm7249_vm15, %v7322_v26, %v7321_v17  ;;  %v6891_v5 = vpack.c.bf16 %v6761_v55, %v6761_v55  ;;  %v7256_v34 = vsel %vm7255_vm1, %v15568_v33, %v7253_v31  ;;  %v15569_v19 = vrot.slane %v14045_v27, 3  ;;  %v15571_v31 = vld [vmem:[#allocation43_spill] sm:$0xff]  ;;  %v14322_v27 = vpop.f32.mrf.mxu1  ;;  %v15573_v26 = vld [vmem:[#allocation45_spill] sm:$0xff] }
 0x4eb   : > { %v6764_v40 = vmax.f32 %v5838_v15, %v9496_v21  ;;  %v6892_v42 = vpack.c.bf16 %v6762_v9, %v6762_v9  ;;  %v6893_v3 = vpack.c.bf16 %v6763_v10, %v6763_v10  ;;  %v7259_v13 = vsel %vm7258_vm5, %v7257_v50, %v7256_v34 }
 0x4ec   : > { %v7269_v28 = vsel %vm7252_vm0, %v15569_v19, %v14059_v49  ;;  %v7147_v29 = vunpack.c.l.b16 %v6891_v5  ;;  %v15570_v17 = vrot.slane %v14047_v48, 2  ;;  %v7272_v60 = vrot.slane %v14049_v2, 1  ;;  %v14336_v5 = vld [vmem:[#allocation6] ss:$0 sm:$0xff]  ;;  %v14346_v19 = vld [vmem:[#allocation7] ss:$0 sm:$0xff] }
 0x4ed   : > { %v6894_v20 = vpack.c.bf16 %v6764_v40, %v6764_v40  ;;  %v14316_v53 = vunpack.c.l.b16 %v6892_v42  ;;  %v14318_v4 = vunpack.c.l.b16 %v6893_v3  ;;  %v5367_v15 = vadd.f32 %v14133_v14, %v15571_v31  ;;  %v14344_v3 = vpop.f32.mrf.mxu1 }
 0x4ee   : > { %v7271_v6 = vsel %vm7255_vm1, %v15570_v17, %v7269_v28  ;;  %v7308_v49 = vrot.slane %v7147_v29, 4  ;;  %v5365_v48 = vadd.f32 %v14143_v63, %v15572_v56  ;;  %v5368_v55 = vadd.f32 %v14146_v11, %v15573_v26  ;;  %15574 = vst [vmem:[#allocation41_spill] sm:$0xff] %v14344_v3  ;;  %v10684_v26 = vld [vmem:[%s15345_s7 + $0x108] sm:$0xff]  }
 0x4ef   : > { %v7273_v44 = vsel %vm7258_vm5, %v7272_v60, %v7271_v6  ;;  %v14329_v2 = vunpack.c.l.b16 %v6894_v20  ;;  %v5437_v33 = vmul.f32 %v14336_v5, %v5367_v15  ;;  %v5366_v42 = vadd.f32 %v14148_v0, %v13944_v51  ;;  %v15576_v20 = vld [vmem:[#allocation25_spill] sm:$0xff]  ;;  %v15577_v0 = vld [vmem:[#allocation27_spill] sm:$0xff] }
 0x4f0   : > { %v7470_v10 = vpack.c.b16 %v7273_v44, %v7259_v13  ;;  %v14334_v14 = vsel %vm7249_vm15, %v7308_v49, %v7307_v18  ;;  %v5435_v34 = vmul.f32 %v14336_v5, %v5365_v48  ;;  %v5438_v63 = vmul.f32 %v14336_v5, %v5368_v55  ;;  %v15575_v13 = vld [vmem:[#allocation46_spill] sm:$0xff] }
 0x4f1   : > { %v5507_v18 = vadd.f32 %v14346_v19, %v5437_v33  ;;  %v5371_v17 = vadd.f32 %v14150_v32, %v15575_v13  ;;  %v5436_v60 = vmul.f32 %v14336_v5, %v5366_v42  ;;  %v5369_v31 = vadd.f32 %v14154_v16, %v15576_v20  ;;  %v14369_v16 = vpop.f32.mrf.mxu1 }
 0x4f2   : > { %v7479_v50 = vshrl.u32 %v7470_v10, 16  ;;  %v7482_v40 = vshll.u32 %v7470_v10, 16  ;;  %v5505_v28 = vadd.f32 %v14346_v19, %v5435_v34  ;;  %v5508_v29 = vadd.f32 %v14346_v19, %v5438_v63  ;;  %15579 = vst [vmem:[#allocation42_spill] sm:$0xff] %v14369_v16 }
 0x4f3   : > { %v14358_v51 = vadd.f32 %v14159_v23, %v15577_v0  ;;  %v5571_v15 = vmax.f32 %v5507_v18, 0.0  ;;  %v5441_v56 = vmul.f32 %v14336_v5, %v5371_v17  ;;  %v14364_v32 = vadd.f32 %v14346_v19, %v5436_v60  ;;  %v14392_v0 = vpop.f32.mrf.mxu1 }
 0x4f4   : > { %v7481_v6 = vrot.slane %v7479_v50, 7  ;;  %v5569_v49 = vmax.f32 %v5505_v28, 0.0  ;;  %v5572_v44 = vmax.f32 %v5508_v29, 0.0  ;;  %v14367_v10 = vmul.f32 %v14336_v5, %v5369_v31  ;;  %15584 = vst [vmem:[#allocation44_spill] sm:$0xff] %v14392_v0 }
 0x4f5   : > { %v15580_v23 = vmax.f32 %v14239_v38, 0.0  ;;  %v15581_v50 = vmax.f32 %v14242_v61, 0.0  ;;  %v15583_v18 = vmax.f32 %v14245_v52, 0.0  ;;  %v14385_v13 = vadd.f32 %v14346_v19, %v5441_v56  ;;  %v14403_v12 = vpop.f32.mrf.mxu1 }
 0x4f6   : > { %v7484_v48 = vor.u32 %v7482_v40, %v7481_v6  ;;  %v7558_v55 = vsel %vm11059_vm2, %v7481_v6, 0  ;;  %15586 = vst [vmem:[#allocation46_spill] sm:$0xff] %v14403_v12 }
 0x4f7   : > { %v7699_v33 = vrot.slane %v7558_v55, 1  ;;  %v5619_v34 = vmax.f32 %v15580_v23, %v5571_v15  ;;  %v7575_v63 = vshll.u32 %v7558_v55, 16  ;;  %v5617_v42 = vmax.f32 %v15581_v50, %v5569_v49  ;;  %v14407_v12 = vpop.f32.mrf.mxu1 }
 0x4f8   : > { %v14377_v40 = vsel %vm11059_vm2, 0, %v7484_v48  ;;  %v14381_v28 = vmax.f32 %v15583_v18, %v5572_v44 }
 0x4f9   : > { %15582 = vst [vmem:[#allocation43_spill] sm:$0xff] %v14377_v40  ;;  %v7698_v38 = vrot.slane %v14377_v40, 1  ;;  %v5907_v17 = vcombine.high %v5619_v34, %v5619_v34  ;;  %v5914_v6 = vrot.slane %v5619_v34, %v13939_v1  ;;  %v7568_v61 = vshrl.u32 %v14377_v40, 16 }
 0x4fa   : > { %v7570_v60 = vshll.u32 %v14377_v40, 16  ;;  %v7577_v20 = vrot.slane %v7575_v63, 1  ;;  %v5873_v31 = vcombine.high %v5617_v42, %v5617_v42  ;;  %v5880_v52 = vrot.slane %v5617_v42, %v13939_v1 }
 0x4fb   : > { %v14395_v15 = vsel %vm1425_vm4, %v7698_v38, %v7699_v33  ;;  %v5921_v49 = vrot.slane %v5907_v17, %v13939_v1  ;;  %v5922_v44 = vcombine.high %v5914_v6, %v5914_v6  ;;  %v9513_v56 = vrot.slane %v5914_v6, 9 }
 0x4fc   : > { %15585 = vst [vmem:[#allocation45_spill] sm:$0xff] %v14395_v15  ;;  %9598 = vmatprep.mubr.msk.bf16.mxu0 %vm4050_vm10, %v14395_v15  ;;  %9644 = vmatprep.mubr.msk.bf16.mxu1 %vm4050_vm10, %v14395_v15  ;;  %v7572_v48 = vrot.slane %v7570_v60, 1  ;;  %v5887_v55 = vrot.slane %v5873_v31, %v13939_v1  ;;  %v5888_v23 = vcombine.high %v5880_v52, %v5880_v52  ;;  %v9505_v34 = vrot.slane %v5880_v52, 9 }
 0x4fd   : > { %v5923_v63 = vcombine.high %v5921_v49, %v5921_v49  ;;  %v9514_v50 = vrot.slane %v5922_v44, 9  ;;  %v9515_v42 = vrot.slane %v5921_v49, 9  ;;  %v6781_v33 = vmax.f32 %v5914_v6, %v9513_v56 }
 0x4fe   : > { %v7573_v18 = vor.u32 %v7572_v48, %v7568_v61  ;;  %v5889_v38 = vcombine.high %v5887_v55, %v5887_v55  ;;  %v9506_v17 = vrot.slane %v5888_v23, 9  ;;  %v9507_v57 = vrot.slane %v5887_v55, 9 }
 0x4ff   : > { %v9516_v11 = vrot.slane %v5923_v63, 9  ;;  %v6782_v35 = vmax.f32 %v5922_v44, %v9514_v50  ;;  %v6783_v9 = vmax.f32 %v5921_v49, %v9515_v42  ;;  %v6911_v21 = vpack.c.bf16 %v6781_v33, %v6781_v33 }
 0x500   : > { %v7578_v60 = vsel %vm982_vm3, %v7573_v18, %v7577_v20  ;;  %v9508_v29 = vrot.slane %v5889_v38, 9  ;;  %v6773_v31 = vmax.f32 %v5880_v52, %v9505_v34  ;;  %v6774_v15 = vmax.f32 %v5888_v23, %v9506_v17 }
 0x501   : > { %v6784_v40 = vmax.f32 %v5923_v63, %v9516_v11  ;;  %v6912_v0 = vpack.c.bf16 %v6782_v35, %v6782_v35  ;;  %v6913_v16 = vpack.c.bf16 %v6783_v9, %v6783_v9  ;;  %v7167_v3 = vunpack.c.l.b16 %v6911_v21  ;;  %7665 = vrot.lane.b32.xlu1 %v7578_v60, %s10884_s20 }
 0x502   : > { %v6775_v6 = vmax.f32 %v5887_v55, %v9507_v57  ;;  %v6776_v61 = vmax.f32 %v5889_v38, %v9508_v29  ;;  %v6903_v56 = vpack.c.bf16 %v6773_v31, %v6773_v31  ;;  %v6904_v48 = vpack.c.bf16 %v6774_v15, %v6774_v15 }
 0x503   : > { %v6914_v44 = vpack.c.bf16 %v6784_v40, %v6784_v40  ;;  %v7168_v49 = vunpack.c.l.b16 %v6912_v0  ;;  %v7169_v50 = vunpack.c.l.b16 %v6913_v16  ;;  %v5924_v20 = vcombine.high %v14381_v28, %v14381_v28  ;;  %v14414_v0 = vpop.f32.mrf.mxu1 }
 0x504   : > { %v6905_v52 = vpack.c.bf16 %v6775_v6, %v6775_v6  ;;  %v6906_v23 = vpack.c.bf16 %v6776_v61, %v6776_v61  ;;  %v7159_v11 = vunpack.c.l.b16 %v6903_v56  ;;  %v7160_v35 = vunpack.c.l.b16 %v6904_v48 }
 0x505   : > { %v7170_v9 = vunpack.c.l.b16 %v6914_v44  ;;  %v7344_v21 = vrot.slane %v7168_v49, 7  ;;  %v7346_v34 = vrot.slane %v7169_v50, 6  ;;  %v5931_v57 = vrot.slane %v14381_v28, %v13939_v1 }
 0x506   : > { %v7161_v29 = vunpack.c.l.b16 %v6905_v52  ;;  %v7162_v15 = vunpack.c.l.b16 %v6906_v23  ;;  %v7330_v55 = vrot.slane %v7160_v35, 7  ;;  %v5938_v40 = vrot.slane %v5924_v20, %v13939_v1  ;;  %v14426_v20 = vpop.f32.mrf.mxu1 }
 0x507   : > { %v7345_v16 = vsel %vm7240_vm12, %v7344_v21, %v7167_v3  ;;  %v7348_v63 = vrot.slane %v7170_v9, 5  ;;  %v5939_v42 = vcombine.high %v5931_v57, %v5931_v57  ;;  %v9517_v33 = vrot.slane %v5931_v57, 9 }
 0x508   : > { %v7347_v18 = vsel %vm7243_vm13, %v7346_v34, %v7345_v16  ;;  %v7331_v38 = vsel %vm7240_vm12, %v7330_v55, %v7159_v11  ;;  %v7332_v17 = vrot.slane %v7161_v29, 6  ;;  %v7334_v60 = vrot.slane %v7162_v15, 5 }
 0x509   : > { %v5940_v31 = vcombine.high %v5938_v40, %v5938_v40  ;;  %v9518_v28 = vrot.slane %v5939_v42, 9  ;;  %v9519_v6 = vrot.slane %v5938_v40, 9  ;;  %v6785_v61 = vmax.f32 %v5931_v57, %v9517_v33 }
 0x50a   : > { %v7333_v56 = vsel %vm7243_vm13, %v7332_v17, %v7331_v38  ;;  %v7349_v48 = vsel %vm7246_vm14, %v7348_v63, %v7347_v18  ;;  %v15587_v44 = vmax.f32 %v14364_v32, 0.0  ;;  %v15588_v3 = vmax.f32 %v14248_v62, 0.0 }
 0x50b   : > { %v5575_v50 = vmax.f32 %v14385_v13, 0.0  ;;  %v9520_v52 = vrot.slane %v5940_v31, 9  ;;  %v6786_v23 = vmax.f32 %v5939_v42, %v9518_v28  ;;  %v6787_v11 = vmax.f32 %v5938_v40, %v9519_v6  ;;  %v14436_v42 = vpop.f32.mrf.mxu1 }
 0x50c   : > { %v5618_v49 = vmax.f32 %v15588_v3, %v15587_v44  ;;  %v6915_v35 = vpack.c.bf16 %v6785_v61, %v6785_v61  ;;  %v7335_v34 = vsel %vm7246_vm14, %v7334_v60, %v7333_v56  ;;  %v14432_v57 = vadd.f32 %v14346_v19, %v14367_v10 }
 0x50d   : > { %v6788_v32 = vmax.f32 %v5940_v31, %v9520_v52  ;;  %v6916_v62 = vpack.c.bf16 %v6786_v23, %v6786_v23  ;;  %v6917_v29 = vpack.c.bf16 %v6787_v11, %v6787_v11  ;;  %v14449_v11 = vpop.f32.mrf.mxu1 }
 0x50e   : > { %v5890_v9 = vcombine.high %v5618_v49, %v5618_v49  ;;  %v5897_v21 = vrot.slane %v5618_v49, %v13939_v1  ;;  %v7171_v15 = vunpack.c.l.b16 %v6915_v35  ;;  %v5573_v40 = vmax.f32 %v14432_v57, 0.0  ;;  %15589 = vst [vmem:[#allocation25_spill] sm:$0xff] %v14449_v11  ;;  %v15608_v35 = vld [vmem:[#allocation28_spill] sm:$0xff] }
 0x50f   : > { %v6918_v33 = vpack.c.bf16 %v6788_v32, %v6788_v32  ;;  %v14438_v18 = vunpack.c.l.b16 %v6916_v62  ;;  %v14440_v38 = vunpack.c.l.b16 %v6917_v29  ;;  %v15591_v32 = vld [vmem:[#allocation31_spill] sm:$0xff] }
 0x510   : > { %v5904_v55 = vrot.slane %v5890_v9, %v13939_v1  ;;  %v5905_v16 = vcombine.high %v5897_v21, %v5897_v21  ;;  %v9509_v63 = vrot.slane %v5897_v21, 9  ;;  %v7350_v17 = vrot.slane %v7171_v15, 4 }
 0x511   : > { %v14442_v6 = vunpack.c.l.b16 %v6918_v33  ;;  %v5442_v9 = vmul.f32 %v14336_v5, %v14358_v51 }
 0x512   : > { %v5906_v10 = vcombine.high %v5904_v55, %v5904_v55  ;;  %v9510_v60 = vrot.slane %v5905_v16, 9  ;;  %v9511_v31 = vrot.slane %v5904_v55, 9  ;;  %v6777_v28 = vmax.f32 %v5897_v21, %v9509_v63  ;;  %v15590_v21 = vld [vmem:[#allocation29_spill] sm:$0xff] }
 0x513   : > { %v14445_v61 = vsel %vm7249_vm15, %v7350_v17, %v7349_v48  ;;  %v5370_v62 = vadd.f32 %v15591_v32, %v15590_v21  ;;  %v15592_v48 = vld [vmem:[#allocation26_spill] sm:$0xff] }
 0x514   : > { %v9512_v3 = vrot.slane %v5906_v10, 9  ;;  %v6778_v49 = vmax.f32 %v5905_v16, %v9510_v60  ;;  %v6779_v52 = vmax.f32 %v5904_v55, %v9511_v31  ;;  %v6907_v23 = vpack.c.bf16 %v6777_v28, %v6777_v28 }
 0x515   : > { %v5375_v29 = vadd.f32 %v14172_v7, %v15592_v48  ;;  %v5512_v55 = vadd.f32 %v14346_v19, %v5442_v9  ;;  %v5440_v16 = vmul.f32 %v14336_v5, %v5370_v62  ;;  %v15593_v31 = vrot.slane %v14191_v45, 3 }
 0x516   : > { %v6780_v15 = vmax.f32 %v5906_v10, %v9512_v3  ;;  %v6908_v63 = vpack.c.bf16 %v6778_v49, %v6778_v49  ;;  %v6909_v33 = vpack.c.bf16 %v6779_v52, %v6779_v52  ;;  %v7163_v17 = vunpack.c.l.b16 %v6907_v23  ;;  %v14469_v10 = vpop.f32.mrf.mxu1 }
 0x517   : > { %v5445_v60 = vmul.f32 %v14336_v5, %v5375_v29  ;;  %v7283_v51 = vsel %vm7252_vm0, %v15593_v31, %v14204_v59  ;;  %15594 = vst [vmem:[#allocation27_spill] sm:$0xff] %v14469_v10  ;;  %v5576_v3 = vmax.f32 %v5512_v55, 0.0  ;;  %v14472_v49 = vadd.f32 %v14346_v19, %v5440_v16  ;;  %v15600_v31 = vld [vmem:[#allocation62_spill] sm:$0xff] }
 0x518   : > { %v6910_v28 = vpack.c.bf16 %v6780_v15, %v6780_v15  ;;  %v14465_v21 = vunpack.c.l.b16 %v6908_v63  ;;  %v14467_v32 = vunpack.c.l.b16 %v6909_v33  ;;  %v7336_v7 = vrot.slane %v7163_v17, 4 }
 0x519   : > { %v5515_v52 = vadd.f32 %v14346_v19, %v5445_v60  ;;  %v15595_v23 = vrot.slane %v14188_v39, 2  ;;  %v15596_v63 = vrot.slane %v14193_v43, 1  ;;  %v15597_v39 = vrot.slane %v14176_v58, 3  ;;  %v15599_v60 = vld [vmem:[#allocation24_spill] sm:$0xff]  ;;  %v14501_v43 = vpop.f32.mrf.mxu1  ;;  %v15604_v58 = vld [vmem:[#allocation61_spill] sm:$0xff] }
 0x51a   : > { %v14478_v9 = vunpack.c.l.b16 %v6910_v28  ;;  %v14481_v59 = vsel %vm7249_vm15, %v7336_v7, %v7335_v34  ;;  %v15598_v34 = vrot.slane %v14174_v8, 2  ;;  %v15601_v28 = vld [vmem:[#allocation22_spill] sm:$0xff]  ;;  %v15602_v7 = vld [vmem:[#allocation33_spill] sm:$0xff]  ;;  %15603 = vst [vmem:[#allocation17_spill] sm:$0xff] %v14501_v43 }
 0x51b   : > { %v7285_v45 = vsel %vm7255_vm1, %v15595_v23, %v7283_v51  ;;  %v5579_v15 = vmax.f32 %v5515_v52, 0.0  ;;  %v7297_v17 = vsel %vm7252_vm0, %v15597_v39, %v14185_v24  ;;  %v5373_v51 = vadd.f32 %v15600_v31, %v15599_v60  ;;  %v15607_v39 = vld [vmem:[#allocation35_spill] sm:$0xff] }
 0x51c   : > { %v7287_v33 = vsel %vm7258_vm5, %v15596_v63, %v7285_v45  ;;  %v7299_v16 = vsel %vm7255_vm1, %v15598_v34, %v7297_v17  ;;  %v5376_v52 = vadd.f32 %v15602_v7, %v15601_v28  ;;  %v15605_v45 = vrot.slane %v15604_v58, 1  ;;  %v15606_v63 = vld [vmem:[#allocation20_spill] sm:$0xff]  ;;  %v15609_v17 = vld [vmem:[#allocation37_spill] sm:$0xff]  ;;  %v15610_v28 = vld [vmem:[#allocation30_spill] sm:$0xff] }
 0x51d   : > { %v5623_v23 = vmax.f32 %v5575_v50, %v5579_v15  ;;  %v5374_v8 = vadd.f32 %v15607_v39, %v15606_v63  ;;  %v5379_v34 = vadd.f32 %v15609_v17, %v15608_v35  ;;  %v5443_v60 = vmul.f32 %v14336_v5, %v5373_v51  ;;  %v15611_v7 = vld [vmem:[#allocation39_spill] sm:$0xff]  ;;  %v14523_v51 = vpop.f32.mrf.mxu1 }
 0x51e   : > { %v7301_v24 = vsel %vm7258_vm5, %v15605_v45, %v7299_v16  ;;  %v5446_v31 = vmul.f32 %v14336_v5, %v5376_v52  ;;  %v14516_v44 = vadd.f32 %v15611_v7, %v15610_v28  ;;  %15612 = vst [vmem:[#allocation29_spill] sm:$0xff] %v14523_v51 }
 0x51f   : > { %v7471_v55 = vpack.c.b16 %v7301_v24, %v7287_v33  ;;  %v5975_v13 = vcombine.high %v5623_v23, %v5623_v23  ;;  %v5982_v50 = vrot.slane %v5623_v23, %v13939_v1  ;;  %v5444_v15 = vmul.f32 %v14336_v5, %v5374_v8  ;;  %v14538_v56 = vpop.f32.mrf.mxu1 }
 0x520   : > { %v5449_v16 = vmul.f32 %v14336_v5, %v5379_v34  ;;  %v5513_v35 = vadd.f32 %v14346_v19, %v5443_v60  ;;  %v5516_v33 = vadd.f32 %v14346_v19, %v5446_v31  ;;  %15614 = vst [vmem:[#allocation26_spill] sm:$0xff] %v14538_v56 }
 0x521   : > { %v7486_v58 = vshrl.u32 %v7471_v55, 16  ;;  %v7489_v45 = vshll.u32 %v7471_v55, 16  ;;  %v5989_v52 = vrot.slane %v5975_v13, %v13939_v1  ;;  %v5990_v24 = vcombine.high %v5982_v50, %v5982_v50 }
 0x522   : > { %v9529_v63 = vrot.slane %v5982_v50, 9  ;;  %v14527_v39 = vadd.f32 %v14346_v19, %v5444_v15  ;;  %v5577_v17 = vmax.f32 %v5513_v35, 0.0  ;;  %v5580_v8 = vmax.f32 %v5516_v33, 0.0 }
 0x523   : > { %v7488_v23 = vrot.slane %v7486_v58, 7  ;;  %v14530_v34 = vadd.f32 %v14346_v19, %v5449_v16  ;;  %v5991_v55 = vcombine.high %v5989_v52, %v5989_v52  ;;  %v9530_v28 = vrot.slane %v5990_v24, 9 }
 0x524   : > { %v9531_v60 = vrot.slane %v5989_v52, 9  ;;  %v6797_v7 = vmax.f32 %v5982_v50, %v9529_v63  ;;  %v5621_v13 = vmax.f32 %v5573_v40, %v5577_v17  ;;  %v5624_v15 = vmax.f32 %v5576_v3, %v5580_v8  ;;  %v14549_v8 = vpop.f32.mrf.mxu1 }
 0x525   : > { %v7491_v31 = vor.u32 %v7489_v45, %v7488_v23  ;;  %v14534_v48 = vsel %vm11059_vm2, %v7488_v23, 0  ;;  %v9532_v58 = vrot.slane %v5991_v55, 9  ;;  %v6798_v35 = vmax.f32 %v5990_v24, %v9530_v28  ;;  %15616 = vst [vmem:[#allocation62_spill] sm:$0xff] %v14549_v8 }
 0x526   : > { %15613 = vst [vmem:[#allocation31_spill] sm:$0xff] %v14534_v48  ;;  %v6799_v33 = vmax.f32 %v5989_v52, %v9531_v60  ;;  %v6927_v16 = vpack.c.bf16 %v6797_v7, %v6797_v7  ;;  %v7587_v50 = vshll.u32 %v14534_v48, 16  ;;  %v5941_v45 = vcombine.high %v5621_v13, %v5621_v13 }
 0x527   : > { %v14542_v62 = vsel %vm11059_vm2, 0, %v7491_v31  ;;  %v5948_v63 = vrot.slane %v5621_v13, %v13939_v1  ;;  %v6800_v23 = vmax.f32 %v5991_v55, %v9532_v58  ;;  %v6928_v29 = vpack.c.bf16 %v6798_v35, %v6798_v35  ;;  %v14551_v58 = vpop.f32.mrf.mxu1 }
 0x528   : > { %15615 = vst [vmem:[#allocation24_spill] sm:$0xff] %v14542_v62  ;;  %v6929_v57 = vpack.c.bf16 %v6799_v33, %v6799_v33  ;;  %v7183_v40 = vunpack.c.l.b16 %v6927_v16  ;;  %v7580_v3 = vshrl.u32 %v14542_v62, 16  ;;  %v7582_v17 = vshll.u32 %v14542_v62, 16  ;;  %15617 = vst [vmem:[#allocation22_spill] sm:$0xff] %v14551_v58 }
 0x529   : > { %v7589_v24 = vrot.slane %v7587_v50, 1  ;;  %v5955_v52 = vrot.slane %v5941_v45, %v13939_v1  ;;  %v6930_v28 = vpack.c.bf16 %v6800_v23, %v6800_v23  ;;  %v7184_v60 = vunpack.c.l.b16 %v6928_v29  ;;  %v14553_v10 = vpop.f32.mrf.mxu1 }
 0x52a   : > { %v7185_v7 = vunpack.c.l.b16 %v6929_v57  ;;  %v5956_v31 = vcombine.high %v5948_v63, %v5948_v63  ;;  %v7584_v48 = vrot.slane %v7582_v17, 1  ;;  %v9521_v13 = vrot.slane %v5948_v63, 9 }
 0x52b   : > { %v5957_v56 = vcombine.high %v5955_v52, %v5955_v52  ;;  %v9523_v55 = vrot.slane %v5955_v52, 9  ;;  %v7186_v35 = vunpack.c.l.b16 %v6930_v28  ;;  %v7372_v33 = vrot.slane %v7184_v60, 7  ;;  %v8112_v60 = vpop.f32.mrf.mxu1 }
 0x52c   : > { %v7374_v16 = vrot.slane %v7185_v7, 6  ;;  %v9522_v51 = vrot.slane %v5956_v31, 9  ;;  %v7585_v62 = vor.u32 %v7584_v48, %v7580_v3  ;;  %v6789_v43 = vmax.f32 %v5948_v63, %v9521_v13 }
 0x52d   : > { %v9524_v50 = vrot.slane %v5957_v56, 9  ;;  %v6791_v45 = vmax.f32 %v5955_v52, %v9523_v55  ;;  %v7373_v29 = vsel %vm7240_vm12, %v7372_v33, %v7183_v40  ;;  %v7376_v23 = vrot.slane %v7186_v35, 5  ;;  %v8113_v13 = vpop.f32.mrf.mxu1 }
 0x52e   : > { %v6790_v57 = vmax.f32 %v5956_v31, %v9522_v51  ;;  %v5992_v17 = vcombine.high %v5624_v15, %v5624_v15  ;;  %v7375_v8 = vsel %vm7243_vm13, %v7374_v16, %v7373_v29  ;;  %v7590_v11 = vsel %vm982_vm3, %v7585_v62, %v7589_v24 }
 0x52f   : > { %v6792_v58 = vmax.f32 %v5957_v56, %v9524_v50  ;;  %v6919_v28 = vpack.c.bf16 %v6789_v43, %v6789_v43  ;;  %7667 = vrot.lane.b32.xlu0 %v7590_v11, %s10884_s20  ;;  %v6921_v3 = vpack.c.bf16 %v6791_v45, %v6791_v45  ;;  %v5999_v63 = vrot.slane %v5624_v15, %v13939_v1  ;;  %v8114_v15 = vpop.f32.mrf.mxu1 }
 0x530   : > { %v6920_v48 = vpack.c.bf16 %v6790_v57, %v6790_v57  ;;  %v6006_v52 = vrot.slane %v5992_v17, %v13939_v1  ;;  %v7377_v51 = vsel %vm7246_vm14, %v7376_v23, %v7375_v8  ;;  %v5578_v31 = vmax.f32 %v14527_v39, 0.0 }
 0x531   : > { %v6922_v7 = vpack.c.bf16 %v6792_v58, %v6792_v58  ;;  %v7175_v40 = vunpack.c.l.b16 %v6919_v28  ;;  %v7177_v62 = vunpack.c.l.b16 %v6921_v3  ;;  %v6007_v56 = vcombine.high %v5999_v63, %v5999_v63  ;;  %v8115_v17 = vpop.f32.mrf.mxu1 }
 0x532   : > { %v7176_v55 = vunpack.c.l.b16 %v6920_v48  ;;  %v6008_v43 = vcombine.high %v6006_v52, %v6006_v52  ;;  %v9533_v35 = vrot.slane %v5999_v63, 9  ;;  %v9535_v11 = vrot.slane %v6006_v52, 9 }
 0x533   : > { %v7178_v24 = vunpack.c.l.b16 %v6922_v7  ;;  %v15618_v33 = vmax.f32 %v14472_v49, 0.0  ;;  %v7360_v45 = vrot.slane %v7177_v62, 6  ;;  %v9534_v58 = vrot.slane %v6007_v56, 9 }
 0x534   : > { %v7358_v50 = vrot.slane %v7176_v55, 7  ;;  %v9536_v29 = vrot.slane %v6008_v43, 9  ;;  %v6801_v8 = vmax.f32 %v5999_v63, %v9533_v35  ;;  %v6803_v23 = vmax.f32 %v6006_v52, %v9535_v11 }
 0x535   : > { %v5622_v16 = vmax.f32 %v15618_v33, %v5578_v31  ;;  %v7362_v57 = vrot.slane %v7178_v24, 5  ;;  %v6802_v60 = vmax.f32 %v6007_v56, %v9534_v58 }
 0x536   : > { %v7359_v28 = vsel %vm7240_vm12, %v7358_v50, %v7175_v40  ;;  %v6804_v48 = vmax.f32 %v6008_v43, %v9536_v29  ;;  %v6931_v49 = vpack.c.bf16 %v6801_v8, %v6801_v8  ;;  %v6933_v31 = vpack.c.bf16 %v6803_v23, %v6803_v23 }
 0x537   : > { %v5958_v39 = vcombine.high %v5622_v16, %v5622_v16  ;;  %v5965_v3 = vrot.slane %v5622_v16, %v13939_v1  ;;  %v7361_v7 = vsel %vm7243_vm13, %v7360_v45, %v7359_v28  ;;  %v6932_v55 = vpack.c.bf16 %v6802_v60, %v6802_v60 }
 0x538   : > { %v6934_v62 = vpack.c.bf16 %v6804_v48, %v6804_v48  ;;  %v7187_v63 = vunpack.c.l.b16 %v6931_v49  ;;  %v14569_v52 = vunpack.c.l.b16 %v6933_v31  ;;  %v7363_v48 = vsel %vm7246_vm14, %v7362_v57, %v7361_v7  ;;  %v15621_v7 = vld [vmem:[#allocation34_spill] sm:$0xff] }
 0x539   : > { %v5972_v13 = vrot.slane %v5958_v39, %v13939_v1  ;;  %v5973_v33 = vcombine.high %v5965_v3, %v5965_v3  ;;  %v9525_v24 = vrot.slane %v5965_v3, 9  ;;  %v14571_v40 = vunpack.c.l.b16 %v6932_v55 }
 0x53a   : > { %v14573_v56 = vunpack.c.l.b16 %v6934_v62  ;;  %v7378_v15 = vrot.slane %v7187_v63, 4  ;;  %v5583_v31 = vmax.f32 %v14530_v34, 0.0  ;;  %v15620_v63 = vld [vmem:[#allocation23_spill] sm:$0xff]  ;;  %v5383_v34 = vadd.f32 %v14273_v37, %v15621_v7 }
 0x53b   : > { %v5974_v35 = vcombine.high %v5972_v13, %v5972_v13  ;;  %v9527_v11 = vrot.slane %v5972_v13, 9  ;;  %v9526_v43 = vrot.slane %v5973_v33, 9  ;;  %v6793_v16 = vmax.f32 %v5965_v3, %v9525_v24  ;;  %v15619_v24 = vld [vmem:[#allocation32_spill] sm:$0xff] }
 0x53c   : > { %v14579_v17 = vsel %vm7249_vm15, %v7378_v15, %v7377_v51  ;;  %v5378_v51 = vadd.f32 %v14268_v36, %v15620_v63 }
 0x53d   : > { %v9528_v45 = vrot.slane %v5974_v35, 9  ;;  %v6795_v58 = vmax.f32 %v5972_v13, %v9527_v11  ;;  %v6794_v23 = vmax.f32 %v5973_v33, %v9526_v43  ;;  %v6923_v39 = vpack.c.bf16 %v6793_v16, %v6793_v16 }
 0x53e   : > { %v5447_v13 = vmul.f32 %v14336_v5, %v14516_v44  ;;  %v5380_v33 = vadd.f32 %v14265_v22, %v15619_v24  ;;  %v5448_v15 = vmul.f32 %v14336_v5, %v5378_v51  ;;  %v15625_v24 = vld [vmem:[#allocation36_spill] sm:$0xff] }
 0x53f   : > { %v6796_v28 = vmax.f32 %v5974_v35, %v9528_v45  ;;  %v6925_v60 = vpack.c.bf16 %v6795_v58, %v6795_v58  ;;  %v6924_v49 = vpack.c.bf16 %v6794_v23, %v6794_v23  ;;  %v7179_v3 = vunpack.c.l.b16 %v6923_v39 }
 0x540   : > { %v5517_v57 = vadd.f32 %v14346_v19, %v5447_v13  ;;  %v5450_v16 = vmul.f32 %v14336_v5, %v5380_v33  ;;  %v5453_v58 = vmul.f32 %v14336_v5, %v5383_v34  ;;  %v14611_v39 = vadd.f32 %v14346_v19, %v5448_v15  ;;  %v15630_v15 = vld [vmem:[#allocation18_spill] sm:$0xff] }
 0x541   : > { %v6926_v55 = vpack.c.bf16 %v6796_v28, %v6796_v28  ;;  %v14585_v62 = vunpack.c.l.b16 %v6925_v60  ;;  %v14591_v35 = vunpack.c.l.b16 %v6924_v49  ;;  %v7364_v11 = vrot.slane %v7179_v3, 4 }
 0x542   : > { %v5581_v45 = vmax.f32 %v5517_v57, 0.0  ;;  %v14608_v37 = vadd.f32 %v14346_v19, %v5450_v16  ;;  %v15622_v28 = vrot.slane %v14316_v53, 3  ;;  %v15623_v49 = vrot.slane %v14318_v4, 2 }
 0x543   : > { %v14596_v43 = vunpack.c.l.b16 %v6926_v55  ;;  %v14602_v22 = vsel %vm7249_vm15, %v7364_v11, %v7363_v48  ;;  %v5523_v48 = vadd.f32 %v14346_v19, %v5453_v58  ;;  %v15624_v13 = vrot.slane %v14285_v41, 3  ;;  %v15631_v58 = vld [vmem:[#allocation40_spill] sm:$0xff] }
 0x544   : > { %v7311_v60 = vsel %vm7252_vm0, %v15622_v28, %v14334_v14  ;;  %v5381_v33 = vadd.f32 %v14283_v25, %v15625_v24  ;;  %v15626_v14 = vrot.slane %v14329_v2, 1  ;;  %v15627_v4 = vrot.slane %v14287_v46, 2  ;;  %v15629_v25 = vld [vmem:[#allocation38_spill] sm:$0xff]  ;;  %v15632_v28 = vld [vmem:[#allocation41_spill] sm:$0xff]  ;;  %v15633_v46 = vld [vmem:[#allocation19_spill] sm:$0xff] }
 0x545   : > { %v7313_v3 = vsel %vm7255_vm1, %v15623_v49, %v7311_v60  ;;  %v7325_v55 = vsel %vm7252_vm0, %v15624_v13, %v14301_v54  ;;  %v5587_v57 = vmax.f32 %v5523_v48, 0.0  ;;  %v15628_v41 = vrot.slane %v14293_v30, 1  ;;  %v15634_v49 = vld [vmem:[#allocation42_spill] sm:$0xff]  ;;  %v15636_v24 = vld [vmem:[#allocation44_spill] sm:$0xff] }
 0x546   : > { %v7315_v51 = vsel %vm7258_vm5, %v15626_v14, %v7313_v3  ;;  %v7327_v11 = vsel %vm7255_vm1, %v15627_v4, %v7325_v55  ;;  %v5451_v7 = vmul.f32 %v14336_v5, %v5381_v33  ;;  %v5384_v34 = vadd.f32 %v14298_v47, %v15629_v25  ;;  %v15635_v55 = vld [vmem:[#allocation16_spill] sm:$0xff] }
 0x547   : > { %v7329_v54 = vsel %vm7258_vm5, %v15628_v41, %v7327_v11  ;;  %v5382_v2 = vadd.f32 %v14322_v27, %v15630_v15  ;;  %v5387_v60 = vadd.f32 %v15632_v28, %v15631_v58  ;;  %v5385_v3 = vadd.f32 %v15634_v49, %v15633_v46 }
 0x548   : > { %v7472_v16 = vpack.c.b16 %v7329_v54, %v7315_v51  ;;  %v5627_v48 = vmax.f32 %v5583_v31, %v5587_v57  ;;  %v5521_v30 = vadd.f32 %v14346_v19, %v5451_v7  ;;  %v5454_v13 = vmul.f32 %v14336_v5, %v5384_v34 }
 0x549   : > { %v14651_v33 = vadd.f32 %v15636_v24, %v15635_v55  ;;  %v5452_v51 = vmul.f32 %v14336_v5, %v5382_v2  ;;  %v5457_v27 = vmul.f32 %v14336_v5, %v5387_v60  ;;  %v14664_v25 = vmul.f32 %v14336_v5, %v5385_v3 }
 0x54a   : > { %v7493_v47 = vshrl.u32 %v7472_v16, 16  ;;  %v7496_v14 = vshll.u32 %v7472_v16, 16  ;;  %v6043_v4 = vcombine.high %v5627_v48, %v5627_v48  ;;  %v6050_v11 = vrot.slane %v5627_v48, %v13939_v1 }
 0x54b   : > { %v5585_v41 = vmax.f32 %v5521_v30, 0.0  ;;  %v5524_v31 = vadd.f32 %v14346_v19, %v5454_v13  ;;  %v14658_v54 = vadd.f32 %v14346_v19, %v5452_v51  ;;  %v14661_v7 = vadd.f32 %v14346_v19, %v5457_v27 }
 0x54c   : > { %v7495_v57 = vrot.slane %v7493_v47, 7  ;;  %v6057_v34 = vrot.slane %v6043_v4, %v13939_v1  ;;  %v6058_v16 = vcombine.high %v6050_v11, %v6050_v11  ;;  %v9545_v15 = vrot.slane %v6050_v11, 9 }
 0x54d   : > { %v5625_v2 = vmax.f32 %v5581_v45, %v5585_v41  ;;  %v5588_v60 = vmax.f32 %v5524_v31, 0.0  ;;  %v5586_v46 = vmax.f32 %v14658_v54, 0.0 }
 0x54e   : > { %v7498_v58 = vor.u32 %v7496_v14, %v7495_v57  ;;  %v14669_v28 = vsel %vm11059_vm2, %v7495_v57, 0  ;;  %v6059_v49 = vcombine.high %v6057_v34, %v6057_v34  ;;  %v9546_v48 = vrot.slane %v6058_v16, 9 }
 0x54f   : > { %v9547_v30 = vrot.slane %v6057_v34, 9  ;;  %v6813_v13 = vmax.f32 %v6050_v11, %v9545_v15  ;;  %v7599_v55 = vshll.u32 %v14669_v28, 16  ;;  %v6009_v24 = vcombine.high %v5625_v2, %v5625_v2 }
 0x550   : > { %v14674_v3 = vsel %vm11059_vm2, 0, %v7498_v58  ;;  %v6016_v45 = vrot.slane %v5625_v2, %v13939_v1  ;;  %v9548_v47 = vrot.slane %v6059_v49, 9  ;;  %v6814_v14 = vmax.f32 %v6058_v16, %v9546_v48 }
 0x551   : > { %v6815_v51 = vmax.f32 %v6057_v34, %v9547_v30  ;;  %v6943_v27 = vpack.c.bf16 %v6813_v13, %v6813_v13  ;;  %v7592_v4 = vshrl.u32 %v14674_v3, 16  ;;  %v7594_v41 = vshll.u32 %v14674_v3, 16 }
 0x552   : > { %v7601_v31 = vrot.slane %v7599_v55, 1  ;;  %v6023_v11 = vrot.slane %v6009_v24, %v13939_v1  ;;  %v6816_v57 = vmax.f32 %v6059_v49, %v9548_v47  ;;  %v6944_v54 = vpack.c.bf16 %v6814_v14, %v6814_v14 }
 0x553   : > { %v6945_v15 = vpack.c.bf16 %v6815_v51, %v6815_v51  ;;  %v7199_v58 = vunpack.c.l.b16 %v6943_v27  ;;  %v7596_v8 = vrot.slane %v7594_v41, 1  ;;  %v6024_v50 = vcombine.high %v6016_v45, %v6016_v45 }
 0x554   : > { %v6025_v29 = vcombine.high %v6023_v11, %v6023_v11  ;;  %v9537_v23 = vrot.slane %v6016_v45, 9  ;;  %v6946_v2 = vpack.c.bf16 %v6816_v57, %v6816_v57  ;;  %v7200_v44 = vunpack.c.l.b16 %v6944_v54 }
 0x555   : > { %v7201_v16 = vunpack.c.l.b16 %v6945_v15  ;;  %v9539_v34 = vrot.slane %v6023_v11, 9  ;;  %v7597_v48 = vor.u32 %v7596_v8, %v7592_v4  ;;  %v9538_v30 = vrot.slane %v6024_v50, 9 }
 0x556   : > { %v9540_v13 = vrot.slane %v6025_v29, 9  ;;  %v6805_v36 = vmax.f32 %v6016_v45, %v9537_v23  ;;  %v7202_v53 = vunpack.c.l.b16 %v6946_v2  ;;  %v7400_v55 = vrot.slane %v7200_v44, 7 }
 0x557   : > { %v7402_v63 = vrot.slane %v7201_v16, 6  ;;  %v6807_v24 = vmax.f32 %v6023_v11, %v9539_v34  ;;  %v7602_v49 = vsel %vm982_vm3, %v7597_v48, %v7601_v31  ;;  %v6806_v47 = vmax.f32 %v6024_v50, %v9538_v30 }
 0x558   : > { %v6808_v14 = vmax.f32 %v6025_v29, %v9540_v13  ;;  %v6935_v51 = vpack.c.bf16 %v6805_v36, %v6805_v36  ;;  %v7401_v27 = vsel %vm7240_vm12, %v7400_v55, %v7199_v58  ;;  %v7404_v41 = vrot.slane %v7202_v53, 5  ;;  %7669 = vrot.lane.b32.xlu1 %v7602_v49, %s10884_s20 }
 0x559   : > { %v6937_v57 = vpack.c.bf16 %v6807_v24, %v6807_v24  ;;  %v15637_v8 = vmax.f32 %v14608_v37, 0.0  ;;  %v7403_v23 = vsel %vm7243_vm13, %v7402_v63, %v7401_v27  ;;  %v6936_v45 = vpack.c.bf16 %v6806_v47, %v6806_v47 }
 0x55a   : > { %v6938_v44 = vpack.c.bf16 %v6808_v14, %v6808_v14  ;;  %v7191_v54 = vunpack.c.l.b16 %v6935_v51  ;;  %v7405_v29 = vsel %vm7246_vm14, %v7404_v41, %v7403_v23  ;;  %v15638_v53 = vmax.f32 %v14611_v39, 0.0 }
 0x55b   : > { %v5628_v4 = vmax.f32 %v15637_v8, %v5588_v60  ;;  %v7193_v11 = vunpack.c.l.b16 %v6937_v57  ;;  %v7192_v36 = vunpack.c.l.b16 %v6936_v45  ;;  %v5591_v2 = vmax.f32 %v14661_v7, 0.0 }
 0x55c   : > { %v7194_v31 = vunpack.c.l.b16 %v6938_v44  ;;  %v5626_v58 = vmax.f32 %v15638_v53, %v5586_v46 }
 0x55d   : > { %v6060_v15 = vcombine.high %v5628_v4, %v5628_v4  ;;  %v6067_v50 = vrot.slane %v5628_v4, %v13939_v1  ;;  %v7388_v37 = vrot.slane %v7193_v11, 6  ;;  %v7386_v34 = vrot.slane %v7192_v36, 7 }
 0x55e   : > { %v7390_v48 = vrot.slane %v7194_v31, 5  ;;  %v6026_v30 = vcombine.high %v5626_v58, %v5626_v58  ;;  %v6033_v13 = vrot.slane %v5626_v58, %v13939_v1 }
 0x55f   : > { %v6074_v60 = vrot.slane %v6060_v15, %v13939_v1  ;;  %v6075_v63 = vcombine.high %v6067_v50, %v6067_v50  ;;  %v9549_v16 = vrot.slane %v6067_v50, 9  ;;  %v7387_v14 = vsel %vm7240_vm12, %v7386_v34, %v7191_v54 }
 0x560   : > { %v6040_v39 = vrot.slane %v6026_v30, %v13939_v1  ;;  %v6041_v46 = vcombine.high %v6033_v13, %v6033_v13  ;;  %v9541_v51 = vrot.slane %v6033_v13, 9  ;;  %v7389_v27 = vsel %vm7243_vm13, %v7388_v37, %v7387_v14 }
 0x561   : > { %v6076_v55 = vcombine.high %v6074_v60, %v6074_v60  ;;  %v9550_v24 = vrot.slane %v6075_v63, 9  ;;  %v9551_v49 = vrot.slane %v6074_v60, 9  ;;  %v6817_v47 = vmax.f32 %v6067_v50, %v9549_v16 }
 0x562   : > { %v6042_v23 = vcombine.high %v6040_v39, %v6040_v39  ;;  %v9542_v45 = vrot.slane %v6041_v46, 9  ;;  %v9543_v44 = vrot.slane %v6040_v39, 9  ;;  %v6809_v31 = vmax.f32 %v6033_v13, %v9541_v51 }
 0x563   : > { %v9552_v41 = vrot.slane %v6076_v55, 9  ;;  %v6818_v57 = vmax.f32 %v6075_v63, %v9550_v24  ;;  %v6819_v8 = vmax.f32 %v6074_v60, %v9551_v49  ;;  %v6947_v4 = vpack.c.bf16 %v6817_v47, %v6817_v47 }
 0x564   : > { %v9544_v53 = vrot.slane %v6042_v23, 9  ;;  %v6810_v54 = vmax.f32 %v6041_v46, %v9542_v45  ;;  %v6811_v58 = vmax.f32 %v6040_v39, %v9543_v44  ;;  %v6939_v37 = vpack.c.bf16 %v6809_v31, %v6809_v31  ;;  %v15639_v31 = vld [vmem:[#allocation57_spill] sm:$0xff] }
 0x565   : > { %v6820_v11 = vmax.f32 %v6076_v55, %v9552_v41  ;;  %v6948_v15 = vpack.c.bf16 %v6818_v57, %v6818_v57  ;;  %v6949_v36 = vpack.c.bf16 %v6819_v8, %v6819_v8  ;;  %v7203_v50 = vunpack.c.l.b16 %v6947_v4 }
 0x566   : > { %v6812_v60 = vmax.f32 %v6042_v23, %v9544_v53  ;;  %v6940_v24 = vpack.c.bf16 %v6810_v54, %v6810_v54  ;;  %v6941_v49 = vpack.c.bf16 %v6811_v58, %v6811_v58  ;;  %v7195_v14 = vunpack.c.l.b16 %v6939_v37 }
 0x567   : > { %v6950_v16 = vpack.c.bf16 %v6820_v11, %v6820_v11  ;;  %v14697_v34 = vunpack.c.l.b16 %v6948_v15  ;;  %v14699_v30 = vunpack.c.l.b16 %v6949_v36  ;;  %v7406_v63 = vrot.slane %v7203_v50, 4  ;;  %v15640_v50 = vld [vmem:[#allocation46_spill] sm:$0xff] }
 0x568   : > { %v6942_v39 = vpack.c.bf16 %v6812_v60, %v6812_v60  ;;  %v14708_v51 = vunpack.c.l.b16 %v6940_v24  ;;  %v14710_v41 = vunpack.c.l.b16 %v6941_v49  ;;  %v7391_v8 = vsel %vm7246_vm14, %v7390_v48, %v7389_v27  ;;  %v15641_v27 = vld [vmem:[#allocation47_spill] sm:$0xff] }
 0x569   : > { %v14701_v47 = vunpack.c.l.b16 %v6950_v16  ;;  %v14706_v46 = vsel %vm7249_vm15, %v7406_v63, %v7405_v29  ;;  %v7392_v4 = vrot.slane %v7195_v14, 4  ;;  %v5525_v23 = vadd.f32 %v14346_v19, %v14664_v25 }
 0x56a   : > { %v14716_v45 = vunpack.c.l.b16 %v6942_v39  ;;  %v7394_v44 = vrot.slane %v14708_v51, 3  ;;  %v5458_v11 = vmul.f32 %v14336_v5, %v14651_v33  ;;  %v5386_v48 = vadd.f32 %v15640_v50, %v15639_v31  ;;  %v14764_v31 = vld [vmem:[#allocation6] ss:$0 sm:$0xff]  ;;  %v15650_v50 = vld [vmem:[#allocation58_spill] sm:$0xff] }
 0x56b   : > { %v14723_v15 = vsel %vm7249_vm15, %v7392_v4, %v7391_v8  ;;  %v5589_v36 = vmax.f32 %v5525_v23, 0.0  ;;  %v5391_v53 = vadd.f32 %v14407_v12, %v15641_v27  ;;  %v15642_v58 = vrot.slane %v14465_v21, 3  ;;  %v15648_v8 = vld [vmem:[#allocation48_spill] sm:$0xff]  ;;  %v15649_v23 = vld [vmem:[#allocation50_spill] sm:$0xff]  ;;  %v15652_v27 = vld [vmem:[#allocation25_spill] sm:$0xff] }
 0x56c   : > { %v14731_v54 = vadd.f32 %v14346_v19, %v5458_v11  ;;  %v15643_v16 = vrot.slane %v14438_v18, 3  ;;  %v5456_v63 = vmul.f32 %v14336_v5, %v5386_v48  ;;  %v15644_v12 = vrot.slane %v14467_v32, 2  ;;  %v15651_v48 = vld [vmem:[#allocation49_spill] sm:$0xff] }
 0x56d   : > { %v7339_v33 = vsel %vm7252_vm0, %v15642_v58, %v14481_v59  ;;  %v5461_v60 = vmul.f32 %v14336_v5, %v5391_v53  ;;  %v15645_v49 = vrot.slane %v14440_v38, 2  ;;  %v15646_v59 = vrot.slane %v14478_v9, 1 }
 0x56e   : > { %v7353_v37 = vsel %vm7252_vm0, %v15643_v16, %v14445_v61  ;;  %v7341_v24 = vsel %vm7255_vm1, %v15644_v12, %v7339_v33  ;;  %v5592_v21 = vmax.f32 %v14731_v54, 0.0  ;;  %v15647_v61 = vrot.slane %v14442_v6, 1  ;;  %v15654_v54 = vld [vmem:[#allocation27_spill] sm:$0xff] }
 0x56f   : > { %v7355_v14 = vsel %vm7255_vm1, %v15645_v49, %v7353_v37  ;;  %v7343_v18 = vsel %vm7258_vm5, %v15646_v59, %v7341_v24  ;;  %v5389_v5 = vadd.f32 %v14414_v0, %v15648_v8  ;;  %v14759_v32 = vadd.f32 %v14346_v19, %v5456_v63  ;;  %v15653_v0 = vld [vmem:[#allocation52_spill] sm:$0xff]  ;;  %v14774_v63 = vld [vmem:[#allocation7] ss:$0 sm:$0xff] }
 0x570   : > { %v7357_v39 = vsel %vm7258_vm5, %v15647_v61, %v7355_v14  ;;  %v5531_v38 = vadd.f32 %v14346_v19, %v5461_v60  ;;  %v5392_v11 = vadd.f32 %v14426_v20, %v15649_v23  ;;  %v5390_v6 = vadd.f32 %v14436_v42, %v15650_v50  ;;  %v15655_v59 = vld [vmem:[#allocation51_spill] sm:$0xff] }
 0x571   : > { %v7473_v4 = vpack.c.b16 %v7357_v39, %v7343_v18  ;;  %v5459_v9 = vmul.f32 %v14764_v31, %v5389_v5  ;;  %v5395_v53 = vadd.f32 %v15652_v27, %v15651_v48  ;;  %v5393_v58 = vadd.f32 %v15654_v54, %v15653_v0  ;;  %v15656_v18 = vld [vmem:[#allocation17_spill] sm:$0xff] }
 0x572   : > { %v5590_v33 = vmax.f32 %v14759_v32, 0.0  ;;  %v5595_v19 = vmax.f32 %v5531_v38, 0.0  ;;  %v5462_v60 = vmul.f32 %v14764_v31, %v5392_v11  ;;  %v5460_v12 = vmul.f32 %v14764_v31, %v5390_v6  ;;  %v10674_v39 = vld [vmem:[%s15345_s7 + $0xf8] sm:$0xff]  }
 0x573   : > { %v7500_v16 = vshrl.u32 %v7473_v4, 16  ;;  %v7503_v37 = vshll.u32 %v7473_v4, 16  ;;  %v5529_v20 = vadd.f32 %v14774_v63, %v5459_v9  ;;  %v5465_v42 = vmul.f32 %v14764_v31, %v5395_v53  ;;  %8301 = vmatpush1.bf16.msra.mxu0 %v10674_v39  ;;  %v10675_v9 = vld [vmem:[%s15345_s7 + $0xf0] sm:$0xff]  }
 0x574   : > { %v5631_v24 = vmax.f32 %v5591_v2, %v5595_v19  ;;  %v14783_v14 = vmul.f32 %v14764_v31, %v5393_v58  ;;  %v14787_v61 = vadd.f32 %v15656_v18, %v15655_v59  ;;  %v5532_v5 = vadd.f32 %v14774_v63, %v5462_v60 }
 0x575   : > { %v7502_v49 = vrot.slane %v7500_v16, 7  ;;  %v5593_v8 = vmax.f32 %v5529_v20, 0.0  ;;  %v14794_v38 = vadd.f32 %v14774_v63, %v5460_v12  ;;  %v14797_v7 = vadd.f32 %v14774_v63, %v5465_v42 }
 0x576   : > { %v6111_v2 = vcombine.high %v5631_v24, %v5631_v24  ;;  %v6118_v4 = vrot.slane %v5631_v24, %v13939_v1  ;;  %v5596_v48 = vmax.f32 %v5532_v5, 0.0  ;;  %v15657_v53 = vmov 0  }
 0x577   : > { %v7505_v23 = vor.u32 %v7503_v37, %v7502_v49  ;;  %v14802_v11 = vsel %vm11059_vm2, %v7502_v49, 0  ;;  %v5629_v6 = vmax.f32 %v5589_v36, %v5593_v8  ;;  %v5594_v27 = vmax.f32 %v14794_v38, 0.0  ;;  %8302 = vmatprep.subr.bf16.mxu0 %v15657_v53  ;;  %v10676_v49 = vld [vmem:[%s15345_s7 + $0xe8] sm:$0xff]  }
 0x578   : > { %v7611_v50 = vshll.u32 %v14802_v11, 16  ;;  %v6125_v0 = vrot.slane %v6111_v2, %v13939_v1  ;;  %v6126_v54 = vcombine.high %v6118_v4, %v6118_v4  ;;  %v9561_v58 = vrot.slane %v6118_v4, 9  ;;  %8303 = vmatpush1.bf16.msra.mxu0 %v10675_v9 }
 0x579   : > { %v14813_v19 = vsel %vm11059_vm2, 0, %v7505_v23  ;;  %v6077_v60 = vcombine.high %v5629_v6, %v5629_v6  ;;  %v6084_v18 = vrot.slane %v5629_v6, %v13939_v1  ;;  %v5632_v8 = vmax.f32 %v5592_v21, %v5596_v48  ;;  %8304 = vmatprep.subr.bf16.mxu0 %v15657_v53 }
 0x57a   : > { %v7604_v16 = vshrl.u32 %v14813_v19, 16  ;;  %v7606_v37 = vshll.u32 %v14813_v19, 16  ;;  %v7613_v20 = vrot.slane %v7611_v50, 1  ;;  %v6127_v36 = vcombine.high %v6125_v0, %v6125_v0 }
 0x57b   : > { %v9562_v12 = vrot.slane %v6126_v54, 9  ;;  %v9563_v42 = vrot.slane %v6125_v0, 9  ;;  %v6829_v24 = vmax.f32 %v6118_v4, %v9561_v58  ;;  %v6091_v39 = vrot.slane %v6077_v60, %v13939_v1 }
 0x57c   : > { %v7608_v59 = vrot.slane %v7606_v37, 1  ;;  %v9564_v5 = vrot.slane %v6127_v36, 9  ;;  %v6092_v13 = vcombine.high %v6084_v18, %v6084_v18  ;;  %v9553_v9 = vrot.slane %v6084_v18, 9  ;;  %8305 = vmatpush1.bf16.msra.mxu0 %v10676_v49 }
 0x57d   : > { %v6830_v2 = vmax.f32 %v6126_v54, %v9562_v12  ;;  %v6831_v23 = vmax.f32 %v6125_v0, %v9563_v42  ;;  %v6959_v50 = vpack.c.bf16 %v6829_v24, %v6829_v24  ;;  %v6093_v4 = vcombine.high %v6091_v39, %v6091_v39  ;;  %8306 = vmatprep.subr.bf16.mxu0 %v15657_v53 }
 0x57e   : > { %v7609_v57 = vor.u32 %v7608_v59, %v7604_v16  ;;  %v6832_v58 = vmax.f32 %v6127_v36, %v9564_v5  ;;  %v9554_v37 = vrot.slane %v6092_v13, 9  ;;  %v9555_v60 = vrot.slane %v6091_v39, 9 }
 0x57f   : > { %v6960_v25 = vpack.c.bf16 %v6830_v2, %v6830_v2  ;;  %v6961_v29 = vpack.c.bf16 %v6831_v23, %v6831_v23  ;;  %v7215_v55 = vunpack.c.l.b16 %v6959_v50  ;;  %v9556_v21 = vrot.slane %v6093_v4, 9 }
 0x580   : > { %v7614_v6 = vsel %vm982_vm3, %v7609_v57, %v7613_v20  ;;  %v6962_v48 = vpack.c.bf16 %v6832_v58, %v6832_v58  ;;  %v6821_v16 = vmax.f32 %v6084_v18, %v9553_v9  ;;  %v6822_v12 = vmax.f32 %v6092_v13, %v9554_v37 }
 0x581   : > { %v7216_v54 = vunpack.c.l.b16 %v6960_v25  ;;  %v7217_v0 = vunpack.c.l.b16 %v6961_v29  ;;  %7671 = vrot.lane.b32.xlu0 %v7614_v6, %s10884_s20  ;;  %v6823_v42 = vmax.f32 %v6091_v39, %v9555_v60  ;;  %v6824_v36 = vmax.f32 %v6093_v4, %v9556_v21 }
 0x582   : > { %v6128_v24 = vcombine.high %v5632_v8, %v5632_v8  ;;  %v7218_v59 = vunpack.c.l.b16 %v6962_v48  ;;  %v6951_v2 = vpack.c.bf16 %v6821_v16, %v6821_v16  ;;  %v6952_v57 = vpack.c.bf16 %v6822_v12, %v6822_v12 }
 0x583   : > { %v7428_v5 = vrot.slane %v7216_v54, 7  ;;  %v7430_v49 = vrot.slane %v7217_v0, 6  ;;  %v6953_v20 = vpack.c.bf16 %v6823_v42, %v6823_v42  ;;  %v6954_v23 = vpack.c.bf16 %v6824_v36, %v6824_v36 }
 0x584   : > { %v6135_v50 = vrot.slane %v5632_v8, %v13939_v1  ;;  %v7432_v25 = vrot.slane %v7218_v59, 5  ;;  %v7207_v29 = vunpack.c.l.b16 %v6951_v2  ;;  %v6142_v6 = vrot.slane %v6128_v24, %v13939_v1 }
 0x585   : > { %v7429_v58 = vsel %vm7240_vm12, %v7428_v5, %v7215_v55  ;;  %v7208_v18 = vunpack.c.l.b16 %v6952_v57  ;;  %v7209_v39 = vunpack.c.l.b16 %v6953_v20  ;;  %v7210_v4 = vunpack.c.l.b16 %v6954_v23 }
 0x586   : > { %v7431_v13 = vsel %vm7243_vm13, %v7430_v49, %v7429_v58  ;;  %v6143_v9 = vcombine.high %v6135_v50, %v6135_v50  ;;  %v6144_v37 = vcombine.high %v6142_v6, %v6142_v6  ;;  %v9565_v60 = vrot.slane %v6135_v50, 9 }
 0x587   : > { %v9567_v21 = vrot.slane %v6142_v6, 9  ;;  %v7414_v48 = vrot.slane %v7208_v18, 7  ;;  %v7416_v54 = vrot.slane %v7209_v39, 6  ;;  %v7418_v0 = vrot.slane %v7210_v4, 5 }
 0x588   : > { %v7433_v8 = vsel %vm7246_vm14, %v7432_v25, %v7431_v13  ;;  %v9566_v16 = vrot.slane %v6143_v9, 9  ;;  %v9568_v55 = vrot.slane %v6144_v37, 9  ;;  %v6833_v12 = vmax.f32 %v6135_v50, %v9565_v60 }
 0x589   : > { %v6835_v42 = vmax.f32 %v6142_v6, %v9567_v21  ;;  %v7415_v36 = vsel %vm7240_vm12, %v7414_v48, %v7207_v29  ;;  %v5630_v24 = vmax.f32 %v5590_v33, %v5594_v27  ;;  %v5599_v59 = vmax.f32 %v14797_v7, 0.0 }
 0x58a   : > { %v14839_v5 = vadd.f32 %v14774_v63, %v14783_v14  ;;  %v7417_v49 = vsel %vm7243_vm13, %v7416_v54, %v7415_v36  ;;  %v6834_v2 = vmax.f32 %v6143_v9, %v9566_v16  ;;  %v6836_v57 = vmax.f32 %v6144_v37, %v9568_v55 }
 0x58b   : > { %v6963_v20 = vpack.c.bf16 %v6833_v12, %v6833_v12  ;;  %v6965_v23 = vpack.c.bf16 %v6835_v42, %v6835_v42  ;;  %v6094_v50 = vcombine.high %v5630_v24, %v5630_v24  ;;  %v6101_v58 = vrot.slane %v5630_v24, %v13939_v1 }
 0x58c   : > { %v7419_v38 = vsel %vm7246_vm14, %v7418_v0, %v7417_v49  ;;  %v6964_v25 = vpack.c.bf16 %v6834_v2, %v6834_v2  ;;  %v6966_v32 = vpack.c.bf16 %v6836_v57, %v6836_v57  ;;  %v5597_v27 = vmax.f32 %v14839_v5, 0.0  ;;  %v15658_v49 = vld [vmem:[#allocation59_spill] sm:$0xff]  ;;  %v15659_v2 = vld [vmem:[#allocation29_spill] sm:$0xff] }
 0x58d   : > { %v7219_v33 = vunpack.c.l.b16 %v6963_v20  ;;  %v14845_v29 = vunpack.c.l.b16 %v6965_v23  ;;  %v6108_v14 = vrot.slane %v6094_v50, %v13939_v1  ;;  %v6109_v6 = vcombine.high %v6101_v58, %v6101_v58  ;;  %v15660_v20 = vld [vmem:[#allocation56_spill] sm:$0xff]  ;;  %v15661_v23 = vld [vmem:[#allocation26_spill] sm:$0xff] }
 0x58e   : > { %v9557_v13 = vrot.slane %v6101_v58, 9  ;;  %v14848_v18 = vunpack.c.l.b16 %v6964_v25  ;;  %v14850_v39 = vunpack.c.l.b16 %v6966_v32  ;;  %v5466_v9 = vmul.f32 %v14764_v31, %v14787_v61 }
 0x58f   : > { %v7434_v4 = vrot.slane %v7219_v33, 4  ;;  %v7438_v37 = vrot.slane %v14845_v29, 2  ;;  %v6110_v60 = vcombine.high %v6108_v14, %v6108_v14  ;;  %v9558_v21 = vrot.slane %v6109_v6, 9  ;;  %v10679_v29 = vld [vmem:[%s15345_s7 + $0xd0] sm:$0xff]  }
 0x590   : > { %v9559_v48 = vrot.slane %v6108_v14, 9  ;;  %v7436_v0 = vrot.slane %v14848_v18, 3  ;;  %v7440_v16 = vrot.slane %v14850_v39, 1  ;;  %v6825_v55 = vmax.f32 %v6101_v58, %v9557_v13 }
 0x591   : > { %v14856_v54 = vsel %vm7249_vm15, %v7434_v4, %v7433_v8  ;;  %v9560_v12 = vrot.slane %v6110_v60, 9  ;;  %v6826_v42 = vmax.f32 %v6109_v6, %v9558_v21  ;;  %v14861_v24 = vadd.f32 %v14774_v63, %v5466_v9 }
 0x592   : > { %v6827_v36 = vmax.f32 %v6108_v14, %v9559_v48  ;;  %v6955_v61 = vpack.c.bf16 %v6825_v55, %v6825_v55  ;;  %v5394_v57 = vadd.f32 %v15659_v2, %v15658_v49  ;;  %v5399_v50 = vadd.f32 %v15661_v23, %v15660_v20 }
 0x593   : > { %v15662_v8 = vrot.slane %v14591_v35, 3  ;;  %v6828_v32 = vmax.f32 %v6110_v60, %v9560_v12  ;;  %v6956_v58 = vpack.c.bf16 %v6826_v42, %v6826_v42  ;;  %v5600_v14 = vmax.f32 %v14861_v24, 0.0 }
 0x594   : > { %v6957_v33 = vpack.c.bf16 %v6827_v36, %v6827_v36  ;;  %v7211_v6 = vunpack.c.l.b16 %v6955_v61  ;;  %v5464_v13 = vmul.f32 %v14764_v31, %v5394_v57  ;;  %v5469_v4 = vmul.f32 %v14764_v31, %v5399_v50 }
 0x595   : > { %v7367_v25 = vsel %vm7252_vm0, %v15662_v8, %v14602_v22  ;;  %v15663_v9 = vrot.slane %v14585_v62, 2  ;;  %v6958_v48 = vpack.c.bf16 %v6828_v32, %v6828_v32  ;;  %v14877_v55 = vunpack.c.l.b16 %v6956_v58  ;;  %v15668_v32 = vld [vmem:[#allocation54_spill] sm:$0xff] }
 0x596   : > { %v14879_v35 = vunpack.c.l.b16 %v6957_v33  ;;  %v15664_v22 = vrot.slane %v14596_v43, 1  ;;  %v7420_v12 = vrot.slane %v7211_v6, 4  ;;  %v14885_v42 = vadd.f32 %v14774_v63, %v5464_v13  ;;  %v15669_v58 = vld [vmem:[#allocation62_spill] sm:$0xff]  ;;  %v15670_v6 = vld [vmem:[#allocation53_spill] sm:$0xff] }
 0x597   : > { %v7369_v21 = vsel %vm7255_vm1, %v15663_v9, %v7367_v25  ;;  %v5539_v36 = vadd.f32 %v14774_v63, %v5469_v4  ;;  %v15665_v62 = vrot.slane %v14571_v40, 3  ;;  %v14892_v61 = vunpack.c.l.b16 %v6958_v48  ;;  %v15672_v4 = vld [vmem:[#allocation60_spill] sm:$0xff] }
 0x598   : > { %v7371_v60 = vsel %vm7258_vm5, %v15664_v22, %v7369_v21  ;;  %v7422_v49 = vrot.slane %v14877_v55, 3  ;;  %v7424_v2 = vrot.slane %v14879_v35, 2  ;;  %v15666_v43 = vrot.slane %v14569_v52, 2  ;;  %v15671_v52 = vld [vmem:[#allocation22_spill] sm:$0xff] }
 0x599   : > { %v7381_v24 = vsel %vm7252_vm0, %v15665_v62, %v14579_v17  ;;  %v14900_v20 = vsel %vm7249_vm15, %v7420_v12, %v7419_v38  ;;  %v5598_v23 = vmax.f32 %v14885_v42, 0.0  ;;  %v5603_v50 = vmax.f32 %v5539_v36, 0.0 }
 0x59a   : > { %v7383_v57 = vsel %vm7255_vm1, %v15666_v43, %v7381_v24  ;;  %v15667_v40 = vrot.slane %v14573_v56, 1  ;;  %v7426_v8 = vrot.slane %v14892_v61, 1  ;;  %v5397_v33 = vadd.f32 %v15669_v58, %v15668_v32 }
 0x59b   : > { %v5400_v13 = vadd.f32 %v15671_v52, %v15670_v6  ;;  %v5635_v38 = vmax.f32 %v5599_v59, %v5603_v50  ;;  %v5398_v9 = vadd.f32 %v14553_v10, %v15672_v4  ;;  %v7395_v56 = vsel %vm7252_vm0, %v7394_v44, %v14723_v15  ;;  %v10678_v4 = vld [vmem:[%s15345_s7 + $0xd8] sm:$0xff]  }
 0x59c   : > { %v7385_v17 = vsel %vm7258_vm5, %v15667_v40, %v7383_v57  ;;  %v15673_v21 = vrot.slane %v14697_v34, 3  ;;  %v5467_v12 = vmul.f32 %v14764_v31, %v5397_v33  ;;  %v15674_v51 = vrot.slane %v14710_v41, 2 }
 0x59d   : > { %v7474_v25 = vpack.c.b16 %v7385_v17, %v7371_v60  ;;  %v5470_v7 = vmul.f32 %v14764_v31, %v5400_v13  ;;  %v6179_v59 = vcombine.high %v5635_v38, %v5635_v38  ;;  %v6186_v10 = vrot.slane %v5635_v38, %v13939_v1 }
 0x59e   : > { %v14923_v48 = vsel %vm7252_vm0, %v15673_v21, %v14706_v46  ;;  %v5468_v36 = vmul.f32 %v14764_v31, %v5398_v9  ;;  %v7397_v44 = vsel %vm7255_vm1, %v15674_v51, %v7395_v56  ;;  %v5537_v34 = vadd.f32 %v14774_v63, %v5467_v12 }
 0x59f   : > { %v7507_v22 = vshrl.u32 %v7474_v25, 16  ;;  %v7510_v60 = vshll.u32 %v7474_v25, 16  ;;  %v5540_v46 = vadd.f32 %v14774_v63, %v5470_v7  ;;  %v15675_v62 = vrot.slane %v14716_v45, 1  ;;  %v10677_v45 = vld [vmem:[%s15345_s7 + $0xe0] sm:$0xff]  }
 0x5a0   : > { %v6193_v43 = vrot.slane %v6179_v59, %v13939_v1  ;;  %v6194_v57 = vcombine.high %v6186_v10, %v6186_v10  ;;  %v9577_v50 = vrot.slane %v6186_v10, 9  ;;  %v14941_v31 = vadd.f32 %v14774_v63, %v5468_v36  ;;  %8307 = vmatpush1.bf16.msra.mxu0 %v10677_v45 }
 0x5a1   : > { %v7509_v15 = vrot.slane %v7507_v22, 7  ;;  %v14937_v24 = vsel %vm7258_vm5, %v15675_v62, %v7397_v44  ;;  %v5601_v17 = vmax.f32 %v5537_v34, 0.0  ;;  %v5604_v25 = vmax.f32 %v5540_v46, 0.0  ;;  %8308 = vmatprep.subr.bf16.mxu0 %v15657_v53 }
 0x5a2   : > { %v6195_v32 = vcombine.high %v6193_v43, %v6193_v43  ;;  %v9578_v58 = vrot.slane %v6194_v57, 9  ;;  %v9579_v33 = vrot.slane %v6193_v43, 9  ;;  %v6845_v6 = vmax.f32 %v6186_v10, %v9577_v50 }
 0x5a3   : > { %v7512_v41 = vor.u32 %v7510_v60, %v7509_v15  ;;  %v14945_v40 = vsel %vm11059_vm2, %v7509_v15, 0  ;;  %v5633_v13 = vmax.f32 %v5597_v27, %v5601_v17  ;;  %v5636_v38 = vmax.f32 %v5600_v14, %v5604_v25 }
 0x5a4   : > { %v7623_v63 = vshll.u32 %v14945_v40, 16  ;;  %v9580_v9 = vrot.slane %v6195_v32, 9  ;;  %v6846_v56 = vmax.f32 %v6194_v57, %v9578_v58  ;;  %v6847_v21 = vmax.f32 %v6193_v43, %v9579_v33  ;;  %8309 = vmatpush1.bf16.msra.mxu0 %v10678_v4 }
 0x5a5   : > { %v14952_v52 = vsel %vm11059_vm2, 0, %v7512_v41  ;;  %v6975_v22 = vpack.c.bf16 %v6845_v6, %v6845_v6  ;;  %v6145_v59 = vcombine.high %v5633_v13, %v5633_v13  ;;  %v6152_v51 = vrot.slane %v5633_v13, %v13939_v1  ;;  %8310 = vmatprep.subr.bf16.mxu0 %v15657_v53 }
 0x5a6   : > { %v7616_v60 = vshrl.u32 %v14952_v52, 16  ;;  %v7618_v12 = vshll.u32 %v14952_v52, 16  ;;  %v7625_v7 = vrot.slane %v7623_v63, 1  ;;  %v6848_v5 = vmax.f32 %v6195_v32, %v9580_v9 }
 0x5a7   : > { %v6976_v27 = vpack.c.bf16 %v6846_v56, %v6846_v56  ;;  %v6977_v14 = vpack.c.bf16 %v6847_v21, %v6847_v21  ;;  %v7231_v10 = vunpack.c.l.b16 %v6975_v22  ;;  %v6159_v44 = vrot.slane %v6145_v59, %v13939_v1 }
 0x5a8   : > { %v7620_v36 = vrot.slane %v7618_v12, 1  ;;  %v6196_v15 = vcombine.high %v5636_v38, %v5636_v38  ;;  %v6978_v34 = vpack.c.bf16 %v6848_v5, %v6848_v5  ;;  %v6203_v43 = vrot.slane %v5636_v38, %v13939_v1  ;;  %8311 = vmatpush1.bf16.msra.mxu0 %v10679_v29 }
 0x5a9   : > { %v7232_v46 = vunpack.c.l.b16 %v6976_v27  ;;  %v7233_v62 = vunpack.c.l.b16 %v6977_v14  ;;  %v6160_v50 = vcombine.high %v6152_v51, %v6152_v51  ;;  %v6161_v41 = vcombine.high %v6159_v44, %v6159_v44  ;;  %8312 = vmatprep.subr.bf16.mxu0 %v15657_v53 }
 0x5aa   : > { %v7621_v57 = vor.u32 %v7620_v36, %v7616_v60  ;;  %v9569_v17 = vrot.slane %v6152_v51, 9  ;;  %v7234_v25 = vunpack.c.l.b16 %v6978_v34  ;;  %v9571_v58 = vrot.slane %v6159_v44, 9 }
 0x5ab   : > { %v7456_v45 = vrot.slane %v7232_v46, 7  ;;  %v7458_v32 = vrot.slane %v7233_v62, 6  ;;  %v9570_v6 = vrot.slane %v6160_v50, 9  ;;  %v9572_v63 = vrot.slane %v6161_v41, 9 }
 0x5ac   : > { %v7626_v33 = vsel %vm982_vm3, %v7621_v57, %v7625_v7  ;;  %v6837_v13 = vmax.f32 %v6152_v51, %v9569_v17  ;;  %v7460_v9 = vrot.slane %v7234_v25, 5  ;;  %v6839_v38 = vmax.f32 %v6159_v44, %v9571_v58 }
 0x5ad   : > { %v7457_v4 = vsel %vm7240_vm12, %v7456_v45, %v7231_v10  ;;  %7673 = vrot.lane.b32.xlu1 %v7626_v33, %s10884_s20  ;;  %v6210_v56 = vrot.slane %v6196_v15, %v13939_v1  ;;  %v6838_v22 = vmax.f32 %v6160_v50, %v9570_v6  ;;  %v6840_v60 = vmax.f32 %v6161_v41, %v9572_v63 }
 0x5ae   : > { %v7459_v21 = vsel %vm7243_vm13, %v7458_v32, %v7457_v4  ;;  %v6967_v12 = vpack.c.bf16 %v6837_v13, %v6837_v13  ;;  %v6969_v59 = vpack.c.bf16 %v6839_v38, %v6839_v38  ;;  %v6211_v5 = vcombine.high %v6203_v43, %v6203_v43 }
 0x5af   : > { %v6212_v27 = vcombine.high %v6210_v56, %v6210_v56  ;;  %v9581_v7 = vrot.slane %v6203_v43, 9  ;;  %v6968_v14 = vpack.c.bf16 %v6838_v22, %v6838_v22  ;;  %v6970_v36 = vpack.c.bf16 %v6840_v60, %v6840_v60 }
 0x5b0   : > { %v7223_v51 = vunpack.c.l.b16 %v6967_v12  ;;  %v9583_v34 = vrot.slane %v6210_v56, 9  ;;  %v7225_v10 = vunpack.c.l.b16 %v6969_v59  ;;  %v9582_v46 = vrot.slane %v6211_v5, 9 }
 0x5b1   : > { %v9584_v62 = vrot.slane %v6212_v27, 9  ;;  %v6849_v57 = vmax.f32 %v6203_v43, %v9581_v7  ;;  %v7224_v44 = vunpack.c.l.b16 %v6968_v14  ;;  %v7226_v17 = vunpack.c.l.b16 %v6970_v36 }
 0x5b2   : > { %v6851_v15 = vmax.f32 %v6210_v56, %v9583_v34  ;;  %v7461_v25 = vsel %vm7246_vm14, %v7460_v9, %v7459_v21  ;;  %v7444_v50 = vrot.slane %v7225_v10, 6  ;;  %v6850_v41 = vmax.f32 %v6211_v5, %v9582_v46 }
 0x5b3   : > { %v6852_v45 = vmax.f32 %v6212_v27, %v9584_v62  ;;  %v6979_v32 = vpack.c.bf16 %v6849_v57, %v6849_v57  ;;  %v7442_v58 = vrot.slane %v7224_v44, 7  ;;  %v7446_v33 = vrot.slane %v7226_v17, 5 }
 0x5b4   : > { %v6981_v6 = vpack.c.bf16 %v6851_v15, %v6851_v15  ;;  %v5602_v63 = vmax.f32 %v14941_v31, 0.0  ;;  %v6980_v13 = vpack.c.bf16 %v6850_v41, %v6850_v41  ;;  %v15676_v43 = vrot.slane %v14699_v30, 2 }
 0x5b5   : > { %v6982_v4 = vpack.c.bf16 %v6852_v45, %v6852_v45  ;;  %v7235_v38 = vunpack.c.l.b16 %v6979_v32  ;;  %v7443_v56 = vsel %vm7240_vm12, %v7442_v58, %v7223_v51  ;;  %v15677_v60 = vrot.slane %v14701_v47, 1 }
 0x5b6   : > { %v7411_v22 = vsel %vm7255_vm1, %v15676_v43, %v14923_v48  ;;  %v7237_v9 = vunpack.c.l.b16 %v6981_v6  ;;  %v5634_v21 = vmax.f32 %v5598_v23, %v5602_v63  ;;  %v7445_v31 = vsel %vm7243_vm13, %v7444_v50, %v7443_v56  ;;  %v7666_v56 = vpop.permute.xlu1 %7665 }
 0x5b7   : > { %v7413_v12 = vsel %vm7258_vm5, %v15677_v60, %v7411_v22  ;;  %v7236_v59 = vunpack.c.l.b16 %v6980_v13  ;;  %v7238_v5 = vunpack.c.l.b16 %v6982_v4  ;;  %v7462_v27 = vrot.slane %v7235_v38, 4 }
 0x5b8   : > { %v7466_v7 = vrot.slane %v7237_v9, 2  ;;  %v6162_v14 = vcombine.high %v5634_v21, %v5634_v21  ;;  %v6169_v30 = vrot.slane %v5634_v21, %v13939_v1  ;;  %v7447_v48 = vsel %vm7246_vm14, %v7446_v33, %v7445_v31 }
 0x5b9   : > { %v7463_v36 = vsel %vm7249_vm15, %v7462_v27, %v7461_v25  ;;  %v7464_v51 = vrot.slane %v7236_v59, 3  ;;  %v7468_v42 = vrot.slane %v7238_v5, 1  ;;  %v7475_v23 = vpack.c.b16 %v7413_v12, %v14937_v24 }
 0x5ba   : > { %v6176_v47 = vrot.slane %v6162_v14, %v13939_v1  ;;  %v6177_v34 = vcombine.high %v6169_v30, %v6169_v30  ;;  %v9573_v10 = vrot.slane %v6169_v30, 9  ;;  %v7423_v46 = vsel %vm7252_vm0, %v7422_v49, %v14900_v20 }
 0x5bb   : > { %v7514_v62 = vshrl.u32 %v7475_v23, 16  ;;  %v7517_v57 = vshll.u32 %v7475_v23, 16  ;;  %v7425_v44 = vsel %vm7255_vm1, %v7424_v2, %v7423_v46  ;;  %v7437_v24 = vsel %vm7252_vm0, %v7436_v0, %v14856_v54  ;;  %v10681_v46 = vld [vmem:[%s15345_s7 + $0xc0] sm:$0xff]  }
 0x5bc   : > { %v6178_v17 = vcombine.high %v6176_v47, %v6176_v47  ;;  %v9574_v15 = vrot.slane %v6177_v34, 9  ;;  %v9575_v25 = vrot.slane %v6176_v47, 9  ;;  %v6841_v50 = vmax.f32 %v6169_v30, %v9573_v10 }
 0x5bd   : > { %v7516_v41 = vrot.slane %v7514_v62, 7  ;;  %v7427_v55 = vsel %vm7258_vm5, %v7426_v8, %v7425_v44  ;;  %v7439_v35 = vsel %vm7255_vm1, %v7438_v37, %v7437_v24  ;;  %v7465_v49 = vsel %vm7252_vm0, %v7464_v51, %v7463_v36  ;;  %v15678_v36 = vld [vmem:[#allocation43_spill] sm:$0xff] }
 0x5be   : > { %v9576_v2 = vrot.slane %v6178_v17, 9  ;;  %v6842_v20 = vmax.f32 %v6177_v34, %v9574_v15  ;;  %v6843_v18 = vmax.f32 %v6176_v47, %v9575_v25  ;;  %v6971_v45 = vpack.c.bf16 %v6841_v50, %v6841_v50  ;;  %v15679_v47 = vld [vmem:[#allocation24_spill] sm:$0xff]  ;;  %v7668_v25 = vpop.permute.xlu0 %7667 }
 0x5bf   : > { %v7519_v54 = vor.u32 %v7517_v57, %v7516_v41  ;;  %v15010_v0 = vsel %vm11059_vm2, %v7516_v41, 0  ;;  %v7441_v61 = vsel %vm7258_vm5, %v7440_v16, %v7439_v35  ;;  %v7467_v8 = vsel %vm7255_vm1, %v7466_v7, %v7465_v49  ;;  %v10680_v16 = vld [vmem:[%s15345_s7 + $0xc8] sm:$0xff]  }
 0x5c0   : > { %v6844_v37 = vmax.f32 %v6178_v17, %v9576_v2  ;;  %v6972_v32 = vpack.c.bf16 %v6842_v20, %v6842_v20  ;;  %v6973_v58 = vpack.c.bf16 %v6843_v18, %v6843_v18  ;;  %v7227_v33 = vunpack.c.l.b16 %v6971_v45  ;;  %8313 = vmatpush1.bf16.msra.mxu0 %v10680_v16  ;;  %v10683_v16 = vld [vmem:[%s15345_s7 + $0x110] sm:$0xff]  }
 0x5c1   : > { %v15021_v6 = vsel %vm11059_vm2, 0, %v7519_v54  ;;  %v7635_v63 = vshll.u32 %v15010_v0, 16  ;;  %v7476_v13 = vpack.c.b16 %v7441_v61, %v7427_v55  ;;  %v7469_v39 = vsel %vm7258_vm5, %v7468_v42, %v7467_v8  ;;  %8314 = vmatprep.subr.bf16.mxu0 %v15657_v53  ;;  %v10682_v8 = vld [vmem:[%s15345_s7 + $0x118] sm:$0xff]  }
 0x5c2   : > { %v6974_v4 = vpack.c.bf16 %v6844_v37, %v6844_v37  ;;  %v7228_v38 = vunpack.c.l.b16 %v6972_v32  ;;  %v7229_v43 = vunpack.c.l.b16 %v6973_v58  ;;  %v7448_v22 = vrot.slane %v7227_v33, 4 }
 0x5c3   : > { %v7628_v9 = vshrl.u32 %v15021_v6, 16  ;;  %v7630_v21 = vshll.u32 %v15021_v6, 16  ;;  %v7637_v60 = vrot.slane %v7635_v63, 1  ;;  %v7521_v12 = vshrl.u32 %v7476_v13, 16 }
 0x5c4   : > { %v7230_v31 = vunpack.c.l.b16 %v6974_v4  ;;  %v7449_v59 = vsel %vm7249_vm15, %v7448_v22, %v7447_v48  ;;  %v7450_v5 = vrot.slane %v7228_v38, 3  ;;  %v7452_v27 = vrot.slane %v7229_v43, 2  ;;  %v15680_v48 = vld [vmem:[#allocation31_spill] sm:$0xff]  ;;  %8315 = vmatpush1.bf16.msra.mxu0 %v10681_v46 }
 0x5c5   : > { %v7632_v7 = vrot.slane %v7630_v21, 1  ;;  %v7523_v14 = vrot.slane %v7521_v12, 7  ;;  %v7524_v30 = vshll.u32 %v7476_v13, 16  ;;  %v15034_v51 = vsel %vm4050_vm10, %v15678_v36, %v7666_v56  ;;  %8324 = vmatprep.subr.bf16.mxu0 %v15657_v53  ;;  %v15135_v36 = vpop.f32.mrf.mxu0 }
 0x5c6   : > { %v7454_v42 = vrot.slane %v7230_v31, 1  ;;  %v7451_v23 = vsel %vm7252_vm0, %v7450_v5, %v7449_v59  ;;  %7913 = vmatmul.mubr.bf16.gmra.mxu0 %v15034_v51  ;;  %8117 = vmatmul.mubr.bf16.gmra.mxu1 %v15034_v51  ;;  %v7701_v34 = vrot.slane %v15679_v47, 1  ;;  %v7702_v10 = vrot.slane %v15680_v48, 1  ;;  %v10685_v59 = vld [vmem:[%s15345_s7 + $0x100] sm:$0xff]  }
 0x5c7   : > { %v7633_v62 = vor.u32 %v7632_v7, %v7628_v9  ;;  %v7526_v57 = vor.u32 %v7524_v30, %v7523_v14  ;;  %v15046_v44 = vsel %vm11059_vm2, %v7523_v14, 0  ;;  %v7453_v24 = vsel %vm7255_vm1, %v7452_v27, %v7451_v23 }
 0x5c8   : > { %v7455_v17 = vsel %vm7258_vm5, %v7454_v42, %v7453_v24  ;;  %v15052_v15 = vsel %vm1425_vm4, %v7701_v34, %v7702_v10  ;;  %v7647_v49 = vshll.u32 %v15046_v44, 16  ;;  %v7704_v2 = vrot.slane %v14674_v3, 1  ;;  %8325 = vmatpush2.bf16.msra.mxu0 %v10682_v8 }
 0x5c9   : > { %v7638_v50 = vsel %vm982_vm3, %v7633_v62, %v7637_v60  ;;  %v15057_v41 = vsel %vm11059_vm2, 0, %v7526_v57  ;;  %v7477_v55 = vpack.c.b16 %v7469_v39, %v7455_v17  ;;  %9599 = vmatprep.mubr.msk.bf16.mxu0 %vm4050_vm10, %v15052_v15  ;;  %9645 = vmatprep.mubr.msk.bf16.mxu1 %vm4050_vm10, %v15052_v15  ;;  %v15069_v18 = vsel %vm4050_vm10, %v15679_v47, %v7668_v25 }
 0x5ca   : > { %7675 = vrot.lane.b32.xlu0 %v7638_v50, %s10884_s20  ;;  %v7642_v35 = vshll.u32 %v15057_v41, 16  ;;  %v7640_v45 = vshrl.u32 %v15057_v41, 16  ;;  %v7705_v61 = vrot.slane %v14669_v28, 1  ;;  %v7649_v58 = vrot.slane %v7647_v49, 1  ;;  %v7670_v39 = vpop.permute.xlu1 %7669  ;;  %8326 = vmatprep.subr.bf16.mxu0 %v15657_v53 }
 0x5cb   : > { %v7528_v20 = vshrl.u32 %v7477_v55, 16  ;;  %v7531_v37 = vshll.u32 %v7477_v55, 16  ;;  %v7707_v22 = vrot.slane %v14813_v19, 1  ;;  %v15105_v56 = vsel %vm4050_vm10, %v14674_v3, %v7670_v39  ;;  %v15681_v55 = vld [vmem:[#allocation55_spill] sm:$0xff] }
 0x5cc   : > { %v7644_v54 = vrot.slane %v7642_v35, 1  ;;  %v15080_v33 = vsel %vm1425_vm4, %v7704_v2, %v7705_v61  ;;  %v7708_v60 = vrot.slane %v14802_v11, 1  ;;  %8327 = vmatpush2.bf16.msra.mxu0 %v10683_v16  ;;  %v7710_v5 = vrot.slane %v14952_v52, 1  ;;  %v15683_v35 = vld [vmem:[#allocation45_spill] sm:$0xff] }
 0x5cd   : > { %v7530_v29 = vrot.slane %v7528_v20, 7  ;;  %8328 = vmatprep.subr.bf16.mxu0 %v15657_v53  ;;  %v7711_v7 = vrot.slane %v14945_v40, 1  ;;  %v7713_v47 = vrot.slane %v15021_v6, 1  ;;  %v7714_v34 = vrot.slane %v15010_v0, 1 }
 0x5ce   : > { %v7645_v32 = vor.u32 %v7644_v54, %v7640_v45  ;;  %7921 = vmatmul.mubr.bf16.gmra.mxu0 %v15069_v18  ;;  %8125 = vmatmul.mubr.bf16.gmra.mxu1 %v15069_v18  ;;  %v15116_v3 = vsel %vm1425_vm4, %v7707_v22, %v7708_v60  ;;  %v7716_v10 = vrot.slane %v15057_v41, 1  ;;  %v7717_v62 = vrot.slane %v15046_v44, 1 }
 0x5cf   : > { %v7533_v63 = vor.u32 %v7531_v37, %v7530_v29  ;;  %v15084_v13 = vsel %vm11059_vm2, %v7530_v29, 0  ;;  %9600 = vmatprep.mubr.msk.bf16.mxu0 %vm4050_vm10, %v15080_v33  ;;  %9646 = vmatprep.mubr.msk.bf16.mxu1 %vm4050_vm10, %v15080_v33  ;;  %v7712_v30 = vsel %vm1425_vm4, %v7710_v5, %v7711_v7  ;;  %v7715_v48 = vsel %vm1425_vm4, %v7713_v47, %v7714_v34 }
 0x5d0   : > { %v7650_v28 = vsel %vm982_vm3, %v7645_v32, %v7649_v58  ;;  %v7659_v43 = vshll.u32 %v15084_v13, 16  ;;  %8329 = vmatpush2.bf16.msra.mxu0 %v10684_v26  ;;  %v7720_v25 = vrot.slane %v15084_v13, 1 }
 0x5d1   : > { %7677 = vrot.lane.b32.xlu1 %v7650_v28, %s10884_s20  ;;  %v15097_v4 = vsel %vm11059_vm2, 0, %v7533_v63  ;;  %8330 = vmatprep.subr.bf16.mxu0 %v15657_v53  ;;  %v7908_v53 = vpop.f32.mrf.mxu0 }
 0x5d2   : > { %v7654_v38 = vshll.u32 %v15097_v4, 16  ;;  %v7652_v9 = vshrl.u32 %v15097_v4, 16  ;;  %v7661_v31 = vrot.slane %v7659_v43, 1  ;;  %v7719_v0 = vrot.slane %v15097_v4, 1 }
 0x5d3   : > { %v15137_v42 = vpop.f32.mrf.mxu0 }
 0x5d4   : > { %v7656_v21 = vrot.slane %v7654_v38, 1  ;;  %8331 = vmatpush2.bf16.msra.mxu0 %v10685_v59 }
 0x5d5   : > { %v7911_v23 = vpop.f32.mrf.mxu0 }
 0x5d6   : > { %v7657_v12 = vor.u32 %v7656_v21, %v7652_v9  ;;  %7929 = vmatmul.mubr.bf16.gmra.mxu0 %v15105_v56  ;;  %8133 = vmatmul.mubr.bf16.gmra.mxu1 %v15105_v56 }
 0x5d7   : > { %9601 = vmatprep.mubr.msk.bf16.mxu0 %vm4050_vm10, %v15116_v3  ;;  %9647 = vmatprep.mubr.msk.bf16.mxu1 %vm4050_vm10, %v15116_v3 }
 0x5d8   : > { %v7662_v11 = vsel %vm982_vm3, %v7657_v12, %v7661_v31 }
 0x5d9   : > { %7679 = vrot.lane.b32.xlu0 %v7662_v11, %s10884_s20  ;;  %s9768_s20 = sshll.u32 %s15685_s16, 4 }
 0x5da   : > { %s15270_s21 = scalar_lea.vmem %s15348_s10, %s9768_s20 }
 0x5f3   : > { %v7672_v27 = vpop.permute.xlu0 %7671 }
 0x5f4   : > { %v7735_v14 = vsel %vm4050_vm10, %v14813_v19, %v7672_v27 }
 0x5f5   : > { %7937 = vmatmul.mubr.bf16.gmra.mxu0 %v7735_v14  ;;  %8141 = vmatmul.mubr.bf16.gmra.mxu1 %v7735_v14 }
 0x5f6   : > { %9602 = vmatprep.mubr.msk.bf16.mxu0 %vm4050_vm10, %v7712_v30  ;;  %9648 = vmatprep.mubr.msk.bf16.mxu1 %vm4050_vm10, %v7712_v30 }
 0x61f   : > { %v7674_v40 = vpop.permute.xlu1 %7673 }
 0x620   : > { %v7738_v19 = vsel %vm4050_vm10, %v14952_v52, %v7674_v40  ;;  %v7718_v52 = vsel %vm1425_vm4, %v7716_v10, %v7717_v62 }
 0x621   : > { %7945 = vmatmul.mubr.bf16.gmra.mxu0 %v7738_v19  ;;  %8149 = vmatmul.mubr.bf16.gmra.mxu1 %v7738_v19 }
 0x622   : > { %9603 = vmatprep.mubr.msk.bf16.mxu0 %vm4050_vm10, %v7715_v48  ;;  %9649 = vmatprep.mubr.msk.bf16.mxu1 %vm4050_vm10, %v7715_v48 }
 0x63c   : > { %v7676_v46 = vpop.permute.xlu0 %7675 }
 0x63d   : > { %v7741_v57 = vsel %vm4050_vm10, %v15021_v6, %v7676_v46  ;;  %v7721_v6 = vsel %vm1425_vm4, %v7719_v0, %v7720_v25 }
 0x63e   : > { %7953 = vmatmul.mubr.bf16.gmra.mxu0 %v7741_v57  ;;  %8157 = vmatmul.mubr.bf16.gmra.mxu1 %v7741_v57 }
 0x63f   : > { %9604 = vmatprep.mubr.msk.bf16.mxu0 %vm4050_vm10, %v7718_v52  ;;  %9650 = vmatprep.mubr.msk.bf16.mxu1 %vm4050_vm10, %v7718_v52 }
 0x643   : > { %v7678_v24 = vpop.permute.xlu1 %7677 }
 0x644   : > { %v7744_v17 = vsel %vm4050_vm10, %v15057_v41, %v7678_v24  ;;  %v15682_v41 = vld [vmem:[#allocation21_spill] sm:$0xff] }
 0x646   : > { %7961 = vmatmul.mubr.bf16.gmra.mxu0 %v7744_v17  ;;  %8165 = vmatmul.mubr.bf16.gmra.mxu1 %v7744_v17 }
 0x647   : > { %9605 = vmatprep.mubr.msk.bf16.mxu0 %vm4050_vm10, %v7721_v6  ;;  %9651 = vmatprep.mubr.msk.bf16.mxu1 %vm4050_vm10, %v7721_v6 }
 0x64b   : > { %v7680_v44 = vpop.permute.xlu0 %7679 }
 0x64c   : > { %v7747_v50 = vsel %vm4050_vm10, %v15097_v4, %v7680_v44 }
 0x64e   : > { %7969 = vmatmul.mubr.bf16.gmra.mxu0 %v7747_v50  ;;  %8173 = vmatmul.mubr.bf16.gmra.mxu1 %v7747_v50 }
 0x64f   : > { %9606 = vmatprep.mubr.msk.bf16.mxu0 %vm4050_vm10, %v15681_v55  ;;  %9652 = vmatprep.mubr.msk.bf16.mxu1 %vm4050_vm10, %v15681_v55 }
 0x656   : > { %7975 = vmatmul.mubr.bf16.gmra.mxu0 %v15682_v41  ;;  %8181 = vmatmul.mubr.bf16.gmra.mxu1 %v15682_v41 }
 0x657   : > { %9689 = vmatprep.mubr.msk.bf16.mxu0 %vm4050_vm10, %v15681_v55 }
 0x65e   : > { %8333 = vmatmul.mubr.bf16.vlgmr.msra.gmra.mxu0 %v15682_v41 }
 0x65f   : > { %9690 = vmatprep.mubr.msk.bf16.mxu0 %vm4050_vm10, %v15683_v35 }
 0x666   : > { %8339 = vmatmul.mubr.bf16.gmra.mxu0 %v15034_v51 }
 0x667   : > { %9691 = vmatprep.mubr.msk.bf16.mxu0 %vm4050_vm10, %v15052_v15 }
 0x66e   : > { %8345 = vmatmul.mubr.bf16.gmra.mxu0 %v15069_v18 }
 0x66f   : > { %9692 = vmatprep.mubr.msk.bf16.mxu0 %vm4050_vm10, %v15080_v33 }
 0x676   : > { %8353 = vmatmul.mubr.bf16.gmra.mxu0 %v15105_v56 }
 0x677   : > { %9693 = vmatprep.mubr.msk.bf16.mxu0 %vm4050_vm10, %v15116_v3 }
 0x67e   : > { %8361 = vmatmul.mubr.bf16.gmra.mxu0 %v7735_v14 }
 0x67f   : > { %9694 = vmatprep.mubr.msk.bf16.mxu0 %vm4050_vm10, %v7712_v30 }
 0x686   : > { %8369 = vmatmul.mubr.bf16.gmra.mxu0 %v7738_v19  ;;  %v7914_v49 = vpop.f32.mrf.mxu0  ;;  %v15183_v2 = vpop.f32.mrf.mxu1 }
 0x687   : > { %9695 = vmatprep.mubr.msk.bf16.mxu0 %vm4050_vm10, %v7715_v48 }
 0x688   : > { %v7916_v51 = vpop.f32.mrf.mxu0  ;;  %v8120_v15 = vpop.f32.mrf.mxu1 }
 0x68a   : > { %v7917_v20 = vpop.f32.mrf.mxu0  ;;  %v15186_v18 = vpop.f32.mrf.mxu1 }
 0x68c   : > { %v7919_v45 = vpop.f32.mrf.mxu0  ;;  %v8123_v54 = vpop.f32.mrf.mxu1 }
 0x68e   : > { %8377 = vmatmul.mubr.bf16.gmra.mxu0 %v7741_v57  ;;  %v7922_v61 = vpop.f32.mrf.mxu0  ;;  %v8126_v8 = vpop.f32.mrf.mxu1 }
 0x68f   : > { %9696 = vmatprep.mubr.msk.bf16.mxu0 %vm4050_vm10, %v7718_v52  ;;  %v15189_v29 = vadd.f32 %v8126_v8, %v7914_v49 }
 0x690   : > { %v7924_v37 = vpop.f32.mrf.mxu0  ;;  %v8128_v32 = vpop.f32.mrf.mxu1 }
 0x692   : > { %v7925_v58 = vpop.f32.mrf.mxu0  ;;  %v8129_v33 = vpop.f32.mrf.mxu1 }
 0x693   : > { %v15191_v63 = vadd.f32 %v8129_v33, %v7917_v20 }
 0x694   : > { %v7927_v13 = vpop.f32.mrf.mxu0  ;;  %v8131_v28 = vpop.f32.mrf.mxu1 }
 0x696   : > { %8385 = vmatmul.mubr.bf16.gmra.mxu0 %v7744_v17  ;;  %v7930_v39 = vpop.f32.mrf.mxu0  ;;  %v8134_v16 = vpop.f32.mrf.mxu1 }
 0x697   : > { %9697 = vmatprep.mubr.msk.bf16.mxu0 %vm4050_vm10, %v7721_v6  ;;  %v15194_v4 = vadd.f32 %v8134_v16, %v7922_v61 }
 0x698   : > { %v7932_v38 = vpop.f32.mrf.mxu0  ;;  %v8136_v43 = vpop.f32.mrf.mxu1 }
 0x69a   : > { %v7933_v22 = vpop.f32.mrf.mxu0  ;;  %v8137_v56 = vpop.f32.mrf.mxu1 }
 0x69b   : > { %v15196_v9 = vadd.f32 %v8137_v56, %v7925_v58 }
 0x69c   : > { %v7935_v21 = vpop.f32.mrf.mxu0  ;;  %v8139_v60 = vpop.f32.mrf.mxu1 }
 0x69e   : > { %8393 = vmatmul.mubr.bf16.gmra.mxu0 %v7747_v50 }
 0x69f   : > { %9698 = vmatprep.mubr.msk.bf16.mxu0 %vm4050_vm10, %v15681_v55 }
 0x6a6   : > { %8401 = vmatmul.mubr.bf16.gmra.mxu0 %v15682_v41 }
 0x6b5   : > { %v7938_v26 = vpop.f32.mrf.mxu0  ;;  %v8142_v12 = vpop.f32.mrf.mxu1 }
 0x6b6   : > { %v15201_v31 = vadd.f32 %v8142_v12, %v7930_v39 }
 0x6b7   : > { %v7940_v3 = vpop.f32.mrf.mxu0  ;;  %v8144_v11 = vpop.f32.mrf.mxu1 }
 0x6b9   : > { %v7941_v59 = vpop.f32.mrf.mxu0  ;;  %v8145_v5 = vpop.f32.mrf.mxu1 }
 0x6ba   : > { %v15203_v27 = vadd.f32 %v8145_v5, %v7933_v22 }
 0x6bb   : > { %v7943_v7 = vpop.f32.mrf.mxu0  ;;  %v8147_v14 = vpop.f32.mrf.mxu1 }
 0x6e1   : > { %v7946_v30 = vpop.f32.mrf.mxu0  ;;  %v8150_v53 = vpop.f32.mrf.mxu1 }
 0x6e2   : > { %v15205_v23 = vadd.f32 %v8150_v53, %v7938_v26 }
 0x6e3   : > { %v7948_v47 = vpop.f32.mrf.mxu0  ;;  %v8152_v40 = vpop.f32.mrf.mxu1 }
 0x6e5   : > { %v7949_v34 = vpop.f32.mrf.mxu0  ;;  %v8153_v19 = vpop.f32.mrf.mxu1 }
 0x6e6   : > { %v15207_v48 = vadd.f32 %v8153_v19, %v7941_v59 }
 0x6e7   : > { %v7951_v10 = vpop.f32.mrf.mxu0  ;;  %v8155_v46 = vpop.f32.mrf.mxu1 }
 0x6e8   : > { %v15223_v46 = vld [vmem:[#allocation9] ss:$0 sm:$0xff] }
 0x6fe   : > { %v7954_v62 = vpop.f32.mrf.mxu0  ;;  %v8158_v57 = vpop.f32.mrf.mxu1 }
 0x6ff   : > { %v15209_v52 = vadd.f32 %v8158_v57, %v7946_v30  ;;  %v8188_v57 = vadd.f32 %v15186_v18, %v15137_v42 }
 0x700   : > { %v7956_v0 = vpop.f32.mrf.mxu0  ;;  %v8160_v24 = vpop.f32.mrf.mxu1 }
 0x702   : > { %v7957_v17 = vpop.f32.mrf.mxu0  ;;  %v8161_v25 = vpop.f32.mrf.mxu1 }
 0x703   : > { %v15211_v6 = vadd.f32 %v8161_v25, %v7949_v34  ;;  %v8187_v34 = vadd.f32 %v15183_v2, %v15135_v36  ;;  %v15228_v25 = vld [vmem:[#allocation10] ss:$0 sm:$0xff] }
 0x704   : > { %v7959_v44 = vpop.f32.mrf.mxu0  ;;  %v8163_v50 = vpop.f32.mrf.mxu1 }
 0x706   : > { %v7962_v55 = vpop.f32.mrf.mxu0  ;;  %v8166_v41 = vpop.f32.mrf.mxu1 }
 0x707   : > { %v15213_v35 = vadd.f32 %v8166_v41, %v7954_v62 }
 0x708   : > { %v7964_v49 = vpop.f32.mrf.mxu0  ;;  %v8168_v51 = vpop.f32.mrf.mxu1 }
 0x70a   : > { %v7965_v15 = vpop.f32.mrf.mxu0  ;;  %v8169_v20 = vpop.f32.mrf.mxu1 }
 0x70b   : > { %v15215_v45 = vadd.f32 %v8169_v20, %v7957_v17 }
 0x70c   : > { %v7967_v54 = vpop.f32.mrf.mxu0  ;;  %v8171_v61 = vpop.f32.mrf.mxu1 }
 0x70e   : > { %v7970_v8 = vpop.f32.mrf.mxu0  ;;  %v8174_v37 = vpop.f32.mrf.mxu1 }
 0x70f   : > { %v15217_v32 = vadd.f32 %v8174_v37, %v7962_v55 }
 0x710   : > { %v7971_v58 = vpop.f32.mrf.mxu0  ;;  %v8176_v33 = vpop.f32.mrf.mxu1 }
 0x712   : > { %v7972_v13 = vpop.f32.mrf.mxu0  ;;  %v8177_v28 = vpop.f32.mrf.mxu1 }
 0x713   : > { %v15219_v39 = vadd.f32 %v8177_v28, %v7965_v15 }
 0x714   : > { %v7973_v16 = vpop.f32.mrf.mxu0  ;;  %v8179_v38 = vpop.f32.mrf.mxu1 }
 0x716   : > { %v7976_v43 = vpop.f32.mrf.mxu0  ;;  %v8182_v22 = vpop.f32.mrf.mxu1 }
 0x718   : > { %v7977_v56 = vpop.f32.mrf.mxu0  ;;  %v8183_v21 = vpop.f32.mrf.mxu1 }
 0x71a   : > { %v7978_v60 = vpop.f32.mrf.mxu0  ;;  %v8184_v26 = vpop.f32.mrf.mxu1 }
 0x71c   : > { %v7979_v12 = vpop.f32.mrf.mxu0  ;;  %v8185_v3 = vpop.f32.mrf.mxu1 }
 0x71e   : > { %v8334_v11 = vpop.f32.mrf.mxu0 }
 0x720   : > { %v8335_v59 = vpop.f32.mrf.mxu0 }
 0x722   : > { %v8336_v5 = vpop.f32.mrf.mxu0 }
 0x724   : > { %v8337_v7 = vpop.f32.mrf.mxu0 }
 0x726   : > { %v8340_v14 = vpop.f32.mrf.mxu0 }
 0x728   : > { %v8341_v30 = vpop.f32.mrf.mxu0 }
 0x72a   : > { %v8342_v53 = vpop.f32.mrf.mxu0 }
 0x72c   : > { %v8343_v47 = vpop.f32.mrf.mxu0 }
 0x72e   : > { %v8346_v40 = vpop.f32.mrf.mxu0 }
 0x72f   : > { %v8409_v10 = vadd.f32 %v8346_v40, %v8187_v34 }
 0x730   : > { %v8348_v19 = vpop.f32.mrf.mxu0 }
 0x731   : > { %v8431_v24 = vmul.f32 %v15223_v46, %v8409_v10 }
 0x732   : > { %v8349_v62 = vpop.f32.mrf.mxu0 }
 0x733   : > { %v8410_v17 = vadd.f32 %v8349_v62, %v8188_v57  ;;  %v8453_v36 = vadd.f32 %v15228_v25, %v8431_v24 }
 0x734   : > { %v8351_v0 = vpop.f32.mrf.mxu0 }
 0x735   : > { %v8432_v2 = vmul.f32 %v15223_v46, %v8410_v17  ;;  %v8469_v15 = vmax.f32 %v8453_v36, 0.0 }
 0x736   : > { %v8354_v44 = vpop.f32.mrf.mxu0 }
 0x737   : > { %v8411_v50 = vadd.f32 %v8354_v44, %v15189_v29  ;;  %v8454_v20 = vadd.f32 %v15228_v25, %v8432_v2 }
 0x738   : > { %v8356_v55 = vpop.f32.mrf.mxu0 }
 0x739   : > { %v8433_v41 = vmul.f32 %v15223_v46, %v8411_v50  ;;  %v8470_v13 = vmax.f32 %v8454_v20, 0.0 }
 0x73a   : > { %v8357_v49 = vpop.f32.mrf.mxu0 }
 0x73b   : > { %v8455_v51 = vadd.f32 %v15228_v25, %v8433_v41  ;;  %v8412_v42 = vadd.f32 %v8357_v49, %v15191_v63 }
 0x73c   : > { %v8359_v18 = vpop.f32.mrf.mxu0 }
 0x73d   : > { %v8471_v54 = vmax.f32 %v8455_v51, 0.0  ;;  %v8434_v61 = vmul.f32 %v15223_v46, %v8412_v42 }
 0x73e   : > { %v8362_v29 = vpop.f32.mrf.mxu0 }
 0x73f   : > { %v8485_v8 = vmax.f32 %v8469_v15, %v8471_v54  ;;  %v8456_v37 = vadd.f32 %v15228_v25, %v8434_v61  ;;  %v8413_v58 = vadd.f32 %v8362_v29, %v15194_v4 }
 0x740   : > { %v8364_v33 = vpop.f32.mrf.mxu0 }
 0x741   : > { %v8501_v28 = vcombine.high %v8485_v8, %v8485_v8  ;;  %v8508_v16 = vrot.slane %v8485_v8, %v13939_v1  ;;  %v8472_v38 = vmax.f32 %v8456_v37, 0.0  ;;  %v8435_v60 = vmul.f32 %v15223_v46, %v8413_v58 }
 0x742   : > { %v8365_v63 = vpop.f32.mrf.mxu0 }
 0x743   : > { %v8515_v43 = vrot.slane %v8501_v28, %v13939_v1  ;;  %v8516_v22 = vcombine.high %v8508_v16, %v8508_v16  ;;  %v9701_v56 = vrot.slane %v8508_v16, 9  ;;  %v8486_v21 = vmax.f32 %v8470_v13, %v8472_v38 }
 0x744   : > { %v8414_v26 = vadd.f32 %v8365_v63, %v15196_v9  ;;  %v8367_v12 = vpop.f32.mrf.mxu0  ;;  %v8457_v9 = vadd.f32 %v15228_v25, %v8435_v60 }
 0x745   : > { %v8517_v3 = vcombine.high %v8515_v43, %v8515_v43  ;;  %v9702_v11 = vrot.slane %v8516_v22, 9  ;;  %v9703_v4 = vrot.slane %v8515_v43, 9  ;;  %v8765_v59 = vmax.f32 %v8508_v16, %v9701_v56 }
 0x746   : > { %v8518_v5 = vcombine.high %v8486_v21, %v8486_v21  ;;  %v8525_v7 = vrot.slane %v8486_v21, %v13939_v1  ;;  %v8436_v14 = vmul.f32 %v15223_v46, %v8414_v26  ;;  %v8370_v30 = vpop.f32.mrf.mxu0 }
 0x747   : > { %v9704_v53 = vrot.slane %v8517_v3, 9  ;;  %v8766_v47 = vmax.f32 %v8516_v22, %v9702_v11  ;;  %v8767_v40 = vmax.f32 %v8515_v43, %v9703_v4  ;;  %v9769_v34 = vpack.c.bf16 %v8765_v59, %v8765_v59 }
 0x748   : > { %v8532_v19 = vrot.slane %v8518_v5, %v13939_v1  ;;  %v8533_v10 = vcombine.high %v8525_v7, %v8525_v7  ;;  %v9705_v62 = vrot.slane %v8525_v7, 9  ;;  %v8372_v57 = vpop.f32.mrf.mxu0  ;;  %v15249_v44 = vadd.f32 %v15228_v25, %v8436_v14 }
 0x749   : > { %v8768_v0 = vmax.f32 %v8517_v3, %v9704_v53  ;;  %v9770_v24 = vpack.c.bf16 %v8766_v47, %v8766_v47  ;;  %v9771_v17 = vpack.c.bf16 %v8767_v40, %v8767_v40  ;;  %v8925_v51 = vunpack.c.l.b16 %v9769_v34 }
 0x74a   : > { %v8534_v50 = vcombine.high %v8532_v19, %v8532_v19  ;;  %v9706_v55 = vrot.slane %v8533_v10, 9  ;;  %v9707_v36 = vrot.slane %v8532_v19, 9  ;;  %v8769_v2 = vmax.f32 %v8525_v7, %v9705_v62  ;;  %v8373_v41 = vpop.f32.mrf.mxu0 }
 0x74b   : > { %v9772_v49 = vpack.c.bf16 %v8768_v0, %v8768_v0  ;;  %v8926_v42 = vunpack.c.l.b16 %v9770_v24  ;;  %v8927_v18 = vunpack.c.l.b16 %v9771_v17  ;;  %v8415_v33 = vadd.f32 %v8370_v30, %v15201_v31 }
 0x74c   : > { %v9708_v15 = vrot.slane %v8534_v50, 9  ;;  %v8770_v20 = vmax.f32 %v8533_v10, %v9706_v55  ;;  %v8771_v54 = vmax.f32 %v8532_v19, %v9707_v36  ;;  %v9773_v61 = vpack.c.bf16 %v8769_v2, %v8769_v2  ;;  %v8375_v29 = vpop.f32.mrf.mxu0 }
 0x74d   : > { %v8928_v8 = vunpack.c.l.b16 %v9772_v49  ;;  %v8957_v37 = vrot.slane %v8926_v42, 7  ;;  %v8959_v58 = vrot.slane %v8927_v18, 6  ;;  %v8437_v56 = vmul.f32 %v15223_v46, %v8415_v33 }
 0x74e   : > { %v8772_v13 = vmax.f32 %v8534_v50, %v9708_v15  ;;  %v9774_v28 = vpack.c.bf16 %v8770_v20, %v8770_v20  ;;  %v9775_v16 = vpack.c.bf16 %v8771_v54, %v8771_v54  ;;  %v8929_v38 = vunpack.c.l.b16 %v9773_v61  ;;  %v8378_v63 = vpop.f32.mrf.mxu0 }
 0x74f   : > { %v8958_v43 = vsel %vm7240_vm12, %v8957_v37, %v8925_v51  ;;  %v8961_v22 = vrot.slane %v8928_v8, 5  ;;  %v8416_v21 = vadd.f32 %v8373_v41, %v15203_v27  ;;  %v8459_v59 = vadd.f32 %v15228_v25, %v8437_v56 }
 0x750   : > { %v8960_v60 = vsel %vm7243_vm13, %v8959_v58, %v8958_v43  ;;  %v9776_v26 = vpack.c.bf16 %v8772_v13, %v8772_v13  ;;  %v8930_v12 = vunpack.c.l.b16 %v9774_v28  ;;  %v8931_v3 = vunpack.c.l.b16 %v9775_v16  ;;  %v8380_v11 = vpop.f32.mrf.mxu0 }
 0x751   : > { %v8962_v31 = vsel %vm7246_vm14, %v8961_v22, %v8960_v60  ;;  %v8963_v4 = vrot.slane %v8929_v38, 4  ;;  %v8438_v5 = vmul.f32 %v15223_v46, %v8416_v21  ;;  %v8417_v53 = vadd.f32 %v8378_v63, %v15205_v23 }
 0x752   : > { %v8932_v7 = vunpack.c.l.b16 %v9776_v26  ;;  %v8965_v14 = vrot.slane %v8930_v12, 3  ;;  %v8967_v30 = vrot.slane %v8931_v3, 2  ;;  %v8381_v47 = vpop.f32.mrf.mxu0  ;;  %v8473_v40 = vmax.f32 %v8457_v9, 0.0 }
 0x753   : > { %v8964_v27 = vsel %vm7249_vm15, %v8963_v4, %v8962_v31  ;;  %v8475_v34 = vmax.f32 %v8459_v59, 0.0  ;;  %v8460_v19 = vadd.f32 %v15228_v25, %v8438_v5  ;;  %v8439_v57 = vmul.f32 %v15223_v46, %v8417_v53 }
 0x754   : > { %v8966_v10 = vsel %vm7252_vm0, %v8965_v14, %v8964_v27  ;;  %v8969_v62 = vrot.slane %v8932_v7, 1  ;;  %v8383_v0 = vpop.f32.mrf.mxu0  ;;  %v8474_v17 = vmax.f32 %v15249_v44, 0.0  ;;  %v8418_v36 = vadd.f32 %v8381_v47, %v15207_v48 }
 0x755   : > { %v8968_v24 = vsel %vm7255_vm1, %v8967_v30, %v8966_v10  ;;  %v8487_v50 = vmax.f32 %v8473_v40, %v8475_v34  ;;  %v8476_v23 = vmax.f32 %v8460_v19, 0.0  ;;  %v8461_v55 = vadd.f32 %v15228_v25, %v8439_v57 }
 0x756   : > { %v8970_v9 = vsel %vm7258_vm5, %v8969_v62, %v8968_v24  ;;  %v8386_v2 = vpop.f32.mrf.mxu0  ;;  %v15281_v48 = vmul.f32 %v15223_v46, %v8418_v36 }
 0x757   : > { %v9013_v41 = vpack.c.b16 %v8970_v9, %v8970_v9  ;;  %v8535_v49 = vcombine.high %v8487_v50, %v8487_v50  ;;  %v8542_v51 = vrot.slane %v8487_v50, %v13939_v1  ;;  %v8488_v44 = vmax.f32 %v8474_v17, %v8476_v23 }
 0x758   : > { %v8419_v42 = vadd.f32 %v8386_v2, %v15209_v52  ;;  %v8388_v18 = vpop.f32.mrf.mxu0  ;;  %v8477_v8 = vmax.f32 %v8461_v55, 0.0 }
 0x759   : > { %9021 = vst [vmem:[%s15270_s21] sm:$0xf] %v9013_v41  ;;  %v8549_v15 = vrot.slane %v8535_v49, %v13939_v1  ;;  %v8550_v20 = vcombine.high %v8542_v51, %v8542_v51  ;;  %v9709_v54 = vrot.slane %v8542_v51, 9  ;;  %v8552_v61 = vcombine.high %v8488_v44, %v8488_v44 }
 0x75a   : > { %v8559_v29 = vrot.slane %v8488_v44, %v13939_v1  ;;  %v8441_v37 = vmul.f32 %v15223_v46, %v8419_v42  ;;  %v8389_v58 = vpop.f32.mrf.mxu0 }
 0x75b   : > { %v8551_v33 = vcombine.high %v8549_v15, %v8549_v15  ;;  %v9710_v13 = vrot.slane %v8550_v20, 9  ;;  %v9711_v28 = vrot.slane %v8549_v15, 9  ;;  %v8773_v52 = vmax.f32 %v8542_v51, %v9709_v54 }
 0x75c   : > { %v8566_v16 = vrot.slane %v8552_v61, %v13939_v1  ;;  %v8567_v38 = vcombine.high %v8559_v29, %v8559_v29  ;;  %v9713_v63 = vrot.slane %v8559_v29, 9  ;;  %v8463_v43 = vadd.f32 %v15228_v25, %v8441_v37  ;;  %v8391_v22 = vpop.f32.mrf.mxu0 }
 0x75d   : > { %v9712_v56 = vrot.slane %v8551_v33, 9  ;;  %v8774_v21 = vmax.f32 %v8550_v20, %v9710_v13  ;;  %v8775_v60 = vmax.f32 %v8549_v15, %v9711_v28  ;;  %v9777_v26 = vpack.c.bf16 %v8773_v52, %v8773_v52 }
 0x75e   : > { %v8568_v12 = vcombine.high %v8566_v16, %v8566_v16  ;;  %v9714_v3 = vrot.slane %v8567_v38, 9  ;;  %v9715_v11 = vrot.slane %v8566_v16, 9  ;;  %v8777_v31 = vmax.f32 %v8559_v29, %v9713_v63  ;;  %v8394_v4 = vpop.f32.mrf.mxu0 }
 0x75f   : > { %v8776_v59 = vmax.f32 %v8551_v33, %v9712_v56  ;;  %v9778_v5 = vpack.c.bf16 %v8774_v21, %v8774_v21  ;;  %v9779_v7 = vpack.c.bf16 %v8775_v60, %v8775_v60  ;;  %v8933_v14 = vunpack.c.l.b16 %v9777_v26 }
 0x760   : > { %v9716_v30 = vrot.slane %v8568_v12, 9  ;;  %v8778_v53 = vmax.f32 %v8567_v38, %v9714_v3  ;;  %v8779_v47 = vmax.f32 %v8566_v16, %v9715_v11  ;;  %v9781_v27 = vpack.c.bf16 %v8777_v31, %v8777_v31  ;;  %v8396_v40 = vpop.f32.mrf.mxu0 }
 0x761   : > { %v9780_v34 = vpack.c.bf16 %v8776_v59, %v8776_v59  ;;  %v8934_v19 = vunpack.c.l.b16 %v9778_v5  ;;  %v8935_v10 = vunpack.c.l.b16 %v9779_v7  ;;  %v8479_v62 = vmax.f32 %v8463_v43, 0.0 }
 0x762   : > { %v8780_v57 = vmax.f32 %v8568_v12, %v9716_v30  ;;  %v9782_v0 = vpack.c.bf16 %v8778_v53, %v8778_v53  ;;  %v9783_v24 = vpack.c.bf16 %v8779_v47, %v8779_v47  ;;  %v8937_v17 = vunpack.c.l.b16 %v9781_v27  ;;  %v8397_v50 = vpop.f32.mrf.mxu0 }
 0x763   : > { %v8936_v23 = vunpack.c.l.b16 %v9780_v34  ;;  %v8971_v9 = vrot.slane %v8934_v19, 7  ;;  %v8973_v55 = vrot.slane %v8935_v10, 6  ;;  %v8489_v36 = vmax.f32 %v8477_v8, %v8479_v62 }
 0x764   : > { %v9784_v2 = vpack.c.bf16 %v8780_v57, %v8780_v57  ;;  %v8938_v41 = vunpack.c.l.b16 %v9782_v0  ;;  %v8939_v49 = vunpack.c.l.b16 %v9783_v24  ;;  %v8977_v51 = vrot.slane %v8937_v17, 4  ;;  %v8399_v44 = vpop.f32.mrf.mxu0 }
 0x765   : > { %v8972_v42 = vsel %vm7240_vm12, %v8971_v9, %v8933_v14  ;;  %v8975_v18 = vrot.slane %v8936_v23, 5  ;;  %v8569_v15 = vcombine.high %v8489_v36, %v8489_v36  ;;  %v8576_v20 = vrot.slane %v8489_v36, %v13939_v1 }
 0x766   : > { %v8974_v54 = vsel %vm7243_vm13, %v8973_v55, %v8972_v42  ;;  %v8940_v61 = vunpack.c.l.b16 %v9784_v2  ;;  %v8979_v29 = vrot.slane %v8938_v41, 3  ;;  %v8981_v37 = vrot.slane %v8939_v49, 2  ;;  %v8402_v33 = vpop.f32.mrf.mxu0 }
 0x767   : > { %v8976_v13 = vsel %vm7246_vm14, %v8975_v18, %v8974_v54  ;;  %v8583_v8 = vrot.slane %v8569_v15, %v13939_v1  ;;  %v8584_v28 = vcombine.high %v8576_v20, %v8576_v20  ;;  %v9717_v52 = vrot.slane %v8576_v20, 9 }
 0x768   : > { %v8978_v16 = vsel %vm7249_vm15, %v8977_v51, %v8976_v13  ;;  %v8983_v38 = vrot.slane %v8940_v61, 1  ;;  %v8420_v63 = vadd.f32 %v8389_v58, %v15211_v6  ;;  %v8421_v43 = vadd.f32 %v8394_v4, %v15213_v35  ;;  %v8404_v22 = vpop.f32.mrf.mxu0 }
 0x769   : > { %v8980_v56 = vsel %vm7252_vm0, %v8979_v29, %v8978_v16  ;;  %v8585_v21 = vcombine.high %v8583_v8, %v8583_v8  ;;  %v9718_v60 = vrot.slane %v8584_v28, 9  ;;  %v9719_v26 = vrot.slane %v8583_v8, 9 }
 0x76a   : > { %v8982_v12 = vsel %vm7255_vm1, %v8981_v37, %v8980_v56  ;;  %v8462_v3 = vadd.f32 %v15228_v25, %v15281_v48  ;;  %v8781_v11 = vmax.f32 %v8576_v20, %v9717_v52  ;;  %v8442_v31 = vmul.f32 %v15223_v46, %v8420_v63  ;;  %v8405_v59 = vpop.f32.mrf.mxu0 }
 0x76b   : > { %v8984_v6 = vsel %vm7258_vm5, %v8983_v38, %v8982_v12  ;;  %v9720_v58 = vrot.slane %v8585_v21, 9  ;;  %v8782_v35 = vmax.f32 %v8584_v28, %v9718_v60  ;;  %v8783_v4 = vmax.f32 %v8583_v8, %v9719_v26 }
 0x76c   : > { %v9014_v5 = vpack.c.b16 %v8984_v6, %v8984_v6  ;;  %v9785_v7 = vpack.c.bf16 %v8781_v11, %v8781_v11  ;;  %v8464_v14 = vadd.f32 %v15228_v25, %v8442_v31  ;;  %v8443_v30 = vmul.f32 %v15223_v46, %v8421_v43  ;;  %v8407_v53 = vpop.f32.mrf.mxu0 }
 0x76d   : > { %v8784_v47 = vmax.f32 %v8585_v21, %v9720_v58  ;;  %v9786_v27 = vpack.c.bf16 %v8782_v35, %v8782_v35  ;;  %v9787_v48 = vpack.c.bf16 %v8783_v4, %v8783_v4  ;;  %v8422_v40 = vadd.f32 %v8397_v50, %v15215_v45 }
 0x76e   : > { %9022 = vst [vmem:[%s15270_s21 + $0x4] sm:$0xf] %v9014_v5  ;;  %v8478_v34 = vmax.f32 %v8462_v3, 0.0  ;;  %v8480_v19 = vmax.f32 %v8464_v14, 0.0  ;;  %v8423_v10 = vadd.f32 %v8402_v33, %v15217_v32  ;;  %v8465_v23 = vadd.f32 %v15228_v25, %v8443_v30 }
 0x76f   : > { %v9788_v62 = vpack.c.bf16 %v8784_v47, %v8784_v47  ;;  %v8942_v57 = vunpack.c.l.b16 %v9786_v27  ;;  %v8943_v0 = vunpack.c.l.b16 %v9787_v48  ;;  %v8444_v24 = vmul.f32 %v15223_v46, %v8422_v40 }
 0x770   : > { %v8490_v17 = vmax.f32 %v8478_v34, %v8480_v19  ;;  %v8445_v9 = vmul.f32 %v15223_v46, %v8423_v10  ;;  %v8424_v55 = vadd.f32 %v8405_v59, %v15219_v39  ;;  %v8941_v36 = vunpack.c.l.b16 %v9785_v7 }
 0x771   : > { %v8944_v2 = vunpack.c.l.b16 %v9788_v62  ;;  %v8985_v45 = vrot.slane %v8942_v57, 7  ;;  %v8987_v50 = vrot.slane %v8943_v0, 6  ;;  %v8466_v42 = vadd.f32 %v15228_v25, %v8444_v24 }
 0x772   : > { %v8586_v41 = vcombine.high %v8490_v17, %v8490_v17  ;;  %v8593_v49 = vrot.slane %v8490_v17, %v13939_v1  ;;  %v8467_v32 = vadd.f32 %v15228_v25, %v8445_v9  ;;  %v8446_v51 = vmul.f32 %v15223_v46, %v8424_v55 }
 0x773   : > { %v8986_v44 = vsel %vm7240_vm12, %v8985_v45, %v8941_v36  ;;  %v8481_v39 = vmax.f32 %v8465_v23, 0.0  ;;  %v8989_v61 = vrot.slane %v8944_v2, 5  ;;  %v8482_v46 = vmax.f32 %v8466_v42, 0.0 }
 0x774   : > { %v8600_v18 = vrot.slane %v8586_v41, %v13939_v1  ;;  %v8601_v15 = vcombine.high %v8593_v49, %v8593_v49  ;;  %v9721_v20 = vrot.slane %v8593_v49, 9  ;;  %v8988_v54 = vsel %vm7243_vm13, %v8987_v50, %v8986_v44 }
 0x775   : > { %v8483_v29 = vmax.f32 %v8467_v32, 0.0  ;;  %v8468_v37 = vadd.f32 %v15228_v25, %v8446_v51  ;;  %v8990_v56 = vsel %vm7246_vm14, %v8989_v61, %v8988_v54 }
 0x776   : > { %v8602_v33 = vcombine.high %v8600_v18, %v8600_v18  ;;  %v9722_v13 = vrot.slane %v8601_v15, 9  ;;  %v9723_v8 = vrot.slane %v8600_v18, 9  ;;  %v8785_v28 = vmax.f32 %v8593_v49, %v9721_v20 }
 0x777   : > { %v8491_v52 = vmax.f32 %v8481_v39, %v8483_v29  ;;  %v8484_v16 = vmax.f32 %v8468_v37, 0.0 }
 0x778   : > { %v9724_v38 = vrot.slane %v8602_v33, 9  ;;  %v8786_v63 = vmax.f32 %v8601_v15, %v9722_v13  ;;  %v8787_v43 = vmax.f32 %v8600_v18, %v9723_v8  ;;  %v9789_v22 = vpack.c.bf16 %v8785_v28, %v8785_v28 }
 0x779   : > { %v8603_v21 = vcombine.high %v8491_v52, %v8491_v52  ;;  %v8610_v60 = vrot.slane %v8491_v52, %v13939_v1  ;;  %v8492_v26 = vmax.f32 %v8482_v46, %v8484_v16 }
 0x77a   : > { %v8788_v12 = vmax.f32 %v8602_v33, %v9724_v38  ;;  %v9790_v3 = vpack.c.bf16 %v8786_v63, %v8786_v63  ;;  %v9791_v25 = vpack.c.bf16 %v8787_v43, %v8787_v43  ;;  %v8945_v11 = vunpack.c.l.b16 %v9789_v22 }
 0x77b   : > { %v8617_v31 = vrot.slane %v8603_v21, %v13939_v1  ;;  %v8618_v59 = vcombine.high %v8610_v60, %v8610_v60  ;;  %v9725_v6 = vrot.slane %v8610_v60, 9  ;;  %v8620_v58 = vcombine.high %v8492_v26, %v8492_v26 }
 0x77c   : > { %v9792_v35 = vpack.c.bf16 %v8788_v12, %v8788_v12  ;;  %v8946_v4 = vunpack.c.l.b16 %v9790_v3  ;;  %v8947_v5 = vunpack.c.l.b16 %v9791_v25  ;;  %v8991_v7 = vrot.slane %v8945_v11, 4 }
 0x77d   : > { %v8619_v14 = vcombine.high %v8617_v31, %v8617_v31  ;;  %v9726_v30 = vrot.slane %v8618_v59, 9  ;;  %v9727_v53 = vrot.slane %v8617_v31, 9  ;;  %v8789_v47 = vmax.f32 %v8610_v60, %v9725_v6 }
 0x77e   : > { %v8948_v27 = vunpack.c.l.b16 %v9792_v35  ;;  %v8992_v48 = vsel %vm7249_vm15, %v8991_v7, %v8990_v56  ;;  %v8993_v40 = vrot.slane %v8946_v4, 3  ;;  %v8995_v34 = vrot.slane %v8947_v5, 2 }
 0x77f   : > { %v9728_v19 = vrot.slane %v8619_v14, 9  ;;  %v8790_v10 = vmax.f32 %v8618_v59, %v9726_v30  ;;  %v8791_v62 = vmax.f32 %v8617_v31, %v9727_v53  ;;  %v9793_v57 = vpack.c.bf16 %v8789_v47, %v8789_v47 }
 0x780   : > { %v8994_v0 = vsel %vm7252_vm0, %v8993_v40, %v8992_v48  ;;  %v8997_v24 = vrot.slane %v8948_v27, 1  ;;  %v8627_v17 = vrot.slane %v8492_v26, %v13939_v1  ;;  %v8634_v23 = vrot.slane %v8620_v58, %v13939_v1 }
 0x781   : > { %v8996_v9 = vsel %vm7255_vm1, %v8995_v34, %v8994_v0  ;;  %v8792_v55 = vmax.f32 %v8619_v14, %v9728_v19  ;;  %v9794_v36 = vpack.c.bf16 %v8790_v10, %v8790_v10  ;;  %v9795_v2 = vpack.c.bf16 %v8791_v62, %v8791_v62 }
 0x782   : > { %v8998_v45 = vsel %vm7258_vm5, %v8997_v24, %v8996_v9  ;;  %v8635_v50 = vcombine.high %v8627_v17, %v8627_v17  ;;  %v8636_v41 = vcombine.high %v8634_v23, %v8634_v23  ;;  %v9729_v42 = vrot.slane %v8627_v17, 9 }
 0x783   : > { %v9015_v49 = vpack.c.b16 %v8998_v45, %v8998_v45  ;;  %v9796_v32 = vpack.c.bf16 %v8792_v55, %v8792_v55  ;;  %v8950_v51 = vunpack.c.l.b16 %v9794_v36  ;;  %v8951_v44 = vunpack.c.l.b16 %v9795_v2 }
 0x784   : > { %v9730_v18 = vrot.slane %v8635_v50, 9  ;;  %v9731_v15 = vrot.slane %v8634_v23, 9  ;;  %v9732_v20 = vrot.slane %v8636_v41, 9  ;;  %v8949_v1 = vunpack.c.l.b16 %v9793_v57 }
 0x785   : > { %9023 = vst [vmem:[%s15270_s21 + $0x8] sm:$0xf] %v9015_v49  ;;  %v8952_v39 = vunpack.c.l.b16 %v9796_v32  ;;  %v8999_v54 = vrot.slane %v8950_v51, 7  ;;  %v9001_v61 = vrot.slane %v8951_v44, 6  ;;  %v8793_v29 = vmax.f32 %v8627_v17, %v9729_v42 }
 0x786   : > { %v8794_v37 = vmax.f32 %v8635_v50, %v9730_v18  ;;  %v8795_v33 = vmax.f32 %v8634_v23, %v9731_v15  ;;  %v8796_v13 = vmax.f32 %v8636_v41, %v9732_v20 }
 0x787   : > { %v9000_v8 = vsel %vm7240_vm12, %v8999_v54, %v8949_v1  ;;  %v9003_v28 = vrot.slane %v8952_v39, 5  ;;  %v9797_v52 = vpack.c.bf16 %v8793_v29, %v8793_v29 }
 0x788   : > { %v9002_v46 = vsel %vm7243_vm13, %v9001_v61, %v9000_v8  ;;  %v9798_v16 = vpack.c.bf16 %v8794_v37, %v8794_v37  ;;  %v9799_v38 = vpack.c.bf16 %v8795_v33, %v8795_v33  ;;  %v9800_v63 = vpack.c.bf16 %v8796_v13, %v8796_v13 }
 0x789   : > { %v8953_v43 = vunpack.c.l.b16 %v9797_v52  ;;  %v9004_v60 = vsel %vm7246_vm14, %v9003_v28, %v9002_v46 }
 0x78a   : > { %v8954_v22 = vunpack.c.l.b16 %v9798_v16  ;;  %v8955_v56 = vunpack.c.l.b16 %v9799_v38  ;;  %v8956_v21 = vunpack.c.l.b16 %v9800_v63 }
 0x78b   : > { %v9005_v26 = vrot.slane %v8953_v43, 4 }
 0x78c   : > { %v9007_v12 = vrot.slane %v8954_v22, 3  ;;  %v9009_v3 = vrot.slane %v8955_v56, 2  ;;  %v9011_v25 = vrot.slane %v8956_v21, 1 }
 0x78d   : > { %v9006_v11 = vsel %vm7249_vm15, %v9005_v26, %v9004_v60 }
 0x78e   : > { %v9008_v31 = vsel %vm7252_vm0, %v9007_v12, %v9006_v11 }
 0x78f   : > { %v9010_v59 = vsel %vm7255_vm1, %v9009_v3, %v9008_v31 }
 0x790   : > { %v9012_v6 = vsel %vm7258_vm5, %v9011_v25, %v9010_v59 }
 0x791   : > { %v9016_v58 = vpack.c.b16 %v9012_v6, %v9012_v6 }
 0x793   : > { %9024 = vst [vmem:[%s15270_s21 + $0xc] sm:$0xf] %v9016_v58 }
 0x794 PF: > { %s24_s13 = sadd.s32 1, %s10871_s13  }
 0x795   : > { %p21_p13 = scmp.ge.s32.totalorder %s24_s13, 4  }
 0x797   :  { %23 = sbr.rel (!%p21_p13) target bundleno = 4 (0x4), region = 121 }
 0x79c   :  { %9046 = vsyncpa [#allocation3], 1 }
 0x79d   :  { %9048 = vsyncpa [#allocation3 + $0x1], 1 }
 0x79e   :  { %9049 = vsyncpa [#allocation5], 1 }
 0x79f   :  { %9050 = vsyncpa [#allocation8], 1 }
 0x7a0   :  { %9051 = vsyncpa [#allocation11], 1 }

</bundles_post_ra>
